<compile_context>
chip_gen: v7x
topology: tpu7x:2x2x1
jax: 0.10.0
libtpu: 0.0.40
codegen_flags: <defaults>
</compile_context>

<pallas_src>
import functools

import jax
import jax.numpy as jnp
from jax.experimental import pallas as pl
from jax.experimental.pallas import tpu as pltpu


def net_kernel(x_ref,
               w1_ref, b1_ref,
               w2_ref, b2_ref,
               w3_ref, b3_ref,
               w4_ref, b4_ref,
               w5_ref, b5_ref,
               w6_ref, b6_ref,
               out_ref,
               acc_ref,
               *, n_points, tile_n):
    i = pl.program_id(0)

    # ---- per-point conv stack on this tile of points ------------------------
    x = x_ref[...]                                        # (TILE_N, 3) f32

    # conv1 (K=3): three broadcast FMAs on the VPU (no padded MXU matmul).
    w1 = w1_ref[...]                                      # (3, 64)
    h1 = (x[:, 0:1] * w1[0:1, :]
          + x[:, 1:2] * w1[1:2, :]
          + x[:, 2:3] * w1[2:3, :]
          + b1_ref[...])
    h1 = jnp.maximum(h1, 0.0)                             # (TILE_N, 64)

    # conv2: 64 -> 128, f32 MXU matmul (only ~6% of per-point FLOPs; kept f32
    # to stay close to the module's numerics).
    h2 = jnp.dot(h1, w2_ref[...], preferred_element_type=jnp.float32)
    h2 = jnp.maximum(h2 + b2_ref[...], 0.0)               # (TILE_N, 128)

    # conv3: 128 -> 1024 (dominant matmul): bf16 operands, f32 accumulation.
    h3 = jnp.dot(h2.astype(jnp.bfloat16), w3_ref[...],
                 preferred_element_type=jnp.float32)
    h3 = jnp.maximum(h3 + b3_ref[...], 0.0)               # (TILE_N, 1024)

    # ---- running max over the point axis ------------------------------------
    if n_points % tile_n != 0:
        # Mask padded tail rows: zero-padded points still yield relu(b) > 0.
        row_ids = jax.lax.broadcasted_iota(jnp.int32, (tile_n, 1), 0) + i * tile_n
        h3 = jnp.where(row_ids < n_points, h3, -jnp.inf)

    tile_max = jnp.max(h3, axis=0, keepdims=True)         # (1, 1024)

    @pl.when(i == 0)
    def _():
        acc_ref[...] = jnp.full_like(acc_ref, -jnp.inf)

    acc_ref[...] = jnp.maximum(acc_ref[...], tile_max)

    # ---- MLP head: run exactly once, on the last grid step ------------------
    @pl.when(i == pl.num_programs(0) - 1)
    def _():
        g = acc_ref[...]                                   # (1, 1024)
        h4 = jnp.dot(g, w4_ref[...], preferred_element_type=jnp.float32)
        h4 = jnp.maximum(h4 + b4_ref[...], 0.0)            # (1, 512)
        h5 = jnp.dot(h4, w5_ref[...], preferred_element_type=jnp.float32)
        h5 = jnp.maximum(h5 + b5_ref[...], 0.0)            # (1, 256)
        out = jnp.dot(h5, w6_ref[...], preferred_element_type=jnp.float32)
        out = out + b6_ref[...]                            # (1, 40)
        out_ref[...] = out.astype(out_ref.dtype)


def net_forward(x, params, *, tile_n=512):
    """x: (N, 3) f32 point cloud. params: six (w, b) pairs, w (in,out), b (1,out)."""
    assert tile_n % 8 == 0, "tile_n must respect the (8, 128) sublane constraint"
    n = int(x.shape[0])
    n_tiles = pl.cdiv(n, tile_n)
    n_pad = n_tiles * tile_n
    if n_pad != n:
        x = jnp.pad(x, ((0, n_pad - n), (0, 0)))

    (w1, b1), (w2, b2), (w3, b3), (w4, b4), (w5, b5), (w6, b6) = params
    w3 = w3.astype(jnp.bfloat16)   # dominant MXU operand in bf16 (VMEM-resident)
    flat = [x, w1, b1, w2, b2, w3, b3, w4, b4, w5, b5, w6, b6]

    def const_spec(a):             # whole array, same block every step -> resident
        return pl.BlockSpec(a.shape, lambda i: (0, 0))

    in_specs = ([pl.BlockSpec((tile_n, 3), lambda i: (i, 0))]
                + [const_spec(a) for a in flat[1:]])

    flops = (2 * n * (3 * 64 + 64 * 128 + 128 * 1024)
             + 2 * (1024 * 512 + 512 * 256 + 256 * 40))
    bytes_accessed = sum(int(a.size) * a.dtype.itemsize for a in flat) + 40 * 4

    kernel = functools.partial(net_kernel, n_points=n, tile_n=tile_n)

    return pl.pallas_call(
        kernel,
        out_shape=jax.ShapeDtypeStruct((1, 40), jnp.float32),
        grid_spec=pltpu.PrefetchScalarGridSpec(
            num_scalar_prefetch=0,
            grid=(n_tiles,),
            in_specs=in_specs,
            out_specs=pl.BlockSpec((1, 40), lambda i: (0, 0)),
            scratch_shapes=[pltpu.VMEM((1, 1024), jnp.float32)],
        ),
        compiler_params=pltpu.CompilerParams(
            dimension_semantics=("arbitrary",),   # N axis carries the running max
            vmem_limit_bytes=48 * 1024 * 1024,
        ),
        cost_estimate=pl.CostEstimate(
            flops=flops, transcendentals=0, bytes_accessed=int(bytes_accessed)),
    )(*flat)


def init_params(key):
    """Deterministic synthetic params.  Weights stored as (in, out); biases as (1, out)."""
    dims = [(3, 64), (64, 128), (128, 1024), (1024, 512), (512, 256), (256, 40)]
    params = []
    for (fan_in, fan_out) in dims:
        key, kw, kb = jax.random.split(key, 3)
        bound = 1.0 / jnp.sqrt(fan_in)
        w = jax.random.uniform(kw, (fan_in, fan_out), jnp.float32, -bound, bound)
        b = jax.random.uniform(kb, (1, fan_out), jnp.float32, -bound, bound)
        params.append((w, b))
    return params


def net_reference(x, params):
    """Pure-JAX reference mirroring the kernel's bf16 conv3 operands."""
    (w1, b1), (w2, b2), (w3, b3), (w4, b4), (w5, b5), (w6, b6) = params
    h = jnp.maximum(x @ w1 + b1, 0.0)
    h = jnp.maximum(jnp.dot(h, w2, preferred_element_type=jnp.float32) + b2, 0.0)
    h = jnp.maximum(
        jnp.dot(h.astype(jnp.bfloat16), w3.astype(jnp.bfloat16),
                preferred_element_type=jnp.float32) + b3, 0.0)
    g = jnp.max(h, axis=0, keepdims=True)
    h = jnp.maximum(jnp.dot(g, w4, preferred_element_type=jnp.float32) + b4, 0.0)
    h = jnp.maximum(jnp.dot(h, w5, preferred_element_type=jnp.float32) + b5, 0.0)
    return jnp.dot(h, w6, preferred_element_type=jnp.float32) + b6


if __name__ == "__main__":
    key = jax.random.PRNGKey(0)
    key, kx = jax.random.split(key)

    N = 1000                      # not a multiple of TILE_N -> exercises masking + multi-step grid
    x = jax.random.normal(kx, (N, 3), jnp.float32)
    params = init_params(key)

    out = net_forward(x, params, tile_n=256)
    out = jax.block_until_ready(out)

    ref = net_reference(x, params)
    assert out.shape == (1, 40), out.shape
    assert jnp.allclose(out, ref, atol=2e-2, rtol=2e-2), (
        "mismatch vs JAX reference: max abs diff "
        f"{jnp.max(jnp.abs(out - ref))}")

    print("KERNEL_OK")
</pallas_src>

<mosaic_0001>
module attributes {stable_mosaic.version = 11 : i64} {
  func.func @net_kernel(%arg0: i32, %arg1: memref<256x3xf32, #tpu.memory_space<vmem>>, %arg2: memref<3x64xf32, #tpu.memory_space<vmem>>, %arg3: memref<1x64xf32, #tpu.memory_space<vmem>>, %arg4: memref<64x128xf32, #tpu.memory_space<vmem>>, %arg5: memref<1x128xf32, #tpu.memory_space<vmem>>, %arg6: memref<128x1024xbf16, #tpu.memory_space<vmem>>, %arg7: memref<1x1024xf32, #tpu.memory_space<vmem>>, %arg8: memref<1024x512xf32, #tpu.memory_space<vmem>>, %arg9: memref<1x512xf32, #tpu.memory_space<vmem>>, %arg10: memref<512x256xf32, #tpu.memory_space<vmem>>, %arg11: memref<1x256xf32, #tpu.memory_space<vmem>>, %arg12: memref<256x40xf32, #tpu.memory_space<vmem>>, %arg13: memref<1x40xf32, #tpu.memory_space<vmem>>, %arg14: memref<1x40xf32, #tpu.memory_space<vmem>>, %arg15: memref<1x1024xf32, #tpu.memory_space<vmem>>) attributes {dimension_semantics = [#tpu.dimension_semantics<arbitrary>], iteration_bounds = array<i64: 4>, scalar_prefetch = 0 : i64, scratch_operands = 1 : i64, tpu.core_type = #tpu.core_type<tc>, window_params = [{transform_indices = @transform_0, window_bounds = array<i64: 256, 3>}, {pipeline_mode = #tpu.pipeline_mode<synchronous>, transform_indices = @transform_1, window_bounds = array<i64: 3, 64>}, {pipeline_mode = #tpu.pipeline_mode<synchronous>, transform_indices = @transform_2, window_bounds = array<i64: 1, 64>}, {pipeline_mode = #tpu.pipeline_mode<synchronous>, transform_indices = @transform_3, window_bounds = array<i64: 64, 128>}, {pipeline_mode = #tpu.pipeline_mode<synchronous>, transform_indices = @transform_4, window_bounds = array<i64: 1, 128>}, {pipeline_mode = #tpu.pipeline_mode<synchronous>, transform_indices = @transform_5, window_bounds = array<i64: 128, 1024>}, {pipeline_mode = #tpu.pipeline_mode<synchronous>, transform_indices = @transform_6, window_bounds = array<i64: 1, 1024>}, {pipeline_mode = #tpu.pipeline_mode<synchronous>, transform_indices = @transform_7, window_bounds = array<i64: 1024, 512>}, {pipeline_mode = #tpu.pipeline_mode<synchronous>, transform_indices = @transform_8, window_bounds = array<i64: 1, 512>}, {pipeline_mode = #tpu.pipeline_mode<synchronous>, transform_indices = @transform_9, window_bounds = array<i64: 512, 256>}, {pipeline_mode = #tpu.pipeline_mode<synchronous>, transform_indices = @transform_10, window_bounds = array<i64: 1, 256>}, {pipeline_mode = #tpu.pipeline_mode<synchronous>, transform_indices = @transform_11, window_bounds = array<i64: 256, 40>}, {pipeline_mode = #tpu.pipeline_mode<synchronous>, transform_indices = @transform_12, window_bounds = array<i64: 1, 40>}, {pipeline_mode = #tpu.pipeline_mode<synchronous>, transform_indices = @transform_13, window_bounds = array<i64: 1, 40>}]} {
    %c0 = arith.constant 0 : index
    %c0_0 = arith.constant 0 : index
    %0 = vector.load %arg1[%c0, %c0_0] : memref<256x3xf32, #tpu.memory_space<vmem>>, vector<256x3xf32>
    %c0_1 = arith.constant 0 : index
    %c0_2 = arith.constant 0 : index
    %1 = vector.load %arg2[%c0_1, %c0_2] : memref<3x64xf32, #tpu.memory_space<vmem>>, vector<3x64xf32>
    %2 = vector.extract_strided_slice %0 {offsets = [0, 0], sizes = [256, 1], strides = [1, 1]} : vector<256x3xf32> to vector<256x1xf32>
    %3 = vector.extract_strided_slice %1 {offsets = [0, 0], sizes = [1, 64], strides = [1, 1]} : vector<3x64xf32> to vector<1x64xf32>
    %4 = vector.broadcast %2 : vector<256x1xf32> to vector<256x64xf32>
    %5 = vector.broadcast %3 : vector<1x64xf32> to vector<256x64xf32>
    %6 = arith.mulf %4, %5 : vector<256x64xf32>
    %7 = vector.extract_strided_slice %0 {offsets = [0, 1], sizes = [256, 1], strides = [1, 1]} : vector<256x3xf32> to vector<256x1xf32>
    %8 = vector.extract_strided_slice %1 {offsets = [1, 0], sizes = [1, 64], strides = [1, 1]} : vector<3x64xf32> to vector<1x64xf32>
    %9 = vector.broadcast %7 : vector<256x1xf32> to vector<256x64xf32>
    %10 = vector.broadcast %8 : vector<1x64xf32> to vector<256x64xf32>
    %11 = arith.mulf %9, %10 : vector<256x64xf32>
    %12 = arith.addf %6, %11 : vector<256x64xf32>
    %13 = vector.extract_strided_slice %0 {offsets = [0, 2], sizes = [256, 1], strides = [1, 1]} : vector<256x3xf32> to vector<256x1xf32>
    %14 = vector.extract_strided_slice %1 {offsets = [2, 0], sizes = [1, 64], strides = [1, 1]} : vector<3x64xf32> to vector<1x64xf32>
    %15 = vector.broadcast %13 : vector<256x1xf32> to vector<256x64xf32>
    %16 = vector.broadcast %14 : vector<1x64xf32> to vector<256x64xf32>
    %17 = arith.mulf %15, %16 : vector<256x64xf32>
    %18 = arith.addf %12, %17 : vector<256x64xf32>
    %c0_3 = arith.constant 0 : index
    %c0_4 = arith.constant 0 : index
    %19 = vector.load %arg3[%c0_3, %c0_4] : memref<1x64xf32, #tpu.memory_space<vmem>>, vector<1x64xf32>
    %20 = vector.broadcast %19 : vector<1x64xf32> to vector<256x64xf32>
    %21 = arith.addf %18, %20 : vector<256x64xf32>
    %cst = arith.constant 0.000000e+00 : f32
    %22 = vector.broadcast %cst : f32 to vector<256x64xf32>
    %23 = arith.maximumf %21, %22 : vector<256x64xf32>
    %c0_5 = arith.constant 0 : index
    %c0_6 = arith.constant 0 : index
    %24 = vector.load %arg4[%c0_5, %c0_6] : memref<64x128xf32, #tpu.memory_space<vmem>>, vector<64x128xf32>
    %cst_7 = arith.constant dense<0.000000e+00> : vector<256x128xf32>
    %25 = tpu.matmul %23, %24, %cst_7 {dimension_numbers = #tpu.dot_dimension_numbers<[1], [0], [0], [1], [0, 0, 1, 1], [], []>} : vector<256x64xf32>, vector<64x128xf32>, vector<256x128xf32> -> vector<256x128xf32>
    %c0_8 = arith.constant 0 : index
    %c0_9 = arith.constant 0 : index
    %26 = vector.load %arg5[%c0_8, %c0_9] : memref<1x128xf32, #tpu.memory_space<vmem>>, vector<1x128xf32>
    %27 = vector.broadcast %26 : vector<1x128xf32> to vector<256x128xf32>
    %28 = arith.addf %25, %27 : vector<256x128xf32>
    %cst_10 = arith.constant 0.000000e+00 : f32
    %29 = vector.broadcast %cst_10 : f32 to vector<256x128xf32>
    %30 = arith.maximumf %28, %29 : vector<256x128xf32>
    %31 = arith.truncf %30 : vector<256x128xf32> to vector<256x128xbf16>
    %c0_11 = arith.constant 0 : index
    %c0_12 = arith.constant 0 : index
    %32 = vector.load %arg6[%c0_11, %c0_12] : memref<128x1024xbf16, #tpu.memory_space<vmem>>, vector<128x1024xbf16>
    %cst_13 = arith.constant dense<0.000000e+00> : vector<256x1024xf32>
    %33 = tpu.matmul %31, %32, %cst_13 {dimension_numbers = #tpu.dot_dimension_numbers<[1], [0], [0], [1], [0, 0, 1, 1], [], []>} : vector<256x128xbf16>, vector<128x1024xbf16>, vector<256x1024xf32> -> vector<256x1024xf32>
    %c0_14 = arith.constant 0 : index
    %c0_15 = arith.constant 0 : index
    %34 = vector.load %arg7[%c0_14, %c0_15] : memref<1x1024xf32, #tpu.memory_space<vmem>>, vector<1x1024xf32>
    %35 = vector.broadcast %34 : vector<1x1024xf32> to vector<256x1024xf32>
    %36 = arith.addf %33, %35 : vector<256x1024xf32>
    %cst_16 = arith.constant 0.000000e+00 : f32
    %37 = vector.broadcast %cst_16 : f32 to vector<256x1024xf32>
    %38 = arith.maximumf %36, %37 : vector<256x1024xf32>
    %39 = tpu.iota {dimensions = array<i32: 0>} : vector<256x1xi32>
    %c256_i32 = arith.constant 256 : i32
    %40 = arith.muli %arg0, %c256_i32 : i32
    %41 = vector.broadcast %40 : i32 to vector<256x1xi32>
    %42 = arith.addi %39, %41 : vector<256x1xi32>
    %c1000_i32 = arith.constant 1000 : i32
    %43 = vector.broadcast %c1000_i32 : i32 to vector<256x1xi32>
    %44 = arith.cmpi slt, %42, %43 : vector<256x1xi32>
    %cst_17 = arith.constant 0xFF800000 : f32
    %45 = vector.shape_cast %44 : vector<256x1xi1> to vector<256x1xi1>
    %46 = vector.broadcast %45 : vector<256x1xi1> to vector<256x1024xi1>
    %47 = vector.broadcast %cst_17 : f32 to vector<256x1024xf32>
    %48 = arith.select %46, %38, %47 : vector<256x1024xi1>, vector<256x1024xf32>
    %cst_18 = arith.constant dense<0xFF800000> : vector<1024xf32>
    %49 = vector.multi_reduction <maximumf>, %48, %cst_18 [0] : vector<256x1024xf32> to vector<1024xf32>
    %50 = vector.shape_cast %49 : vector<1024xf32> to vector<1x1024xf32>
    %c0_i32 = arith.constant 0 : i32
    %51 = arith.cmpi eq, %arg0, %c0_i32 : i32
    %52 = arith.extui %51 : i1 to i32
    %c0_i32_19 = arith.constant 0 : i32
    %53 = arith.cmpi ne, %52, %c0_i32_19 : i32
    scf.if %53 {
      %cst_25 = arith.constant 0xFF800000 : f32
      %60 = vector.broadcast %cst_25 : f32 to vector<1x1024xf32>
      %c0_26 = arith.constant 0 : index
      %c0_27 = arith.constant 0 : index
      %61 = vector.load %arg15[%c0_26, %c0_27] : memref<1x1024xf32, #tpu.memory_space<vmem>>, vector<1x1024xf32>
      tpu.vector_store %arg15[%c0_26, %c0_27], %60 {strides = array<i32>} : memref<1x1024xf32, #tpu.memory_space<vmem>>, vector<1x1024xf32>,
    } else {
    }
    %c0_20 = arith.constant 0 : index
    %c0_21 = arith.constant 0 : index
    %54 = vector.load %arg15[%c0_20, %c0_21] : memref<1x1024xf32, #tpu.memory_space<vmem>>, vector<1x1024xf32>
    %55 = arith.maximumf %54, %50 : vector<1x1024xf32>
    %c0_22 = arith.constant 0 : index
    %c0_23 = arith.constant 0 : index
    %56 = vector.load %arg15[%c0_22, %c0_23] : memref<1x1024xf32, #tpu.memory_space<vmem>>, vector<1x1024xf32>
    tpu.vector_store %arg15[%c0_22, %c0_23], %55 {strides = array<i32>} : memref<1x1024xf32, #tpu.memory_space<vmem>>, vector<1x1024xf32>,
    %c3_i32 = arith.constant 3 : i32
    %57 = arith.cmpi eq, %arg0, %c3_i32 : i32
    %58 = arith.extui %57 : i1 to i32
    %c0_i32_24 = arith.constant 0 : i32
    %59 = arith.cmpi ne, %58, %c0_i32_24 : i32
    scf.if %59 {
      %c0_25 = arith.constant 0 : index
      %c0_26 = arith.constant 0 : index
      %60 = vector.load %arg15[%c0_25, %c0_26] : memref<1x1024xf32, #tpu.memory_space<vmem>>, vector<1x1024xf32>
      %c0_27 = arith.constant 0 : index
      %c0_28 = arith.constant 0 : index
      %61 = vector.load %arg8[%c0_27, %c0_28] : memref<1024x512xf32, #tpu.memory_space<vmem>>, vector<1024x512xf32>
      %cst_29 = arith.constant dense<0.000000e+00> : vector<1x512xf32>
      %62 = tpu.matmul %60, %61, %cst_29 {dimension_numbers = #tpu.dot_dimension_numbers<[1], [0], [0], [1], [0, 0, 1, 1], [], []>} : vector<1x1024xf32>, vector<1024x512xf32>, vector<1x512xf32> -> vector<1x512xf32>
      %c0_30 = arith.constant 0 : index
      %c0_31 = arith.constant 0 : index
      %63 = vector.load %arg9[%c0_30, %c0_31] : memref<1x512xf32, #tpu.memory_space<vmem>>, vector<1x512xf32>
      %64 = arith.addf %62, %63 : vector<1x512xf32>
      %cst_32 = arith.constant 0.000000e+00 : f32
      %65 = vector.broadcast %cst_32 : f32 to vector<1x512xf32>
      %66 = arith.maximumf %64, %65 : vector<1x512xf32>
      %c0_33 = arith.constant 0 : index
      %c0_34 = arith.constant 0 : index
      %67 = vector.load %arg10[%c0_33, %c0_34] : memref<512x256xf32, #tpu.memory_space<vmem>>, vector<512x256xf32>
      %cst_35 = arith.constant dense<0.000000e+00> : vector<1x256xf32>
      %68 = tpu.matmul %66, %67, %cst_35 {dimension_numbers = #tpu.dot_dimension_numbers<[1], [0], [0], [1], [0, 0, 1, 1], [], []>} : vector<1x512xf32>, vector<512x256xf32>, vector<1x256xf32> -> vector<1x256xf32>
      %c0_36 = arith.constant 0 : index
      %c0_37 = arith.constant 0 : index
      %69 = vector.load %arg11[%c0_36, %c0_37] : memref<1x256xf32, #tpu.memory_space<vmem>>, vector<1x256xf32>
      %70 = arith.addf %68, %69 : vector<1x256xf32>
      %cst_38 = arith.constant 0.000000e+00 : f32
      %71 = vector.broadcast %cst_38 : f32 to vector<1x256xf32>
      %72 = arith.maximumf %70, %71 : vector<1x256xf32>
      %c0_39 = arith.constant 0 : index
      %c0_40 = arith.constant 0 : index
      %73 = vector.load %arg12[%c0_39, %c0_40] : memref<256x40xf32, #tpu.memory_space<vmem>>, vector<256x40xf32>
      %cst_41 = arith.constant dense<0.000000e+00> : vector<1x40xf32>
      %74 = tpu.matmul %72, %73, %cst_41 {dimension_numbers = #tpu.dot_dimension_numbers<[1], [0], [0], [1], [0, 0, 1, 1], [], []>} : vector<1x256xf32>, vector<256x40xf32>, vector<1x40xf32> -> vector<1x40xf32>
      %c0_42 = arith.constant 0 : index
      %c0_43 = arith.constant 0 : index
      %75 = vector.load %arg13[%c0_42, %c0_43] : memref<1x40xf32, #tpu.memory_space<vmem>>, vector<1x40xf32>
      %76 = arith.addf %74, %75 : vector<1x40xf32>
      %c0_44 = arith.constant 0 : index
      %c0_45 = arith.constant 0 : index
      %77 = vector.load %arg14[%c0_44, %c0_45] : memref<1x40xf32, #tpu.memory_space<vmem>>, vector<1x40xf32>
      tpu.vector_store %arg14[%c0_44, %c0_45], %76 {strides = array<i32>} : memref<1x40xf32, #tpu.memory_space<vmem>>, vector<1x40xf32>,
    } else {
    }
    return
  }
  func.func @transform_0(%arg0: i32) -> (i32, i32) {
    %c0_i32 = arith.constant 0 : i32
    %c0_i32_0 = arith.constant 0 : i32
    return %arg0, %c0_i32 : i32, i32
  }
  func.func @transform_1(%arg0: i32) -> (i32, i32) {
    %c0_i32 = arith.constant 0 : i32
    %c0_i32_0 = arith.constant 0 : i32
    %c0_i32_1 = arith.constant 0 : i32
    return %c0_i32, %c0_i32_0 : i32, i32
  }
  func.func @transform_2(%arg0: i32) -> (i32, i32) {
    %c0_i32 = arith.constant 0 : i32
    %c0_i32_0 = arith.constant 0 : i32
    %c0_i32_1 = arith.constant 0 : i32
    return %c0_i32, %c0_i32_0 : i32, i32
  }
  func.func @transform_3(%arg0: i32) -> (i32, i32) {
    %c0_i32 = arith.constant 0 : i32
    %c0_i32_0 = arith.constant 0 : i32
    %c0_i32_1 = arith.constant 0 : i32
    return %c0_i32, %c0_i32_0 : i32, i32
  }
  func.func @transform_4(%arg0: i32) -> (i32, i32) {
    %c0_i32 = arith.constant 0 : i32
    %c0_i32_0 = arith.constant 0 : i32
    %c0_i32_1 = arith.constant 0 : i32
    return %c0_i32, %c0_i32_0 : i32, i32
  }
  func.func @transform_5(%arg0: i32) -> (i32, i32) {
    %c0_i32 = arith.constant 0 : i32
    %c0_i32_0 = arith.constant 0 : i32
    %c0_i32_1 = arith.constant 0 : i32
    return %c0_i32, %c0_i32_0 : i32, i32
  }
  func.func @transform_6(%arg0: i32) -> (i32, i32) {
    %c0_i32 = arith.constant 0 : i32
    %c0_i32_0 = arith.constant 0 : i32
    %c0_i32_1 = arith.constant 0 : i32
    return %c0_i32, %c0_i32_0 : i32, i32
  }
  func.func @transform_7(%arg0: i32) -> (i32, i32) {
    %c0_i32 = arith.constant 0 : i32
    %c0_i32_0 = arith.constant 0 : i32
    %c0_i32_1 = arith.constant 0 : i32
    return %c0_i32, %c0_i32_0 : i32, i32
  }
  func.func @transform_8(%arg0: i32) -> (i32, i32) {
    %c0_i32 = arith.constant 0 : i32
    %c0_i32_0 = arith.constant 0 : i32
    %c0_i32_1 = arith.constant 0 : i32
    return %c0_i32, %c0_i32_0 : i32, i32
  }
  func.func @transform_9(%arg0: i32) -> (i32, i32) {
    %c0_i32 = arith.constant 0 : i32
    %c0_i32_0 = arith.constant 0 : i32
    %c0_i32_1 = arith.constant 0 : i32
    return %c0_i32, %c0_i32_0 : i32, i32
  }
  func.func @transform_10(%arg0: i32) -> (i32, i32) {
    %c0_i32 = arith.constant 0 : i32
    %c0_i32_0 = arith.constant 0 : i32
    %c0_i32_1 = arith.constant 0 : i32
    return %c0_i32, %c0_i32_0 : i32, i32
  }
  func.func @transform_11(%arg0: i32) -> (i32, i32) {
    %c0_i32 = arith.constant 0 : i32
    %c0_i32_0 = arith.constant 0 : i32
    %c0_i32_1 = arith.constant 0 : i32
    return %c0_i32, %c0_i32_0 : i32, i32
  }
  func.func @transform_12(%arg0: i32) -> (i32, i32) {
    %c0_i32 = arith.constant 0 : i32
    %c0_i32_0 = arith.constant 0 : i32
    %c0_i32_1 = arith.constant 0 : i32
    return %c0_i32, %c0_i32_0 : i32, i32
  }
  func.func @transform_13(%arg0: i32) -> (i32, i32) {
    %c0_i32 = arith.constant 0 : i32
    %c0_i32_0 = arith.constant 0 : i32
    %c0_i32_1 = arith.constant 0 : i32
    return %c0_i32, %c0_i32_0 : i32, i32
  }
}

</mosaic_0001>

<bundles_post_ra>
// kernel: tpu_custom_call.1
= control target key start
LH: loop header
LB: loop body
LE: loop exit
PB: predicated region body
PF: predicated region fallthrough
CT: control target
= control target key end

     0   :  { %s9305_s0 = inlined_call_operand.vmem [shape: f32[1024,3], index: 0, kind: input, shape index: {}]   ;;  %s9306_s1 = inlined_call_operand.hbm [shape: f32[3,64], index: 1, kind: input, shape index: {}]   ;;  %s9307_s2 = inlined_call_operand.hbm [shape: f32[1,64], index: 2, kind: input, shape index: {}]   ;;  %s9308_s3 = inlined_call_operand.hbm [shape: f32[64,128], index: 3, kind: input, shape index: {}]   ;;  %s9309_s4 = inlined_call_operand.hbm [shape: f32[1,128], index: 4, kind: input, shape index: {}]   ;;  %s9310_s5 = inlined_call_operand.hbm [shape: bf16[128,1024], index: 5, kind: input, shape index: {}]   ;;  %s9311_s6 = inlined_call_operand.hbm [shape: f32[1,1024], index: 6, kind: input, shape index: {}]   ;;  %s9312_s7 = inlined_call_operand.hbm [shape: f32[1024,512], index: 7, kind: input, shape index: {}]   ;;  %s9313_s8 = inlined_call_operand.hbm [shape: f32[1,512], index: 8, kind: input, shape index: {}]   ;;  %s9314_s9 = inlined_call_operand.hbm [shape: f32[512,256], index: 9, kind: input, shape index: {}]   ;;  %s9315_s10 = inlined_call_operand.hbm [shape: f32[1,256], index: 10, kind: input, shape index: {}]   ;;  %s9316_s11 = inlined_call_operand.vmem [shape: f32[256,40], index: 11, kind: input, shape index: {}]   ;;  %s9317_s12 = inlined_call_operand.hbm [shape: f32[1,40], index: 12, kind: input, shape index: {}]   ;;  %s9318_s13 = inlined_call_operand.hbm [shape: f32[1,40], index: 13, kind: output, shape index: {}]  }
   0x1   :  { %9362 = sst [smem:[#allocation41_spill]] %s9306_s1 }
   0x2   :  { %9363 = sst [smem:[#allocation42_spill]] %s9307_s2 }
   0x3   :  { %9364 = sst [smem:[#allocation43_spill]] %s9308_s3 }
   0x4   :  { %18 = vsyncpa [#allocation4], 0 }
   0x5   :  { %19 = vsyncpa [#allocation7], 0 }
   0x6   :  { %20 = vsyncpa [#allocation10], 0 }
   0x7   :  { %21 = vsyncpa [#allocation13], 0 }
   0x8   :  { %22 = vsyncpa [#allocation16], 0 }
   0x9   :  { %23 = vsyncpa [#allocation19], 0 }
   0xa   :  { %24 = vsyncpa [#allocation5], 0  ;;  %s7229_s25 = smov 0  }
   0xb LB: > { %9365 = sst [smem:[#allocation29_spill]] %s7134_s25  ;;  %s7136_s26 = smov [#allocation6]   ;;  %s7134_s25 = sphi %s7229_s25, %s30_s25  }
   0xc   : > { %s358_s27 = sshll.u32 %s7136_s26, 4  ;;  %s7235_s28 = sadd.s32 4294967295, %s7134_s25   ;;  %s7241_s27 = int_to_ptr.vmem [resolvable:$true] %s358_s27 }
   0xd   : > { %p5583_p0 = scmp.ge.s32.totalorder %s7134_s25, 1  ;;  %p334_p1 = scmp.lt.s32.totalorder %s7134_s25, 5 }
   0xe   : > { %p9320_p3 = scmp.eq.s32.totalorder %s7235_s28, 0  ;;  %s7137_s30 = smov [#allocation9]  }
   0xf   : > { %p7243_p4 = pnand %p5583_p0, %p334_p1  ;;  %s382_s14 = sshll.u32 %s7137_s30, 4  ;;  %s7249_s14 = int_to_ptr.vmem [resolvable:$true] %s382_s14 }
  0x10   : > { %s7138_s15 = smov [#allocation12]   ;;  %s7139_s18 = smov [#allocation15]  }
  0x11   : > { %s9366_s29 = scalar_select %p7243_p4, 1, 0 }
  0x12   : > { %p6618_p5 = pneg %p7243_p4  ;;  %s406_s16 = sshll.u32 %s7138_s15, 4  ;;  %s7257_s16 = int_to_ptr.vmem [resolvable:$true] %s406_s16 }
  0x13   : > { %s430_s19 = sshll.u32 %s7139_s18, 4  ;;  %s9368_s2 = sld [smem:[#allocation42_spill]]  ;;  %s7259_s19 = int_to_ptr.vmem [resolvable:$true] %s430_s19 }
  0x14   : > { %p7253_p6 = pnand %p9320_p3, %p6618_p5 }
  0x16   : > { %p7269_p8 = pneg %p7253_p6 }
  0x19   : > { %s6766_s22 = scalar_lea.hbm %s9368_s2, 16 }
  0x1a   : > { %p6767_p7 = scmp.ne.s32.totalorder %s9368_s2, %s6766_s22  ;;  %p6773_p11 = scmp.lt.u32.totalorder %s6766_s22, %s9368_s2 }
  0x1c   : > { %p6769_p9 = pnand %p7269_p8, %p6767_p7 }
  0x1e   : > { %p6770_p10 = pneg %p6769_p9 }
  0x20   : > { %p6775_p12 = pnand %p6773_p11, %p6770_p10 }
  0x22   : > { %6778 = shalt.err (!%p6775_p12)
}
  0x23   : > { %s6779_s18 = scalar_lea.vmem %s7241_s27, 16  ;;  %s6786_s20 = scalar_lea.vmem %s7241_s27, 32 }
  0x24   : > { %p6780_p13 = scmp.ne.s32.totalorder %s7241_s27, %s6779_s18  ;;  %p6787_p5 = scmp.lt.s32.totalorder %s7241_s27, %s7241_s27 }
  0x25   : > { %p6788_p7 = scmp.lt.s32.totalorder %s6786_s20, %s6779_s18 }
  0x26   : > { %p6782_p0 = pnand %p6780_p13, %p7269_p8 }
  0x27   : > { %p6789_p9 = por %p6788_p7, %p6787_p5 }
  0x28   : > { %p6783_p1 = pneg %p6782_p0 }
  0x2a   : > { %p6790_p2 = pnand %p6789_p9, %p6783_p1 }
  0x2c   : > { %6793 = shalt.err (!%p6790_p2)
}
  0x2d   : > { %6624 = dma.hbm_to_vmem [thread:$0]  (!%p7253_p6), %s9368_s2, 16, %s7241_s27, [#allocation7]  }
  0x2e   : > { %s6794_s30 = scalar_lea.hbm %s9309_s4, 16 }
  0x2f   : > { %p6795_p10 = scmp.ne.s32.totalorder %s9309_s4, %s6794_s30  ;;  %p6801_p2 = scmp.lt.u32.totalorder %s6794_s30, %s9309_s4 }
  0x31   : > { %p6797_p11 = pnand %p6795_p10, %p7269_p8 }
  0x33   : > { %p6798_p12 = pneg %p6797_p11 }
  0x35   : > { %p6803_p13 = pnand %p6801_p2, %p6798_p12 }
  0x37   : > { %6806 = shalt.err (!%p6803_p13)
}
  0x38   : > { %s6807_s27 = scalar_lea.vmem %s7249_s14, 16  ;;  %s6814_s25 = scalar_lea.vmem %s7249_s14, 32 }
  0x39   : > { %p6808_p0 = scmp.ne.s32.totalorder %s7249_s14, %s6807_s27  ;;  %p6815_p7 = scmp.lt.s32.totalorder %s7249_s14, %s7249_s14 }
  0x3a   : > { %p6816_p9 = scmp.lt.s32.totalorder %s6814_s25, %s6807_s27 }
  0x3b   : > { %p6810_p1 = pnand %p6808_p0, %p7269_p8 }
  0x3c   : > { %p6817_p10 = por %p6816_p9, %p6815_p7 }
  0x3d   : > { %p6811_p5 = pneg %p6810_p1 }
  0x3f   : > { %p6818_p11 = pnand %p6817_p10, %p6811_p5 }
  0x41   : > { %6821 = shalt.err (!%p6818_p11)
}
  0x42   : > { %6630 = dma.hbm_to_vmem [thread:$0]  (!%p7253_p6), %s9309_s4, 16, %s7249_s14, [#allocation10]  }
  0x43   : > { %s6822_s30 = scalar_lea.hbm %s9311_s6, 128 }
  0x44   : > { %p6823_p12 = scmp.ne.s32.totalorder %s9311_s6, %s6822_s30  ;;  %p6829_p0 = scmp.lt.u32.totalorder %s6822_s30, %s9311_s6 }
  0x46   : > { %p6825_p2 = pnand %p6823_p12, %p7269_p8 }
  0x48   : > { %p6826_p13 = pneg %p6825_p2 }
  0x4a   : > { %p6831_p1 = pnand %p6829_p0, %p6826_p13 }
  0x4c   : > { %6834 = shalt.err (!%p6831_p1)
}
  0x4d   : > { %s6835_s14 = scalar_lea.vmem %s7257_s16, 128  ;;  %p6843_p10 = scmp.lt.s32.totalorder %s7257_s16, %s7257_s16 }
  0x4e   : > { %p6836_p5 = scmp.ne.s32.totalorder %s7257_s16, %s6835_s14  ;;  %p6844_p11 = scmp.lt.s32.totalorder %s6835_s14, %s6835_s14 }
  0x50   : > { %p6838_p7 = pnand %p6836_p5, %p7269_p8  ;;  %p6845_p12 = por %p6844_p11, %p6843_p10 }
  0x52   : > { %p6839_p9 = pneg %p6838_p7 }
  0x54   : > { %p6846_p2 = pnand %p6845_p12, %p6839_p9 }
  0x56   : > { %6849 = shalt.err (!%p6846_p2)
}
  0x57   : > { %6636 = dma.hbm_to_vmem [thread:$0]  (!%p7253_p6), %s9311_s6, 128, %s7257_s16, [#allocation13]  }
  0x58   : > { %s6850_s24 = scalar_lea.hbm %s9313_s8, 64 }
  0x59   : > { %p6851_p13 = scmp.ne.s32.totalorder %s9313_s8, %s6850_s24  ;;  %p6857_p5 = scmp.lt.u32.totalorder %s6850_s24, %s9313_s8 }
  0x5b   : > { %p6853_p0 = pnand %p6851_p13, %p7269_p8 }
  0x5d   : > { %p6854_p1 = pneg %p6853_p0 }
  0x5f   : > { %p6859_p7 = pnand %p6857_p5, %p6854_p1 }
  0x61   : > { %6862 = shalt.err (!%p6859_p7)
}
  0x62   : > { %s6863_s16 = scalar_lea.vmem %s7259_s19, 64  ;;  %p6871_p12 = scmp.lt.s32.totalorder %s7259_s19, %s7259_s19 }
  0x63   : > { %p6864_p9 = scmp.ne.s32.totalorder %s7259_s19, %s6863_s16  ;;  %p6872_p2 = scmp.lt.s32.totalorder %s6863_s16, %s6863_s16 }
  0x65   : > { %p6866_p10 = pnand %p6864_p9, %p7269_p8  ;;  %p6873_p13 = por %p6872_p2, %p6871_p12 }
  0x67   : > { %p6867_p11 = pneg %p6866_p10 }
  0x69   : > { %p6874_p0 = pnand %p6873_p13, %p6867_p11 }
  0x6b   : > { %6877 = shalt.err (!%p6874_p0)
}
  0x6c   : > { %6642 = dma.hbm_to_vmem [thread:$0]  (!%p7253_p6), %s9313_s8, 64, %s7259_s19, [#allocation16]  }
  0x6d   : > { %s7140_s25 = smov [#allocation18]   ;;  %s7141_s22 = smov [#allocation3]  }
  0x6e   : > { %s454_s21 = sshll.u32 %s7140_s25, 4  ;;  %s347_s23 = sshll.u32 %s7141_s22, 4  ;;  %s455_s21 = int_to_ptr.vmem [resolvable:$true] %s454_s21  ;;  %s348_s23 = int_to_ptr.vmem [resolvable:$true] %s347_s23 }
  0x6f   : > { %s6878_s15 = scalar_lea.hbm %s9315_s10, 32 }
  0x70   : > { %p6879_p1 = scmp.ne.s32.totalorder %s9315_s10, %s6878_s15  ;;  %p6885_p9 = scmp.lt.u32.totalorder %s6878_s15, %s9315_s10 }
  0x72   : > { %p6881_p5 = pnand %p6879_p1, %p7269_p8 }
  0x74   : > { %p6882_p7 = pneg %p6881_p5 }
  0x76   : > { %p6887_p10 = pnand %p6885_p9, %p6882_p7 }
  0x78   : > { %6890 = shalt.err (!%p6887_p10)
}
  0x79   : > { %s6891_s19 = scalar_lea.vmem %s455_s21, 32  ;;  %p6899_p13 = scmp.lt.s32.totalorder %s455_s21, %s455_s21 }
  0x7a   : > { %p6892_p11 = scmp.ne.s32.totalorder %s455_s21, %s6891_s19  ;;  %p6900_p0 = scmp.lt.s32.totalorder %s6891_s19, %s6891_s19 }
  0x7c   : > { %p6894_p12 = pnand %p6892_p11, %p7269_p8  ;;  %p6901_p3 = por %p6900_p0, %p6899_p13 }
  0x7e   : > { %p6895_p2 = pneg %p6894_p12 }
  0x80   : > { %p6902_p4 = pnand %p6901_p3, %p6895_p2 }
  0x82   : > { %6905 = shalt.err (!%p6902_p4)
}
  0x83   : > { %6648 = dma.hbm_to_vmem [thread:$0]  (!%p7253_p6), %s9315_s10, 32, %s455_s21, [#allocation19]  }
  0x84   : > { %s9370_s1 = sld [smem:[#allocation41_spill]] }
  0x8a   : > { %s6906_s30 = scalar_lea.hbm %s9370_s1, 64 }
  0x8b   : > { %p6907_p1 = scmp.ne.s32.totalorder %s9370_s1, %s6906_s30  ;;  %p6913_p4 = scmp.lt.u32.totalorder %s6906_s30, %s9370_s1 }
  0x8d   : > { %p6909_p5 = pnand %p6907_p1, %p7269_p8 }
  0x8f   : > { %p6910_p3 = pneg %p6909_p5 }
  0x91   : > { %p6915_p7 = pnand %p6913_p4, %p6910_p3 }
  0x93   : > { %6918 = shalt.err (!%p6915_p7)
}
  0x94   : > { %s6919_s27 = scalar_lea.vmem %s348_s23, 64  ;;  %p6927_p12 = scmp.lt.s32.totalorder %s348_s23, %s348_s23 }
  0x95   : > { %p6920_p9 = scmp.ne.s32.totalorder %s348_s23, %s6919_s27  ;;  %p6928_p2 = scmp.lt.s32.totalorder %s6919_s27, %s6919_s27 }
  0x97   : > { %p6922_p10 = pnand %p6920_p9, %p7269_p8  ;;  %p6929_p13 = por %p6928_p2, %p6927_p12 }
  0x99   : > { %p6923_p11 = pneg %p6922_p10 }
  0x9b   : > { %p6930_p0 = pnand %p6929_p13, %p6923_p11 }
  0x9d   : > { %6933 = shalt.err (!%p6930_p0)
}
  0x9e   : > { %6621 = dma.hbm_to_vmem [thread:$0]  (!%p7253_p6), %s9370_s1, 64, %s348_s23, [#allocation4]  }
  0x9f   : > { %s7142_s14 = smov [#allocation8]   ;;  %s9371_s3 = sld [smem:[#allocation43_spill]] }
  0xa0   : > { %s368_s25 = sshll.u32 %s7142_s14, 4  ;;  %s369_s25 = int_to_ptr.vmem [resolvable:$true] %s368_s25 }
  0xa5   : > { %s6934_s30 = scalar_lea.hbm %s9371_s3, 1024 }
  0xa6   : > { %p6935_p1 = scmp.ne.s32.totalorder %s9371_s3, %s6934_s30  ;;  %p6941_p4 = scmp.lt.u32.totalorder %s6934_s30, %s9371_s3 }
  0xa8   : > { %p6937_p5 = pnand %p6935_p1, %p7269_p8 }
  0xaa   : > { %p6938_p3 = pneg %p6937_p5 }
  0xac   : > { %p6943_p7 = pnand %p6941_p4, %p6938_p3 }
  0xae   : > { %6946 = shalt.err (!%p6943_p7)
}
  0xaf   : > { %s6947_s23 = scalar_lea.vmem %s369_s25, 1024  ;;  %p6955_p12 = scmp.lt.s32.totalorder %s369_s25, %s369_s25 }
  0xb0   : > { %p6948_p9 = scmp.ne.s32.totalorder %s369_s25, %s6947_s23  ;;  %p6956_p2 = scmp.lt.s32.totalorder %s6947_s23, %s6947_s23 }
  0xb2   : > { %p6950_p10 = pnand %p6948_p9, %p7269_p8  ;;  %p6957_p13 = por %p6956_p2, %p6955_p12 }
  0xb4   : > { %p6951_p11 = pneg %p6950_p10 }
  0xb6   : > { %p6958_p0 = pnand %p6957_p13, %p6951_p11 }
  0xb8   : > { %6961 = shalt.err (!%p6958_p0)
}
  0xb9   : > { %s7143_s27 = smov 128   ;;  %s7144_s21 = smov 8  }
  0xba   : > { %6627 = dma.hbm_to_vmem [thread:$0]  (!%p7253_p6), %s9371_s3, 1024, %s369_s25, [#allocation7], %s7143_s27, %s7143_s27, %s7144_s21  }
  0xbb   : > { %s7145_s22 = smov [#allocation11]   ;;  %s6962_s18 = scalar_lea.hbm %s9310_s5, 8192 }
  0xbc   : > { %s392_s24 = sshll.u32 %s7145_s22, 4  ;;  %p6963_p1 = scmp.ne.s32.totalorder %s9310_s5, %s6962_s18  ;;  %s393_s24 = int_to_ptr.vmem [resolvable:$true] %s392_s24 }
  0xbd   : > { %p6969_p4 = scmp.lt.u32.totalorder %s6962_s18, %s9310_s5 }
  0xbe   : > { %p6965_p5 = pnand %p6963_p1, %p7269_p8 }
  0xc0   : > { %p6966_p3 = pneg %p6965_p5 }
  0xc2   : > { %p6971_p7 = pnand %p6969_p4, %p6966_p3 }
  0xc4   : > { %6974 = shalt.err (!%p6971_p7)
}
  0xc5   : > { %s6975_s25 = scalar_lea.vmem %s393_s24, 8192  ;;  %p6983_p12 = scmp.lt.s32.totalorder %s393_s24, %s393_s24 }
  0xc6   : > { %p6976_p9 = scmp.ne.s32.totalorder %s393_s24, %s6975_s25  ;;  %p6984_p2 = scmp.lt.s32.totalorder %s6975_s25, %s6975_s25 }
  0xc8   : > { %p6978_p10 = pnand %p6976_p9, %p7269_p8  ;;  %p6985_p13 = por %p6984_p2, %p6983_p12 }
  0xca   : > { %p6979_p11 = pneg %p6978_p10 }
  0xcc   : > { %p6986_p0 = pnand %p6985_p13, %p6979_p11 }
  0xce   : > { %6989 = shalt.err (!%p6986_p0)
}
  0xcf   : > { %s7146_s27 = smov 512   ;;  %s7147_s21 = smov 32  }
  0xd0   : > { %6633 = dma.hbm_to_vmem [thread:$0]  (!%p7253_p6), %s9310_s5, 8192, %s393_s24, [#allocation10], %s7146_s27, %s7146_s27, %s7147_s21  }
  0xd1   : > { %s7148_s14 = smov [#allocation14]   ;;  %s7149_s30 = smov [#allocation17]  }
  0xd2   : > { %s416_s22 = sshll.u32 %s7148_s14, 4  ;;  %s440_s15 = sshll.u32 %s7149_s30, 4  ;;  %s417_s22 = int_to_ptr.vmem [resolvable:$true] %s416_s22  ;;  %s441_s15 = int_to_ptr.vmem [resolvable:$true] %s440_s15 }
  0xd3   : > { %s6990_s16 = scalar_lea.hbm %s9312_s7, 65536 }
  0xd4   : > { %p6991_p1 = scmp.ne.s32.totalorder %s9312_s7, %s6990_s16  ;;  %p6997_p4 = scmp.lt.u32.totalorder %s6990_s16, %s9312_s7 }
  0xd6   : > { %p6993_p5 = pnand %p6991_p1, %p7269_p8 }
  0xd8   : > { %p6994_p3 = pneg %p6993_p5 }
  0xda   : > { %p6999_p7 = pnand %p6997_p4, %p6994_p3 }
  0xdc   : > { %7002 = shalt.err (!%p6999_p7)
}
  0xdd   : > { %s7003_s24 = scalar_lea.vmem %s417_s22, 65536  ;;  %p7011_p12 = scmp.lt.s32.totalorder %s417_s22, %s417_s22 }
  0xde   : > { %p7004_p9 = scmp.ne.s32.totalorder %s417_s22, %s7003_s24  ;;  %p7012_p2 = scmp.lt.s32.totalorder %s7003_s24, %s7003_s24 }
  0xe0   : > { %p7006_p10 = pnand %p7004_p9, %p7269_p8  ;;  %p7013_p13 = por %p7012_p2, %p7011_p12 }
  0xe2   : > { %p7007_p11 = pneg %p7006_p10 }
  0xe4   : > { %p7014_p0 = pnand %p7013_p13, %p7007_p11 }
  0xe6   : > { %7017 = shalt.err (!%p7014_p0)
}
  0xe7   : > { %6639 = dma.hbm_to_vmem [thread:$0]  (!%p7253_p6), %s9312_s7, 65536, %s417_s22, [#allocation13], %s7146_s27, %s7146_s27, %s7147_s21  }
  0xe8   : > { %s7018_s14 = scalar_lea.hbm %s9314_s9, 16384 }
  0xe9   : > { %p7019_p1 = scmp.ne.s32.totalorder %s9314_s9, %s7018_s14  ;;  %p7025_p4 = scmp.lt.u32.totalorder %s7018_s14, %s9314_s9 }
  0xeb   : > { %p7021_p5 = pnand %p7019_p1, %p7269_p8 }
  0xed   : > { %p7022_p3 = pneg %p7021_p5 }
  0xef   : > { %p7027_p7 = pnand %p7025_p4, %p7022_p3 }
  0xf1   : > { %7030 = shalt.err (!%p7027_p7)
}
  0xf2   : > { %s7031_s23 = scalar_lea.vmem %s441_s15, 16384  ;;  %p7039_p12 = scmp.lt.s32.totalorder %s441_s15, %s441_s15 }
  0xf3   : > { %p7032_p9 = scmp.ne.s32.totalorder %s441_s15, %s7031_s23  ;;  %p7040_p2 = scmp.lt.s32.totalorder %s7031_s23, %s7031_s23 }
  0xf5   : > { %p7034_p10 = pnand %p7032_p9, %p7269_p8  ;;  %p7041_p13 = por %p7040_p2, %p7039_p12 }
  0xf7   : > { %p7035_p11 = pneg %p7034_p10 }
  0xf9   : > { %p7042_p0 = pnand %p7041_p13, %p7035_p11 }
  0xfb   : > { %7045 = shalt.err (!%p7042_p0)
}
  0xfc   : > { %s7150_s27 = smov 256   ;;  %s7151_s21 = smov 16  }
  0xfd   : > { %6645 = dma.hbm_to_vmem [thread:$0]  (!%p7253_p6), %s9314_s9, 16384, %s441_s15, [#allocation16], %s7150_s27, %s7150_s27, %s7151_s21  }
  0xfe   : > { %s7152_s24 = smov [#allocation20]   ;;  %s7046_s3 = scalar_lea.hbm %s9317_s12, 16 }
  0xff   : > { %s468_s1 = sshll.u32 %s7152_s24, 4  ;;  %p7047_p1 = scmp.ne.s32.totalorder %s9317_s12, %s7046_s3  ;;  %s469_s1 = int_to_ptr.vmem [resolvable:$true] %s468_s1 }
 0x100   : > { %p7053_p4 = scmp.lt.u32.totalorder %s7046_s3, %s9317_s12 }
 0x101   : > { %p7049_p5 = pnand %p7047_p1, %p7269_p8 }
 0x103   : > { %p7050_p3 = pneg %p7049_p5 }
 0x105   : > { %p7055_p7 = pnand %p7053_p4, %p7050_p3 }
 0x107   : > { %7058 = shalt.err (!%p7055_p7)
}
 0x108   : > { %s7059_s15 = scalar_lea.vmem %s469_s1, 16  ;;  %s7066_s16 = scalar_lea.vmem %s469_s1, 32 }
 0x109   : > { %p7060_p9 = scmp.ne.s32.totalorder %s469_s1, %s7059_s15  ;;  %p7067_p12 = scmp.lt.s32.totalorder %s469_s1, %s469_s1 }
 0x10a   : > { %p7068_p2 = scmp.lt.s32.totalorder %s7066_s16, %s7059_s15 }
 0x10b   : > { %p7062_p10 = pnand %p7060_p9, %p7269_p8 }
 0x10c   : > { %p7069_p13 = por %p7068_p2, %p7067_p12 }
 0x10d   : > { %p7063_p11 = pneg %p7062_p10 }
 0x10f   : > { %p7070_p0 = pnand %p7069_p13, %p7063_p11 }
 0x111   : > { %7073 = shalt.err (!%p7070_p0)
}
 0x112   : > { %6651 = dma.hbm_to_vmem [thread:$0]  (!%p7253_p6), %s9317_s12, 16, %s469_s1, [#allocation19]  }
 0x113   : > { %p9372_p1 = scmp.ne.s32.totalorder %s9366_s29, 0 }
 0x115   : > { %490 = sbr.rel (%p9372_p1) target bundleno = 2340 (0x924), region = 72 }
 0x11c   : > { %p9373_p5 = scmp.eq.s32.totalorder %s7235_s28, 0 }
 0x11e   : > { %7105 = dma.done.wait (%p9373_p5), [#allocation4], 64   ;;  %p9374_p8 = pmov %p9373_p5 }
 0x11f   : > { %p9375_p3 = pmov %p9373_p5 }
 0x120   : > { %7107 = vsyncadd (%p9374_p8), [#allocation4], 4294967232 }
 0x121   : > { %7109 = dma.done.wait (%p9375_p3), [#allocation7], 1040   ;;  %p9376_p4 = pmov %p9375_p3 }
 0x122   : > { %p9377_p7 = pmov %p9375_p3 }
 0x123   : > { %7111 = vsyncadd (%p9376_p4), [#allocation7], 4294966256 }
 0x124   : > { %7113 = dma.done.wait (%p9377_p7), [#allocation10], 8208   ;;  %p9378_p6 = pmov %p9375_p3 }
 0x125   : > { %p9379_p9 = pmov %p9375_p3 }
 0x126   : > { %7115 = vsyncadd (%p9378_p6), [#allocation10], 4294959088 }
 0x127   : > { %7117 = dma.done.wait (%p9379_p9), [#allocation13], 65664   ;;  %p9380_p10 = pmov %p9375_p3 }
 0x128   : > { %p9381_p11 = pmov %p9375_p3 }
 0x129   : > { %7119 = vsyncadd (%p9380_p10), [#allocation13], 4294901632 }
 0x12a   : > { %7121 = dma.done.wait (%p9381_p11), [#allocation16], 16448   ;;  %p9382_p12 = pmov %p9375_p3 }
 0x12b   : > { %p9383_p2 = pmov %p9375_p3 }
 0x12c   : > { %7123 = vsyncadd (%p9382_p12), [#allocation16], 4294950848 }
 0x12d   : > { %7125 = dma.done.wait (%p9383_p2), [#allocation19], 48   ;;  %p9384_p13 = pmov %p9383_p2 }
 0x12e   : > { %s5608_s29 = sshll.u32 %s7235_s28, 5  ;;  %v7153_v0 = vmov 1   ;;  %v7154_v1 = vmov 0   ;;  %v7155_v4 = vmov 2   ;;  %v1268_v7 = vld [vmem:[#allocation8] sm:$0xff]  ;;  %v1269_v8 = vld [vmem:[#allocation8 + $0x8] sm:$0xff]  ;;  %v769_v36 = vlaneseq }
 0x12f   : > { %7127 = vsyncadd (%p9384_p13), [#allocation19], 4294967248  ;;  %6707 = vset.pattern.permute.xlu0 %v7153_v0  ;;  %6708 = vset.pattern.permute.xlu1 %v7154_v1  ;;  %p570_p0 = scmp.lt.s32.totalorder %s5608_s29, 127  ;;  %v5854_v9 = vpack.c.bf16 %v1269_v8, %v1268_v7  ;;  %v1270_v11 = vld [vmem:[#allocation8 + $0x10] sm:$0xff]  ;;  %v1271_v12 = vld [vmem:[#allocation8 + $0x18] sm:$0xff]  ;;  %vm1283_vm0 = vcmask 523264  }
 0x130   : > { %v5858_v13 = vpack.c.bf16 %v1271_v12, %v1270_v11  ;;  %v1272_v14 = vld [vmem:[#allocation8 + $0x20] sm:$0xff]  ;;  %v1273_v15 = vld [vmem:[#allocation8 + $0x28] sm:$0xff]  ;;  %v1274_v17 = vld [vmem:[#allocation8 + $0x30] sm:$0xff]  ;;  %v7597_v40 = vshrl.u32 %v769_v36, 7  ;;  %s5708_s25 = sshll.u32 %s7235_s28, 8  ;;  %p9465_p1 = scmp.ne.s32.totalorder %s7235_s28, 0 }
 0x131   : > { %s9479_s29 = smov (!%p570_p0, %s5608_s29), 127  ;;  %5855 = vmatprep.subr.bf16.mxu0 %v5854_v9  ;;  %6542 = vmatprep.subr.bf16.mxu1 %v5854_v9  ;;  %v5862_v16 = vpack.c.bf16 %v1273_v15, %v1272_v14  ;;  %v1275_v18 = vld [vmem:[#allocation8 + $0x38] sm:$0xff] }
 0x132   : > { %s5609_s17 = sshll.u32 %s9479_s29, 3  ;;  %5857 = vmatpush3.bf16.msra.mxu0 %v5854_v9  ;;  %6546 = vmatpush3.bf16.msra.mxu1 %v5854_v9  ;;  %v5866_v19 = vpack.c.bf16 %v1275_v18, %v1274_v17  ;;  %9385 = vst [vmem:[#allocation30_spill] sm:$0xff] %v7597_v40  ;;  %v7600_v41 = vsub.s32 1, %v7597_v40  ;;  %v7603_v44 = vsub.s32 0, %v7597_v40  ;;  %v608_v45 = vld [vmem:[#allocation3] sm:$0x7] }
 0x133   : > { %s7519_s22 = scalar_lea.vmem %s9305_s0, %s5609_s17  ;;  %5859 = vmatprep.subr.bf16.mxu0 %v5858_v13  ;;  %6543 = vmatprep.subr.bf16.mxu1 %v5858_v13  ;;  %v7610_v47 = vsub.s32 2, %v7597_v40 }
 0x134   : > { %v577_v2 = vld [vmem:[%s7519_s22 + $0x8] sm:$0xff]  ;;  %v576_v3 = vld [vmem:[%s7519_s22] sm:$0xff]  ;;  %v579_v5 = vld [vmem:[%s7519_s22 + $0x18] sm:$0xff]  ;;  %9386 = vst [vmem:[#allocation31_spill] sm:$0xff] %v7600_v41  ;;  %v7607_v46 = vrot.slane %v608_v45, %v7600_v41  ;;  %v7617_v50 = vrot.slane %v608_v45, %v7603_v44 }
 0x135   : > { %616 = vperm.xlu1 %6708, %v577_v2   ;;  %806 = vperm.xlu0 %6707, %v576_v3   ;;  %v581_v6 = vld [vmem:[%s7519_s22 + $0x28] sm:$0xff]  ;;  %v578_v10 = vld [vmem:[%s7519_s22 + $0x10] sm:$0xff]  ;;  %v583_v20 = vld [vmem:[%s7519_s22 + $0x38] sm:$0xff]  ;;  %9387 = vst [vmem:[#allocation32_spill] sm:$0xff] %v7603_v44  ;;  %v7622_v53 = vrot.slane %v608_v45, %v7610_v47 }
 0x136   : > { %5861 = vmatpush3.bf16.msra.mxu0 %v5858_v13  ;;  %6547 = vmatpush3.bf16.msra.mxu1 %v5858_v13  ;;  %v580_v21 = vld [vmem:[%s7519_s22 + $0x20] sm:$0xff]  ;;  %v585_v22 = vld [vmem:[%s7519_s22 + $0x48] sm:$0xff]  ;;  %v587_v23 = vld [vmem:[%s7519_s22 + $0x58] sm:$0xff]  ;;  %9388 = vst [vmem:[#allocation33_spill] sm:$0xff] %v7610_v47 }
 0x137   : > { %5863 = vmatprep.subr.bf16.mxu0 %v5862_v16  ;;  %6544 = vmatprep.subr.bf16.mxu1 %v5862_v16  ;;  %v589_v24 = vld [vmem:[%s7519_s22 + $0x68] sm:$0xff]  ;;  %v7541_v25 = vld [vmem:[%s7519_s22 + $0x78] sm:$0xff]  ;;  %v582_v26 = vld [vmem:[%s7519_s22 + $0x30] sm:$0xff] }
 0x138   : > { %v7552_v27 = vld [vmem:[%s7519_s22 + $0x88] sm:$0xff]  ;;  %v584_v28 = vld [vmem:[%s7519_s22 + $0x40] sm:$0xff]  ;;  %v7558_v29 = vld [vmem:[%s7519_s22 + $0x98] sm:$0xff] }
 0x139   : > { %6709 = vset.pattern.permute.xlu1 %v7153_v0  ;;  %6711 = vset.pattern.permute.xlu0 %v7155_v4  ;;  %v7563_v30 = vld [vmem:[%s7519_s22 + $0xa8] sm:$0xff]  ;;  %v586_v31 = vld [vmem:[%s7519_s22 + $0x50] sm:$0xff]  ;;  %v7574_v32 = vld [vmem:[%s7519_s22 + $0xb8] sm:$0xff] }
 0x13a   : > { %810 = vperm.xlu1 %6709, %v577_v2   ;;  %1006 = vperm.xlu0 %6711, %v577_v2   ;;  %v7579_v33 = vld [vmem:[%s7519_s22 + $0xc8] sm:$0xff]  ;;  %v7583_v34 = vld [vmem:[%s7519_s22 + $0xd8] sm:$0xff]  ;;  %v588_v35 = vld [vmem:[%s7519_s22 + $0x60] sm:$0xff] }
 0x13b   : > { %5865 = vmatpush3.bf16.msra.mxu0 %v5862_v16  ;;  %6548 = vmatpush3.bf16.msra.mxu1 %v5862_v16  ;;  %v590_v37 = vld [vmem:[%s7519_s22 + $0x70] sm:$0xff]  ;;  %v7613_v48 = vld [vmem:[%s7519_s22 + $0xe8] sm:$0xff]  ;;  %v592_v61 = vld [vmem:[%s7519_s22 + $0x80] sm:$0xff] }
 0x13c   : > { %5867 = vmatprep.subr.bf16.mxu0 %v5866_v19  ;;  %6545 = vmatprep.subr.bf16.mxu1 %v5866_v19 }
 0x13e   : > { %6710 = vset.pattern.permute.xlu1 %v7155_v4  ;;  %1014 = vperm.xlu0 %6711, %v579_v5  }
 0x13f   : > { %1002 = vperm.xlu1 %6710, %v576_v3   ;;  %5869 = vmatpush3.bf16.msra.mxu0 %v5866_v19 }
 0x140   : > { %6549 = vmatpush3.bf16.msra.mxu1 %v5866_v19 }
 0x142   : > { %1022 = vperm.xlu0 %6711, %v581_v6  }
 0x143   : > { %6712 = vset.pattern.permute.xlu1 %v7154_v1 }
 0x144   : > { %621 = vperm.xlu1 %6712, %v578_v10  }
 0x146   : > { %6718 = vset.pattern.permute.xlu0 %v7154_v1 }
 0x147   : > { %611 = vperm.xlu0 %6718, %v576_v3   ;;  %v7635_v3 = vld [vmem:[#allocation6] ss:$0 sm:$0xff] }
 0x148   : > { %6713 = vset.pattern.permute.xlu1 %v7153_v0 }
 0x149   : > { %814 = vperm.xlu1 %6713, %v578_v10  }
 0x14b   : > { %626 = vperm.xlu0 %6718, %v579_v5  }
 0x14d   : > { %818 = vperm.xlu1 %6713, %v579_v5  }
 0x14f   : > { %636 = vperm.xlu0 %6718, %v581_v6  }
 0x151   : > { %6714 = vset.pattern.permute.xlu1 %v7155_v4 }
 0x152   : > { %1010 = vperm.xlu1 %6714, %v578_v10  }
 0x153   : > { %646 = vperm.xlu0 %6718, %v583_v20  }
 0x156   : > { %6715 = vset.pattern.permute.xlu1 %v7154_v1 }
 0x157   : > { %631 = vperm.xlu1 %6715, %v580_v21   ;;  %656 = vperm.xlu0 %6718, %v585_v22  }
 0x15b   : > { %6716 = vset.pattern.permute.xlu1 %v7153_v0  ;;  %666 = vperm.xlu0 %6718, %v587_v23  }
 0x15c   : > { %822 = vperm.xlu1 %6716, %v580_v21  }
 0x15f   : > { %676 = vperm.xlu0 %6718, %v589_v24  }
 0x160   : > { %826 = vperm.xlu1 %6716, %v581_v6  }
 0x163   : > { %686 = vperm.xlu0 %6718, %v7541_v25  }
 0x164   : > { %6717 = vset.pattern.permute.xlu1 %v7155_v4 }
 0x165   : > { %1018 = vperm.xlu1 %6717, %v580_v21  }
 0x167   : > { %6733 = vset.pattern.permute.xlu0 %v7155_v4 }
 0x168   : > { %1030 = vperm.xlu0 %6733, %v583_v20  }
 0x169   : > { %6719 = vset.pattern.permute.xlu1 %v7154_v1 }
 0x16a   : > { %641 = vperm.xlu1 %6719, %v582_v26  }
 0x16c   : > { %1038 = vperm.xlu0 %6733, %v585_v22  }
 0x16e   : > { %6720 = vset.pattern.permute.xlu1 %v7153_v0 }
 0x16f   : > { %830 = vperm.xlu1 %6720, %v582_v26  }
 0x170   : > { %1046 = vperm.xlu0 %6733, %v587_v23  }
 0x173   : > { %834 = vperm.xlu1 %6720, %v583_v20  }
 0x174   : > { %1054 = vperm.xlu0 %6733, %v589_v24  }
 0x177   : > { %6721 = vset.pattern.permute.xlu1 %v7155_v4 }
 0x178   : > { %1026 = vperm.xlu1 %6721, %v582_v26   ;;  %1062 = vperm.xlu0 %6733, %v7541_v25   ;;  %v7651_v26 = vld [vmem:[%s7519_s22 + $0xf8] sm:$0xff] }
 0x17c   : > { %6722 = vset.pattern.permute.xlu1 %v7154_v1  ;;  %1070 = vperm.xlu0 %6733, %v7552_v27  }
 0x17d   : > { %651 = vperm.xlu1 %6722, %v584_v28  }
 0x180   : > { %1078 = vperm.xlu0 %6733, %v7558_v29  }
 0x181   : > { %6723 = vset.pattern.permute.xlu1 %v7153_v0 }
 0x182   : > { %838 = vperm.xlu1 %6723, %v584_v28  }
 0x184   : > { %1086 = vperm.xlu0 %6733, %v7563_v30  }
 0x186   : > { %842 = vperm.xlu1 %6723, %v585_v22  }
 0x188   : > { %6744 = vset.pattern.permute.xlu0 %v7154_v1 }
 0x189   : > { %696 = vperm.xlu0 %6744, %v7552_v27  }
 0x18a   : > { %6724 = vset.pattern.permute.xlu1 %v7155_v4 }
 0x18b   : > { %1034 = vperm.xlu1 %6724, %v584_v28  }
 0x18d   : > { %706 = vperm.xlu0 %6744, %v7558_v29  }
 0x18f   : > { %6725 = vset.pattern.permute.xlu1 %v7154_v1 }
 0x190   : > { %661 = vperm.xlu1 %6725, %v586_v31  }
 0x191   : > { %716 = vperm.xlu0 %6744, %v7563_v30  }
 0x194   : > { %6726 = vset.pattern.permute.xlu1 %v7153_v0 }
 0x195   : > { %846 = vperm.xlu1 %6726, %v586_v31   ;;  %726 = vperm.xlu0 %6744, %v7574_v32  }
 0x199   : > { %850 = vperm.xlu1 %6726, %v587_v23   ;;  %736 = vperm.xlu0 %6744, %v7579_v33  }
 0x19d   : > { %6727 = vset.pattern.permute.xlu1 %v7155_v4  ;;  %746 = vperm.xlu0 %6744, %v7583_v34  }
 0x19e   : > { %1042 = vperm.xlu1 %6727, %v586_v31  }
 0x1a1   : > { %6753 = vset.pattern.permute.xlu0 %v7155_v4 }
 0x1a2   : > { %6728 = vset.pattern.permute.xlu1 %v7154_v1  ;;  %1094 = vperm.xlu0 %6753, %v7574_v32  }
 0x1a3   : > { %671 = vperm.xlu1 %6728, %v588_v35  }
 0x1a6   : > { %1102 = vperm.xlu0 %6753, %v7579_v33  }
 0x1a7   : > { %6729 = vset.pattern.permute.xlu1 %v7153_v0 }
 0x1a8   : > { %854 = vperm.xlu1 %6729, %v588_v35  }
 0x1aa   : > { %1110 = vperm.xlu0 %6753, %v7583_v34  }
 0x1ac   : > { %858 = vperm.xlu1 %6729, %v589_v24  }
 0x1ae   : > { %1118 = vperm.xlu0 %6753, %v7613_v48  }
 0x1b0   : > { %6730 = vset.pattern.permute.xlu1 %v7155_v4 }
 0x1b1   : > { %1050 = vperm.xlu1 %6730, %v588_v35  }
 0x1b2   : > { %6758 = vset.pattern.permute.xlu0 %v7154_v1 }
 0x1b3   : > { %756 = vperm.xlu0 %6758, %v7613_v48  }
 0x1b4   : > { %v617_v38 = vpop.permute.xlu1 %616  ;;  %v807_v39 = vpop.permute.xlu0 %806 }
 0x1b5   : > { %6731 = vset.pattern.permute.xlu1 %v7154_v1  ;;  %v774_v55 = vmul.f32 %v7617_v50, %v617_v38  ;;  %v937_v59 = vmul.f32 %v7607_v46, %v807_v39  ;;  %v594_v39 = vld [vmem:[%s7519_s22 + $0x90] sm:$0xff] }
 0x1b6   : > { %681 = vperm.xlu1 %6731, %v590_v37  }
 0x1b7   : > { %766 = vperm.xlu0 %6758, %v7651_v26  }
 0x1b9   : > { %v811_v42 = vpop.permute.xlu1 %810  ;;  %v1007_v43 = vpop.permute.xlu0 %1006 }
 0x1ba   : > { %6732 = vset.pattern.permute.xlu1 %v7153_v0  ;;  %v938_v52 = vmul.f32 %v7607_v46, %v811_v42  ;;  %v1134_v58 = vmul.f32 %v7622_v53, %v1007_v43 }
 0x1bb   : > { %862 = vperm.xlu1 %6732, %v590_v37   ;;  %6762 = vset.pattern.permute.xlu0 %v7155_v4 }
 0x1bc   : > { %v970_v57 = vadd.f32 %v938_v52, %v774_v55  ;;  %1126 = vperm.xlu0 %6762, %v7651_v26  }
 0x1bd   : > { %v1015_v49 = vpop.permute.xlu0 %1014 }
 0x1be   : > { %v1003_v51 = vpop.permute.xlu1 %1002  ;;  %v1166_v63 = vadd.f32 %v1134_v58, %v970_v57  ;;  %v1136_v12 = vmul.f32 %v7622_v53, %v1015_v49 }
 0x1bf   : > { %866 = vperm.xlu1 %6732, %v7541_v25   ;;  %v1133_v5 = vmul.f32 %v7622_v53, %v1003_v51 }
 0x1c0   : > { %v1205_v10 = vadd.f32 %v7635_v3, %v1166_v63 }
 0x1c1   : > { %v7624_v54 = vpop.permute.xlu0 %1022 }
 0x1c2   : > { %v1237_v19 = vmax.f32 %v1205_v10, 0.0  ;;  %v1138_v51 = vmul.f32 %v7622_v53, %v7624_v54 }
 0x1c3   : > { %6734 = vset.pattern.permute.xlu1 %v7155_v4  ;;  %v622_v56 = vpop.permute.xlu1 %621 }
 0x1c4   : > { %1058 = vperm.xlu1 %6734, %v590_v37   ;;  %v775_v20 = vmul.f32 %v7617_v50, %v622_v56 }
 0x1c6   : > { %v612_v60 = vpop.permute.xlu0 %611 }
 0x1c7   : > { %v773_v62 = vmul.f32 %v7617_v50, %v612_v60 }
 0x1c8   : > { %6735 = vset.pattern.permute.xlu1 %v7154_v1  ;;  %v815_v2 = vpop.permute.xlu1 %814 }
 0x1c9   : > { %v969_v6 = vadd.f32 %v937_v59, %v773_v62  ;;  %691 = vperm.xlu1 %6735, %v592_v61   ;;  %v939_v15 = vmul.f32 %v7607_v46, %v815_v2 }
 0x1ca   : > { %v627_v7 = vpop.permute.xlu0 %626 }
 0x1cb   : > { %v776_v8 = vmul.f32 %v7617_v50, %v627_v7  ;;  %v1165_v9 = vadd.f32 %v1133_v5, %v969_v6  ;;  %v971_v23 = vadd.f32 %v939_v15, %v775_v20 }
 0x1cc   : > { %v819_v11 = vpop.permute.xlu1 %818 }
 0x1cd   : > { %v940_v13 = vmul.f32 %v7607_v46, %v819_v11  ;;  %6736 = vset.pattern.permute.xlu1 %v7153_v0  ;;  %v1204_v14 = vadd.f32 %v7635_v3, %v1165_v9  ;;  %v596_v9 = vld [vmem:[%s7519_s22 + $0xa0] sm:$0xff] }
 0x1ce   : > { %870 = vperm.xlu1 %6736, %v592_v61   ;;  %v637_v16 = vpop.permute.xlu0 %636 }
 0x1cf   : > { %v972_v17 = vadd.f32 %v940_v13, %v776_v8  ;;  %v1236_v18 = vmax.f32 %v1204_v14, 0.0  ;;  %v778_v43 = vmul.f32 %v7617_v50, %v637_v16 }
 0x1d1   : > { %v1168_v21 = vadd.f32 %v1136_v12, %v972_v17  ;;  %v1011_v22 = vpop.permute.xlu1 %1010  ;;  %5806 = vmatprep.mubr.msk.f32.mxu0 %vm1283_vm0, %v1236_v18 }
 0x1d2   : > { %v1135_v24 = vmul.f32 %v7622_v53, %v1011_v22  ;;  %874 = vperm.xlu1 %6736, %v7552_v27   ;;  %5807 = vmatmul.mubr.msk.f32.vlgmr.msra.gmra.mrb[0].mxu0 %vm1283_vm0, %v1237_v19  ;;  %v647_v25 = vpop.permute.xlu0 %646 }
 0x1d3   : > { %v1207_v31 = vadd.f32 %v7635_v3, %v1168_v21  ;;  %v780_v11 = vmul.f32 %v7617_v50, %v647_v25 }
 0x1d4   : > { %v1167_v28 = vadd.f32 %v1135_v24, %v971_v23 }
 0x1d5   : > { %v1239_v38 = vmax.f32 %v1207_v31, 0.0 }
 0x1d6   : > { %v1206_v35 = vadd.f32 %v7635_v3, %v1167_v28  ;;  %6737 = vset.pattern.permute.xlu1 %v7155_v4  ;;  %v632_v36 = vpop.permute.xlu1 %631  ;;  %v7658_v37 = vpop.permute.xlu0 %656 }
 0x1d7   : > { %1066 = vperm.xlu1 %6737, %v592_v61   ;;  %v777_v57 = vmul.f32 %v7617_v50, %v632_v36 }
 0x1d8   : > { %v1238_v27 = vmax.f32 %v1206_v35, 0.0  ;;  %v598_v35 = vld [vmem:[%s7519_s22 + $0xb0] sm:$0xff] }
 0x1da   : > { %5809 = vmatprep.mubr.msk.f32.mxu0 %vm1283_vm0, %v1238_v27  ;;  %v7666_v45 = vpop.permute.xlu0 %666  ;;  %v782_v27 = vmul.f32 %v7617_v50, %v7658_v37 }
 0x1db   : > { %6738 = vset.pattern.permute.xlu1 %v7154_v1  ;;  %v823_v42 = vpop.permute.xlu1 %822  ;;  %5810 = vmatmul.mubr.msk.f32.gmra.mrb[2].mxu0 %vm1283_vm0, %v1239_v38 }
 0x1dc   : > { %701 = vperm.xlu1 %6738, %v594_v39   ;;  %v941_v55 = vmul.f32 %v7607_v46, %v823_v42 }
 0x1de   : > { %v7674_v60 = vpop.permute.xlu0 %676  ;;  %v973_v61 = vadd.f32 %v941_v55, %v777_v57  ;;  %v1658_v57 = vld [vmem:[#allocation11 + $0x28] sm:$0xff] }
 0x1df   : > { %v827_v49 = vpop.permute.xlu1 %826 }
 0x1e0   : > { %v942_v52 = vmul.f32 %v7607_v46, %v827_v49  ;;  %6739 = vset.pattern.permute.xlu1 %v7153_v0 }
 0x1e1   : > { %878 = vperm.xlu1 %6739, %v594_v39  }
 0x1e2   : > { %v974_v56 = vadd.f32 %v942_v52, %v778_v43  ;;  %v7681_v6 = vpop.permute.xlu0 %686 }
 0x1e4   : > { %v1170_v58 = vadd.f32 %v1138_v51, %v974_v56  ;;  %v1019_v59 = vpop.permute.xlu1 %1018  ;;  %v1654_v56 = vld [vmem:[#allocation11 + $0x8] sm:$0xff] }
 0x1e5   : > { %v1137_v62 = vmul.f32 %v7622_v53, %v1019_v59  ;;  %882 = vperm.xlu1 %6739, %v7558_v29   ;;  %v5647_v59 = vcombine.high %v1654_v56, %v1658_v57 }
 0x1e6   : > { %v1209_v63 = vadd.f32 %v7635_v3, %v1170_v58 }
 0x1e7   : > { %v1169_v54 = vadd.f32 %v1137_v62, %v973_v61  ;;  %v1031_v29 = vpop.permute.xlu0 %1030  ;;  %v5646_v61 = vcombine.low %v1654_v56, %v1658_v57  ;;  %2272 = vmatprep.subr.bf16.mxu0 %v5647_v59  ;;  %v1706_v59 = vld [vmem:[#allocation11 + $0x1a8] sm:$0xff] }
 0x1e8   : > { %v1241_v8 = vmax.f32 %v1209_v63, 0.0  ;;  %v1140_v14 = vmul.f32 %v7622_v53, %v1031_v29  ;;  %v1662_v63 = vld [vmem:[#allocation11 + $0x48] sm:$0xff]  ;;  %v600_v29 = vld [vmem:[%s7519_s22 + $0xc0] sm:$0xff] }
 0x1e9   : > { %v1208_v2 = vadd.f32 %v7635_v3, %v1169_v54  ;;  %6740 = vset.pattern.permute.xlu1 %v7155_v4  ;;  %v642_v5 = vpop.permute.xlu1 %641  ;;  %2273 = vmatpush1.bf16.msra.mxu0 %v5646_v61 }
 0x1ea   : > { %1074 = vperm.xlu1 %6740, %v594_v39   ;;  %v779_v17 = vmul.f32 %v7617_v50, %v642_v5 }
 0x1eb   : > { %v1240_v7 = vmax.f32 %v1208_v2, 0.0  ;;  %v1666_v2 = vld [vmem:[#allocation11 + $0x68] sm:$0xff] }
 0x1ed   : > { %5812 = vmatprep.mubr.msk.f32.mxu0 %vm1283_vm0, %v1240_v7 }
 0x1ee   : > { %6741 = vset.pattern.permute.xlu1 %v7154_v1  ;;  %v831_v10 = vpop.permute.xlu1 %830  ;;  %5813 = vmatmul.mubr.msk.f32.gmra.mrb[4].mxu0 %vm1283_vm0, %v1241_v8  ;;  %v5655_v8 = vcombine.high %v1662_v63, %v1666_v2 }
 0x1ef   : > { %711 = vperm.xlu1 %6741, %v596_v9   ;;  %v943_v15 = vmul.f32 %v7607_v46, %v831_v10 }
 0x1f0   : > { %2274 = vmatprep.subr.bf16.mxu0 %v5655_v8 }
 0x1f1   : > { %v975_v20 = vadd.f32 %v943_v15, %v779_v17  ;;  %v1678_v17 = vld [vmem:[#allocation11 + $0xc8] sm:$0xff] }
 0x1f2   : > { %v835_v12 = vpop.permute.xlu1 %834 }
 0x1f3   : > { %v944_v13 = vmul.f32 %v7607_v46, %v835_v12  ;;  %6742 = vset.pattern.permute.xlu1 %v7153_v0  ;;  %v1674_v12 = vld [vmem:[#allocation11 + $0xa8] sm:$0xff] }
 0x1f4   : > { %886 = vperm.xlu1 %6742, %v596_v9  }
 0x1f5   : > { %v976_v16 = vadd.f32 %v944_v13, %v780_v11  ;;  %v1670_v11 = vld [vmem:[#allocation11 + $0x88] sm:$0xff] }
 0x1f6   : > { %v5663_v13 = vcombine.high %v1670_v11, %v1674_v12  ;;  %v5662_v15 = vcombine.low %v1670_v11, %v1674_v12 }
 0x1f7   : > { %v1172_v18 = vadd.f32 %v1140_v14, %v976_v16  ;;  %v1027_v19 = vpop.permute.xlu1 %1026 }
 0x1f8   : > { %v1139_v21 = vmul.f32 %v7622_v53, %v1027_v19  ;;  %890 = vperm.xlu1 %6742, %v7563_v30   ;;  %v1039_v30 = vpop.permute.xlu0 %1038  ;;  %v784_v19 = vmul.f32 %v7617_v50, %v7666_v45 }
 0x1f9   : > { %v1211_v23 = vadd.f32 %v7635_v3, %v1172_v18  ;;  %v1142_v42 = vmul.f32 %v7622_v53, %v1039_v30  ;;  %v1682_v18 = vld [vmem:[#allocation11 + $0xe8] sm:$0xff] }
 0x1fa   : > { %v1171_v22 = vadd.f32 %v1139_v21, %v975_v20  ;;  %v5671_v20 = vcombine.high %v1678_v17, %v1682_v18 }
 0x1fb   : > { %v1243_v31 = vmax.f32 %v1211_v23, 0.0 }
 0x1fc   : > { %v1210_v24 = vadd.f32 %v7635_v3, %v1171_v22  ;;  %6743 = vset.pattern.permute.xlu1 %v7155_v4  ;;  %v652_v25 = vpop.permute.xlu1 %651  ;;  %v1047_v16 = vpop.permute.xlu0 %1046  ;;  %v5670_v22 = vcombine.low %v1678_v17, %v1682_v18 }
 0x1fd   : > { %1082 = vperm.xlu1 %6743, %v596_v9   ;;  %v781_v51 = vmul.f32 %v7617_v50, %v652_v25  ;;  %v5654_v9 = vcombine.low %v1662_v63, %v1666_v2  ;;  %v602_v63 = vld [vmem:[%s7519_s22 + $0xd0] sm:$0xff]  ;;  %v1710_v2 = vld [vmem:[#allocation11 + $0x1c8] sm:$0xff] }
 0x1fe   : > { %v1242_v28 = vmax.f32 %v1210_v24, 0.0  ;;  %v1144_v24 = vmul.f32 %v7622_v53, %v1047_v16 }
 0x1ff   : > { %2275 = vmatpush1.bf16.msra.mxu0 %v5654_v9 }
 0x200   : > { %5815 = vmatprep.mubr.msk.f32.mxu0 %vm1283_vm0, %v1242_v28  ;;  %2276 = vmatprep.subr.bf16.mxu0 %v5663_v13  ;;  %v1686_v28 = vld [vmem:[#allocation11 + $0x108] sm:$0xff] }
 0x201   : > { %6745 = vset.pattern.permute.xlu1 %v7154_v1  ;;  %v839_v36 = vpop.permute.xlu1 %838  ;;  %5816 = vmatmul.mubr.msk.f32.gmra.mrb[6].mxu0 %vm1283_vm0, %v1243_v31  ;;  %v1690_v31 = vld [vmem:[#allocation11 + $0x128] sm:$0xff] }
 0x202   : > { %721 = vperm.xlu1 %6745, %v598_v35   ;;  %v945_v43 = vmul.f32 %v7607_v46, %v839_v36  ;;  %v5679_v36 = vcombine.high %v1686_v28, %v1690_v31  ;;  %v5678_v30 = vcombine.low %v1686_v28, %v1690_v31  ;;  %v604_v28 = vld [vmem:[%s7519_s22 + $0xe0] sm:$0xff] }
 0x203   : > { %2277 = vmatpush1.bf16.msra.mxu0 %v5662_v15 }
 0x204   : > { %v977_v58 = vadd.f32 %v945_v43, %v781_v51  ;;  %2278 = vmatprep.subr.bf16.mxu0 %v5671_v20  ;;  %v1694_v43 = vld [vmem:[#allocation11 + $0x148] sm:$0xff] }
 0x205   : > { %v843_v38 = vpop.permute.xlu1 %842 }
 0x206   : > { %v946_v39 = vmul.f32 %v7607_v46, %v843_v38  ;;  %6746 = vset.pattern.permute.xlu1 %v7153_v0 }
 0x207   : > { %894 = vperm.xlu1 %6746, %v598_v35   ;;  %2279 = vmatpush1.bf16.msra.mxu0 %v5670_v22 }
 0x208   : > { %v978_v49 = vadd.f32 %v946_v39, %v782_v27  ;;  %2280 = vmatprep.subr.bf16.mxu0 %v5679_v36 }
 0x20a   : > { %v1174_v52 = vadd.f32 %v1142_v42, %v978_v49  ;;  %v1035_v55 = vpop.permute.xlu1 %1034  ;;  %v1698_v49 = vld [vmem:[#allocation11 + $0x168] sm:$0xff] }
 0x20b   : > { %v1141_v37 = vmul.f32 %v7622_v53, %v1035_v55  ;;  %898 = vperm.xlu1 %6746, %v7574_v32   ;;  %2281 = vmatpush1.bf16.msra.mxu0 %v5678_v30  ;;  %v5687_v51 = vcombine.high %v1694_v43, %v1698_v49  ;;  %v5686_v55 = vcombine.low %v1694_v43, %v1698_v49 }
 0x20c   : > { %v1213_v54 = vadd.f32 %v7635_v3, %v1174_v52 }
 0x20d   : > { %v1173_v62 = vadd.f32 %v1141_v37, %v977_v58  ;;  %2282 = vmatprep.subr.bf16.mxu0 %v5687_v51  ;;  %v1702_v37 = vld [vmem:[#allocation11 + $0x188] sm:$0xff] }
 0x20e   : > { %v1245_v32 = vmax.f32 %v1213_v54, 0.0 }
 0x20f   : > { %v1212_v5 = vadd.f32 %v7635_v3, %v1173_v62  ;;  %6747 = vset.pattern.permute.xlu1 %v7155_v4  ;;  %v662_v7 = vpop.permute.xlu1 %661  ;;  %2283 = vmatpush1.bf16.msra.mxu0 %v5686_v55  ;;  %v5694_v62 = vcombine.low %v1702_v37, %v1706_v59  ;;  %v1653_v55 = vld [vmem:[#allocation11] sm:$0xff] }
 0x210   : > { %1090 = vperm.xlu1 %6747, %v598_v35   ;;  %v783_v45 = vmul.f32 %v7617_v50, %v662_v7 }
 0x211   : > { %v1244_v10 = vmax.f32 %v1212_v5, 0.0  ;;  %v1714_v5 = vld [vmem:[#allocation11 + $0x1e8] sm:$0xff] }
 0x212   : > { %v5703_v8 = vcombine.high %v1710_v2, %v1714_v5  ;;  %v5702_v9 = vcombine.low %v1710_v2, %v1714_v5 }
 0x213   : > { %5818 = vmatprep.mubr.msk.f32.mxu0 %vm1283_vm0, %v1244_v10  ;;  %v1055_v10 = vpop.permute.xlu0 %1054 }
 0x214   : > { %6748 = vset.pattern.permute.xlu1 %v7154_v1  ;;  %v847_v14 = vpop.permute.xlu1 %846  ;;  %5819 = vmatmul.mubr.msk.f32.gmra.mrb[8].mxu0 %vm1283_vm0, %v1245_v32  ;;  %v786_v32 = vmul.f32 %v7617_v50, %v7674_v60  ;;  %v1146_v12 = vmul.f32 %v7622_v53, %v1055_v10 }
 0x215   : > { %731 = vperm.xlu1 %6748, %v600_v29   ;;  %v947_v25 = vmul.f32 %v7607_v46, %v847_v14 }
 0x217   : > { %v979_v39 = vadd.f32 %v947_v25, %v783_v45 }
 0x218   : > { %v851_v21 = vpop.permute.xlu1 %850 }
 0x219   : > { %v948_v23 = vmul.f32 %v7607_v46, %v851_v21  ;;  %6749 = vset.pattern.permute.xlu1 %v7153_v0 }
 0x21a   : > { %902 = vperm.xlu1 %6749, %v600_v29  }
 0x21b   : > { %v980_v35 = vadd.f32 %v948_v23, %v784_v19  ;;  %v1063_v23 = vpop.permute.xlu0 %1062 }
 0x21c   : > { %v1148_v30 = vmul.f32 %v7622_v53, %v1063_v23  ;;  %v1673_v23 = vld [vmem:[#allocation11 + $0xa0] sm:$0xff] }
 0x21d   : > { %v1176_v27 = vadd.f32 %v1144_v24, %v980_v35  ;;  %v1043_v38 = vpop.permute.xlu1 %1042  ;;  %v788_v35 = vmul.f32 %v7617_v50, %v7681_v6 }
 0x21e   : > { %v1143_v42 = vmul.f32 %v7622_v53, %v1043_v38  ;;  %906 = vperm.xlu1 %6749, %v7579_v33   ;;  %v5695_v33 = vcombine.high %v1702_v37, %v1706_v59 }
 0x21f   : > { %v1215_v56 = vadd.f32 %v7635_v3, %v1176_v27 }
 0x220   : > { %v1175_v52 = vadd.f32 %v1143_v42, %v979_v39  ;;  %2284 = vmatprep.subr.bf16.mxu0 %v5695_v33 }
 0x221   : > { %v1247_v54 = vmax.f32 %v1215_v56, 0.0  ;;  %2285 = vmatpush1.bf16.msra.mxu0 %v5694_v62  ;;  %v1657_v56 = vld [vmem:[#allocation11 + $0x20] sm:$0xff] }
 0x222   : > { %v1214_v57 = vadd.f32 %v7635_v3, %v1175_v52  ;;  %6750 = vset.pattern.permute.xlu1 %v7155_v4  ;;  %v672_v58 = vpop.permute.xlu1 %671  ;;  %2286 = vmatprep.subr.bf16.mxu0 %v5703_v8  ;;  %v5645_v37 = vcombine.high %v1653_v55, %v1657_v56 }
 0x223   : > { %1098 = vperm.xlu1 %6750, %v600_v29   ;;  %v785_v15 = vmul.f32 %v7617_v50, %v672_v58 }
 0x224   : > { %v1246_v61 = vmax.f32 %v1214_v57, 0.0  ;;  %2079 = vmatprep.subr.bf16.mxu1 %v5645_v37  ;;  %v1693_v37 = vld [vmem:[#allocation11 + $0x140] sm:$0xff] }
 0x225   : > { %2287 = vmatpush1.bf16.msra.mxu0 %v5702_v9 }
 0x226   : > { %5821 = vmatprep.mubr.msk.f32.mxu0 %vm1283_vm0, %v1246_v61 }
 0x227   : > { %6751 = vset.pattern.permute.xlu1 %v7154_v1  ;;  %v855_v7 = vpop.permute.xlu1 %854  ;;  %5822 = vmatmul.mubr.msk.f32.gmra.mrb[10].mxu0 %vm1283_vm0, %v1247_v54  ;;  %v606_v54 = vld [vmem:[%s7519_s22 + $0xf0] sm:$0xff] }
 0x228   : > { %741 = vperm.xlu1 %6751, %v602_v63   ;;  %v949_v13 = vmul.f32 %v7607_v46, %v855_v7 }
 0x22a   : > { %v981_v18 = vadd.f32 %v949_v13, %v785_v15 }
 0x22b   : > { %v859_v29 = vpop.permute.xlu1 %858 }
 0x22c   : > { %v950_v11 = vmul.f32 %v7607_v46, %v859_v29  ;;  %6752 = vset.pattern.permute.xlu1 %v7153_v0 }
 0x22d   : > { %910 = vperm.xlu1 %6752, %v602_v63  }
 0x22e   : > { %v982_v14 = vadd.f32 %v950_v11, %v786_v32 }
 0x230   : > { %v1178_v16 = vadd.f32 %v1146_v12, %v982_v14  ;;  %v1051_v17 = vpop.permute.xlu1 %1050 }
 0x231   : > { %v1145_v60 = vmul.f32 %v7622_v53, %v1051_v17  ;;  %914 = vperm.xlu1 %6752, %v7583_v34   ;;  %v1071_v34 = vpop.permute.xlu0 %1070  ;;  %v1661_v17 = vld [vmem:[#allocation11 + $0x40] sm:$0xff] }
 0x232   : > { %v1217_v20 = vadd.f32 %v7635_v3, %v1178_v16  ;;  %v1150_v7 = vmul.f32 %v7622_v53, %v1071_v34  ;;  %v1681_v34 = vld [vmem:[#allocation11 + $0xe0] sm:$0xff] }
 0x233   : > { %v1177_v19 = vadd.f32 %v1145_v60, %v981_v18  ;;  %v1665_v18 = vld [vmem:[#allocation11 + $0x60] sm:$0xff] }
 0x234   : > { %v1249_v25 = vmax.f32 %v1217_v20, 0.0 }
 0x235   : > { %v1216_v21 = vadd.f32 %v7635_v3, %v1177_v19  ;;  %6754 = vset.pattern.permute.xlu1 %v7155_v4  ;;  %v682_v22 = vpop.permute.xlu1 %681  ;;  %v7756_v39 = vpop.permute.xlu0 %1078  ;;  %v5644_v19 = vcombine.low %v1653_v55, %v1657_v56 }
 0x236   : > { %1106 = vperm.xlu1 %6754, %v602_v63   ;;  %v787_v42 = vmul.f32 %v7617_v50, %v682_v22  ;;  %v1669_v22 = vld [vmem:[#allocation11 + $0x80] sm:$0xff] }
 0x237   : > { %v1248_v24 = vmax.f32 %v1216_v21, 0.0  ;;  %v5653_v21 = vcombine.high %v1661_v17, %v1665_v18 }
 0x239   : > { %5824 = vmatprep.mubr.msk.f32.mxu0 %vm1283_vm0, %v1248_v24  ;;  %v7762_v58 = vpop.permute.xlu0 %1086 }
 0x23a   : > { %6755 = vset.pattern.permute.xlu1 %v7154_v1  ;;  %v863_v31 = vpop.permute.xlu1 %862  ;;  %5825 = vmatmul.mubr.msk.f32.gmra.mrb[12].mxu0 %vm1283_vm0, %v1249_v25  ;;  %v5661_v25 = vcombine.high %v1669_v22, %v1673_v23 }
 0x23b   : > { %751 = vperm.xlu1 %6755, %v604_v28   ;;  %v951_v27 = vmul.f32 %v7607_v46, %v863_v31  ;;  %v1677_v31 = vld [vmem:[#allocation11 + $0xc0] sm:$0xff] }
 0x23c   : > { %v5668_v55 = vcombine.low %v1677_v31, %v1681_v34 }
 0x23d   : > { %v983_v51 = vadd.f32 %v951_v27, %v787_v42  ;;  %v697_v63 = vpop.permute.xlu0 %696 }
 0x23e   : > { %v867_v36 = vpop.permute.xlu1 %866  ;;  %v790_v2 = vmul.f32 %v7617_v50, %v697_v63 }
 0x23f   : > { %v952_v45 = vmul.f32 %v7607_v46, %v867_v36  ;;  %6756 = vset.pattern.permute.xlu1 %v7153_v0  ;;  %v1152_v36 = vmul.f32 %v7622_v53, %v7756_v39 }
 0x240   : > { %918 = vperm.xlu1 %6756, %v604_v28  }
 0x241   : > { %v984_v38 = vadd.f32 %v952_v45, %v788_v35  ;;  %v707_v24 = vpop.permute.xlu0 %706 }
 0x243   : > { %v1180_v43 = vadd.f32 %v1148_v30, %v984_v38  ;;  %v1059_v49 = vpop.permute.xlu1 %1058  ;;  %v5660_v30 = vcombine.low %v1669_v22, %v1673_v23  ;;  %v5669_v38 = vcombine.high %v1677_v31, %v1681_v34 }
 0x244   : > { %v1147_v6 = vmul.f32 %v7622_v53, %v1059_v49  ;;  %922 = vperm.xlu1 %6756, %v7613_v48   ;;  %v1689_v49 = vld [vmem:[#allocation11 + $0x120] sm:$0xff] }
 0x245   : > { %v1219_v57 = vadd.f32 %v7635_v3, %v1180_v43  ;;  %v1685_v43 = vld [vmem:[#allocation11 + $0x100] sm:$0xff] }
 0x246   : > { %v1179_v52 = vadd.f32 %v1147_v6, %v983_v51 }
 0x247   : > { %v1251_v62 = vmax.f32 %v1219_v57, 0.0  ;;  %v5677_v57 = vcombine.high %v1685_v43, %v1689_v49 }
 0x248   : > { %v1218_v59 = vadd.f32 %v7635_v3, %v1179_v52  ;;  %6757 = vset.pattern.permute.xlu1 %v7155_v4  ;;  %v692_v33 = vpop.permute.xlu1 %691 }
 0x249   : > { %1114 = vperm.xlu1 %6757, %v604_v28   ;;  %v789_v32 = vmul.f32 %v7617_v50, %v692_v33  ;;  %v792_v28 = vmul.f32 %v7617_v50, %v707_v24 }
 0x24a   : > { %v1250_v61 = vmax.f32 %v1218_v59, 0.0  ;;  %v1697_v59 = vld [vmem:[#allocation11 + $0x160] sm:$0xff] }
 0x24b   : > { %v5685_v63 = vcombine.high %v1693_v37, %v1697_v59 }
 0x24c   : > { %5827 = vmatprep.mubr.msk.f32.mxu0 %vm1283_vm0, %v1250_v61 }
 0x24d   : > { %6759 = vset.pattern.permute.xlu1 %v7154_v1  ;;  %v871_v48 = vpop.permute.xlu1 %870  ;;  %5828 = vmatmul.mubr.msk.f32.gmra.mrb[14].mxu0 %vm1283_vm0, %v1251_v62  ;;  %v5676_v62 = vcombine.low %v1685_v43, %v1689_v49 }
 0x24e   : > { %761 = vperm.xlu1 %6759, %v606_v54   ;;  %2304 = vmatprep.mubr.bf16.mxu0 %v7154_v1  ;;  %v953_v9 = vmul.f32 %v7607_v46, %v871_v48 }
 0x250   : > { %v985_v12 = vadd.f32 %v953_v9, %v789_v32  ;;  %v5684_v9 = vcombine.low %v1693_v37, %v1697_v59 }
 0x251   : > { %v875_v5 = vpop.permute.xlu1 %874 }
 0x252   : > { %v954_v8 = vmul.f32 %v7607_v46, %v875_v5  ;;  %6760 = vset.pattern.permute.xlu1 %v7153_v0  ;;  %v1705_v5 = vld [vmem:[#allocation11 + $0x1a0] sm:$0xff] }
 0x253   : > { %926 = vperm.xlu1 %6760, %v606_v54  }
 0x254   : > { %v986_v10 = vadd.f32 %v954_v8, %v790_v2  ;;  %v1701_v2 = vld [vmem:[#allocation11 + $0x180] sm:$0xff] }
 0x255   : > { %v5693_v32 = vcombine.high %v1701_v2, %v1705_v5 }
 0x256   : > { %v1182_v29 = vadd.f32 %v1150_v7, %v986_v10  ;;  %v1067_v11 = vpop.permute.xlu1 %1066  ;;  %v717_v10 = vpop.permute.xlu0 %716 }
 0x257   : > { %v1149_v13 = vmul.f32 %v7622_v53, %v1067_v11  ;;  %930 = vperm.xlu1 %6760, %v7651_v26   ;;  %v1709_v11 = vld [vmem:[#allocation11 + $0x1c0] sm:$0xff] }
 0x258   : > { %v1221_v15 = vadd.f32 %v7635_v3, %v1182_v29 }
 0x259   : > { %v1181_v14 = vadd.f32 %v1149_v13, %v985_v12  ;;  %v1713_v12 = vld [vmem:[#allocation11 + $0x1e0] sm:$0xff]  ;;  %v5692_v13 = vcombine.low %v1701_v2, %v1705_v5 }
 0x25a   : > { %v1253_v20 = vmax.f32 %v1221_v15, 0.0  ;;  %v727_v15 = vpop.permute.xlu0 %726 }
 0x25b   : > { %6761 = vset.pattern.permute.xlu1 %v7155_v4  ;;  %v702_v16 = vpop.permute.xlu1 %701  ;;  %v1220_v0 = vadd.f32 %v7635_v3, %v1181_v14  ;;  %v5652_v4 = vcombine.low %v1661_v17, %v1665_v18  ;;  %v794_v14 = vmul.f32 %v7617_v50, %v717_v10  ;;  %v1154_v17 = vmul.f32 %v7622_v53, %v7762_v58 }
 0x25c   : > { %1122 = vperm.xlu1 %6761, %v606_v54   ;;  %v791_v51 = vmul.f32 %v7617_v50, %v702_v16  ;;  %v5701_v16 = vcombine.high %v1709_v11, %v1713_v12 }
 0x25d   : > { %v1252_v60 = vmax.f32 %v1220_v0, 0.0 }
 0x25f   : > { %5830 = vmatprep.mubr.msk.f32.mxu1 %vm1283_vm0, %v1252_v60 }
 0x260   : > { %v879_v26 = vpop.permute.xlu1 %878  ;;  %5831 = vmatmul.mubr.msk.f32.vlgmr.msra.gmra.mrb[0].mxu1 %vm1283_vm0, %v1253_v20 }
 0x261   : > { %2080 = vmatpush1.bf16.msra.mxu1 %v5644_v19  ;;  %v955_v27 = vmul.f32 %v7607_v46, %v879_v26  ;;  %v5700_v19 = vcombine.low %v1709_v11, %v1713_v12  ;;  %v737_v26 = vpop.permute.xlu0 %736 }
 0x262   : > { %2081 = vmatprep.subr.bf16.mxu1 %v5653_v21 }
 0x263   : > { %v987_v56 = vadd.f32 %v955_v27, %v791_v51  ;;  %v796_v27 = vmul.f32 %v7617_v50, %v727_v15 }
 0x264   : > { %v883_v35 = vpop.permute.xlu1 %882 }
 0x265   : > { %v956_v45 = vmul.f32 %v7607_v46, %v883_v35  ;;  %2082 = vmatpush1.bf16.msra.mxu1 %v5652_v4  ;;  %v7804_v34 = vpop.permute.xlu0 %746 }
 0x266   : > { %2083 = vmatprep.subr.bf16.mxu1 %v5661_v25 }
 0x267   : > { %v988_v42 = vadd.f32 %v956_v45, %v792_v28 }
 0x269   : > { %v1184_v6 = vadd.f32 %v1152_v36, %v988_v42  ;;  %v1075_v52 = vpop.permute.xlu1 %1074  ;;  %2084 = vmatpush1.bf16.msra.mxu1 %v5660_v30  ;;  %v1095_v30 = vpop.permute.xlu0 %1094 }
 0x26a   : > { %v1151_v39 = vmul.f32 %v7622_v53, %v1075_v52  ;;  %2085 = vmatprep.subr.bf16.mxu1 %v5669_v38  ;;  %v1156_v43 = vmul.f32 %v7622_v53, %v1095_v30 }
 0x26b   : > { %v1223_v61 = vadd.f32 %v7635_v3, %v1184_v6 }
 0x26c   : > { %v1183_v33 = vadd.f32 %v1151_v39, %v987_v56 }
 0x26d   : > { %2086 = vmatpush1.bf16.msra.mxu1 %v5668_v55  ;;  %v1255_v8 = vmax.f32 %v1223_v61, 0.0 }
 0x26e   : > { %v1222_v54 = vadd.f32 %v7635_v3, %v1183_v33  ;;  %v712_v48 = vpop.permute.xlu1 %711  ;;  %2087 = vmatprep.subr.bf16.mxu1 %v5677_v57 }
 0x26f   : > { %v793_v21 = vmul.f32 %v7617_v50, %v712_v48  ;;  %v1103_v48 = vpop.permute.xlu0 %1102 }
 0x270   : > { %v1254_v7 = vmax.f32 %v1222_v54, 0.0 }
 0x271   : > { %2088 = vmatpush1.bf16.msra.mxu1 %v5676_v62 }
 0x272   : > { %5833 = vmatprep.mubr.msk.f32.mxu1 %vm1283_vm0, %v1254_v7  ;;  %2089 = vmatprep.subr.bf16.mxu1 %v5685_v63  ;;  %v798_v63 = vmul.f32 %v7617_v50, %v737_v26  ;;  %v1158_v7 = vmul.f32 %v7622_v53, %v1103_v48 }
 0x273   : > { %v887_v29 = vpop.permute.xlu1 %886  ;;  %5834 = vmatmul.mubr.msk.f32.gmra.mrb[2].mxu1 %vm1283_vm0, %v1255_v8 }
 0x274   : > { %v957_v60 = vmul.f32 %v7607_v46, %v887_v29 }
 0x275   : > { %2090 = vmatpush1.bf16.msra.mxu1 %v5684_v9 }
 0x276   : > { %2091 = vmatprep.subr.bf16.mxu1 %v5693_v32  ;;  %v989_v24 = vadd.f32 %v957_v60, %v793_v21 }
 0x277   : > { %v891_v0 = vpop.permute.xlu1 %890 }
 0x278   : > { %v958_v18 = vmul.f32 %v7607_v46, %v891_v0 }
 0x279   : > { %2092 = vmatpush1.bf16.msra.mxu1 %v5692_v13  ;;  %v7824_v13 = vld [vmem:[#allocation9] ss:$0 sm:$0xff] }
 0x27a   : > { %v990_v20 = vadd.f32 %v958_v18, %v794_v14  ;;  %2093 = vmatprep.subr.bf16.mxu1 %v5701_v16 }
 0x27c   : > { %v1186_v22 = vadd.f32 %v1154_v17, %v990_v20  ;;  %v1083_v23 = vpop.permute.xlu1 %1082 }
 0x27d   : > { %v1153_v4 = vmul.f32 %v7622_v53, %v1083_v23  ;;  %2094 = vmatpush1.bf16.msra.mxu1 %v5700_v19 }
 0x27e   : > { %v1225_v58 = vadd.f32 %v7635_v3, %v1186_v22 }
 0x27f   : > { %v1185_v25 = vadd.f32 %v1153_v4, %v989_v24 }
 0x280   : > { %v1257_v36 = vmax.f32 %v1225_v58, 0.0 }
 0x281   : > { %v1224_v28 = vadd.f32 %v7635_v3, %v1185_v25  ;;  %v722_v31 = vpop.permute.xlu1 %721  ;;  %v1111_v25 = vpop.permute.xlu0 %1110 }
 0x282   : > { %v795_v6 = vmul.f32 %v7617_v50, %v722_v31 }
 0x283   : > { %v1256_v35 = vmax.f32 %v1224_v28, 0.0 }
 0x285   : > { %5836 = vmatprep.mubr.msk.f32.mxu1 %vm1283_vm0, %v1256_v35 }
 0x286   : > { %v895_v45 = vpop.permute.xlu1 %894  ;;  %5837 = vmatmul.mubr.msk.f32.gmra.mrb[4].mxu1 %vm1283_vm0, %v1257_v36  ;;  %v800_v36 = vmul.f32 %v7617_v50, %v7804_v34 }
 0x287   : > { %v959_v49 = vmul.f32 %v7607_v46, %v895_v45 }
 0x289   : > { %v991_v56 = vadd.f32 %v959_v49, %v795_v6 }
 0x28a   : > { %v899_v38 = vpop.permute.xlu1 %898 }
 0x28b   : > { %v960_v42 = vmul.f32 %v7607_v46, %v899_v38 }
 0x28d   : > { %v992_v51 = vadd.f32 %v960_v42, %v796_v27  ;;  %v1160_v27 = vmul.f32 %v7622_v53, %v1111_v25  ;;  %v1660_v25 = vld [vmem:[#allocation11 + $0x38] sm:$0xff] }
 0x28f   : > { %v1188_v52 = vadd.f32 %v1156_v43, %v992_v51  ;;  %v1091_v55 = vpop.permute.xlu1 %1090 }
 0x290   : > { %v1155_v39 = vmul.f32 %v7622_v53, %v1091_v55 }
 0x291   : > { %v1227_v37 = vadd.f32 %v7635_v3, %v1188_v52 }
 0x292   : > { %v1187_v57 = vadd.f32 %v1155_v39, %v991_v56 }
 0x293   : > { %v1259_v62 = vmax.f32 %v1227_v37, 0.0 }
 0x294   : > { %v1226_v59 = vadd.f32 %v7635_v3, %v1187_v57  ;;  %v732_v33 = vpop.permute.xlu1 %731 }
 0x295   : > { %v797_v10 = vmul.f32 %v7617_v50, %v732_v33 }
 0x296   : > { %v1258_v61 = vmax.f32 %v1226_v59, 0.0  ;;  %v1119_v59 = vpop.permute.xlu0 %1118 }
 0x298   : > { %5839 = vmatprep.mubr.msk.f32.mxu1 %vm1283_vm0, %v1258_v61 }
 0x299   : > { %v903_v54 = vpop.permute.xlu1 %902  ;;  %5840 = vmatmul.mubr.msk.f32.gmra.mrb[6].mxu1 %vm1283_vm0, %v1259_v62 }
 0x29a   : > { %v961_v8 = vmul.f32 %v7607_v46, %v903_v54  ;;  %v757_v54 = vpop.permute.xlu0 %756 }
 0x29c   : > { %v993_v11 = vadd.f32 %v961_v8, %v797_v10 }
 0x29d   : > { %v907_v2 = vpop.permute.xlu1 %906 }
 0x29e   : > { %v962_v5 = vmul.f32 %v7607_v46, %v907_v2 }
 0x2a0   : > { %v994_v9 = vadd.f32 %v962_v5, %v798_v63  ;;  %v802_v5 = vmul.f32 %v7617_v50, %v757_v54 }
 0x2a2   : > { %v1190_v32 = vadd.f32 %v1158_v7, %v994_v9  ;;  %v1099_v29 = vpop.permute.xlu1 %1098 }
 0x2a3   : > { %v1157_v12 = vmul.f32 %v7622_v53, %v1099_v29 }
 0x2a4   : > { %v1229_v16 = vadd.f32 %v7635_v3, %v1190_v32 }
 0x2a5   : > { %v1189_v14 = vadd.f32 %v1157_v12, %v993_v11  ;;  %v5808_v15 = vpop.f32.mrb[0].mxu0  ;;  %v1162_v11 = vmul.f32 %v7622_v53, %v1119_v59 }
 0x2a6   : > { %v1452_v0 = vadd.f32 %v5808_v15, %v7824_v13  ;;  %v1446_v17 = vpop.f32.mrb[1].mxu0  ;;  %v1261_v23 = vmax.f32 %v1229_v16, 0.0 }
 0x2a7   : > { %v1228_v18 = vadd.f32 %v7635_v3, %v1189_v14  ;;  %v1447_v60 = vadd.f32 %v7824_v13, %v1446_v17  ;;  %v742_v19 = vpop.permute.xlu1 %741 }
 0x2a8   : > { %v1606_v20 = vmax.f32 %v1452_v0, 0.0  ;;  %v799_v49 = vmul.f32 %v7617_v50, %v742_v19 }
 0x2a9   : > { %v1260_v21 = vmax.f32 %v1228_v18, 0.0  ;;  %v1605_v22 = vmax.f32 %v1447_v60, 0.0 }
 0x2ab   : > { %v7830_v26 = vpack.c.bf16 %v1606_v20, %v1605_v22  ;;  %5842 = vmatprep.mubr.msk.f32.mxu1 %vm1283_vm0, %v1260_v21  ;;  %v7866_v20 = vld [vmem:[#allocation11 + $0x10] sm:$0xff]  ;;  %v1656_v22 = vld [vmem:[#allocation11 + $0x18] sm:$0xff] }
 0x2ac   : > { %v911_v24 = vpop.permute.xlu1 %910  ;;  %5843 = vmatmul.mubr.msk.f32.gmra.mrb[8].mxu1 %vm1283_vm0, %v1261_v23  ;;  %v7868_v21 = vld [vmem:[#allocation11 + $0x30] sm:$0xff] }
 0x2ad   : > { %2305 = vmatmul.mubr.bf16.vlgmr.msra.gmra.mrb[16].mxu0 %v7830_v26  ;;  %v963_v38 = vmul.f32 %v7607_v46, %v911_v24 }
 0x2ae   : > { %v5811_v4 = vpop.f32.mrb[2].mxu0  ;;  %2314 = vmatprep.mubr.bf16.mxu0 %v7154_v1 }
 0x2af   : > { %v1462_v58 = vadd.f32 %v5811_v4, %v7824_v13  ;;  %v1456_v28 = vpop.f32.mrb[3].mxu0  ;;  %v995_v55 = vadd.f32 %v963_v38, %v799_v49  ;;  %v5649_v4 = vcombine.high %v7866_v20, %v7868_v21 }
 0x2b0   : > { %v1457_v31 = vadd.f32 %v7824_v13, %v1456_v28  ;;  %v915_v35 = vpop.permute.xlu1 %914  ;;  %v5651_v28 = vcombine.high %v1656_v22, %v1660_v25 }
 0x2b1   : > { %v1608_v45 = vmax.f32 %v1462_v58, 0.0  ;;  %v964_v30 = vmul.f32 %v7607_v46, %v915_v35  ;;  %v5650_v58 = vcombine.low %v1656_v22, %v1660_v25  ;;  %2465 = vmatprep.subr.bf16.mxu1 %v5649_v4 }
 0x2b2   : > { %v1607_v42 = vmax.f32 %v1457_v31, 0.0  ;;  %v1664_v31 = vld [vmem:[#allocation11 + $0x58] sm:$0xff]  ;;  %2658 = vmatprep.subr.bf16.mxu0 %v5651_v28  ;;  %v1683_v28 = vld [vmem:[#allocation11 + $0xf0] sm:$0xff] }
 0x2b3   : > { %v996_v43 = vadd.f32 %v964_v30, %v800_v36  ;;  %v1668_v36 = vld [vmem:[#allocation11 + $0x78] sm:$0xff]  ;;  %v767_v30 = vpop.permute.xlu0 %766  ;;  %2659 = vmatpush1.bf16.msra.mxu0 %v5650_v58  ;;  %v1679_v58 = vld [vmem:[#allocation11 + $0xd0] sm:$0xff] }
 0x2b4   : > { %v7844_v51 = vpack.c.bf16 %v1608_v45, %v1607_v42  ;;  %v5658_v38 = vcombine.low %v1664_v31, %v1668_v36 }
 0x2b5   : > { %v1192_v6 = vadd.f32 %v1160_v27, %v996_v43  ;;  %v1107_v52 = vpop.permute.xlu1 %1106  ;;  %v5659_v27 = vcombine.high %v1664_v31, %v1668_v36  ;;  %v1680_v31 = vld [vmem:[#allocation11 + $0xd8] sm:$0xff]  ;;  %v5673_v36 = vcombine.high %v1679_v58, %v1683_v28 }
 0x2b6   : > { %v1159_v56 = vmul.f32 %v7622_v53, %v1107_v52  ;;  %2315 = vmatmul.mubr.bf16.gmra.mrb[20].mxu0 %v7844_v51 }
 0x2b7   : > { %2324 = vmatprep.mubr.bf16.mxu0 %v7154_v1  ;;  %v1231_v39 = vadd.f32 %v7635_v3, %v1192_v6  ;;  %2660 = vmatprep.subr.bf16.mxu0 %v5659_v27  ;;  %v1127_v43 = vpop.permute.xlu0 %1126 }
 0x2b8   : > { %v1191_v34 = vadd.f32 %v1159_v56, %v995_v55  ;;  %2661 = vmatpush1.bf16.msra.mxu0 %v5658_v38  ;;  %v804_v56 = vmul.f32 %v7617_v50, %v767_v30 }
 0x2b9   : > { %v1263_v61 = vmax.f32 %v1231_v39, 0.0 }
 0x2ba   : > { %v1230_v57 = vadd.f32 %v7635_v3, %v1191_v34  ;;  %v752_v37 = vpop.permute.xlu1 %751 }
 0x2bb   : > { %v801_v14 = vmul.f32 %v7617_v50, %v752_v37 }
 0x2bc   : > { %v1262_v33 = vmax.f32 %v1230_v57, 0.0  ;;  %v1164_v57 = vmul.f32 %v7622_v53, %v1127_v43 }
 0x2be   : > { %5845 = vmatprep.mubr.msk.f32.mxu1 %vm1283_vm0, %v1262_v33 }
 0x2bf   : > { %v919_v62 = vpop.permute.xlu1 %918  ;;  %5846 = vmatmul.mubr.msk.f32.gmra.mrb[10].mxu1 %vm1283_vm0, %v1263_v61 }
 0x2c0   : > { %v965_v32 = vmul.f32 %v7607_v46, %v919_v62 }
 0x2c1   : > { %v5814_v48 = vpop.f32.mrb[4].mxu0 }
 0x2c2   : > { %v1472_v63 = vadd.f32 %v5814_v48, %v7824_v13  ;;  %v1466_v2 = vpop.f32.mrb[5].mxu0  ;;  %v997_v17 = vadd.f32 %v965_v32, %v801_v14  ;;  %v1676_v32 = vld [vmem:[#allocation11 + $0xb8] sm:$0xff]  ;;  %v1667_v14 = vld [vmem:[#allocation11 + $0x70] sm:$0xff] }
 0x2c3   : > { %v1467_v7 = vadd.f32 %v7824_v13, %v1466_v2  ;;  %v923_v8 = vpop.permute.xlu1 %922 }
 0x2c4   : > { %v1610_v9 = vmax.f32 %v1472_v63, 0.0  ;;  %v966_v10 = vmul.f32 %v7607_v46, %v923_v8 }
 0x2c5   : > { %v1609_v29 = vmax.f32 %v1467_v7, 0.0  ;;  %v6763_v7 = vld [vmem:[#allocation6] ss:$0 sm:$0xff] }
 0x2c6   : > { %v998_v12 = vadd.f32 %v966_v10, %v802_v5 }
 0x2c7   : > { %v7860_v15 = vpack.c.bf16 %v1610_v9, %v1609_v29 }
 0x2c8   : > { %v1194_v16 = vadd.f32 %v1162_v11, %v998_v12  ;;  %v1115_v0 = vpop.permute.xlu1 %1114  ;;  %v1663_v12 = vld [vmem:[#allocation11 + $0x50] sm:$0xff] }
 0x2c9   : > { %v1161_v18 = vmul.f32 %v7622_v53, %v1115_v0  ;;  %2325 = vmatmul.mubr.bf16.gmra.mrb[24].mxu0 %v7860_v15  ;;  %v5657_v0 = vcombine.high %v1663_v12, %v1667_v14 }
 0x2ca   : > { %2334 = vmatprep.mubr.bf16.mxu0 %v7154_v1  ;;  %v1233_v19 = vadd.f32 %v7635_v3, %v1194_v16 }
 0x2cb   : > { %v1193_v60 = vadd.f32 %v1161_v18, %v997_v17 }
 0x2cc   : > { %v1265_v45 = vmax.f32 %v1233_v19, 0.0  ;;  %v1675_v19 = vld [vmem:[#allocation11 + $0xb0] sm:$0xff] }
 0x2cd   : > { %v1232_v23 = vadd.f32 %v7635_v3, %v1193_v60  ;;  %v762_v24 = vpop.permute.xlu1 %761  ;;  %v1671_v60 = vld [vmem:[#allocation11 + $0x90] sm:$0xff] }
 0x2ce   : > { %v803_v61 = vmul.f32 %v7617_v50, %v762_v24  ;;  %v5656_v24 = vcombine.low %v1663_v12, %v1667_v14  ;;  %v5664_v25 = vcombine.low %v1671_v60, %v1675_v19 }
 0x2cf   : > { %v1264_v35 = vmax.f32 %v1232_v23, 0.0 }
 0x2d1   : > { %5848 = vmatprep.mubr.msk.f32.mxu1 %vm1283_vm0, %v1264_v35  ;;  %v5672_v35 = vcombine.low %v1679_v58, %v1683_v28 }
 0x2d2   : > { %v927_v3 = vpop.permute.xlu1 %926  ;;  %5849 = vmatmul.mubr.msk.f32.gmra.mrb[12].mxu1 %vm1283_vm0, %v1265_v45  ;;  %v1684_v45 = vld [vmem:[#allocation11 + $0xf8] sm:$0xff] }
 0x2d3   : > { %v967_v37 = vmul.f32 %v7607_v46, %v927_v3  ;;  %v5674_v30 = vcombine.low %v1680_v31, %v1684_v45  ;;  %v5675_v27 = vcombine.high %v1680_v31, %v1684_v45 }
 0x2d4   : > { %v5817_v42 = vpop.f32.mrb[6].mxu0 }
 0x2d5   : > { %v1482_v49 = vadd.f32 %v5817_v42, %v7824_v13  ;;  %v1476_v6 = vpop.f32.mrb[7].mxu0  ;;  %v999_v63 = vadd.f32 %v967_v37, %v803_v61  ;;  %v1692_v37 = vld [vmem:[#allocation11 + $0x138] sm:$0xff] }
 0x2d6   : > { %v1477_v52 = vadd.f32 %v7824_v13, %v1476_v6  ;;  %v931_v55 = vpop.permute.xlu1 %930 }
 0x2d7   : > { %v1612_v34 = vmax.f32 %v1482_v49, 0.0  ;;  %v968_v39 = vmul.f32 %v7607_v46, %v931_v55  ;;  %v1672_v46 = vld [vmem:[#allocation11 + $0x98] sm:$0xff]  ;;  %v1687_v55 = vld [vmem:[#allocation11 + $0x110] sm:$0xff] }
 0x2d8   : > { %v1611_v59 = vmax.f32 %v1477_v52, 0.0  ;;  %v5666_v50 = vcombine.low %v1672_v46, %v1676_v32  ;;  %v5667_v11 = vcombine.high %v1672_v46, %v1676_v32  ;;  %v1696_v46 = vld [vmem:[#allocation11 + $0x158] sm:$0xff] }
 0x2d9   : > { %v1000_v33 = vadd.f32 %v968_v39, %v804_v56  ;;  %v1691_v56 = vld [vmem:[#allocation11 + $0x130] sm:$0xff] }
 0x2da   : > { %v7882_v62 = vpack.c.bf16 %v1612_v34, %v1611_v59  ;;  %2662 = vmatprep.subr.bf16.mxu0 %v5667_v11  ;;  %v1688_v34 = vld [vmem:[#allocation11 + $0x118] sm:$0xff]  ;;  %v5680_v39 = vcombine.low %v1687_v55, %v1691_v56 }
 0x2db   : > { %v1196_v54 = vadd.f32 %v1164_v57, %v1000_v33  ;;  %v1123_v48 = vpop.permute.xlu1 %1122  ;;  %2663 = vmatpush1.bf16.msra.mxu0 %v5666_v50  ;;  %v5681_v57 = vcombine.high %v1687_v55, %v1691_v56  ;;  %v5682_v59 = vcombine.low %v1688_v34, %v1692_v37  ;;  %v5683_v33 = vcombine.high %v1688_v34, %v1692_v37 }
 0x2dc   : > { %v1163_v2 = vmul.f32 %v7622_v53, %v1123_v48  ;;  %2335 = vmatmul.mubr.bf16.gmra.mrb[28].mxu0 %v7882_v62  ;;  %v5648_v53 = vcombine.low %v7866_v20, %v7868_v21  ;;  %v5665_v20 = vcombine.high %v1671_v60, %v1675_v19  ;;  %2664 = vmatprep.subr.bf16.mxu0 %v5675_v27  ;;  %v1703_v60 = vld [vmem:[#allocation11 + $0x190] sm:$0xff] }
 0x2dd   : > { %2344 = vmatprep.mubr.bf16.mxu0 %v7154_v1  ;;  %v1235_v8 = vadd.f32 %v6763_v7, %v1196_v54  ;;  %v1707_v19 = vld [vmem:[#allocation11 + $0x1b0] sm:$0xff] }
 0x2de   : > { %v1195_v5 = vadd.f32 %v1163_v2, %v999_v63  ;;  %v1715_v27 = vld [vmem:[#allocation11 + $0x1f0] sm:$0xff] }
 0x2df   : > { %v1267_v29 = vmax.f32 %v1235_v8, 0.0  ;;  %2665 = vmatpush1.bf16.msra.mxu0 %v5674_v30  ;;  %v1695_v8 = vld [vmem:[#allocation11 + $0x150] sm:$0xff] }
 0x2e0   : > { %v1234_v9 = vadd.f32 %v6763_v7, %v1195_v5  ;;  %2666 = vmatprep.subr.bf16.mxu0 %v5683_v33  ;;  %v1711_v30 = vld [vmem:[#allocation11 + $0x1d0] sm:$0xff] }
 0x2e2   : > { %v1266_v10 = vmax.f32 %v1234_v9, 0.0  ;;  %v1699_v9 = vld [vmem:[#allocation11 + $0x170] sm:$0xff] }
 0x2e3   : > { %2667 = vmatpush1.bf16.msra.mxu0 %v5682_v59  ;;  %v5689_v32 = vcombine.high %v1695_v8, %v1699_v9 }
 0x2e4   : > { %5851 = vmatprep.mubr.msk.f32.mxu1 %vm1283_vm0, %v1266_v10  ;;  %v5688_v10 = vcombine.low %v1695_v8, %v1699_v9 }
 0x2e5   : > { %5852 = vmatmul.mubr.msk.f32.gmra.mrb[14].mxu1 %vm1283_vm0, %v1267_v29  ;;  %v1700_v29 = vld [vmem:[#allocation11 + $0x178] sm:$0xff] }
 0x2e6   : > { %2111 = vmatprep.mubr.bf16.mxu1 %v7154_v1  ;;  %v5690_v50 = vcombine.low %v1696_v46, %v1700_v29  ;;  %v5691_v11 = vcombine.high %v1696_v46, %v1700_v29 }
 0x2e7   : > { %v5820_v16 = vpop.f32.mrb[8].mxu0 }
 0x2e8   : > { %v1492_v17 = vadd.f32 %v5820_v16, %v7824_v13  ;;  %v1486_v18 = vpop.f32.mrb[9].mxu0  ;;  %2668 = vmatprep.subr.bf16.mxu0 %v5691_v11 }
 0x2e9   : > { %v1487_v22 = vadd.f32 %v7824_v13, %v1486_v18  ;;  %2112 = vmatmul.mubr.bf16.vlgmr.msra.gmra.mrb[16].mxu1 %v7830_v26  ;;  %2669 = vmatpush1.bf16.msra.mxu0 %v5690_v50 }
 0x2ea   : > { %v1614_v23 = vmax.f32 %v1492_v17, 0.0  ;;  %2121 = vmatprep.mubr.bf16.mxu1 %v7154_v1  ;;  %2466 = vmatpush1.bf16.msra.mxu1 %v5648_v53 }
 0x2eb   : > { %v1613_v4 = vmax.f32 %v1487_v22, 0.0  ;;  %2467 = vmatprep.subr.bf16.mxu1 %v5657_v0  ;;  %v1704_v22 = vld [vmem:[#allocation11 + $0x198] sm:$0xff] }
 0x2ed   : > { %v7896_v21 = vpack.c.bf16 %v1614_v23, %v1613_v4  ;;  %v5696_v23 = vcombine.low %v1703_v60, %v1707_v19  ;;  %v1708_v4 = vld [vmem:[#allocation11 + $0x1b8] sm:$0xff] }
 0x2ee   : > { %2468 = vmatpush1.bf16.msra.mxu1 %v5656_v24  ;;  %v5697_v24 = vcombine.high %v1703_v60, %v1707_v19 }
 0x2ef   : > { %2345 = vmatmul.mubr.bf16.gmra.mrb[32].mxu0 %v7896_v21  ;;  %2469 = vmatprep.subr.bf16.mxu1 %v5665_v20  ;;  %v5698_v20 = vcombine.low %v1704_v22, %v1708_v4 }
 0x2f0   : > { %2354 = vmatprep.mubr.bf16.mxu0 %v7154_v1 }
 0x2f1   : > { %2122 = vmatmul.mubr.bf16.gmra.mrb[20].mxu1 %v7844_v51 }
 0x2f2   : > { %2131 = vmatprep.mubr.bf16.mxu1 %v7154_v1  ;;  %2470 = vmatpush1.bf16.msra.mxu1 %v5664_v25  ;;  %v5699_v25 = vcombine.high %v1704_v22, %v1708_v4 }
 0x2f3   : > { %2471 = vmatprep.subr.bf16.mxu1 %v5673_v36 }
 0x2f4   : > { %2670 = vmatprep.subr.bf16.mxu0 %v5699_v25 }
 0x2f5   : > { %2671 = vmatpush1.bf16.msra.mxu0 %v5698_v20 }
 0x2f6   : > { %2472 = vmatpush1.bf16.msra.mxu1 %v5672_v35 }
 0x2f7   : > { %2473 = vmatprep.subr.bf16.mxu1 %v5681_v57 }
 0x2f9   : > { %2132 = vmatmul.mubr.bf16.gmra.mrb[24].mxu1 %v7860_v15 }
 0x2fa   : > { %v5823_v38 = vpop.f32.mrb[10].mxu0  ;;  %2141 = vmatprep.mubr.bf16.mxu1 %v7154_v1  ;;  %2474 = vmatpush1.bf16.msra.mxu1 %v5680_v39 }
 0x2fb   : > { %v1502_v3 = vadd.f32 %v5823_v38, %v7824_v13  ;;  %v1496_v42 = vpop.f32.mrb[11].mxu0  ;;  %2475 = vmatprep.subr.bf16.mxu1 %v5689_v32  ;;  %v1712_v38 = vld [vmem:[#allocation11 + $0x1d8] sm:$0xff] }
 0x2fc   : > { %v1497_v43 = vadd.f32 %v7824_v13, %v1496_v42  ;;  %v5705_v42 = vcombine.high %v1711_v30, %v1715_v27 }
 0x2fd   : > { %v1616_v49 = vmax.f32 %v1502_v3, 0.0 }
 0x2fe   : > { %v1615_v6 = vmax.f32 %v1497_v43, 0.0  ;;  %2476 = vmatpush1.bf16.msra.mxu1 %v5688_v10  ;;  %v1716_v43 = vld [vmem:[#allocation11 + $0x1f8] sm:$0xff] }
 0x2ff   : > { %2477 = vmatprep.subr.bf16.mxu1 %v5697_v24  ;;  %v5707_v55 = vcombine.high %v1712_v38, %v1716_v43 }
 0x300   : > { %v7906_v52 = vpack.c.bf16 %v1616_v49, %v1615_v6  ;;  %v5704_v49 = vcombine.low %v1711_v30, %v1715_v27  ;;  %v5706_v6 = vcombine.low %v1712_v38, %v1716_v43  ;;  %v3110_v38 = vadd.s32 16, %v7597_v40 }
 0x301   : > { %2142 = vmatmul.mubr.bf16.gmra.mrb[28].mxu1 %v7882_v62  ;;  %2672 = vmatprep.subr.bf16.mxu0 %v5707_v55  ;;  %v3111_v55 = vadd.s32 24, %v7597_v40 }
 0x302   : > { %2355 = vmatmul.mubr.bf16.gmra.mrb[36].mxu0 %v7906_v52  ;;  %2151 = vmatprep.mubr.bf16.mxu1 %v7154_v1 }
 0x303   : > { %2364 = vmatprep.mubr.bf16.mxu0 %v7154_v1  ;;  %2478 = vmatpush1.bf16.msra.mxu1 %v5696_v23 }
 0x304   : > { %2479 = vmatprep.subr.bf16.mxu1 %v5705_v42  ;;  %2673 = vmatpush1.bf16.msra.mxu0 %v5706_v6 }
 0x307   : > { %2480 = vmatpush1.bf16.msra.mxu1 %v5704_v49 }
 0x309   : > { %2152 = vmatmul.mubr.bf16.gmra.mrb[32].mxu1 %v7896_v21 }
 0x30a   : > { %2161 = vmatprep.mubr.bf16.mxu1 %v7154_v1 }
 0x30d   : > { %v5826_v61 = vpop.f32.mrb[12].mxu0 }
 0x30e   : > { %v1512_v54 = vadd.f32 %v5826_v61, %v7824_v13  ;;  %v1506_v48 = vpop.f32.mrb[13].mxu0 }
 0x30f   : > { %v1507_v63 = vadd.f32 %v7824_v13, %v1506_v48 }
 0x310   : > { %v1618_v2 = vmax.f32 %v1512_v54, 0.0 }
 0x311   : > { %v1617_v5 = vmax.f32 %v1507_v63, 0.0  ;;  %2162 = vmatmul.mubr.bf16.gmra.mrb[36].mxu1 %v7906_v52 }
 0x312   : > { %2171 = vmatprep.mubr.bf16.mxu1 %v7154_v1 }
 0x313   : > { %v7918_v7 = vpack.c.bf16 %v1618_v2, %v1617_v5 }
 0x315   : > { %2365 = vmatmul.mubr.bf16.gmra.mrb[40].mxu0 %v7918_v7 }
 0x316   : > { %2374 = vmatprep.mubr.bf16.mxu0 %v7154_v1 }
 0x319   : > { %2172 = vmatmul.mubr.bf16.gmra.mrb[40].mxu1 %v7918_v7 }
 0x31a   : > { %2181 = vmatprep.mubr.bf16.mxu1 %v7154_v1 }
 0x320   : > { %v5829_v12 = vpop.f32.mrb[14].mxu0 }
 0x321   : > { %v1522_v14 = vadd.f32 %v5829_v12, %v7824_v13  ;;  %v1516_v53 = vpop.f32.mrb[15].mxu0  ;;  %v7964_v12 = vld [vmem:[#allocation12] sm:$0xff] }
 0x322   : > { %v1517_v16 = vadd.f32 %v7824_v13, %v1516_v53  ;;  %v3109_v53 = vadd.s32 8, %v7597_v40 }
 0x323   : > { %v1620_v0 = vmax.f32 %v1522_v14, 0.0  ;;  %v7968_v14 = vsub.s32 3, %v7597_v40 }
 0x324   : > { %v1619_v17 = vmax.f32 %v1517_v16, 0.0  ;;  %v7973_v16 = vrot.slane %v7964_v12, %v7610_v47 }
 0x325   : > { %9389 = vst [vmem:[#allocation34_spill] sm:$0xff] %v7968_v14 }
 0x326   : > { %v7926_v18 = vpack.c.bf16 %v1620_v0, %v1619_v17  ;;  %v7975_v0 = vstv %s5708_s25  ;;  %v7979_v17 = vrot.slane %v7964_v12, %v7968_v14 }
 0x327   : > { %v7984_v24 = vadd.s32 %v7975_v0, %v7597_v40  ;;  %v7987_v4 = vadd.s32 %v7975_v0, %v3109_v53 }
 0x328   : > { %2182 = vmatmul.mubr.bf16.gmra.mrb[44].mxu1 %v7926_v18  ;;  %2375 = vmatmul.mubr.bf16.gmra.mrb[44].mxu0 %v7926_v18 }
 0x329   : > { %2191 = vmatprep.mubr.bf16.mxu1 %v7154_v1  ;;  %2384 = vmatprep.mubr.bf16.mxu0 %v7154_v1  ;;  %vm3174_vm1 = vcmp.lt.s32.totalorder %v7984_v24, 1000  ;;  %vm3175_vm2 = vcmp.lt.s32.totalorder %v7987_v4, 1000 }
 0x333   : > { %v5832_v58 = vpop.f32.mrb[0].mxu1 }
 0x334   : > { %v1532_v28 = vadd.f32 %v5832_v58, %v7824_v13  ;;  %v1526_v31 = vpop.f32.mrb[1].mxu1 }
 0x335   : > { %v1527_v35 = vadd.f32 %v7824_v13, %v1526_v31 }
 0x336   : > { %v1622_v36 = vmax.f32 %v1532_v28, 0.0 }
 0x337   : > { %v1621_v45 = vmax.f32 %v1527_v35, 0.0 }
 0x339   : > { %v7934_v3 = vpack.c.bf16 %v1622_v36, %v1621_v45 }
 0x33b   : > { %2192 = vmatmul.mubr.bf16.gmra.mrb[48].mxu1 %v7934_v3  ;;  %2385 = vmatmul.mubr.bf16.gmra.mrb[48].mxu0 %v7934_v3 }
 0x33c   : > { %2201 = vmatprep.mubr.bf16.mxu1 %v7154_v1  ;;  %2394 = vmatprep.mubr.bf16.mxu0 %v7154_v1 }
 0x346   : > { %v5835_v56 = vpop.f32.mrb[2].mxu1 }
 0x347   : > { %v1542_v34 = vadd.f32 %v5835_v56, %v7824_v13  ;;  %v1536_v39 = vpop.f32.mrb[3].mxu1 }
 0x348   : > { %v1537_v57 = vadd.f32 %v7824_v13, %v1536_v39 }
 0x349   : > { %v1624_v37 = vmax.f32 %v1542_v34, 0.0 }
 0x34a   : > { %v1623_v59 = vmax.f32 %v1537_v57, 0.0  ;;  %v8007_v57 = vadd.s32 %v7975_v0, %v3110_v38 }
 0x34c   : > { %v7942_v33 = vpack.c.bf16 %v1624_v37, %v1623_v59  ;;  %vm3176_vm3 = vcmp.lt.s32.totalorder %v8007_v57, 1000 }
 0x34e   : > { %2202 = vmatmul.mubr.bf16.gmra.mrb[52].mxu1 %v7942_v33  ;;  %2395 = vmatmul.mubr.bf16.gmra.mrb[52].mxu0 %v7942_v33 }
 0x34f   : > { %2211 = vmatprep.mubr.bf16.mxu1 %v7154_v1  ;;  %2404 = vmatprep.mubr.bf16.mxu0 %v7154_v1 }
 0x359   : > { %v5838_v61 = vpop.f32.mrb[4].mxu1 }
 0x35a   : > { %v1552_v54 = vadd.f32 %v5838_v61, %v7824_v13  ;;  %v1546_v48 = vpop.f32.mrb[5].mxu1 }
 0x35b   : > { %v1547_v63 = vadd.f32 %v7824_v13, %v1546_v48 }
 0x35c   : > { %v1626_v2 = vmax.f32 %v1552_v54, 0.0 }
 0x35d   : > { %v1625_v5 = vmax.f32 %v1547_v63, 0.0  ;;  %v8016_v63 = vadd.s32 %v7975_v0, %v3111_v55  ;;  %v3113_v55 = vadd.s32 40, %v7597_v40 }
 0x35f   : > { %v7950_v8 = vpack.c.bf16 %v1626_v2, %v1625_v5  ;;  %vm3177_vm4 = vcmp.lt.s32.totalorder %v8016_v63, 1000 }
 0x361   : > { %2212 = vmatmul.mubr.bf16.gmra.mrb[56].mxu1 %v7950_v8  ;;  %2405 = vmatmul.mubr.bf16.gmra.mrb[56].mxu0 %v7950_v8 }
 0x362   : > { %2221 = vmatprep.mubr.bf16.mxu1 %v7154_v1  ;;  %2414 = vmatprep.mubr.bf16.mxu0 %v7154_v1 }
 0x36c   : > { %v5841_v9 = vpop.f32.mrb[6].mxu1 }
 0x36d   : > { %v1562_v46 = vadd.f32 %v5841_v9, %v7824_v13  ;;  %v1556_v10 = vpop.f32.mrb[7].mxu1 }
 0x36e   : > { %v1557_v32 = vadd.f32 %v7824_v13, %v1556_v10 }
 0x36f   : > { %v1628_v29 = vmax.f32 %v1562_v46, 0.0 }
 0x370   : > { %v1627_v50 = vmax.f32 %v1557_v32, 0.0 }
 0x372   : > { %v7958_v11 = vpack.c.bf16 %v1628_v29, %v1627_v50 }
 0x374   : > { %2222 = vmatmul.mubr.bf16.gmra.mrb[60].mxu1 %v7958_v11  ;;  %2415 = vmatmul.mubr.bf16.gmra.mrb[60].mxu0 %v7958_v11 }
 0x375   : > { %2231 = vmatprep.mubr.bf16.mxu1 %v7154_v1  ;;  %2424 = vmatprep.mubr.bf16.mxu0 %v7154_v1 }
 0x37f   : > { %v5844_v60 = vpop.f32.mrb[8].mxu1 }
 0x380   : > { %v1572_v19 = vadd.f32 %v5844_v60, %v7824_v13  ;;  %v1566_v22 = vpop.f32.mrb[9].mxu1  ;;  %v2306_v23 = vpop.f32.mrb[16].mxu0 }
 0x381   : > { %v1567_v20 = vadd.f32 %v7824_v13, %v1566_v22  ;;  %v2307_v25 = vadd.f32 %v2306_v23, %v7973_v16  ;;  %v2308_v58 = vpop.f32.mrb[17].mxu0 }
 0x382   : > { %v1630_v28 = vmax.f32 %v1572_v19, 0.0  ;;  %v2309_v31 = vadd.f32 %v2308_v58, %v7979_v17  ;;  %v2310_v35 = vpop.f32.mrb[18].mxu0 }
 0x383   : > { %v1629_v36 = vmax.f32 %v1567_v20, 0.0  ;;  %v2853_v45 = vmax.f32 %v2307_v25, 0.0  ;;  %v2311_v30 = vadd.f32 %v2310_v35, %v7973_v16  ;;  %v2312_v27 = vpop.f32.mrb[19].mxu0 }
 0x384   : > { %v2854_v42 = vmax.f32 %v2309_v31, 0.0  ;;  %v2313_v43 = vadd.f32 %v2312_v27, %v7979_v17 }
 0x385   : > { %v7997_v49 = vpack.c.bf16 %v1630_v28, %v1629_v36  ;;  %v2861_v6 = vmax.f32 %v2311_v30, 0.0  ;;  %v3272_v34 = vsel %vm3174_vm1, %v2853_v45, -inf }
 0x386   : > { %v2862_v56 = vmax.f32 %v2313_v43, 0.0  ;;  %v3273_v37 = vsel %vm3174_vm1, %v2854_v42, -inf  ;;  %v3112_v43 = vadd.s32 32, %v7597_v40 }
 0x387   : > { %v3280_v39 = vsel %vm3175_vm2, %v2861_v6, -inf  ;;  %2232 = vmatmul.mubr.bf16.gmra.mrb[64].mxu1 %v7997_v49  ;;  %2425 = vmatmul.mubr.bf16.gmra.mrb[64].mxu0 %v7997_v49 }
 0x388   : > { %v3600_v59 = vmax.f32 %v3272_v34, %v3280_v39  ;;  %v3281_v61 = vsel %vm3175_vm2, %v2862_v56, -inf  ;;  %2241 = vmatprep.mubr.bf16.mxu1 %v7154_v1  ;;  %2434 = vmatprep.mubr.bf16.mxu0 %v7154_v1  ;;  %v8041_v56 = vadd.s32 %v7975_v0, %v3112_v43  ;;  %v8046_v39 = vadd.s32 %v7975_v0, %v3113_v55 }
 0x389   : > { %v3637_v54 = vmax.f32 %v3273_v37, %v3281_v61  ;;  %v2316_v48 = vpop.f32.mrb[20].mxu0 }
 0x38a   : > { %v2317_v2 = vadd.f32 %v2316_v48, %v7973_v16  ;;  %v2318_v5 = vpop.f32.mrb[21].mxu0  ;;  %vm3178_vm5 = vcmp.lt.s32.totalorder %v8041_v56, 1000  ;;  %vm3179_vm6 = vcmp.lt.s32.totalorder %v8046_v39, 1000 }
 0x38b   : > { %v2319_v9 = vadd.f32 %v2318_v5, %v7979_v17  ;;  %v2320_v46 = vpop.f32.mrb[22].mxu0 }
 0x38c   : > { %v2869_v10 = vmax.f32 %v2317_v2, 0.0  ;;  %v2321_v32 = vadd.f32 %v2320_v46, %v7973_v16  ;;  %v2322_v29 = vpop.f32.mrb[23].mxu0 }
 0x38d   : > { %v2870_v50 = vmax.f32 %v2319_v9, 0.0  ;;  %v2323_v53 = vadd.f32 %v2322_v29, %v7979_v17 }
 0x38e   : > { %v3288_v60 = vsel %vm3176_vm3, %v2869_v10, -inf  ;;  %v2877_v19 = vmax.f32 %v2321_v32, 0.0 }
 0x38f   : > { %v3601_v22 = vmax.f32 %v3600_v59, %v3288_v60  ;;  %v3289_v23 = vsel %vm3176_vm3, %v2870_v50, -inf  ;;  %v2878_v20 = vmax.f32 %v2323_v53, 0.0 }
 0x390   : > { %v3638_v25 = vmax.f32 %v3637_v54, %v3289_v23  ;;  %v3296_v58 = vsel %vm3177_vm4, %v2877_v19, -inf }
 0x391   : > { %v3602_v28 = vmax.f32 %v3601_v22, %v3296_v58  ;;  %v3297_v31 = vsel %vm3177_vm4, %v2878_v20, -inf }
 0x392   : > { %v3639_v35 = vmax.f32 %v3638_v25, %v3297_v31  ;;  %v5847_v36 = vpop.f32.mrb[10].mxu1 }
 0x393   : > { %v1582_v45 = vadd.f32 %v5847_v36, %v7824_v13  ;;  %v1576_v30 = vpop.f32.mrb[11].mxu1 }
 0x394   : > { %v1577_v27 = vadd.f32 %v7824_v13, %v1576_v30  ;;  %v3114_v30 = vadd.s32 48, %v7597_v40 }
 0x395   : > { %v1632_v38 = vmax.f32 %v1582_v45, 0.0 }
 0x396   : > { %v1631_v42 = vmax.f32 %v1577_v27, 0.0 }
 0x398   : > { %v8035_v6 = vpack.c.bf16 %v1632_v38, %v1631_v42  ;;  %v8071_v38 = vadd.s32 %v7975_v0, %v3114_v30 }
 0x39a   : > { %2242 = vmatmul.mubr.bf16.gmra.mrb[68].mxu1 %v8035_v6  ;;  %2435 = vmatmul.mubr.bf16.gmra.mrb[68].mxu0 %v8035_v6  ;;  %vm3180_vm7 = vcmp.lt.s32.totalorder %v8071_v38, 1000 }
 0x39b   : > { %2251 = vmatprep.mubr.bf16.mxu1 %v7154_v1  ;;  %2444 = vmatprep.mubr.bf16.mxu0 %v7154_v1 }
 0x39c   : > { %v2326_v34 = vpop.f32.mrb[24].mxu0 }
 0x39d   : > { %v2327_v37 = vadd.f32 %v2326_v34, %v7973_v16  ;;  %v2328_v59 = vpop.f32.mrb[25].mxu0 }
 0x39e   : > { %v2329_v61 = vadd.f32 %v2328_v59, %v7979_v17  ;;  %v2330_v54 = vpop.f32.mrb[26].mxu0 }
 0x39f   : > { %v2885_v48 = vmax.f32 %v2327_v37, 0.0  ;;  %v2331_v2 = vadd.f32 %v2330_v54, %v7973_v16  ;;  %v2332_v5 = vpop.f32.mrb[27].mxu0 }
 0x3a0   : > { %v2886_v9 = vmax.f32 %v2329_v61, 0.0  ;;  %v2333_v46 = vadd.f32 %v2332_v5, %v7979_v17 }
 0x3a1   : > { %v3304_v10 = vsel %vm3178_vm5, %v2885_v48, -inf  ;;  %v2893_v32 = vmax.f32 %v2331_v2, 0.0 }
 0x3a2   : > { %v3603_v29 = vmax.f32 %v3602_v28, %v3304_v10  ;;  %v3305_v50 = vsel %vm3178_vm5, %v2886_v9, -inf  ;;  %v2894_v53 = vmax.f32 %v2333_v46, 0.0 }
 0x3a3   : > { %v3640_v60 = vmax.f32 %v3639_v35, %v3305_v50  ;;  %v3312_v19 = vsel %vm3179_vm6, %v2893_v32, -inf  ;;  %v3115_v35 = vadd.s32 56, %v7597_v40 }
 0x3a4   : > { %v3604_v22 = vmax.f32 %v3603_v29, %v3312_v19  ;;  %v3313_v23 = vsel %vm3179_vm6, %v2894_v53, -inf }
 0x3a5   : > { %v3641_v20 = vmax.f32 %v3640_v60, %v3313_v23  ;;  %v5850_v25 = vpop.f32.mrb[12].mxu1  ;;  %v8076_v43 = vadd.s32 %v7975_v0, %v3115_v35 }
 0x3a6   : > { %v1592_v58 = vadd.f32 %v5850_v25, %v7824_v13  ;;  %v1586_v31 = vpop.f32.mrb[13].mxu1 }
 0x3a7   : > { %v1587_v36 = vadd.f32 %v7824_v13, %v1586_v31  ;;  %vm3181_vm8 = vcmp.lt.s32.totalorder %v8076_v43, 1000 }
 0x3a8   : > { %v1634_v28 = vmax.f32 %v1592_v58, 0.0 }
 0x3a9   : > { %v1633_v45 = vmax.f32 %v1587_v36, 0.0  ;;  %v8109_v36 = vrot.slane %v7964_v12, %v7600_v41 }
 0x3ab   : > { %v8065_v27 = vpack.c.bf16 %v1634_v28, %v1633_v45  ;;  %v3116_v45 = vadd.s32 64, %v7597_v40 }
 0x3ad   : > { %2252 = vmatmul.mubr.bf16.gmra.mrb[72].mxu1 %v8065_v27  ;;  %2445 = vmatmul.mubr.bf16.gmra.mrb[72].mxu0 %v8065_v27 }
 0x3ae   : > { %2261 = vmatprep.mubr.bf16.mxu1 %v7154_v1  ;;  %2454 = vmatprep.mubr.bf16.mxu0 %v7154_v1 }
 0x3af   : > { %v2336_v42 = vpop.f32.mrb[28].mxu0 }
 0x3b0   : > { %v2337_v55 = vadd.f32 %v2336_v42, %v7973_v16  ;;  %v2338_v34 = vpop.f32.mrb[29].mxu0 }
 0x3b1   : > { %v2339_v37 = vadd.f32 %v2338_v34, %v7979_v17  ;;  %v2340_v59 = vpop.f32.mrb[30].mxu0 }
 0x3b2   : > { %v2901_v61 = vmax.f32 %v2337_v55, 0.0  ;;  %v2341_v54 = vadd.f32 %v2340_v59, %v7973_v16  ;;  %v2342_v48 = vpop.f32.mrb[31].mxu0 }
 0x3b3   : > { %v2902_v2 = vmax.f32 %v2339_v37, 0.0  ;;  %v2343_v5 = vadd.f32 %v2342_v48, %v7979_v17  ;;  %v8119_v48 = vadd.s32 %v7975_v0, %v3116_v45 }
 0x3b4   : > { %v3320_v9 = vsel %vm3180_vm7, %v2901_v61, -inf  ;;  %v2909_v46 = vmax.f32 %v2341_v54, 0.0  ;;  %v3117_v61 = vadd.s32 72, %v7597_v40 }
 0x3b5   : > { %v8086_v10 = vmax.f32 %v3604_v22, %v3320_v9  ;;  %v3321_v32 = vsel %vm3180_vm7, %v2902_v2, -inf  ;;  %v2910_v29 = vmax.f32 %v2343_v5, 0.0  ;;  %vm3182_vm9 = vcmp.lt.s32.totalorder %v8119_v48, 1000 }
 0x3b6   : > { %v8090_v50 = vmax.f32 %v3641_v20, %v3321_v32  ;;  %v3328_v53 = vsel %vm3181_vm8, %v2909_v46, -inf  ;;  %v8104_v20 = vrot.slane %v7964_v12, %v7603_v44  ;;  %v8127_v32 = vadd.s32 %v7975_v0, %v3117_v61 }
 0x3b7   : > { %v3606_v60 = vmax.f32 %v8086_v10, %v3328_v53  ;;  %v8097_v19 = vsel %vm3181_vm8, %v2910_v29, -inf }
 0x3b8   : > { %v3643_v23 = vmax.f32 %v8090_v50, %v8097_v19  ;;  %v5853_v22 = vpop.f32.mrb[14].mxu1  ;;  %vm3183_vm10 = vcmp.lt.s32.totalorder %v8127_v32, 1000 }
 0x3b9   : > { %v1602_v25 = vadd.f32 %v5853_v22, %v7824_v13  ;;  %v1596_v58 = vpop.f32.mrb[15].mxu1 }
 0x3ba   : > { %v1597_v31 = vadd.f32 %v7824_v13, %v1596_v58 }
 0x3bb   : > { %v1636_v28 = vmax.f32 %v1602_v25, 0.0 }
 0x3bc   : > { %v1635_v30 = vmax.f32 %v1597_v31, 0.0  ;;  %v2113_v35 = vpop.f32.mrb[16].mxu1 }
 0x3bd   : > { %v2114_v42 = vadd.f32 %v2113_v35, %v8104_v20  ;;  %v2115_v55 = vpop.f32.mrb[17].mxu1 }
 0x3be   : > { %v8113_v34 = vpack.c.bf16 %v1636_v28, %v1635_v30  ;;  %v2116_v37 = vadd.f32 %v2115_v55, %v8109_v36  ;;  %v2117_v59 = vpop.f32.mrb[18].mxu1 }
 0x3bf   : > { %v2851_v13 = vmax.f32 %v2114_v42, 0.0  ;;  %v2118_v54 = vadd.f32 %v2117_v59, %v8104_v20  ;;  %v2119_v12 = vpop.f32.mrb[19].mxu1 }
 0x3c0   : > { %v2852_v2 = vmax.f32 %v2116_v37, 0.0  ;;  %v2120_v5 = vadd.f32 %v2119_v12, %v8109_v36  ;;  %2262 = vmatmul.mubr.bf16.gmra.mrb[76].mxu1 %v8113_v34  ;;  %2455 = vmatmul.mubr.bf16.gmra.mrb[76].mxu0 %v8113_v34 }
 0x3c1   : > { %v2859_v9 = vmax.f32 %v2118_v54, 0.0  ;;  %2497 = vmatprep.mubr.bf16.mxu1 %v7154_v1  ;;  %2690 = vmatprep.mubr.bf16.mxu0 %v7154_v1  ;;  %v3270_v29 = vsel %vm3174_vm1, %v2851_v13, -inf }
 0x3c2   : > { %v2860_v46 = vmax.f32 %v2120_v5, 0.0  ;;  %v2346_v10 = vpop.f32.mrb[32].mxu0  ;;  %v3271_v58 = vsel %vm3174_vm1, %v2852_v2, -inf }
 0x3c3   : > { %v3278_v53 = vsel %vm3175_vm2, %v2859_v9, -inf  ;;  %v2347_v22 = vadd.f32 %v2346_v10, %v7973_v16  ;;  %v2348_v25 = vpop.f32.mrb[33].mxu0 }
 0x3c4   : > { %v3526_v31 = vmax.f32 %v3270_v29, %v3278_v53  ;;  %v3279_v28 = vsel %vm3175_vm2, %v2860_v46, -inf  ;;  %v2349_v45 = vadd.f32 %v2348_v25, %v7979_v17  ;;  %v2123_v30 = vpop.f32.mrb[20].mxu1  ;;  %v2350_v35 = vpop.f32.mrb[34].mxu0 }
 0x3c5   : > { %v3563_v42 = vmax.f32 %v3271_v58, %v3279_v28  ;;  %v2917_v55 = vmax.f32 %v2347_v22, 0.0  ;;  %v2124_v37 = vadd.f32 %v2123_v30, %v8104_v20  ;;  %v2351_v59 = vadd.f32 %v2350_v35, %v7973_v16  ;;  %v2125_v61 = vpop.f32.mrb[21].mxu1  ;;  %v2352_v13 = vpop.f32.mrb[35].mxu0 }
 0x3c6   : > { %v2918_v54 = vmax.f32 %v2349_v45, 0.0  ;;  %v2126_v12 = vadd.f32 %v2125_v61, %v8109_v36  ;;  %v2353_v2 = vadd.f32 %v2352_v13, %v7979_v17  ;;  %v2127_v5 = vpop.f32.mrb[22].mxu1 }
 0x3c7   : > { %v3336_v9 = vsel %vm3182_vm9, %v2917_v55, -inf  ;;  %v2867_v46 = vmax.f32 %v2124_v37, 0.0  ;;  %v2925_v10 = vmax.f32 %v2351_v59, 0.0  ;;  %v2128_v29 = vadd.f32 %v2127_v5, %v8104_v20  ;;  %v2129_v53 = vpop.f32.mrb[23].mxu1 }
 0x3c8   : > { %v8148_v22 = vmax.f32 %v3606_v60, %v3336_v9  ;;  %v3337_v25 = vsel %vm3182_vm9, %v2918_v54, -inf  ;;  %v2868_v58 = vmax.f32 %v2126_v12, 0.0  ;;  %v2926_v28 = vmax.f32 %v2353_v2, 0.0  ;;  %2498 = vmatmul.mubr.bf16.vlgmr.msra.gmra.mrb[80].mxu1 %v7830_v26  ;;  %2691 = vmatmul.mubr.bf16.vlgmr.msra.gmra.mrb[80].mxu0 %v7830_v26 }
 0x3c9   : > { %v8157_v45 = vmax.f32 %v3643_v23, %v3337_v25  ;;  %v3286_v30 = vsel %vm3176_vm3, %v2867_v46, -inf  ;;  %v8163_v60 = vsel %vm3183_vm10, %v2925_v10, -inf  ;;  %v2875_v35 = vmax.f32 %v2128_v29, 0.0  ;;  %2507 = vmatprep.mubr.bf16.mxu1 %v7154_v1  ;;  %2700 = vmatprep.mubr.bf16.mxu0 %v7154_v1 }
 0x3ca   : > { %v3527_v55 = vmax.f32 %v3526_v31, %v3286_v30  ;;  %v3608_v26 = vmax.f32 %v8148_v22, %v8163_v60  ;;  %v3287_v50 = vsel %vm3176_vm3, %v2868_v58, -inf  ;;  %v8173_v19 = vsel %vm3183_vm10, %v2926_v28, -inf }
 0x3cb   : > { %v3564_v23 = vmax.f32 %v3563_v42, %v3287_v50  ;;  %v3645_v37 = vmax.f32 %v8157_v45, %v8173_v19  ;;  %v3294_v59 = vsel %vm3177_vm4, %v2875_v35, -inf  ;;  %v2130_v61 = vadd.f32 %v2129_v53, %v8109_v36 }
 0x3cc   : > { %v3528_v31 = vmax.f32 %v3527_v55, %v3294_v59  ;;  %v2133_v13 = vpop.f32.mrb[24].mxu1  ;;  %v3118_v46 = vadd.s32 80, %v7597_v40  ;;  %v3119_v53 = vadd.s32 88, %v7597_v40 }
 0x3cd   : > { %v2876_v54 = vmax.f32 %v2130_v61, 0.0  ;;  %v2134_v12 = vadd.f32 %v2133_v13, %v8104_v20  ;;  %v2135_v2 = vpop.f32.mrb[25].mxu1 }
 0x3ce   : > { %v2136_v5 = vadd.f32 %v2135_v2, %v8109_v36  ;;  %v2137_v9 = vpop.f32.mrb[26].mxu1  ;;  %v8197_v61 = vadd.s32 %v7975_v0, %v3118_v46 }
 0x3cf   : > { %v3295_v42 = vsel %vm3177_vm4, %v2876_v54, -inf  ;;  %v2883_v10 = vmax.f32 %v2134_v12, 0.0  ;;  %v2138_v29 = vadd.f32 %v2137_v9, %v8104_v20  ;;  %v2139_v25 = vpop.f32.mrb[27].mxu1  ;;  %v8202_v54 = vadd.s32 %v7975_v0, %v3119_v53 }
 0x3d0   : > { %v3565_v58 = vmax.f32 %v3564_v23, %v3295_v42  ;;  %v2884_v28 = vmax.f32 %v2136_v5, 0.0  ;;  %v2140_v30 = vadd.f32 %v2139_v25, %v8109_v36  ;;  %2508 = vmatmul.mubr.bf16.gmra.mrb[84].mxu1 %v7844_v51  ;;  %2701 = vmatmul.mubr.bf16.gmra.mrb[84].mxu0 %v7844_v51  ;;  %vm3184_vm11 = vcmp.lt.s32.totalorder %v8197_v61, 1000 }
 0x3d1   : > { %v3302_v35 = vsel %vm3178_vm5, %v2883_v10, -inf  ;;  %v2891_v55 = vmax.f32 %v2138_v29, 0.0  ;;  %2517 = vmatprep.mubr.bf16.mxu1 %v7154_v1  ;;  %2710 = vmatprep.mubr.bf16.mxu0 %v7154_v1  ;;  %vm3185_vm12 = vcmp.lt.s32.totalorder %v8202_v54, 1000 }
 0x3d2   : > { %v3529_v50 = vmax.f32 %v3528_v31, %v3302_v35  ;;  %v3303_v59 = vsel %vm3178_vm5, %v2884_v28, -inf  ;;  %v2892_v23 = vmax.f32 %v2140_v30, 0.0 }
 0x3d3   : > { %v3566_v13 = vmax.f32 %v3565_v58, %v3303_v59  ;;  %v3310_v51 = vsel %vm3179_vm6, %v2891_v55, -inf }
 0x3d4   : > { %v3530_v12 = vmax.f32 %v3529_v50, %v3310_v51  ;;  %v3311_v2 = vsel %vm3179_vm6, %v2892_v23, -inf  ;;  %v2143_v5 = vpop.f32.mrb[28].mxu1 }
 0x3d5   : > { %v3567_v31 = vmax.f32 %v3566_v13, %v3311_v2  ;;  %v2144_v9 = vadd.f32 %v2143_v5, %v8104_v20  ;;  %v2145_v42 = vpop.f32.mrb[29].mxu1  ;;  %v2356_v10 = vpop.f32.mrb[36].mxu0 }
 0x3d6   : > { %v2146_v46 = vadd.f32 %v2145_v42, %v8109_v36  ;;  %v2357_v29 = vadd.f32 %v2356_v10, %v7973_v16  ;;  %v2147_v25 = vpop.f32.mrb[30].mxu1  ;;  %v2358_v58 = vpop.f32.mrb[37].mxu0 }
 0x3d7   : > { %v2899_v53 = vmax.f32 %v2144_v9, 0.0  ;;  %v2148_v28 = vadd.f32 %v2147_v25, %v8104_v20  ;;  %v2359_v30 = vadd.f32 %v2358_v58, %v7979_v17  ;;  %v2149_v35 = vpop.f32.mrb[31].mxu1  ;;  %v2360_v55 = vpop.f32.mrb[38].mxu0 }
 0x3d8   : > { %v2900_v50 = vmax.f32 %v2146_v46, 0.0  ;;  %v2933_v59 = vmax.f32 %v2357_v29, 0.0  ;;  %v2150_v23 = vadd.f32 %v2149_v35, %v8109_v36  ;;  %v2361_v13 = vadd.f32 %v2360_v55, %v7973_v16  ;;  %v2362_v51 = vpop.f32.mrb[39].mxu0  ;;  %2518 = vmatmul.mubr.bf16.gmra.mrb[88].mxu1 %v7860_v15  ;;  %2711 = vmatmul.mubr.bf16.gmra.mrb[88].mxu0 %v7860_v15 }
 0x3d9   : > { %v3318_v2 = vsel %vm3180_vm7, %v2899_v53, -inf  ;;  %v2907_v5 = vmax.f32 %v2148_v28, 0.0  ;;  %v2934_v9 = vmax.f32 %v2359_v30, 0.0  ;;  %v2363_v42 = vadd.f32 %v2362_v51, %v7979_v17  ;;  %2527 = vmatprep.mubr.bf16.mxu1 %v7154_v1  ;;  %2720 = vmatprep.mubr.bf16.mxu0 %v7154_v1 }
 0x3da   : > { %v3531_v10 = vmax.f32 %v3530_v12, %v3318_v2  ;;  %v3319_v46 = vsel %vm3180_vm7, %v2900_v50, -inf  ;;  %v3352_v29 = vsel %vm3184_vm11, %v2933_v59, -inf  ;;  %v2908_v25 = vmax.f32 %v2150_v23, 0.0 }
 0x3db   : > { %v3568_v15 = vmax.f32 %v3567_v31, %v3319_v46  ;;  %v8229_v58 = vmax.f32 %v3608_v26, %v3352_v29  ;;  %v3326_v53 = vsel %vm3181_vm8, %v2907_v5, -inf  ;;  %v3353_v28 = vsel %vm3184_vm11, %v2934_v9, -inf }
 0x3dc   : > { %v3532_v12 = vmax.f32 %v3531_v10, %v3326_v53  ;;  %v8238_v30 = vmax.f32 %v3645_v37, %v3353_v28  ;;  %v3327_v31 = vsel %vm3181_vm8, %v2908_v25, -inf  ;;  %v2941_v35 = vmax.f32 %v2361_v13, 0.0  ;;  %v2153_v55 = vpop.f32.mrb[32].mxu1 }
 0x3dd   : > { %v3569_v22 = vmax.f32 %v3568_v15, %v3327_v31  ;;  %v2942_v60 = vmax.f32 %v2363_v42, 0.0  ;;  %v2154_v26 = vadd.f32 %v2153_v55, %v8104_v20  ;;  %v2155_v50 = vpop.f32.mrb[33].mxu1  ;;  %v3120_v10 = vadd.s32 96, %v7597_v40 }
 0x3de   : > { %v8245_v59 = vsel %vm3185_vm12, %v2941_v35, -inf  ;;  %v2156_v23 = vadd.f32 %v2155_v50, %v8109_v36  ;;  %v2157_v51 = vpop.f32.mrb[34].mxu1  ;;  %v3121_v25 = vadd.s32 104, %v7597_v40 }
 0x3df   : > { %v3610_v45 = vmax.f32 %v8229_v58, %v8245_v59  ;;  %v8252_v19 = vsel %vm3185_vm12, %v2942_v60, -inf  ;;  %v2915_v37 = vmax.f32 %v2154_v26, 0.0  ;;  %v2158_v13 = vadd.f32 %v2157_v51, %v8104_v20  ;;  %v2159_v2 = vpop.f32.mrb[35].mxu1 }
 0x3e0   : > { %v3647_v5 = vmax.f32 %v8238_v30, %v8252_v19  ;;  %v2916_v9 = vmax.f32 %v2156_v23, 0.0  ;;  %v2160_v42 = vadd.f32 %v2159_v2, %v8109_v36  ;;  %2528 = vmatmul.mubr.bf16.gmra.mrb[92].mxu1 %v7882_v62  ;;  %2721 = vmatmul.mubr.bf16.gmra.mrb[92].mxu0 %v7882_v62  ;;  %v8273_v26 = vadd.s32 %v7975_v0, %v3120_v10 }
 0x3e1   : > { %v3334_v46 = vsel %vm3182_vm9, %v2915_v37, -inf  ;;  %v2923_v29 = vmax.f32 %v2158_v13, 0.0  ;;  %2537 = vmatprep.mubr.bf16.mxu1 %v7154_v1  ;;  %2730 = vmatprep.mubr.bf16.mxu0 %v7154_v1  ;;  %v8277_v51 = vadd.s32 %v7975_v0, %v3121_v25 }
 0x3e2   : > { %v3533_v15 = vmax.f32 %v3532_v12, %v3334_v46  ;;  %v3335_v53 = vsel %vm3182_vm9, %v2916_v9, -inf  ;;  %v2924_v28 = vmax.f32 %v2160_v42, 0.0  ;;  %vm3186_vm13 = vcmp.lt.s32.totalorder %v8273_v26, 1000 }
 0x3e3   : > { %v3570_v31 = vmax.f32 %v3569_v22, %v3335_v53  ;;  %v3342_v62 = vsel %vm3183_vm10, %v2923_v29, -inf  ;;  %vm3187_vm14 = vcmp.lt.s32.totalorder %v8277_v51, 1000 }
 0x3e4   : > { %v3534_v35 = vmax.f32 %v3533_v15, %v3342_v62  ;;  %v3343_v55 = vsel %vm3183_vm10, %v2924_v28, -inf  ;;  %v2163_v60 = vpop.f32.mrb[36].mxu1 }
 0x3e5   : > { %v3571_v50 = vmax.f32 %v3570_v31, %v3343_v55  ;;  %v2164_v23 = vadd.f32 %v2163_v60, %v8104_v20  ;;  %v2165_v12 = vpop.f32.mrb[37].mxu1 }
 0x3e6   : > { %v2166_v22 = vadd.f32 %v2165_v12, %v8109_v36  ;;  %v2167_v37 = vpop.f32.mrb[38].mxu1 }
 0x3e7   : > { %v2931_v13 = vmax.f32 %v2164_v23, 0.0  ;;  %v2168_v2 = vadd.f32 %v2167_v37, %v8104_v20  ;;  %v2169_v9 = vpop.f32.mrb[39].mxu1 }
 0x3e8   : > { %v2932_v42 = vmax.f32 %v2166_v22, 0.0  ;;  %v2170_v46 = vadd.f32 %v2169_v9, %v8109_v36  ;;  %v2366_v29 = vpop.f32.mrb[40].mxu0  ;;  %2538 = vmatmul.mubr.bf16.gmra.mrb[96].mxu1 %v7896_v21  ;;  %2731 = vmatmul.mubr.bf16.gmra.mrb[96].mxu0 %v7896_v21 }
 0x3e9   : > { %v3350_v10 = vsel %vm3184_vm11, %v2931_v13, -inf  ;;  %v2939_v25 = vmax.f32 %v2168_v2, 0.0  ;;  %v2367_v15 = vadd.f32 %v2366_v29, %v7973_v16  ;;  %v2368_v53 = vpop.f32.mrb[41].mxu0  ;;  %2547 = vmatprep.mubr.bf16.mxu1 %v7154_v1  ;;  %2740 = vmatprep.mubr.bf16.mxu0 %v7154_v1 }
 0x3ea   : > { %v3535_v28 = vmax.f32 %v3534_v35, %v3350_v10  ;;  %v3351_v31 = vsel %vm3184_vm11, %v2932_v42, -inf  ;;  %v2940_v62 = vmax.f32 %v2170_v46, 0.0  ;;  %v2369_v21 = vadd.f32 %v2368_v53, %v7979_v17  ;;  %v2370_v55 = vpop.f32.mrb[42].mxu0 }
 0x3eb   : > { %v3572_v60 = vmax.f32 %v3571_v50, %v3351_v31  ;;  %v3358_v23 = vsel %vm3185_vm12, %v2939_v25, -inf  ;;  %v2949_v12 = vmax.f32 %v2367_v15, 0.0  ;;  %v2371_v22 = vadd.f32 %v2370_v55, %v7973_v16  ;;  %v2372_v37 = vpop.f32.mrb[43].mxu0 }
 0x3ec   : > { %v3536_v13 = vmax.f32 %v3535_v28, %v3358_v23  ;;  %v3359_v2 = vsel %vm3185_vm12, %v2940_v62, -inf  ;;  %v2950_v35 = vmax.f32 %v2369_v21, 0.0  ;;  %v2373_v9 = vadd.f32 %v2372_v37, %v7979_v17  ;;  %v2173_v42 = vpop.f32.mrb[40].mxu1 }
 0x3ed   : > { %v3573_v46 = vmax.f32 %v3572_v60, %v3359_v2  ;;  %v3368_v29 = vsel %vm3186_vm13, %v2949_v12, -inf  ;;  %v2957_v50 = vmax.f32 %v2371_v22, 0.0  ;;  %v2174_v10 = vadd.f32 %v2173_v42, %v8104_v20  ;;  %v2175_v25 = vpop.f32.mrb[41].mxu1 }
 0x3ee   : > { %v8306_v15 = vmax.f32 %v3610_v45, %v3368_v29  ;;  %v3369_v53 = vsel %vm3186_vm13, %v2950_v35, -inf  ;;  %v2958_v28 = vmax.f32 %v2373_v9, 0.0  ;;  %v2176_v31 = vadd.f32 %v2175_v25, %v8109_v36  ;;  %v2177_v62 = vpop.f32.mrb[42].mxu1 }
 0x3ef   : > { %v8314_v21 = vmax.f32 %v3647_v5, %v3369_v53  ;;  %v3376_v55 = vsel %vm3187_vm14, %v2957_v50, -inf  ;;  %v2947_v60 = vmax.f32 %v2174_v10, 0.0  ;;  %v2178_v58 = vadd.f32 %v2177_v62, %v8104_v20  ;;  %v2179_v59 = vpop.f32.mrb[43].mxu1 }
 0x3f0   : > { %v3612_v45 = vmax.f32 %v8306_v15, %v3376_v55  ;;  %v3377_v23 = vsel %vm3187_vm14, %v2958_v28, -inf  ;;  %v2948_v12 = vmax.f32 %v2176_v31, 0.0  ;;  %v2180_v22 = vadd.f32 %v2179_v59, %v8109_v36  ;;  %2548 = vmatmul.mubr.bf16.gmra.mrb[100].mxu1 %v7906_v52  ;;  %2741 = vmatmul.mubr.bf16.gmra.mrb[100].mxu0 %v7906_v52 }
 0x3f1   : > { %v3649_v30 = vmax.f32 %v8314_v21, %v3377_v23  ;;  %v3366_v19 = vsel %vm3186_vm13, %v2947_v60, -inf  ;;  %v2955_v5 = vmax.f32 %v2178_v58, 0.0  ;;  %2557 = vmatprep.mubr.bf16.mxu1 %v7154_v1  ;;  %2750 = vmatprep.mubr.bf16.mxu0 %v7154_v1  ;;  %v3122_v10 = vadd.s32 112, %v7597_v40 }
 0x3f2   : > { %v3537_v37 = vmax.f32 %v3536_v13, %v3366_v19  ;;  %v3367_v2 = vsel %vm3186_vm13, %v2948_v12, -inf  ;;  %v2956_v35 = vmax.f32 %v2180_v22, 0.0  ;;  %v3123_v25 = vadd.s32 120, %v7597_v40 }
 0x3f3   : > { %v3574_v9 = vmax.f32 %v3573_v46, %v3367_v2  ;;  %v3374_v42 = vsel %vm3187_vm14, %v2955_v5, -inf  ;;  %v8341_v13 = vadd.s32 %v7975_v0, %v3122_v10 }
 0x3f4   : > { %v3538_v52 = vmax.f32 %v3537_v37, %v3374_v42  ;;  %v3375_v29 = vsel %vm3187_vm14, %v2956_v35, -inf  ;;  %v8344_v46 = vadd.s32 %v7975_v0, %v3123_v25 }
 0x3f5   : > { %v3575_v50 = vmax.f32 %v3574_v9, %v3375_v29  ;;  %vm9323_vm15 = vcmp.lt.s32.totalorder %v8341_v13, 1000 }
 0x3f6   : > { %vm9322_vm0 = vcmp.lt.s32.totalorder %v8344_v46, 1000 }
 0x3f8   : > { %2558 = vmatmul.mubr.bf16.gmra.mrb[104].mxu1 %v7918_v7  ;;  %2751 = vmatmul.mubr.bf16.gmra.mrb[104].mxu0 %v7918_v7 }
 0x3f9   : > { %2567 = vmatprep.mubr.bf16.mxu1 %v7154_v1  ;;  %2760 = vmatprep.mubr.bf16.mxu0 %v7154_v1 }
 0x3fb   : > { %v2183_v15 = vpop.f32.mrb[44].mxu1  ;;  %v2376_v53 = vpop.f32.mrb[44].mxu0 }
 0x3fc   : > { %v2184_v28 = vadd.f32 %v2183_v15, %v8104_v20  ;;  %v2377_v31 = vadd.f32 %v2376_v53, %v7973_v16  ;;  %v2185_v62 = vpop.f32.mrb[45].mxu1  ;;  %v2378_v21 = vpop.f32.mrb[45].mxu0 }
 0x3fd   : > { %v2186_v7 = vadd.f32 %v2185_v62, %v8109_v36  ;;  %v2379_v55 = vadd.f32 %v2378_v21, %v7979_v17  ;;  %v2187_v60 = vpop.f32.mrb[46].mxu1  ;;  %v2380_v58 = vpop.f32.mrb[46].mxu0 }
 0x3fe   : > { %v2963_v59 = vmax.f32 %v2184_v28, 0.0  ;;  %v2965_v23 = vmax.f32 %v2377_v31, 0.0  ;;  %v2188_v12 = vadd.f32 %v2187_v60, %v8104_v20  ;;  %v2381_v22 = vadd.f32 %v2380_v58, %v7973_v16  ;;  %v2189_v19 = vpop.f32.mrb[47].mxu1  ;;  %v2382_v5 = vpop.f32.mrb[47].mxu0 }
 0x3ff   : > { %v2964_v37 = vmax.f32 %v2186_v7, 0.0  ;;  %v2966_v2 = vmax.f32 %v2379_v55, 0.0  ;;  %v2190_v35 = vadd.f32 %v2189_v19, %v8109_v36  ;;  %v2383_v9 = vadd.f32 %v2382_v5, %v7979_v17 }
 0x400   : > { %v3382_v42 = vsel %vm9323_vm15, %v2963_v59, -inf  ;;  %v3384_v29 = vsel %vm9323_vm15, %v2965_v23, -inf  ;;  %v2971_v10 = vmax.f32 %v2188_v12, 0.0  ;;  %v2973_v25 = vmax.f32 %v2381_v22, 0.0  ;;  %2568 = vmatmul.mubr.bf16.gmra.mrb[108].mxu1 %v7926_v18  ;;  %2761 = vmatmul.mubr.bf16.gmra.mrb[108].mxu0 %v7926_v18 }
 0x401   : > { %v3539_v15 = vmax.f32 %v3538_v52, %v3382_v42  ;;  %v3613_v53 = vmax.f32 %v3612_v45, %v3384_v29  ;;  %v3383_v28 = vsel %vm9323_vm15, %v2964_v37, -inf  ;;  %v3385_v31 = vsel %vm9323_vm15, %v2966_v2, -inf  ;;  %2577 = vmatprep.mubr.bf16.mxu1 %v7154_v1  ;;  %2770 = vmatprep.mubr.bf16.mxu0 %v7154_v1 }
 0x402   : > { %v3576_v62 = vmax.f32 %v3575_v50, %v3383_v28  ;;  %v3650_v21 = vmax.f32 %v3649_v30, %v3385_v31  ;;  %v3390_v7 = vsel %vm9322_vm0, %v2971_v10, -inf  ;;  %v3392_v18 = vsel %vm9322_vm0, %v2973_v25, -inf }
 0x403   : > { %v3540_v52 = vmax.f32 %v3539_v15, %v3390_v7  ;;  %v3614_v45 = vmax.f32 %v3613_v53, %v3392_v18  ;;  %v2972_v55 = vmax.f32 %v2190_v35, 0.0  ;;  %v2974_v60 = vmax.f32 %v2383_v9, 0.0 }
 0x404   : > { %v3124_v30 = vadd.s32 128, %v7597_v40  ;;  %v3125_v50 = vadd.s32 136, %v7597_v40 }
 0x405   : > { %v3391_v58 = vsel %vm9322_vm0, %v2972_v55, -inf  ;;  %v3393_v59 = vsel %vm9322_vm0, %v2974_v60, -inf }
 0x406   : > { %v3577_v23 = vmax.f32 %v3576_v62, %v3391_v58  ;;  %v3651_v12 = vmax.f32 %v3650_v21, %v3393_v59  ;;  %v8385_v22 = vadd.s32 %v7975_v0, %v3124_v30  ;;  %v8388_v19 = vadd.s32 %v7975_v0, %v3125_v50 }
 0x408   : > { %2578 = vmatmul.mubr.bf16.gmra.mrb[112].mxu1 %v7934_v3  ;;  %2771 = vmatmul.mubr.bf16.gmra.mrb[112].mxu0 %v7934_v3  ;;  %vm9325_vm0 = vcmp.lt.s32.totalorder %v8385_v22, 1000  ;;  %vm9324_vm15 = vcmp.lt.s32.totalorder %v8388_v19, 1000 }
 0x409   : > { %2587 = vmatprep.mubr.bf16.mxu1 %v7154_v1  ;;  %2780 = vmatprep.mubr.bf16.mxu0 %v7154_v1 }
 0x40e   : > { %v2193_v5 = vpop.f32.mrb[48].mxu1  ;;  %v2386_v37 = vpop.f32.mrb[48].mxu0 }
 0x40f   : > { %v2194_v2 = vadd.f32 %v2193_v5, %v8104_v20  ;;  %v2387_v3 = vadd.f32 %v2386_v37, %v7973_v16  ;;  %v2195_v35 = vpop.f32.mrb[49].mxu1  ;;  %v2388_v9 = vpop.f32.mrb[49].mxu0 }
 0x410   : > { %v2196_v42 = vadd.f32 %v2195_v35, %v8109_v36  ;;  %v2389_v29 = vadd.f32 %v2388_v9, %v7979_v17  ;;  %v2197_v10 = vpop.f32.mrb[50].mxu1  ;;  %v2390_v25 = vpop.f32.mrb[50].mxu0  ;;  %2588 = vmatmul.mubr.bf16.gmra.mrb[116].mxu1 %v7942_v33  ;;  %2781 = vmatmul.mubr.bf16.gmra.mrb[116].mxu0 %v7942_v33 }
 0x411   : > { %v2979_v15 = vmax.f32 %v2194_v2, 0.0  ;;  %v2981_v53 = vmax.f32 %v2387_v3, 0.0  ;;  %v2198_v28 = vadd.f32 %v2197_v10, %v8104_v20  ;;  %v2391_v31 = vadd.f32 %v2390_v25, %v7973_v16  ;;  %v2199_v62 = vpop.f32.mrb[51].mxu1  ;;  %v2392_v21 = vpop.f32.mrb[51].mxu0  ;;  %2597 = vmatprep.mubr.bf16.mxu1 %v7154_v1  ;;  %2790 = vmatprep.mubr.bf16.mxu0 %v7154_v1 }
 0x412   : > { %v2980_v7 = vmax.f32 %v2196_v42, 0.0  ;;  %v2982_v18 = vmax.f32 %v2389_v29, 0.0  ;;  %v2200_v55 = vadd.f32 %v2199_v62, %v8109_v36  ;;  %v2393_v60 = vadd.f32 %v2392_v21, %v7979_v17 }
 0x413   : > { %v3398_v33 = vsel %vm9325_vm0, %v2979_v15, -inf  ;;  %v3400_v58 = vsel %vm9325_vm0, %v2981_v53, -inf  ;;  %v2987_v59 = vmax.f32 %v2198_v28, 0.0  ;;  %v2989_v30 = vmax.f32 %v2391_v31, 0.0 }
 0x414   : > { %v3541_v50 = vmax.f32 %v3540_v52, %v3398_v33  ;;  %v3615_v5 = vmax.f32 %v3614_v45, %v3400_v58  ;;  %v3399_v37 = vsel %vm9325_vm0, %v2980_v7, -inf  ;;  %v3401_v2 = vsel %vm9325_vm0, %v2982_v18, -inf }
 0x415   : > { %v3578_v3 = vmax.f32 %v3577_v23, %v3399_v37  ;;  %v3652_v35 = vmax.f32 %v3651_v12, %v3401_v2  ;;  %v3406_v9 = vsel %vm9324_vm15, %v2987_v59, -inf  ;;  %v3408_v42 = vsel %vm9324_vm15, %v2989_v30, -inf }
 0x416   : > { %v3542_v29 = vmax.f32 %v3541_v50, %v3406_v9  ;;  %v3616_v10 = vmax.f32 %v3615_v5, %v3408_v42  ;;  %v2988_v25 = vmax.f32 %v2200_v55, 0.0  ;;  %v2990_v15 = vmax.f32 %v2393_v60, 0.0 }
 0x417   : > { %v3126_v53 = vadd.s32 144, %v7597_v40  ;;  %v3127_v28 = vadd.s32 152, %v7597_v40 }
 0x418   : > { %v3407_v52 = vsel %vm9324_vm15, %v2988_v25, -inf  ;;  %v3409_v45 = vsel %vm9324_vm15, %v2990_v15, -inf  ;;  %2598 = vmatmul.mubr.bf16.gmra.mrb[120].mxu1 %v7950_v8  ;;  %2791 = vmatmul.mubr.bf16.gmra.mrb[120].mxu0 %v7950_v8 }
 0x419   : > { %v3579_v23 = vmax.f32 %v3578_v3, %v3407_v52  ;;  %v3653_v12 = vmax.f32 %v3652_v35, %v3409_v45  ;;  %2607 = vmatprep.mubr.bf16.mxu1 %v7154_v1  ;;  %2800 = vmatprep.mubr.bf16.mxu0 %v7154_v1  ;;  %v8427_v31 = vadd.s32 %v7975_v0, %v3126_v53 }
 0x41a   : > { %v8430_v62 = vadd.s32 %v7975_v0, %v3127_v28 }
 0x41b   : > { %vm9327_vm15 = vcmp.lt.s32.totalorder %v8427_v31, 1000 }
 0x41c   : > { %vm9326_vm0 = vcmp.lt.s32.totalorder %v8430_v62, 1000 }
 0x420   : > { %2608 = vmatmul.mubr.bf16.gmra.mrb[124].mxu1 %v7958_v11  ;;  %2801 = vmatmul.mubr.bf16.gmra.mrb[124].mxu0 %v7958_v11 }
 0x421   : > { %v2203_v8 = vpop.f32.mrb[52].mxu1  ;;  %v2396_v21 = vpop.f32.mrb[52].mxu0  ;;  %2617 = vmatprep.mubr.bf16.mxu1 %v7154_v1  ;;  %2810 = vmatprep.mubr.bf16.mxu0 %v7154_v1 }
 0x422   : > { %v2204_v7 = vadd.f32 %v2203_v8, %v8104_v20  ;;  %v2397_v18 = vadd.f32 %v2396_v21, %v7973_v16  ;;  %v2205_v55 = vpop.f32.mrb[53].mxu1  ;;  %v2398_v60 = vpop.f32.mrb[53].mxu0 }
 0x423   : > { %v2206_v33 = vadd.f32 %v2205_v55, %v8109_v36  ;;  %v2399_v58 = vadd.f32 %v2398_v60, %v7979_v17  ;;  %v2207_v59 = vpop.f32.mrb[54].mxu1  ;;  %v2400_v11 = vpop.f32.mrb[54].mxu0 }
 0x424   : > { %v2995_v30 = vmax.f32 %v2204_v7, 0.0  ;;  %v2997_v50 = vmax.f32 %v2397_v18, 0.0  ;;  %v2208_v5 = vadd.f32 %v2207_v59, %v8104_v20  ;;  %v2401_v37 = vadd.f32 %v2400_v11, %v7973_v16  ;;  %v2209_v2 = vpop.f32.mrb[55].mxu1  ;;  %v2402_v3 = vpop.f32.mrb[55].mxu0 }
 0x425   : > { %v2996_v35 = vmax.f32 %v2206_v33, 0.0  ;;  %v2998_v9 = vmax.f32 %v2399_v58, 0.0  ;;  %v2210_v42 = vadd.f32 %v2209_v2, %v8109_v36  ;;  %v2403_v25 = vadd.f32 %v2402_v3, %v7979_v17 }
 0x426   : > { %v3414_v15 = vsel %vm9327_vm15, %v2995_v30, -inf  ;;  %v3416_v52 = vsel %vm9327_vm15, %v2997_v50, -inf  ;;  %v3003_v45 = vmax.f32 %v2208_v5, 0.0  ;;  %v3005_v53 = vmax.f32 %v2401_v37, 0.0 }
 0x427   : > { %v3543_v28 = vmax.f32 %v3542_v29, %v3414_v15  ;;  %v3617_v8 = vmax.f32 %v3616_v10, %v3416_v52  ;;  %v3415_v21 = vsel %vm9327_vm15, %v2996_v35, -inf  ;;  %v3417_v7 = vsel %vm9327_vm15, %v2998_v9, -inf }
 0x428   : > { %v3580_v18 = vmax.f32 %v3579_v23, %v3415_v21  ;;  %v3654_v55 = vmax.f32 %v3653_v12, %v3417_v7  ;;  %v3422_v60 = vsel %vm9326_vm0, %v3003_v45, -inf  ;;  %v3424_v33 = vsel %vm9326_vm0, %v3005_v53, -inf  ;;  %2618 = vmatmul.mubr.bf16.gmra.mrb[128].mxu1 %v7997_v49  ;;  %2811 = vmatmul.mubr.bf16.gmra.mrb[128].mxu0 %v7997_v49 }
 0x429   : > { %v3544_v29 = vmax.f32 %v3543_v28, %v3422_v60  ;;  %v3618_v10 = vmax.f32 %v3617_v8, %v3424_v33  ;;  %v3004_v58 = vmax.f32 %v2210_v42, 0.0  ;;  %v3006_v59 = vmax.f32 %v2403_v25, 0.0  ;;  %2627 = vmatprep.mubr.bf16.mxu1 %v7154_v1  ;;  %2820 = vmatprep.mubr.bf16.mxu0 %v7154_v1 }
 0x42a   : > { %v3128_v50 = vadd.s32 160, %v7597_v40  ;;  %v3129_v49 = vadd.s32 168, %v7597_v40 }
 0x42b   : > { %v3423_v23 = vsel %vm9326_vm0, %v3004_v58, -inf  ;;  %v3425_v12 = vsel %vm9326_vm0, %v3006_v59, -inf }
 0x42c   : > { %v3581_v11 = vmax.f32 %v3580_v18, %v3423_v23  ;;  %v3655_v30 = vmax.f32 %v3654_v55, %v3425_v12  ;;  %v8473_v5 = vadd.s32 %v7975_v0, %v3128_v50  ;;  %v8476_v37 = vadd.s32 %v7975_v0, %v3129_v49 }
 0x42e   : > { %vm9329_vm0 = vcmp.lt.s32.totalorder %v8473_v5, 1000  ;;  %vm9328_vm15 = vcmp.lt.s32.totalorder %v8476_v37, 1000 }
 0x430   : > { %2628 = vmatmul.mubr.bf16.gmra.mrb[132].mxu1 %v8035_v6  ;;  %2821 = vmatmul.mubr.bf16.gmra.mrb[132].mxu0 %v8035_v6 }
 0x431   : > { %2637 = vmatprep.mubr.bf16.mxu1 %v7154_v1  ;;  %2830 = vmatprep.mubr.bf16.mxu0 %v7154_v1 }
 0x434   : > { %v2213_v2 = vpop.f32.mrb[56].mxu1  ;;  %v2406_v3 = vpop.f32.mrb[56].mxu0 }
 0x435   : > { %v2214_v35 = vadd.f32 %v2213_v2, %v8104_v20  ;;  %v2407_v9 = vadd.f32 %v2406_v3, %v7973_v16  ;;  %v2215_v42 = vpop.f32.mrb[57].mxu1  ;;  %v2408_v25 = vpop.f32.mrb[57].mxu0 }
 0x436   : > { %v2216_v6 = vadd.f32 %v2215_v42, %v8109_v36  ;;  %v2409_v15 = vadd.f32 %v2408_v25, %v7979_v17  ;;  %v2217_v52 = vpop.f32.mrb[58].mxu1  ;;  %v2410_v45 = vpop.f32.mrb[58].mxu0 }
 0x437   : > { %v3011_v53 = vmax.f32 %v2214_v35, 0.0  ;;  %v3013_v28 = vmax.f32 %v2407_v9, 0.0  ;;  %v2218_v8 = vadd.f32 %v2217_v52, %v8104_v20  ;;  %v2411_v21 = vadd.f32 %v2410_v45, %v7973_v16  ;;  %v2219_v7 = vpop.f32.mrb[59].mxu1  ;;  %v2412_v18 = vpop.f32.mrb[59].mxu0 }
 0x438   : > { %v3012_v55 = vmax.f32 %v2216_v6, 0.0  ;;  %v3014_v60 = vmax.f32 %v2409_v15, 0.0  ;;  %v2220_v33 = vadd.f32 %v2219_v7, %v8109_v36  ;;  %v2413_v58 = vadd.f32 %v2412_v18, %v7979_v17  ;;  %2638 = vmatmul.mubr.bf16.gmra.mrb[136].mxu1 %v8065_v27  ;;  %2831 = vmatmul.mubr.bf16.gmra.mrb[136].mxu0 %v8065_v27 }
 0x439   : > { %v3430_v59 = vsel %vm9329_vm0, %v3011_v53, -inf  ;;  %v3432_v23 = vsel %vm9329_vm0, %v3013_v28, -inf  ;;  %v3019_v12 = vmax.f32 %v2218_v8, 0.0  ;;  %v3021_v50 = vmax.f32 %v2411_v21, 0.0  ;;  %2647 = vmatprep.mubr.bf16.mxu1 %v7154_v1  ;;  %2840 = vmatprep.mubr.bf16.mxu0 %v7154_v1 }
 0x43a   : > { %v3545_v49 = vmax.f32 %v3544_v29, %v3430_v59  ;;  %v3619_v2 = vmax.f32 %v3618_v10, %v3432_v23  ;;  %v3431_v3 = vsel %vm9329_vm0, %v3012_v55, -inf  ;;  %v3433_v27 = vsel %vm9329_vm0, %v3014_v60, -inf }
 0x43b   : > { %v3582_v35 = vmax.f32 %v3581_v11, %v3431_v3  ;;  %v3656_v9 = vmax.f32 %v3655_v30, %v3433_v27  ;;  %v3438_v42 = vsel %vm9328_vm15, %v3019_v12, -inf  ;;  %v3440_v25 = vsel %vm9328_vm15, %v3021_v50, -inf }
 0x43c   : > { %v3546_v6 = vmax.f32 %v3545_v49, %v3438_v42  ;;  %v3620_v15 = vmax.f32 %v3619_v2, %v3440_v25  ;;  %v3020_v52 = vmax.f32 %v2220_v33, 0.0  ;;  %v3022_v1 = vmax.f32 %v2413_v58, 0.0 }
 0x43d   : > { %v3130_v11 = vadd.s32 176, %v7597_v40  ;;  %v3131_v30 = vadd.s32 184, %v7597_v40 }
 0x43e   : > { %v3439_v29 = vsel %vm9328_vm15, %v3020_v52, -inf  ;;  %v3441_v10 = vsel %vm9328_vm15, %v3022_v1, -inf }
 0x43f   : > { %v3583_v45 = vmax.f32 %v3582_v35, %v3439_v29  ;;  %v3657_v53 = vmax.f32 %v3656_v9, %v3441_v10  ;;  %v8513_v28 = vadd.s32 %v7975_v0, %v3130_v11  ;;  %v8516_v8 = vadd.s32 %v7975_v0, %v3131_v30 }
 0x440   : > { %2648 = vmatmul.mubr.bf16.gmra.mrb[140].mxu1 %v8113_v34  ;;  %2841 = vmatmul.mubr.bf16.gmra.mrb[140].mxu0 %v8113_v34 }
 0x441   : > { %vm9331_vm15 = vcmp.lt.s32.totalorder %v8513_v28, 1000  ;;  %vm9330_vm0 = vcmp.lt.s32.totalorder %v8516_v8, 1000 }
 0x447   : > { %v2223_v21 = vpop.f32.mrb[60].mxu1  ;;  %v2416_v7 = vpop.f32.mrb[60].mxu0 }
 0x448   : > { %v2224_v18 = vadd.f32 %v2223_v21, %v8104_v20  ;;  %v2417_v55 = vadd.f32 %v2416_v7, %v7973_v16  ;;  %v2225_v60 = vpop.f32.mrb[61].mxu1  ;;  %v2418_v33 = vpop.f32.mrb[61].mxu0 }
 0x449   : > { %v2226_v34 = vadd.f32 %v2225_v60, %v8109_v36  ;;  %v2419_v58 = vadd.f32 %v2418_v33, %v7979_v17  ;;  %v2227_v59 = vpop.f32.mrb[62].mxu1  ;;  %v2420_v23 = vpop.f32.mrb[62].mxu0 }
 0x44a   : > { %v3027_v12 = vmax.f32 %v2224_v18, 0.0  ;;  %v3029_v50 = vmax.f32 %v2417_v55, 0.0  ;;  %v2228_v49 = vadd.f32 %v2227_v59, %v8104_v20  ;;  %v2421_v2 = vadd.f32 %v2420_v23, %v7973_v16  ;;  %v2229_v3 = vpop.f32.mrb[63].mxu1  ;;  %v2422_v27 = vpop.f32.mrb[63].mxu0 }
 0x44b   : > { %v3028_v35 = vmax.f32 %v2226_v34, 0.0  ;;  %v3030_v9 = vmax.f32 %v2419_v58, 0.0  ;;  %v2230_v42 = vadd.f32 %v2229_v3, %v8109_v36  ;;  %v2423_v25 = vadd.f32 %v2422_v27, %v7979_v17 }
 0x44c   : > { %v3446_v52 = vsel %vm9331_vm15, %v3027_v12, -inf  ;;  %v3448_v1 = vsel %vm9331_vm15, %v3029_v50, -inf  ;;  %v3035_v29 = vmax.f32 %v2228_v49, 0.0  ;;  %v3037_v10 = vmax.f32 %v2421_v2, 0.0 }
 0x44d   : > { %v3547_v11 = vmax.f32 %v3546_v6, %v3446_v52  ;;  %v3621_v30 = vmax.f32 %v3620_v15, %v3448_v1  ;;  %v3447_v21 = vsel %vm9331_vm15, %v3028_v35, -inf  ;;  %v3449_v7 = vsel %vm9331_vm15, %v3030_v9, -inf }
 0x44e   : > { %v3584_v18 = vmax.f32 %v3583_v45, %v3447_v21  ;;  %v3658_v55 = vmax.f32 %v3657_v53, %v3449_v7  ;;  %v3454_v60 = vsel %vm9330_vm0, %v3035_v29, -inf  ;;  %v3456_v33 = vsel %vm9330_vm0, %v3037_v10, -inf }
 0x44f   : > { %v3548_v34 = vmax.f32 %v3547_v11, %v3454_v60  ;;  %v3622_v58 = vmax.f32 %v3621_v30, %v3456_v33  ;;  %v3036_v59 = vmax.f32 %v2230_v42, 0.0  ;;  %v3038_v23 = vmax.f32 %v2423_v25, 0.0 }
 0x450   : > { %v3132_v45 = vadd.s32 192, %v7597_v40  ;;  %v3133_v53 = vadd.s32 200, %v7597_v40 }
 0x451   : > { %v3455_v6 = vsel %vm9330_vm0, %v3036_v59, -inf  ;;  %v3457_v15 = vsel %vm9330_vm0, %v3038_v23, -inf }
 0x452   : > { %v3585_v12 = vmax.f32 %v3584_v18, %v3455_v6  ;;  %v3659_v50 = vmax.f32 %v3658_v55, %v3457_v15  ;;  %v8547_v49 = vadd.s32 %v7975_v0, %v3132_v45  ;;  %v8550_v2 = vadd.s32 %v7975_v0, %v3133_v53 }
 0x454   : > { %vm9333_vm0 = vcmp.lt.s32.totalorder %v8547_v49, 1000  ;;  %vm9332_vm15 = vcmp.lt.s32.totalorder %v8550_v2, 1000 }
 0x45a   : > { %v2233_v3 = vpop.f32.mrb[64].mxu1  ;;  %v2426_v27 = vpop.f32.mrb[64].mxu0 }
 0x45b   : > { %v2234_v35 = vadd.f32 %v2233_v3, %v8104_v20  ;;  %v2427_v9 = vadd.f32 %v2426_v27, %v7973_v16  ;;  %v2235_v42 = vpop.f32.mrb[65].mxu1  ;;  %v2428_v25 = vpop.f32.mrb[65].mxu0 }
 0x45c   : > { %v2236_v52 = vadd.f32 %v2235_v42, %v8109_v36  ;;  %v2429_v1 = vadd.f32 %v2428_v25, %v7979_v17  ;;  %v2237_v29 = vpop.f32.mrb[66].mxu1  ;;  %v2430_v10 = vpop.f32.mrb[66].mxu0 }
 0x45d   : > { %v3043_v11 = vmax.f32 %v2234_v35, 0.0  ;;  %v3045_v30 = vmax.f32 %v2427_v9, 0.0  ;;  %v2238_v21 = vadd.f32 %v2237_v29, %v8104_v20  ;;  %v2431_v7 = vadd.f32 %v2430_v10, %v7973_v16  ;;  %v2239_v18 = vpop.f32.mrb[67].mxu1  ;;  %v2432_v55 = vpop.f32.mrb[67].mxu0 }
 0x45e   : > { %v3044_v60 = vmax.f32 %v2236_v52, 0.0  ;;  %v3046_v33 = vmax.f32 %v2429_v1, 0.0  ;;  %v2240_v59 = vadd.f32 %v2239_v18, %v8109_v36  ;;  %v2433_v23 = vadd.f32 %v2432_v55, %v7979_v17 }
 0x45f   : > { %v3462_v6 = vsel %vm9333_vm0, %v3043_v11, -inf  ;;  %v3464_v15 = vsel %vm9333_vm0, %v3045_v30, -inf  ;;  %v3051_v45 = vmax.f32 %v2238_v21, 0.0  ;;  %v3053_v53 = vmax.f32 %v2431_v7, 0.0 }
 0x460   : > { %v3549_v3 = vmax.f32 %v3548_v34, %v3462_v6  ;;  %v3623_v27 = vmax.f32 %v3622_v58, %v3464_v15  ;;  %v3463_v35 = vsel %vm9333_vm0, %v3044_v60, -inf  ;;  %v3465_v9 = vsel %vm9333_vm0, %v3046_v33, -inf }
 0x461   : > { %v3586_v42 = vmax.f32 %v3585_v12, %v3463_v35  ;;  %v3660_v25 = vmax.f32 %v3659_v50, %v3465_v9  ;;  %v3470_v52 = vsel %vm9332_vm15, %v3051_v45, -inf  ;;  %v3472_v1 = vsel %vm9332_vm15, %v3053_v53, -inf }
 0x462   : > { %v3550_v29 = vmax.f32 %v3549_v3, %v3470_v52  ;;  %v3624_v10 = vmax.f32 %v3623_v27, %v3472_v1  ;;  %v3052_v11 = vmax.f32 %v2240_v59, 0.0  ;;  %v3054_v30 = vmax.f32 %v2433_v23, 0.0 }
 0x463   : > { %v3134_v12 = vadd.s32 208, %v7597_v40  ;;  %v3135_v50 = vadd.s32 216, %v7597_v40 }
 0x464   : > { %v3471_v34 = vsel %vm9332_vm15, %v3052_v11, -inf  ;;  %v3473_v58 = vsel %vm9332_vm15, %v3054_v30, -inf }
 0x465   : > { %v3587_v21 = vmax.f32 %v3586_v42, %v3471_v34  ;;  %v3661_v7 = vmax.f32 %v3660_v25, %v3473_v58  ;;  %v8581_v18 = vadd.s32 %v7975_v0, %v3134_v12  ;;  %v8584_v55 = vadd.s32 %v7975_v0, %v3135_v50 }
 0x467   : > { %9390 = vst [vmem:[#allocation35_spill] sm:$0xff] %v8584_v55  ;;  %vm9335_vm15 = vcmp.lt.s32.totalorder %v8581_v18, 1000  ;;  %vm9334_vm0 = vcmp.lt.s32.totalorder %v8584_v55, 1000 }
 0x46d   : > { %v2243_v60 = vpop.f32.mrb[68].mxu1  ;;  %v2436_v33 = vpop.f32.mrb[68].mxu0 }
 0x46e   : > { %v2244_v59 = vadd.f32 %v2243_v60, %v8104_v20  ;;  %v2437_v23 = vadd.f32 %v2436_v33, %v7973_v16  ;;  %v2245_v6 = vpop.f32.mrb[69].mxu1  ;;  %v2438_v15 = vpop.f32.mrb[69].mxu0 }
 0x46f   : > { %v2246_v45 = vadd.f32 %v2245_v6, %v8109_v36  ;;  %v2439_v53 = vadd.f32 %v2438_v15, %v7979_v17  ;;  %v2247_v3 = vpop.f32.mrb[70].mxu1  ;;  %v2440_v27 = vpop.f32.mrb[70].mxu0 }
 0x470   : > { %v3059_v35 = vmax.f32 %v2244_v59, 0.0  ;;  %v3061_v9 = vmax.f32 %v2437_v23, 0.0  ;;  %v2248_v42 = vadd.f32 %v2247_v3, %v8104_v20  ;;  %v2441_v25 = vadd.f32 %v2440_v27, %v7973_v16  ;;  %v2249_v52 = vpop.f32.mrb[71].mxu1  ;;  %v2442_v1 = vpop.f32.mrb[71].mxu0 }
 0x471   : > { %v3060_v11 = vmax.f32 %v2246_v45, 0.0  ;;  %v3062_v30 = vmax.f32 %v2439_v53, 0.0  ;;  %v2250_v34 = vadd.f32 %v2249_v52, %v8109_v36  ;;  %v2443_v58 = vadd.f32 %v2442_v1, %v7979_v17 }
 0x472   : > { %v3478_v12 = vsel %vm9335_vm15, %v3059_v35, -inf  ;;  %v3480_v50 = vsel %vm9335_vm15, %v3061_v9, -inf  ;;  %v3067_v60 = vmax.f32 %v2248_v42, 0.0  ;;  %v3069_v33 = vmax.f32 %v2441_v25, 0.0 }
 0x473   : > { %v3551_v59 = vmax.f32 %v3550_v29, %v3478_v12  ;;  %v3625_v23 = vmax.f32 %v3624_v10, %v3480_v50  ;;  %v3479_v6 = vsel %vm9335_vm15, %v3060_v11, -inf  ;;  %v3481_v15 = vsel %vm9335_vm15, %v3062_v30, -inf }
 0x474   : > { %v3588_v45 = vmax.f32 %v3587_v21, %v3479_v6  ;;  %v3662_v53 = vmax.f32 %v3661_v7, %v3481_v15  ;;  %v3486_v3 = vsel %vm9334_vm0, %v3067_v60, -inf  ;;  %v3488_v27 = vsel %vm9334_vm0, %v3069_v33, -inf }
 0x475   : > { %v3552_v35 = vmax.f32 %v3551_v59, %v3486_v3  ;;  %v3626_v9 = vmax.f32 %v3625_v23, %v3488_v27  ;;  %v3068_v42 = vmax.f32 %v2250_v34, 0.0  ;;  %v3070_v25 = vmax.f32 %v2443_v58, 0.0 }
 0x476   : > { %v3136_v21 = vadd.s32 224, %v7597_v40  ;;  %v3137_v7 = vadd.s32 232, %v7597_v40 }
 0x477   : > { %v3487_v29 = vsel %vm9334_vm0, %v3068_v42, -inf  ;;  %v3489_v10 = vsel %vm9334_vm0, %v3070_v25, -inf }
 0x478   : > { %v3589_v52 = vmax.f32 %v3588_v45, %v3487_v29  ;;  %v3663_v1 = vmax.f32 %v3662_v53, %v3489_v10  ;;  %v8615_v11 = vadd.s32 %v7975_v0, %v3136_v21  ;;  %v8618_v30 = vadd.s32 %v7975_v0, %v3137_v7 }
 0x47a   : > { %9391 = vst [vmem:[#allocation36_spill] sm:$0xff] %v8615_v11  ;;  %9392 = vst [vmem:[#allocation37_spill] sm:$0xff] %v8618_v30  ;;  %vm9337_vm0 = vcmp.lt.s32.totalorder %v8615_v11, 1000  ;;  %vm9336_vm15 = vcmp.lt.s32.totalorder %v8618_v30, 1000 }
 0x480   : > { %v2253_v34 = vpop.f32.mrb[72].mxu1  ;;  %v2446_v58 = vpop.f32.mrb[72].mxu0 }
 0x481   : > { %v2254_v12 = vadd.f32 %v2253_v34, %v8104_v20  ;;  %v2447_v50 = vadd.f32 %v2446_v58, %v7973_v16  ;;  %v2255_v60 = vpop.f32.mrb[73].mxu1  ;;  %v2448_v33 = vpop.f32.mrb[73].mxu0 }
 0x482   : > { %v2256_v59 = vadd.f32 %v2255_v60, %v8109_v36  ;;  %v2449_v23 = vadd.f32 %v2448_v33, %v7979_v17  ;;  %v2257_v6 = vpop.f32.mrb[74].mxu1  ;;  %v2450_v15 = vpop.f32.mrb[74].mxu0 }
 0x483   : > { %v3075_v45 = vmax.f32 %v2254_v12, 0.0  ;;  %v3077_v53 = vmax.f32 %v2447_v50, 0.0  ;;  %v2258_v3 = vadd.f32 %v2257_v6, %v8104_v20  ;;  %v2451_v27 = vadd.f32 %v2450_v15, %v7973_v16  ;;  %v2259_v42 = vpop.f32.mrb[75].mxu1  ;;  %v2452_v25 = vpop.f32.mrb[75].mxu0 }
 0x484   : > { %v3076_v29 = vmax.f32 %v2256_v59, 0.0  ;;  %v3078_v10 = vmax.f32 %v2449_v23, 0.0  ;;  %v2260_v21 = vadd.f32 %v2259_v42, %v8109_v36  ;;  %v2453_v7 = vadd.f32 %v2452_v25, %v7979_v17 }
 0x485   : > { %v3494_v34 = vsel %vm9337_vm0, %v3075_v45, -inf  ;;  %v3496_v58 = vsel %vm9337_vm0, %v3077_v53, -inf  ;;  %v3083_v12 = vmax.f32 %v2258_v3, 0.0  ;;  %v3085_v50 = vmax.f32 %v2451_v27, 0.0 }
 0x486   : > { %v3553_v60 = vmax.f32 %v3552_v35, %v3494_v34  ;;  %v3627_v33 = vmax.f32 %v3626_v9, %v3496_v58  ;;  %v3495_v6 = vsel %vm9337_vm0, %v3076_v29, -inf  ;;  %v3497_v59 = vsel %vm9337_vm0, %v3078_v10, -inf }
 0x487   : > { %v3590_v23 = vmax.f32 %v3589_v52, %v3495_v6  ;;  %v3664_v15 = vmax.f32 %v3663_v1, %v3497_v59  ;;  %v3502_v42 = vsel %vm9336_vm15, %v3083_v12, -inf  ;;  %v3504_v45 = vsel %vm9336_vm15, %v3085_v50, -inf }
 0x488   : > { %v3554_v25 = vmax.f32 %v3553_v60, %v3502_v42  ;;  %v3628_v53 = vmax.f32 %v3627_v33, %v3504_v45  ;;  %v3084_v3 = vmax.f32 %v2260_v21, 0.0  ;;  %v3086_v27 = vmax.f32 %v2453_v7, 0.0 }
 0x489   : > { %v3138_v52 = vadd.s32 240, %v7597_v40  ;;  %v3139_v1 = vadd.s32 248, %v7597_v40  ;;  %v9338_v21 = vsub.s32 4, %v7597_v40  ;;  %v9339_v7 = vsub.s32 6, %v7597_v40 }
 0x48a   : > { %v3503_v35 = vsel %vm9336_vm15, %v3084_v3, -inf  ;;  %v3505_v9 = vsel %vm9336_vm15, %v3086_v27, -inf  ;;  %v9348_v12 = vsub.s32 5, %v7597_v40  ;;  %v9349_v50 = vsub.s32 7, %v7597_v40 }
 0x48b   : > { %v3591_v29 = vmax.f32 %v3590_v23, %v3503_v35  ;;  %v3665_v10 = vmax.f32 %v3664_v15, %v3505_v9  ;;  %v8649_v34 = vadd.s32 %v7975_v0, %v3138_v52  ;;  %v8652_v58 = vadd.s32 %v7975_v0, %v3139_v1  ;;  %v6764_v15 = vld [vmem:[#allocation12] sm:$0xff] }
 0x48c   : > { %v8664_v42 = vrot.slane %v6764_v15, %v9338_v21  ;;  %v8668_v45 = vrot.slane %v6764_v15, %v9339_v7  ;;  %v8674_v52 = vrot.slane %v6764_v15, %v9348_v12  ;;  %v8678_v1 = vrot.slane %v6764_v15, %v9349_v50 }
 0x48d   : > { %9393 = vst [vmem:[#allocation38_spill] sm:$0xff] %v8649_v34  ;;  %9394 = vst [vmem:[#allocation39_spill] sm:$0xff] %v8652_v58  ;;  %vm3204_vm15 = vcmp.lt.s32.totalorder %v8649_v34, 1000  ;;  %vm3205_vm0 = vcmp.lt.s32.totalorder %v8652_v58, 1000 }
 0x493   : > { %v2263_v60 = vpop.f32.mrb[76].mxu1  ;;  %v2456_v33 = vpop.f32.mrb[76].mxu0 }
 0x494   : > { %v2264_v6 = vadd.f32 %v2263_v60, %v8104_v20  ;;  %v2457_v59 = vadd.f32 %v2456_v33, %v7973_v16  ;;  %v2265_v0 = vpop.f32.mrb[77].mxu1  ;;  %v2458_v23 = vpop.f32.mrb[77].mxu0 }
 0x495   : > { %v2266_v3 = vadd.f32 %v2265_v0, %v8109_v36  ;;  %v2459_v27 = vadd.f32 %v2458_v23, %v7979_v17  ;;  %v2267_v35 = vpop.f32.mrb[78].mxu1  ;;  %v2460_v9 = vpop.f32.mrb[78].mxu0 }
 0x496   : > { %v3091_v60 = vmax.f32 %v2264_v6, 0.0  ;;  %v3093_v33 = vmax.f32 %v2457_v59, 0.0  ;;  %v2268_v21 = vadd.f32 %v2267_v35, %v8104_v20  ;;  %v2461_v7 = vadd.f32 %v2460_v9, %v7973_v16  ;;  %v2269_v47 = vpop.f32.mrb[79].mxu1  ;;  %v2462_v0 = vpop.f32.mrb[79].mxu0 }
 0x497   : > { %v3092_v44 = vmax.f32 %v2266_v3, 0.0  ;;  %v3094_v23 = vmax.f32 %v2459_v27, 0.0  ;;  %v2270_v14 = vadd.f32 %v2269_v47, %v8109_v36  ;;  %v2463_v41 = vadd.f32 %v2462_v0, %v7979_v17 }
 0x498   : > { %v3510_v12 = vsel %vm3204_vm15, %v3091_v60, -inf  ;;  %v3512_v15 = vsel %vm3204_vm15, %v3093_v33, -inf  ;;  %v3099_v6 = vmax.f32 %v2268_v21, 0.0  ;;  %v3101_v59 = vmax.f32 %v2461_v7, 0.0 }
 0x499   : > { %v3555_v50 = vmax.f32 %v3554_v25, %v3510_v12  ;;  %v3629_v20 = vmax.f32 %v3628_v53, %v3512_v15  ;;  %v3511_v16 = vsel %vm3204_vm15, %v3092_v44, -inf  ;;  %v3513_v3 = vsel %vm3204_vm15, %v3094_v23, -inf }
 0x49a   : > { %v3592_v27 = vmax.f32 %v3591_v29, %v3511_v16  ;;  %v3666_v47 = vmax.f32 %v3665_v10, %v3513_v3  ;;  %v3518_v17 = vsel %vm3205_vm0, %v3099_v6, -inf  ;;  %v3520_v36 = vsel %vm3205_vm0, %v3101_v59, -inf }
 0x49b   : > { %v3556_v35 = vmax.f32 %v3555_v50, %v3518_v17  ;;  %v3630_v9 = vmax.f32 %v3629_v20, %v3520_v36  ;;  %v3100_v21 = vmax.f32 %v2270_v14, 0.0  ;;  %v3102_v7 = vmax.f32 %v2463_v41, 0.0  ;;  %v2499_v25 = vpop.f32.mrb[80].mxu1  ;;  %v2692_v53 = vpop.f32.mrb[80].mxu0 }
 0x49c   : > { %v2500_v12 = vadd.f32 %v2499_v25, %v8664_v42  ;;  %v2693_v44 = vadd.f32 %v2692_v53, %v8668_v45  ;;  %v2501_v60 = vpop.f32.mrb[81].mxu1  ;;  %v2694_v33 = vpop.f32.mrb[81].mxu0 }
 0x49d   : > { %v3557_v29 = vrot.slane %v3556_v35, 4  ;;  %v3631_v10 = vrot.slane %v3630_v9, 4  ;;  %v3519_v0 = vsel %vm3205_vm0, %v3100_v21, -inf  ;;  %v3521_v23 = vsel %vm3205_vm0, %v3102_v7, -inf  ;;  %v2503_v50 = vpop.f32.mrb[82].mxu1  ;;  %v2696_v15 = vpop.f32.mrb[82].mxu0 }
 0x49e   : > { %v3593_v14 = vmax.f32 %v3592_v27, %v3519_v0  ;;  %v3667_v41 = vmax.f32 %v3666_v47, %v3521_v23  ;;  %v2855_v6 = vmax.f32 %v2500_v12, 0.0  ;;  %v2857_v59 = vmax.f32 %v2693_v44, 0.0  ;;  %v2505_v20 = vpop.f32.mrb[83].mxu1  ;;  %v2698_v16 = vpop.f32.mrb[83].mxu0 }
 0x49f   : > { %v3558_v3 = vmax.f32 %v3556_v35, %v3557_v29  ;;  %v3632_v17 = vmax.f32 %v3630_v9, %v3631_v10  ;;  %v2502_v36 = vadd.f32 %v2501_v60, %v8674_v52  ;;  %v2695_v25 = vadd.f32 %v2694_v33, %v8678_v1 }
 0x4a0   : > { %v3594_v53 = vrot.slane %v3593_v14, 4  ;;  %v3668_v40 = vrot.slane %v3667_v41, 4  ;;  %v8706_v21 = vsel %vm3174_vm1, %v2855_v6, -inf  ;;  %v8710_v27 = vsel %vm3174_vm1, %v2857_v59, -inf }
 0x4a1   : > { %v3559_v47 = vrot.slane %v3558_v3, 2  ;;  %v3633_v7 = vrot.slane %v3632_v17, 2  ;;  %v2856_v12 = vmax.f32 %v2502_v36, 0.0  ;;  %v2858_v44 = vmax.f32 %v2695_v25, 0.0 }
 0x4a2   : > { %v3595_v35 = vmax.f32 %v3593_v14, %v3594_v53  ;;  %v3669_v9 = vmax.f32 %v3667_v41, %v3668_v40  ;;  %v2504_v60 = vadd.f32 %v2503_v50, %v8664_v42  ;;  %v2697_v33 = vadd.f32 %v2696_v15, %v8668_v45 }
 0x4a3   : > { %v3560_v29 = vmax.f32 %v3558_v3, %v3559_v47  ;;  %v3634_v10 = vmax.f32 %v3632_v17, %v3633_v7  ;;  %v8716_v0 = vsel %vm3174_vm1, %v2856_v12, -inf  ;;  %v8720_v23 = vsel %vm3174_vm1, %v2858_v44, -inf  ;;  %v2509_v6 = vpop.f32.mrb[84].mxu1  ;;  %v2702_v59 = vpop.f32.mrb[84].mxu0 }
 0x4a4   : > { %v3596_v36 = vrot.slane %v3595_v35, 2  ;;  %v3670_v25 = vrot.slane %v3669_v9, 2  ;;  %v2863_v14 = vmax.f32 %v2504_v60, 0.0  ;;  %v2865_v40 = vmax.f32 %v2697_v33, 0.0  ;;  %v2511_v41 = vpop.f32.mrb[85].mxu1  ;;  %v2704_v50 = vpop.f32.mrb[85].mxu0 }
 0x4a5   : > { %v3561_v53 = vrot.slane %v3560_v29, 1  ;;  %v3635_v15 = vrot.slane %v3634_v10, 1  ;;  %v2506_v3 = vadd.f32 %v2505_v20, %v8674_v52  ;;  %v2699_v17 = vadd.f32 %v2698_v16, %v8678_v1  ;;  %v2513_v47 = vpop.f32.mrb[86].mxu1  ;;  %v2706_v7 = vpop.f32.mrb[86].mxu0 }
 0x4a6   : > { %v3597_v12 = vmax.f32 %v3595_v35, %v3596_v36  ;;  %v3671_v24 = vmax.f32 %v3669_v9, %v3670_v25  ;;  %v3282_v44 = vsel %vm3175_vm2, %v2863_v14, -inf  ;;  %v3284_v58 = vsel %vm3175_vm2, %v2865_v40, -inf  ;;  %v2515_v60 = vpop.f32.mrb[87].mxu1  ;;  %v2708_v33 = vpop.f32.mrb[87].mxu0 }
 0x4a7   : > { %v8728_v34 = vmax.f32 %v3560_v29, %v3561_v53  ;;  %v8730_v30 = vmax.f32 %v3634_v10, %v3635_v15  ;;  %v3674_v20 = vmax.f32 %v8706_v21, %v3282_v44  ;;  %v3748_v16 = vmax.f32 %v8710_v27, %v3284_v58 }
 0x4a8   : > { %v3598_v11 = vrot.slane %v3597_v12, 1  ;;  %v3672_v55 = vrot.slane %v3671_v24, 1  ;;  %v2864_v35 = vmax.f32 %v2506_v3, 0.0  ;;  %v2866_v9 = vmax.f32 %v2699_v17, 0.0 }
 0x4a9   : > { %9395 = vst [vmem:[#allocation40_spill] sm:$0xff] %v8730_v30  ;;  %v2510_v36 = vadd.f32 %v2509_v6, %v8664_v42  ;;  %v2703_v25 = vadd.f32 %v2702_v59, %v8668_v45  ;;  %v2512_v14 = vadd.f32 %v2511_v41, %v8674_v52  ;;  %v2705_v40 = vadd.f32 %v2704_v50, %v8678_v1 }
 0x4aa   : > { %v8738_v29 = vmax.f32 %v3597_v12, %v3598_v11  ;;  %v8740_v10 = vmax.f32 %v3671_v24, %v3672_v55  ;;  %v3283_v21 = vsel %vm3175_vm2, %v2864_v35, -inf  ;;  %v3285_v58 = vsel %vm3175_vm2, %v2866_v9, -inf }
 0x4ab   : > { %v3711_v27 = vmax.f32 %v8716_v0, %v3283_v21  ;;  %v3785_v6 = vmax.f32 %v8720_v23, %v3285_v58  ;;  %v2871_v53 = vmax.f32 %v2510_v36, 0.0  ;;  %v2873_v59 = vmax.f32 %v2703_v25, 0.0  ;;  %v2519_v15 = vpop.f32.mrb[88].mxu1  ;;  %v2712_v41 = vpop.f32.mrb[88].mxu0 }
 0x4ac   : > { %v2872_v3 = vmax.f32 %v2512_v14, 0.0  ;;  %v2874_v50 = vmax.f32 %v2705_v40, 0.0  ;;  %v2514_v11 = vadd.f32 %v2513_v47, %v8664_v42  ;;  %v2707_v55 = vadd.f32 %v2706_v7, %v8668_v45  ;;  %v2521_v17 = vpop.f32.mrb[89].mxu1  ;;  %v2714_v12 = vpop.f32.mrb[89].mxu0 }
 0x4ad   : > { %v3290_v4 = vsel %vm3176_vm3, %v2871_v53, -inf  ;;  %v3292_v0 = vsel %vm3176_vm3, %v2873_v59, -inf  ;;  %v2516_v23 = vadd.f32 %v2515_v60, %v8674_v52  ;;  %v2709_v24 = vadd.f32 %v2708_v33, %v8678_v1  ;;  %v2523_v44 = vpop.f32.mrb[90].mxu1  ;;  %v2716_v35 = vpop.f32.mrb[90].mxu0 }
 0x4ae   : > { %v3675_v9 = vmax.f32 %v3674_v20, %v3290_v4  ;;  %v3749_v36 = vmax.f32 %v3748_v16, %v3292_v0  ;;  %v3291_v47 = vsel %vm3176_vm3, %v2872_v3, -inf  ;;  %v3293_v7 = vsel %vm3176_vm3, %v2874_v50, -inf  ;;  %v2525_v25 = vpop.f32.mrb[91].mxu1  ;;  %v2718_v14 = vpop.f32.mrb[91].mxu0 }
 0x4af   : > { %v3712_v40 = vmax.f32 %v3711_v27, %v3291_v47  ;;  %v3786_v21 = vmax.f32 %v3785_v6, %v3293_v7  ;;  %v2879_v58 = vmax.f32 %v2514_v11, 0.0  ;;  %v2881_v53 = vmax.f32 %v2707_v55, 0.0 }
 0x4b0   : > { %v2880_v59 = vmax.f32 %v2516_v23, 0.0  ;;  %v2882_v60 = vmax.f32 %v2709_v24, 0.0  ;;  %v2520_v33 = vadd.f32 %v2519_v15, %v8664_v42  ;;  %v2713_v30 = vadd.f32 %v2712_v41, %v8668_v45 }
 0x4b1   : > { %v3298_v20 = vsel %vm3177_vm4, %v2879_v58, -inf  ;;  %v3300_v16 = vsel %vm3177_vm4, %v2881_v53, -inf  ;;  %v2522_v57 = vadd.f32 %v2521_v17, %v8674_v52  ;;  %v2715_v3 = vadd.f32 %v2714_v12, %v8678_v1 }
 0x4b2   : > { %v3676_v27 = vmax.f32 %v3675_v9, %v3298_v20  ;;  %v3750_v6 = vmax.f32 %v3749_v36, %v3300_v16  ;;  %v3299_v50 = vsel %vm3177_vm4, %v2880_v59, -inf  ;;  %v3301_v15 = vsel %vm3177_vm4, %v2882_v60, -inf }
 0x4b3   : > { %v3713_v11 = vmax.f32 %v3712_v40, %v3299_v50  ;;  %v3787_v41 = vmax.f32 %v3786_v21, %v3301_v15  ;;  %v2887_v55 = vmax.f32 %v2520_v33, 0.0  ;;  %v2889_v4 = vmax.f32 %v2713_v30, 0.0  ;;  %v2529_v0 = vpop.f32.mrb[92].mxu1  ;;  %v2722_v23 = vpop.f32.mrb[92].mxu0 }
 0x4b4   : > { %v2888_v24 = vmax.f32 %v2522_v57, 0.0  ;;  %v2890_v47 = vmax.f32 %v2715_v3, 0.0  ;;  %v2524_v17 = vadd.f32 %v2523_v44, %v8664_v42  ;;  %v2717_v12 = vadd.f32 %v2716_v35, %v8668_v45  ;;  %v2531_v9 = vpop.f32.mrb[93].mxu1  ;;  %v2724_v36 = vpop.f32.mrb[93].mxu0 }
 0x4b5   : > { %v3306_v7 = vsel %vm3178_vm5, %v2887_v55, -inf  ;;  %v3308_v63 = vsel %vm3178_vm5, %v2889_v4, -inf  ;;  %v2526_v40 = vadd.f32 %v2525_v25, %v8674_v52  ;;  %v2719_v30 = vadd.f32 %v2718_v14, %v8678_v1  ;;  %v2533_v21 = vpop.f32.mrb[94].mxu1  ;;  %v2726_v58 = vpop.f32.mrb[94].mxu0 }
 0x4b6   : > { %v3677_v53 = vmax.f32 %v3676_v27, %v3306_v7  ;;  %v3751_v59 = vmax.f32 %v3750_v6, %v3308_v63  ;;  %v3307_v44 = vsel %vm3178_vm5, %v2888_v24, -inf  ;;  %v3309_v35 = vsel %vm3178_vm5, %v2890_v47, -inf  ;;  %v2535_v60 = vpop.f32.mrb[95].mxu1  ;;  %v2728_v33 = vpop.f32.mrb[95].mxu0 }
 0x4b7   : > { %v3714_v20 = vmax.f32 %v3713_v11, %v3307_v44  ;;  %v3788_v16 = vmax.f32 %v3787_v41, %v3309_v35  ;;  %v2895_v57 = vmax.f32 %v2524_v17, 0.0  ;;  %v2897_v3 = vmax.f32 %v2717_v12, 0.0 }
 0x4b8   : > { %v2896_v50 = vmax.f32 %v2526_v40, 0.0  ;;  %v2898_v25 = vmax.f32 %v2719_v30, 0.0  ;;  %v2530_v14 = vadd.f32 %v2529_v0, %v8664_v42  ;;  %v2723_v15 = vadd.f32 %v2722_v23, %v8668_v45 }
 0x4b9   : > { %v3314_v27 = vsel %vm3179_vm6, %v2895_v57, -inf  ;;  %v3316_v6 = vsel %vm3179_vm6, %v2897_v3, -inf  ;;  %v2532_v56 = vadd.f32 %v2531_v9, %v8674_v52  ;;  %v2725_v55 = vadd.f32 %v2724_v36, %v8678_v1 }
 0x4ba   : > { %v3678_v11 = vmax.f32 %v3677_v53, %v3314_v27  ;;  %v3752_v41 = vmax.f32 %v3751_v59, %v3316_v6  ;;  %v3315_v4 = vsel %vm3179_vm6, %v2896_v50, -inf  ;;  %v3317_v0 = vsel %vm3179_vm6, %v2898_v25, -inf }
 0x4bb   : > { %v3715_v24 = vmax.f32 %v3714_v20, %v3315_v4  ;;  %v3789_v23 = vmax.f32 %v3788_v16, %v3317_v0  ;;  %v2903_v47 = vmax.f32 %v2530_v14, 0.0  ;;  %v2905_v17 = vmax.f32 %v2723_v15, 0.0  ;;  %v2539_v12 = vpop.f32.mrb[96].mxu1  ;;  %v2732_v7 = vpop.f32.mrb[96].mxu0 }
 0x4bc   : > { %v2904_v63 = vmax.f32 %v2532_v56, 0.0  ;;  %v2906_v40 = vmax.f32 %v2725_v55, 0.0  ;;  %v2534_v9 = vadd.f32 %v2533_v21, %v8664_v42  ;;  %v2727_v36 = vadd.f32 %v2726_v58, %v8668_v45  ;;  %v2541_v30 = vpop.f32.mrb[97].mxu1  ;;  %v2734_v53 = vpop.f32.mrb[97].mxu0 }
 0x4bd   : > { %v3322_v59 = vsel %vm3180_vm7, %v2903_v47, -inf  ;;  %v3324_v39 = vsel %vm3180_vm7, %v2905_v17, -inf  ;;  %v2536_v44 = vadd.f32 %v2535_v60, %v8674_v52  ;;  %v2729_v35 = vadd.f32 %v2728_v33, %v8678_v1  ;;  %v2543_v20 = vpop.f32.mrb[98].mxu1  ;;  %v2736_v16 = vpop.f32.mrb[98].mxu0 }
 0x4be   : > { %v3679_v57 = vmax.f32 %v3678_v11, %v3322_v59  ;;  %v3753_v3 = vmax.f32 %v3752_v41, %v3324_v39  ;;  %v3323_v21 = vsel %vm3180_vm7, %v2904_v63, -inf  ;;  %v3325_v58 = vsel %vm3180_vm7, %v2906_v40, -inf  ;;  %v2545_v50 = vpop.f32.mrb[99].mxu1  ;;  %v2738_v25 = vpop.f32.mrb[99].mxu0 }
 0x4bf   : > { %v3716_v14 = vmax.f32 %v3715_v24, %v3323_v21  ;;  %v3790_v15 = vmax.f32 %v3789_v23, %v3325_v58  ;;  %v2911_v27 = vmax.f32 %v2534_v9, 0.0  ;;  %v2913_v6 = vmax.f32 %v2727_v36, 0.0 }
 0x4c0   : > { %v2912_v56 = vmax.f32 %v2536_v44, 0.0  ;;  %v2914_v60 = vmax.f32 %v2729_v35, 0.0  ;;  %v2540_v33 = vadd.f32 %v2539_v12, %v8664_v42  ;;  %v2733_v55 = vadd.f32 %v2732_v7, %v8668_v45 }
 0x4c1   : > { %v3330_v11 = vsel %vm3181_vm8, %v2911_v27, -inf  ;;  %v3332_v41 = vsel %vm3181_vm8, %v2913_v6, -inf  ;;  %v2542_v38 = vadd.f32 %v2541_v30, %v8674_v52  ;;  %v2735_v4 = vadd.f32 %v2734_v53, %v8678_v1 }
 0x4c2   : > { %v3680_v0 = vmax.f32 %v3679_v57, %v3330_v11  ;;  %v3754_v24 = vmax.f32 %v3753_v3, %v3332_v41  ;;  %v3331_v23 = vsel %vm3181_vm8, %v2912_v56, -inf  ;;  %v3333_v47 = vsel %vm3181_vm8, %v2914_v60, -inf }
 0x4c3   : > { %v3717_v17 = vmax.f32 %v3716_v14, %v3331_v23  ;;  %v3791_v12 = vmax.f32 %v3790_v15, %v3333_v47  ;;  %v2919_v7 = vmax.f32 %v2540_v33, 0.0  ;;  %v2921_v63 = vmax.f32 %v2733_v55, 0.0  ;;  %v2549_v40 = vpop.f32.mrb[100].mxu1  ;;  %v2742_v9 = vpop.f32.mrb[100].mxu0 }
 0x4c4   : > { %v2920_v36 = vmax.f32 %v2542_v38, 0.0  ;;  %v2922_v59 = vmax.f32 %v2735_v4, 0.0  ;;  %v2544_v30 = vadd.f32 %v2543_v20, %v8664_v42  ;;  %v2737_v53 = vadd.f32 %v2736_v16, %v8668_v45  ;;  %v2551_v39 = vpop.f32.mrb[101].mxu1  ;;  %v2744_v44 = vpop.f32.mrb[101].mxu0 }
 0x4c5   : > { %v3338_v35 = vsel %vm3182_vm9, %v2919_v7, -inf  ;;  %v3340_v43 = vsel %vm3182_vm9, %v2921_v63, -inf  ;;  %v2546_v57 = vadd.f32 %v2545_v50, %v8674_v52  ;;  %v2739_v3 = vadd.f32 %v2738_v25, %v8678_v1  ;;  %v2553_v21 = vpop.f32.mrb[102].mxu1  ;;  %v2746_v58 = vpop.f32.mrb[102].mxu0 }
 0x4c6   : > { %v3681_v14 = vmax.f32 %v3680_v0, %v3338_v35  ;;  %v3755_v15 = vmax.f32 %v3754_v24, %v3340_v43  ;;  %v3339_v20 = vsel %vm3182_vm9, %v2920_v36, -inf  ;;  %v3341_v16 = vsel %vm3182_vm9, %v2922_v59, -inf  ;;  %v2555_v27 = vpop.f32.mrb[103].mxu1  ;;  %v2748_v6 = vpop.f32.mrb[103].mxu0 }
 0x4c7   : > { %v3718_v56 = vmax.f32 %v3717_v17, %v3339_v20  ;;  %v3792_v60 = vmax.f32 %v3791_v12, %v3341_v16  ;;  %v2927_v33 = vmax.f32 %v2544_v30, 0.0  ;;  %v2929_v55 = vmax.f32 %v2737_v53, 0.0 }
 0x4c8   : > { %v2928_v11 = vmax.f32 %v2546_v57, 0.0  ;;  %v2930_v50 = vmax.f32 %v2739_v3, 0.0  ;;  %v2550_v25 = vadd.f32 %v2549_v40, %v8664_v42  ;;  %v2743_v41 = vadd.f32 %v2742_v9, %v8668_v45 }
 0x4c9   : > { %v3346_v38 = vsel %vm3183_vm10, %v2927_v33, -inf  ;;  %v3348_v4 = vsel %vm3183_vm10, %v2929_v55, -inf  ;;  %v2552_v48 = vadd.f32 %v2551_v39, %v8674_v52  ;;  %v2745_v0 = vadd.f32 %v2744_v44, %v8678_v1 }
 0x4ca   : > { %v3682_v24 = vmax.f32 %v3681_v14, %v3346_v38  ;;  %v3756_v23 = vmax.f32 %v3755_v15, %v3348_v4  ;;  %v3347_v47 = vsel %vm3183_vm10, %v2928_v11, -inf  ;;  %v3349_v17 = vsel %vm3183_vm10, %v2930_v50, -inf }
 0x4cb   : > { %v3719_v12 = vmax.f32 %v3718_v56, %v3347_v47  ;;  %v3793_v7 = vmax.f32 %v3792_v60, %v3349_v17  ;;  %v2935_v63 = vmax.f32 %v2550_v25, 0.0  ;;  %v2937_v40 = vmax.f32 %v2743_v41, 0.0  ;;  %v2559_v9 = vpop.f32.mrb[104].mxu1  ;;  %v2752_v36 = vpop.f32.mrb[104].mxu0 }
 0x4cc   : > { %v2936_v59 = vmax.f32 %v2552_v48, 0.0  ;;  %v2938_v30 = vmax.f32 %v2745_v0, 0.0  ;;  %v2554_v53 = vadd.f32 %v2553_v21, %v8664_v42  ;;  %v2747_v39 = vadd.f32 %v2746_v58, %v8668_v45  ;;  %v2561_v44 = vpop.f32.mrb[105].mxu1  ;;  %v2754_v35 = vpop.f32.mrb[105].mxu0 }
 0x4cd   : > { %v3354_v43 = vsel %vm3184_vm11, %v2935_v63, -inf  ;;  %v3356_v32 = vsel %vm3184_vm11, %v2937_v40, -inf  ;;  %v2556_v57 = vadd.f32 %v2555_v27, %v8674_v52  ;;  %v2749_v3 = vadd.f32 %v2748_v6, %v8678_v1  ;;  %v2563_v14 = vpop.f32.mrb[106].mxu1  ;;  %v2756_v15 = vpop.f32.mrb[106].mxu0 }
 0x4ce   : > { %v3683_v20 = vmax.f32 %v3682_v24, %v3354_v43  ;;  %v3757_v16 = vmax.f32 %v3756_v23, %v3356_v32  ;;  %v3355_v21 = vsel %vm3184_vm11, %v2936_v59, -inf  ;;  %v3357_v58 = vsel %vm3184_vm11, %v2938_v30, -inf  ;;  %v2565_v56 = vpop.f32.mrb[107].mxu1  ;;  %v2758_v60 = vpop.f32.mrb[107].mxu0 }
 0x4cf   : > { %v3720_v33 = vmax.f32 %v3719_v12, %v3355_v21  ;;  %v3794_v55 = vmax.f32 %v3793_v7, %v3357_v58  ;;  %v2943_v11 = vmax.f32 %v2554_v53, 0.0  ;;  %v2945_v50 = vmax.f32 %v2747_v39, 0.0 }
 0x4d0   : > { %v2944_v25 = vmax.f32 %v2556_v57, 0.0  ;;  %v2946_v27 = vmax.f32 %v2749_v3, 0.0  ;;  %v2560_v6 = vadd.f32 %v2559_v9, %v8664_v42  ;;  %v2753_v41 = vadd.f32 %v2752_v36, %v8668_v45 }
 0x4d1   : > { %v3362_v38 = vsel %vm3185_vm12, %v2943_v11, -inf  ;;  %v3364_v4 = vsel %vm3185_vm12, %v2945_v50, -inf  ;;  %v2562_v61 = vadd.f32 %v2561_v44, %v8674_v52  ;;  %v2755_v48 = vadd.f32 %v2754_v35, %v8678_v1 }
 0x4d2   : > { %v3684_v0 = vmax.f32 %v3683_v20, %v3362_v38  ;;  %v3758_v24 = vmax.f32 %v3757_v16, %v3364_v4  ;;  %v3363_v23 = vsel %vm3185_vm12, %v2944_v25, -inf  ;;  %v3365_v47 = vsel %vm3185_vm12, %v2946_v27, -inf }
 0x4d3   : > { %v3721_v17 = vmax.f32 %v3720_v33, %v3363_v23  ;;  %v3795_v12 = vmax.f32 %v3794_v55, %v3365_v47  ;;  %v2951_v7 = vmax.f32 %v2560_v6, 0.0  ;;  %v2953_v63 = vmax.f32 %v2753_v41, 0.0  ;;  %v2569_v40 = vpop.f32.mrb[108].mxu1  ;;  %v2762_v9 = vpop.f32.mrb[108].mxu0 }
 0x4d4   : > { %v2952_v36 = vmax.f32 %v2562_v61, 0.0  ;;  %v2954_v59 = vmax.f32 %v2755_v48, 0.0  ;;  %v2564_v30 = vadd.f32 %v2563_v14, %v8664_v42  ;;  %v2757_v53 = vadd.f32 %v2756_v15, %v8668_v45  ;;  %v2571_v39 = vpop.f32.mrb[109].mxu1  ;;  %v2764_v44 = vpop.f32.mrb[109].mxu0 }
 0x4d5   : > { %v3370_v35 = vsel %vm3186_vm13, %v2951_v7, -inf  ;;  %v3372_v54 = vsel %vm3186_vm13, %v2953_v63, -inf  ;;  %v2566_v43 = vadd.f32 %v2565_v56, %v8674_v52  ;;  %v2759_v32 = vadd.f32 %v2758_v60, %v8678_v1  ;;  %v2573_v57 = vpop.f32.mrb[110].mxu1  ;;  %v2766_v3 = vpop.f32.mrb[110].mxu0 }
 0x4d6   : > { %v3685_v20 = vmax.f32 %v3684_v0, %v3370_v35  ;;  %v3759_v16 = vmax.f32 %v3758_v24, %v3372_v54  ;;  %v3371_v14 = vsel %vm3186_vm13, %v2952_v36, -inf  ;;  %v3373_v15 = vsel %vm3186_vm13, %v2954_v59, -inf  ;;  %v2575_v21 = vpop.f32.mrb[111].mxu1  ;;  %v2768_v58 = vpop.f32.mrb[111].mxu0 }
 0x4d7   : > { %v3722_v33 = vmax.f32 %v3721_v17, %v3371_v14  ;;  %v3796_v55 = vmax.f32 %v3795_v12, %v3373_v15  ;;  %v2959_v11 = vmax.f32 %v2564_v30, 0.0  ;;  %v2961_v50 = vmax.f32 %v2757_v53, 0.0 }
 0x4d8   : > { %v2960_v25 = vmax.f32 %v2566_v43, 0.0  ;;  %v2962_v56 = vmax.f32 %v2759_v32, 0.0  ;;  %v2570_v60 = vadd.f32 %v2569_v40, %v8664_v42  ;;  %v2763_v27 = vadd.f32 %v2762_v9, %v8668_v45 }
 0x4d9   : > { %v3378_v6 = vsel %vm3187_vm14, %v2959_v11, -inf  ;;  %v3380_v41 = vsel %vm3187_vm14, %v2961_v50, -inf  ;;  %v2572_v26 = vadd.f32 %v2571_v39, %v8674_v52  ;;  %v2765_v38 = vadd.f32 %v2764_v44, %v8678_v1 }
 0x4da   : > { %v3686_v4 = vmax.f32 %v3685_v20, %v3378_v6  ;;  %v3760_v61 = vmax.f32 %v3759_v16, %v3380_v41  ;;  %v3379_v48 = vsel %vm3187_vm14, %v2960_v25, -inf  ;;  %v3381_v0 = vsel %vm3187_vm14, %v2962_v56, -inf }
 0x4db   : > { %v3723_v24 = vmax.f32 %v3722_v33, %v3379_v48  ;;  %v3797_v23 = vmax.f32 %v3796_v55, %v3381_v0  ;;  %v2967_v47 = vmax.f32 %v2570_v60, 0.0  ;;  %v2969_v17 = vmax.f32 %v2763_v27, 0.0  ;;  %v2579_v12 = vpop.f32.mrb[112].mxu1  ;;  %v2772_v7 = vpop.f32.mrb[112].mxu0 }
 0x4dc   : > { %v2968_v63 = vmax.f32 %v2572_v26, 0.0  ;;  %v2970_v40 = vmax.f32 %v2765_v38, 0.0  ;;  %v2574_v9 = vadd.f32 %v2573_v57, %v8664_v42  ;;  %v2767_v36 = vadd.f32 %v2766_v3, %v8668_v45  ;;  %v2581_v59 = vpop.f32.mrb[113].mxu1  ;;  %v2774_v30 = vpop.f32.mrb[113].mxu0 }
 0x4dd   : > { %vm9396_vm1 = vcmp.lt.s32.totalorder %v8341_v13, 1000  ;;  %v2576_v39 = vadd.f32 %v2575_v21, %v8674_v52  ;;  %v2769_v44 = vadd.f32 %v2768_v58, %v8678_v1  ;;  %v2583_v35 = vpop.f32.mrb[114].mxu1  ;;  %v2776_v54 = vpop.f32.mrb[114].mxu0  ;;  %v2580_v58 = vadd.f32 %v2579_v12, %v8664_v42 }
 0x4de   : > { %v3386_v53 = vsel %vm9396_vm1, %v2967_v47, -inf  ;;  %vm9397_vm2 = vmmov %vm9396_vm1  ;;  %v2585_v20 = vpop.f32.mrb[115].mxu1  ;;  %v2778_v16 = vpop.f32.mrb[115].mxu0  ;;  %v2975_v33 = vmax.f32 %v2574_v9, 0.0  ;;  %v2977_v55 = vmax.f32 %v2767_v36, 0.0  ;;  %v2773_v50 = vadd.f32 %v2772_v7, %v8668_v45 }
 0x4df   : > { %v3388_v51 = vsel %vm9397_vm2, %v2969_v17, -inf  ;;  %v3687_v43 = vmax.f32 %v3686_v4, %v3386_v53  ;;  %vm9398_vm3 = vmmov %vm9396_vm1  ;;  %v2976_v11 = vmax.f32 %v2576_v39, 0.0  ;;  %v2978_v21 = vmax.f32 %v2769_v44, 0.0 }
 0x4e0   : > { %v3761_v32 = vmax.f32 %v3760_v61, %v3388_v51  ;;  %v3387_v57 = vsel %vm9398_vm3, %v2968_v63, -inf  ;;  %vm9399_vm4 = vmmov %vm9396_vm1  ;;  %vm9400_vm5 = vcmp.lt.s32.totalorder %v8344_v46, 1000  ;;  %v2582_v13 = vadd.f32 %v2581_v59, %v8674_v52 }
 0x4e1   : > { %v3389_v3 = vsel %vm9399_vm4, %v2970_v40, -inf  ;;  %v3724_v14 = vmax.f32 %v3723_v24, %v3387_v57  ;;  %v3394_v25 = vsel %vm9400_vm5, %v2975_v33, -inf  ;;  %vm9401_vm6 = vmmov %vm9400_vm5  ;;  %v2775_v60 = vadd.f32 %v2774_v30, %v8678_v1 }
 0x4e2   : > { %v3798_v15 = vmax.f32 %v3797_v23, %v3389_v3  ;;  %v3396_v56 = vsel %vm9401_vm6, %v2977_v55, -inf  ;;  %v3688_v27 = vmax.f32 %v3687_v43, %v3394_v25  ;;  %vm9402_vm7 = vmmov %vm9400_vm5  ;;  %v2983_v61 = vmax.f32 %v2580_v58, 0.0 }
 0x4e3   : > { %v3762_v6 = vmax.f32 %v3761_v32, %v3396_v56  ;;  %v3395_v41 = vsel %vm9402_vm7, %v2976_v11, -inf  ;;  %vm9403_vm8 = vmmov %vm9400_vm5  ;;  %v2985_v48 = vmax.f32 %v2773_v50, 0.0  ;;  %v2589_v0 = vpop.f32.mrb[116].mxu1  ;;  %v2782_v24 = vpop.f32.mrb[116].mxu0  ;;  %v2984_v23 = vmax.f32 %v2582_v13, 0.0 }
 0x4e4   : > { %v3397_v26 = vsel %vm9403_vm8, %v2978_v21, -inf  ;;  %v3725_v38 = vmax.f32 %v3724_v14, %v3395_v41  ;;  %v2986_v47 = vmax.f32 %v2775_v60, 0.0  ;;  %v2584_v17 = vadd.f32 %v2583_v35, %v8664_v42  ;;  %v2591_v7 = vpop.f32.mrb[117].mxu1  ;;  %v2784_v63 = vpop.f32.mrb[117].mxu0 }
 0x4e5   : > { %v3799_v4 = vmax.f32 %v3798_v15, %v3397_v26  ;;  %v2777_v12 = vadd.f32 %v2776_v54, %v8668_v45  ;;  %vm9404_vm9 = vcmp.lt.s32.totalorder %v8385_v22, 1000  ;;  %v2586_v9 = vadd.f32 %v2585_v20, %v8674_v52  ;;  %v2593_v59 = vpop.f32.mrb[118].mxu1  ;;  %v2786_v30 = vpop.f32.mrb[118].mxu0 }
 0x4e6   : > { %v3402_v40 = vsel %vm9404_vm9, %v2983_v61, -inf  ;;  %vm9405_vm10 = vmmov %vm9404_vm9  ;;  %v2779_v36 = vadd.f32 %v2778_v16, %v8678_v1  ;;  %v2595_v35 = vpop.f32.mrb[119].mxu1  ;;  %v2788_v54 = vpop.f32.mrb[119].mxu0  ;;  %v2991_v57 = vmax.f32 %v2584_v17, 0.0  ;;  %v2590_v16 = vadd.f32 %v2589_v0, %v8664_v42 }
 0x4e7   : > { %v3404_v46 = vsel %vm9405_vm10, %v2985_v48, -inf  ;;  %v3689_v53 = vmax.f32 %v3688_v27, %v3402_v40  ;;  %vm9406_vm11 = vmmov %vm9404_vm9  ;;  %v2993_v3 = vmax.f32 %v2777_v12, 0.0  ;;  %v2992_v14 = vmax.f32 %v2586_v9, 0.0 }
 0x4e8   : > { %v3763_v51 = vmax.f32 %v3762_v6, %v3404_v46  ;;  %v3403_v39 = vsel %vm9406_vm11, %v2984_v23, -inf  ;;  %vm9407_vm12 = vmmov %vm9404_vm9  ;;  %v2994_v20 = vmax.f32 %v2779_v36, 0.0  ;;  %v2783_v15 = vadd.f32 %v2782_v24, %v8668_v45 }
 0x4e9   : > { %v3405_v44 = vsel %vm9407_vm12, %v2986_v47, -inf  ;;  %v3726_v43 = vmax.f32 %v3725_v38, %v3403_v39  ;;  %vm9408_vm13 = vcmp.lt.s32.totalorder %v8388_v19, 1000  ;;  %v2592_v22 = vadd.f32 %v2591_v7, %v8674_v52 }
 0x4ea   : > { %v3800_v32 = vmax.f32 %v3799_v4, %v3405_v44  ;;  %v3410_v33 = vsel %vm9408_vm13, %v2991_v57, -inf  ;;  %vm9409_vm14 = vmmov %vm9408_vm13  ;;  %v2785_v11 = vadd.f32 %v2784_v63, %v8678_v1  ;;  %v2999_v60 = vmax.f32 %v2590_v16, 0.0 }
 0x4eb   : > { %v3412_v55 = vsel %vm9409_vm14, %v2993_v3, -inf  ;;  %v3690_v21 = vmax.f32 %v3689_v53, %v3410_v33  ;;  %vm9410_vm1 = vmmov %vm9408_vm13  ;;  %v3001_v27 = vmax.f32 %v2783_v15, 0.0  ;;  %v2599_v6 = vpop.f32.mrb[120].mxu1  ;;  %v2792_v41 = vpop.f32.mrb[120].mxu0  ;;  %v3000_v26 = vmax.f32 %v2592_v22, 0.0 }
 0x4ec   : > { %v3764_v58 = vmax.f32 %v3763_v51, %v3412_v55  ;;  %v3411_v50 = vsel %vm9410_vm1, %v2992_v14, -inf  ;;  %vm9411_vm2 = vmmov %vm9410_vm1  ;;  %v3002_v38 = vmax.f32 %v2785_v11, 0.0  ;;  %v2594_v4 = vadd.f32 %v2593_v59, %v8664_v42  ;;  %v2601_v48 = vpop.f32.mrb[121].mxu1  ;;  %v2794_v0 = vpop.f32.mrb[121].mxu0 }
 0x4ed   : > { %v3413_v25 = vsel %vm9411_vm2, %v2994_v20, -inf  ;;  %v3727_v56 = vmax.f32 %v3726_v43, %v3411_v50  ;;  %v2787_v61 = vadd.f32 %v2786_v30, %v8668_v45  ;;  %vm9412_vm3 = vcmp.lt.s32.totalorder %v8427_v31, 1000  ;;  %v2603_v17 = vpop.f32.mrb[122].mxu1  ;;  %v2796_v12 = vpop.f32.mrb[122].mxu0 }
 0x4ee   : > { %v3801_v13 = vmax.f32 %v3800_v32, %v3413_v25  ;;  %v3418_v24 = vsel %vm9412_vm3, %v2999_v60, -inf  ;;  %vm9413_vm4 = vmmov %vm9412_vm3  ;;  %v2596_v23 = vadd.f32 %v2595_v35, %v8674_v52  ;;  %v2789_v47 = vadd.f32 %v2788_v54, %v8678_v1  ;;  %v2605_v9 = vpop.f32.mrb[123].mxu1  ;;  %v2798_v36 = vpop.f32.mrb[123].mxu0 }
 0x4ef   : > { %v3420_v19 = vsel %vm9413_vm4, %v3001_v27, -inf  ;;  %v3691_v7 = vmax.f32 %v3690_v21, %v3418_v24  ;;  %vm9414_vm5 = vmmov %vm9412_vm3  ;;  %v3007_v53 = vmax.f32 %v2594_v4, 0.0  ;;  %v3009_v51 = vmax.f32 %v2787_v61, 0.0 }
 0x4f0   : > { %v3765_v63 = vmax.f32 %v3764_v58, %v3420_v19  ;;  %v3419_v40 = vsel %vm9414_vm5, %v3000_v26, -inf  ;;  %vm9415_vm6 = vmmov %vm9412_vm3  ;;  %v3008_v39 = vmax.f32 %v2596_v23, 0.0  ;;  %v3010_v44 = vmax.f32 %v2789_v47, 0.0 }
 0x4f1   : > { %v3421_v46 = vsel %vm9415_vm6, %v3002_v38, -inf  ;;  %v3728_v59 = vmax.f32 %v3727_v56, %v3419_v40  ;;  %v2600_v35 = vadd.f32 %v2599_v6, %v8664_v42  ;;  %v2793_v54 = vadd.f32 %v2792_v41, %v8668_v45 }
 0x4f2   : > { %v3802_v30 = vmax.f32 %v3801_v13, %v3421_v46  ;;  %vm9416_vm7 = vcmp.lt.s32.totalorder %v8430_v62, 1000  ;;  %v2602_v31 = vadd.f32 %v2601_v48, %v8674_v52  ;;  %v2795_v57 = vadd.f32 %v2794_v0, %v8678_v1 }
 0x4f3   : > { %v3426_v43 = vsel %vm9416_vm7, %v3007_v53, -inf  ;;  %vm9417_vm8 = vmmov %vm9416_vm7  ;;  %v3015_v55 = vmax.f32 %v2600_v35, 0.0  ;;  %v3017_v22 = vmax.f32 %v2793_v54, 0.0  ;;  %v2609_v11 = vpop.f32.mrb[124].mxu1  ;;  %v2802_v21 = vpop.f32.mrb[124].mxu0  ;;  %v2604_v25 = vadd.f32 %v2603_v17, %v8664_v42 }
 0x4f4   : > { %v3428_v32 = vsel %vm9417_vm8, %v3009_v51, -inf  ;;  %v3692_v3 = vmax.f32 %v3691_v7, %v3426_v43  ;;  %vm9418_vm9 = vmmov %vm9416_vm7  ;;  %v3016_v58 = vmax.f32 %v2602_v31, 0.0  ;;  %v3018_v50 = vmax.f32 %v2795_v57, 0.0  ;;  %v2611_v13 = vpop.f32.mrb[125].mxu1  ;;  %v2804_v60 = vpop.f32.mrb[125].mxu0 }
 0x4f5   : > { %v3766_v14 = vmax.f32 %v3765_v63, %v3428_v32  ;;  %v3427_v20 = vsel %vm9418_vm9, %v3008_v39, -inf  ;;  %vm9419_vm10 = vmmov %vm9416_vm7  ;;  %v2797_v56 = vadd.f32 %v2796_v12, %v8668_v45  ;;  %vm9420_vm11 = vcmp.lt.s32.totalorder %v8473_v5, 1000  ;;  %v2613_v26 = vpop.f32.mrb[126].mxu1  ;;  %v2806_v38 = vpop.f32.mrb[126].mxu0 }
 0x4f6   : > { %v3429_v16 = vsel %vm9419_vm10, %v3010_v44, -inf  ;;  %v3729_v15 = vmax.f32 %v3728_v59, %v3427_v20  ;;  %v3434_v27 = vsel %vm9420_vm11, %v3015_v55, -inf  ;;  %vm9421_vm12 = vmmov %vm9420_vm11  ;;  %v2606_v6 = vadd.f32 %v2605_v9, %v8674_v52  ;;  %v2615_v24 = vpop.f32.mrb[127].mxu1  ;;  %v2808_v19 = vpop.f32.mrb[127].mxu0 }
 0x4f7   : > { %v3803_v33 = vmax.f32 %v3802_v30, %v3429_v16  ;;  %v3436_v62 = vsel %vm9421_vm12, %v3017_v22, -inf  ;;  %v2799_v41 = vadd.f32 %v2798_v36, %v8678_v1  ;;  %v3693_v4 = vmax.f32 %v3692_v3, %v3434_v27  ;;  %vm9422_vm13 = vmmov %vm9420_vm11 }
 0x4f8   : > { %v3767_v61 = vmax.f32 %v3766_v14, %v3436_v62  ;;  %v3435_v48 = vsel %vm9422_vm13, %v3016_v58, -inf  ;;  %vm9423_vm14 = vmmov %vm9420_vm11  ;;  %v3023_v17 = vmax.f32 %v2604_v25, 0.0  ;;  %v3025_v12 = vmax.f32 %v2797_v56, 0.0 }
 0x4f9   : > { %v3437_v0 = vsel %vm9423_vm14, %v3018_v50, -inf  ;;  %v3730_v23 = vmax.f32 %v3729_v15, %v3435_v48  ;;  %v3024_v7 = vmax.f32 %v2606_v6, 0.0  ;;  %v3026_v63 = vmax.f32 %v2799_v41, 0.0 }
 0x4fa   : > { %v3804_v47 = vmax.f32 %v3803_v33, %v3437_v0  ;;  %v2610_v40 = vadd.f32 %v2609_v11, %v8664_v42  ;;  %v2803_v46 = vadd.f32 %v2802_v21, %v8668_v45  ;;  %vm9424_vm1 = vcmp.lt.s32.totalorder %v8476_v37, 1000 }
 0x4fb   : > { %v3442_v9 = vsel %vm9424_vm1, %v3023_v17, -inf  ;;  %vm9425_vm2 = vmmov %vm9424_vm1  ;;  %v2612_v5 = vadd.f32 %v2611_v13, %v8674_v52  ;;  %v2805_v59 = vadd.f32 %v2804_v60, %v8678_v1  ;;  %v2619_v32 = vpop.f32.mrb[128].mxu1  ;;  %v2812_v31 = vpop.f32.mrb[128].mxu0  ;;  %v2614_v14 = vadd.f32 %v2613_v26, %v8664_v42 }
 0x4fc   : > { %v3444_v36 = vsel %vm9425_vm2, %v3025_v12, -inf  ;;  %v3694_v30 = vmax.f32 %v3693_v4, %v3442_v9  ;;  %vm9426_vm3 = vmmov %vm9424_vm1  ;;  %v3031_v54 = vmax.f32 %v2610_v40, 0.0  ;;  %v3033_v43 = vmax.f32 %v2803_v46, 0.0  ;;  %v2621_v16 = vpop.f32.mrb[129].mxu1  ;;  %v2814_v15 = vpop.f32.mrb[129].mxu0 }
 0x4fd   : > { %v3768_v53 = vmax.f32 %v3767_v61, %v3444_v36  ;;  %v3443_v51 = vsel %vm9426_vm3, %v3024_v7, -inf  ;;  %vm9427_vm4 = vmmov %vm9424_vm1  ;;  %v3032_v57 = vmax.f32 %v2612_v5, 0.0  ;;  %v3034_v3 = vmax.f32 %v2805_v59, 0.0  ;;  %v2623_v11 = vpop.f32.mrb[130].mxu1  ;;  %v2816_v21 = vpop.f32.mrb[130].mxu0 }
 0x4fe   : > { %v3445_v39 = vsel %vm9427_vm4, %v3026_v63, -inf  ;;  %v3731_v44 = vmax.f32 %v3730_v23, %v3443_v51  ;;  %v2807_v20 = vadd.f32 %v2806_v38, %v8668_v45  ;;  %vm9428_vm5 = vcmp.lt.s32.totalorder %v8513_v28, 1000  ;;  %v2625_v13 = vpop.f32.mrb[131].mxu1  ;;  %v2818_v60 = vpop.f32.mrb[131].mxu0 }
 0x4ff   : > { %v3805_v35 = vmax.f32 %v3804_v47, %v3445_v39  ;;  %v3450_v33 = vsel %vm9428_vm5, %v3031_v54, -inf  ;;  %vm9429_vm6 = vmmov %vm9428_vm5  ;;  %v2616_v55 = vadd.f32 %v2615_v24, %v8674_v52  ;;  %v2809_v22 = vadd.f32 %v2808_v19, %v8678_v1 }
 0x500   : > { %v3452_v37 = vsel %vm9429_vm6, %v3033_v43, -inf  ;;  %v3695_v58 = vmax.f32 %v3694_v30, %v3450_v33  ;;  %vm9430_vm7 = vmmov %vm9428_vm5  ;;  %v3039_v6 = vmax.f32 %v2614_v14, 0.0  ;;  %v3041_v41 = vmax.f32 %v2807_v20, 0.0 }
 0x501   : > { %v3769_v50 = vmax.f32 %v3768_v53, %v3452_v37  ;;  %v3451_v25 = vsel %vm9430_vm7, %v3032_v57, -inf  ;;  %vm9431_vm8 = vmmov %vm9428_vm5  ;;  %v3040_v26 = vmax.f32 %v2616_v55, 0.0  ;;  %v3042_v38 = vmax.f32 %v2809_v22, 0.0 }
 0x502   : > { %v3453_v56 = vsel %vm9431_vm8, %v3034_v3, -inf  ;;  %v3732_v27 = vmax.f32 %v3731_v44, %v3451_v25  ;;  %v2620_v4 = vadd.f32 %v2619_v32, %v8664_v42  ;;  %v2813_v61 = vadd.f32 %v2812_v31, %v8668_v45 }
 0x503   : > { %v3806_v62 = vmax.f32 %v3805_v35, %v3453_v56  ;;  %vm9432_vm9 = vcmp.lt.s32.totalorder %v8516_v8, 1000  ;;  %v2622_v28 = vadd.f32 %v2621_v16, %v8674_v52  ;;  %v2815_v24 = vadd.f32 %v2814_v15, %v8678_v1  ;;  %v2629_v46 = vpop.f32.mrb[132].mxu1  ;;  %v2822_v9 = vpop.f32.mrb[132].mxu0 }
 0x504   : > { %v3458_v48 = vsel %vm9432_vm9, %v3039_v6, -inf  ;;  %vm9433_vm10 = vmmov %vm9432_vm9  ;;  %v3047_v63 = vmax.f32 %v2620_v4, 0.0  ;;  %v3049_v40 = vmax.f32 %v2813_v61, 0.0  ;;  %v2624_v59 = vadd.f32 %v2623_v11, %v8664_v42  ;;  %v2631_v53 = vpop.f32.mrb[133].mxu1  ;;  %v2824_v51 = vpop.f32.mrb[133].mxu0 }
 0x505   : > { %v3460_v0 = vsel %vm9433_vm10, %v3041_v41, -inf  ;;  %v3696_v19 = vmax.f32 %v3695_v58, %v3458_v48  ;;  %vm9434_vm11 = vmmov %vm9432_vm9  ;;  %v3048_v36 = vmax.f32 %v2622_v28, 0.0  ;;  %v3050_v5 = vmax.f32 %v2815_v24, 0.0  ;;  %v2633_v54 = vpop.f32.mrb[134].mxu1  ;;  %v2826_v43 = vpop.f32.mrb[134].mxu0 }
 0x506   : > { %v3770_v23 = vmax.f32 %v3769_v50, %v3460_v0  ;;  %v3459_v47 = vsel %vm9434_vm11, %v3040_v26, -inf  ;;  %vm9435_vm12 = vmmov %vm9432_vm9  ;;  %v2817_v30 = vadd.f32 %v2816_v21, %v8668_v45  ;;  %vm9436_vm13 = vcmp.lt.s32.totalorder %v8547_v49, 1000  ;;  %v2635_v14 = vpop.f32.mrb[135].mxu1  ;;  %v2828_v20 = vpop.f32.mrb[135].mxu0 }
 0x507   : > { %v3461_v17 = vsel %vm9435_vm12, %v3042_v38, -inf  ;;  %v3733_v12 = vmax.f32 %v3732_v27, %v3459_v47  ;;  %v3466_v39 = vsel %vm9436_vm13, %v3047_v63, -inf  ;;  %vm9437_vm14 = vmmov %vm9436_vm13  ;;  %v2626_v44 = vadd.f32 %v2625_v13, %v8674_v52 }
 0x508   : > { %v3807_v7 = vmax.f32 %v3806_v62, %v3461_v17  ;;  %v3468_v8 = vsel %vm9437_vm14, %v3049_v40, -inf  ;;  %v2819_v35 = vadd.f32 %v2818_v60, %v8678_v1  ;;  %v3697_v32 = vmax.f32 %v3696_v19, %v3466_v39  ;;  %vm9438_vm1 = vmmov %vm9436_vm13 }
 0x509   : > { %v3771_v31 = vmax.f32 %v3770_v23, %v3468_v8  ;;  %v3467_v57 = vsel %vm9438_vm1, %v3048_v36, -inf  ;;  %vm9439_vm2 = vmmov %vm9438_vm1  ;;  %v3055_v33 = vmax.f32 %v2624_v59, 0.0  ;;  %v3057_v37 = vmax.f32 %v2817_v30, 0.0 }
 0x50a   : > { %v3469_v3 = vsel %vm9439_vm2, %v3050_v5, -inf  ;;  %v3734_v16 = vmax.f32 %v3733_v12, %v3467_v57  ;;  %v3056_v55 = vmax.f32 %v2626_v44, 0.0  ;;  %v3058_v22 = vmax.f32 %v2819_v35, 0.0 }
 0x50b   : > { %v3808_v15 = vmax.f32 %v3807_v7, %v3469_v3  ;;  %v2630_v11 = vadd.f32 %v2629_v46, %v8664_v42  ;;  %v2823_v21 = vadd.f32 %v2822_v9, %v8668_v45  ;;  %vm9440_vm3 = vcmp.lt.s32.totalorder %v8550_v2, 1000  ;;  %v2639_v38 = vpop.f32.mrb[136].mxu1  ;;  %v2832_v4 = vpop.f32.mrb[136].mxu0 }
 0x50c   : > { %v3474_v58 = vsel %vm9440_vm3, %v3055_v33, -inf  ;;  %vm9441_vm4 = vmmov %vm9440_vm3  ;;  %v2632_v49 = vadd.f32 %v2631_v53, %v8674_v52  ;;  %v2825_v25 = vadd.f32 %v2824_v51, %v8678_v1  ;;  %v2634_v0 = vadd.f32 %v2633_v54, %v8664_v42  ;;  %v2641_v24 = vpop.f32.mrb[137].mxu1  ;;  %v2834_v19 = vpop.f32.mrb[137].mxu0  ;;  %v9448_v54 = vld [vmem:[#allocation35_spill] sm:$0xff] }
 0x50d   : > { %v3476_v50 = vsel %vm9441_vm4, %v3057_v37, -inf  ;;  %v3698_v56 = vmax.f32 %v3697_v32, %v3474_v58  ;;  %vm9442_vm5 = vmmov %vm9440_vm3  ;;  %v3063_v41 = vmax.f32 %v2630_v11, 0.0  ;;  %v3065_v26 = vmax.f32 %v2823_v21, 0.0  ;;  %v2643_v12 = vpop.f32.mrb[138].mxu1  ;;  %v2836_v7 = vpop.f32.mrb[138].mxu0 }
 0x50e   : > { %v3772_v13 = vmax.f32 %v3771_v31, %v3476_v50  ;;  %v3475_v60 = vsel %vm9442_vm5, %v3056_v55, -inf  ;;  %vm9443_vm6 = vmmov %vm9440_vm3  ;;  %v3064_v61 = vmax.f32 %v2632_v49, 0.0  ;;  %v3066_v48 = vmax.f32 %v2825_v25, 0.0  ;;  %v2645_v36 = vpop.f32.mrb[139].mxu1  ;;  %v2838_v5 = vpop.f32.mrb[139].mxu0 }
 0x50f   : > { %v3477_v27 = vsel %vm9443_vm6, %v3058_v22, -inf  ;;  %v3735_v62 = vmax.f32 %v3734_v16, %v3475_v60  ;;  %v2827_v28 = vadd.f32 %v2826_v43, %v8668_v45  ;;  %vm9444_vm7 = vcmp.lt.s32.totalorder %v8581_v18, 1000 }
 0x510   : > { %v3809_v6 = vmax.f32 %v3808_v15, %v3477_v27  ;;  %v3482_v23 = vsel %vm9444_vm7, %v3063_v41, -inf  ;;  %vm9445_vm8 = vmmov %vm9444_vm7  ;;  %v2636_v47 = vadd.f32 %v2635_v14, %v8674_v52  ;;  %v2829_v17 = vadd.f32 %v2828_v20, %v8678_v1 }
 0x511   : > { %v3484_v2 = vsel %vm9445_vm8, %v3065_v26, -inf  ;;  %v3699_v63 = vmax.f32 %v3698_v56, %v3482_v23  ;;  %vm9446_vm9 = vmmov %vm9444_vm7  ;;  %v3071_v53 = vmax.f32 %v2634_v0, 0.0  ;;  %v3073_v51 = vmax.f32 %v2827_v28, 0.0  ;;  %v9453_v56 = vld [vmem:[#allocation36_spill] sm:$0xff] }
 0x512   : > { %v3773_v40 = vmax.f32 %v3772_v13, %v3484_v2  ;;  %v3483_v46 = vsel %vm9446_vm9, %v3064_v61, -inf  ;;  %vm9447_vm10 = vmmov %vm9444_vm7  ;;  %v3072_v39 = vmax.f32 %v2636_v47, 0.0  ;;  %v3074_v8 = vmax.f32 %v2829_v17, 0.0 }
 0x513   : > { %v3485_v9 = vsel %vm9447_vm10, %v3066_v48, -inf  ;;  %v3736_v59 = vmax.f32 %v3735_v62, %v3483_v46  ;;  %v2640_v44 = vadd.f32 %v2639_v38, %v8664_v42  ;;  %v2833_v35 = vadd.f32 %v2832_v4, %v8668_v45  ;;  %v2649_v55 = vpop.f32.mrb[140].mxu1  ;;  %v2842_v22 = vpop.f32.mrb[140].mxu0 }
 0x514   : > { %v3810_v30 = vmax.f32 %v3809_v6, %v3485_v9  ;;  %vm9449_vm11 = vcmp.lt.s32.totalorder %v9448_v54, 1000  ;;  %v2642_v18 = vadd.f32 %v2641_v24, %v8674_v52  ;;  %v2835_v31 = vadd.f32 %v2834_v19, %v8678_v1  ;;  %v2651_v49 = vpop.f32.mrb[141].mxu1  ;;  %v2844_v25 = vpop.f32.mrb[141].mxu0 }
 0x515   : > { %v3490_v43 = vsel %vm9449_vm11, %v3071_v53, -inf  ;;  %vm9450_vm12 = vmmov %vm9449_vm11  ;;  %v3079_v33 = vmax.f32 %v2640_v44, 0.0  ;;  %v3081_v37 = vmax.f32 %v2833_v35, 0.0  ;;  %v2644_v58 = vadd.f32 %v2643_v12, %v8664_v42  ;;  %v2653_v6 = vpop.f32.mrb[142].mxu1  ;;  %v2846_v41 = vpop.f32.mrb[142].mxu0 }
 0x516   : > { %v3492_v32 = vsel %vm9450_vm12, %v3073_v51, -inf  ;;  %v3700_v57 = vmax.f32 %v3699_v63, %v3490_v43  ;;  %vm9451_vm13 = vmmov %vm9449_vm11  ;;  %v3080_v11 = vmax.f32 %v2642_v18, 0.0  ;;  %v3082_v21 = vmax.f32 %v2835_v31, 0.0  ;;  %v2655_v48 = vpop.f32.mrb[143].mxu1  ;;  %v2848_v0 = vpop.f32.mrb[143].mxu0 }
 0x517   : > { %v3774_v3 = vmax.f32 %v3773_v40, %v3492_v32  ;;  %v3491_v14 = vsel %vm9451_vm13, %v3072_v39, -inf  ;;  %vm9452_vm14 = vmmov %vm9449_vm11  ;;  %v2837_v50 = vadd.f32 %v2836_v7, %v8668_v45  ;;  %vm9454_vm1 = vcmp.lt.s32.totalorder %v9453_v56, 1000  ;;  %v9458_v7 = vld [vmem:[#allocation37_spill] sm:$0xff] }
 0x518   : > { %v3493_v20 = vsel %vm9452_vm14, %v3074_v8, -inf  ;;  %v3737_v16 = vmax.f32 %v3736_v59, %v3491_v14  ;;  %v3498_v13 = vsel %vm9454_vm1, %v3079_v33, -inf  ;;  %vm9455_vm2 = vmmov %vm9454_vm1  ;;  %v2646_v27 = vadd.f32 %v2645_v36, %v8674_v52 }
 0x519   : > { %v3811_v15 = vmax.f32 %v3810_v30, %v3493_v20  ;;  %v3500_v60 = vsel %vm9455_vm2, %v3081_v37, -inf  ;;  %v2839_v62 = vadd.f32 %v2838_v5, %v8678_v1  ;;  %v3701_v26 = vmax.f32 %v3700_v57, %v3498_v13  ;;  %vm9456_vm3 = vmmov %vm9454_vm1 }
 0x51a   : > { %v3775_v38 = vmax.f32 %v3774_v3, %v3500_v60  ;;  %v3499_v4 = vsel %vm9456_vm3, %v3080_v11, -inf  ;;  %vm9457_vm4 = vmmov %vm9454_vm1  ;;  %v3087_v19 = vmax.f32 %v2644_v58, 0.0  ;;  %v3089_v23 = vmax.f32 %v2837_v50, 0.0 }
 0x51b   : > { %v3501_v61 = vsel %vm9457_vm4, %v3082_v21, -inf  ;;  %v3738_v28 = vmax.f32 %v3737_v16, %v3499_v4  ;;  %v3088_v2 = vmax.f32 %v2646_v27, 0.0  ;;  %v3090_v47 = vmax.f32 %v2839_v62, 0.0 }
 0x51c   : > { %v3812_v24 = vmax.f32 %v3811_v15, %v3501_v61  ;;  %v2650_v17 = vadd.f32 %v2649_v55, %v8664_v42  ;;  %v2843_v12 = vadd.f32 %v2842_v22, %v8668_v45  ;;  %vm9459_vm5 = vcmp.lt.s32.totalorder %v9458_v7, 1000 }
 0x51d   : > { %v3506_v63 = vsel %vm9459_vm5, %v3087_v19, -inf  ;;  %vm9460_vm6 = vmmov %vm9459_vm5  ;;  %v2652_v46 = vadd.f32 %v2651_v49, %v8674_v52  ;;  %v2845_v9 = vadd.f32 %v2844_v25, %v8678_v1  ;;  %v2654_v54 = vadd.f32 %v2653_v6, %v8664_v42 }
 0x51e   : > { %v3508_v40 = vsel %vm9460_vm6, %v3089_v23, -inf  ;;  %v3702_v36 = vmax.f32 %v3701_v26, %v3506_v63  ;;  %vm9461_vm7 = vmmov %vm9459_vm5  ;;  %v3095_v39 = vmax.f32 %v2650_v17, 0.0  ;;  %v3097_v8 = vmax.f32 %v2843_v12, 0.0 }
 0x51f   : > { %v3776_v5 = vmax.f32 %v3775_v38, %v3508_v40  ;;  %v3507_v59 = vsel %vm9461_vm7, %v3088_v2, -inf  ;;  %vm9462_vm8 = vmmov %vm9459_vm5  ;;  %v3096_v44 = vmax.f32 %v2652_v46, 0.0  ;;  %v3098_v35 = vmax.f32 %v2845_v9, 0.0 }
 0x520   : > { %v3509_v30 = vsel %vm9462_vm8, %v3090_v47, -inf  ;;  %v3739_v53 = vmax.f32 %v3738_v28, %v3507_v59  ;;  %v2847_v43 = vadd.f32 %v2846_v41, %v8668_v45  ;;  %v3514_v18 = vsel %vm3204_vm15, %v3095_v39, -inf }
 0x521   : > { %v3813_v51 = vmax.f32 %v3812_v24, %v3509_v30  ;;  %v3516_v31 = vsel %vm3204_vm15, %v3097_v8, -inf  ;;  %v2656_v57 = vadd.f32 %v2655_v48, %v8674_v52  ;;  %v2849_v3 = vadd.f32 %v2848_v0, %v8678_v1 }
 0x522   : > { %v3703_v14 = vmax.f32 %v3702_v36, %v3514_v18  ;;  %v3777_v20 = vmax.f32 %v3776_v5, %v3516_v31  ;;  %v3515_v16 = vsel %vm3204_vm15, %v3096_v44, -inf  ;;  %v3517_v42 = vsel %vm3204_vm15, %v3098_v35, -inf }
 0x523   : > { %v3740_v15 = vmax.f32 %v3739_v53, %v3515_v16  ;;  %v3814_v45 = vmax.f32 %v3813_v51, %v3517_v42  ;;  %v3103_v33 = vmax.f32 %v2654_v54, 0.0  ;;  %v3105_v37 = vmax.f32 %v2847_v43, 0.0 }
 0x524   : > { %v3104_v55 = vmax.f32 %v2656_v57, 0.0  ;;  %v3106_v22 = vmax.f32 %v2849_v3, 0.0  ;;  %v7156_v9 = vmov (!%p9465_p1), -inf  }
 0x525   : > { %v3522_v21 = vsel %vm3205_vm0, %v3103_v33, -inf  ;;  %v3524_v52 = vsel %vm3205_vm0, %v3105_v37, -inf  ;;  %3826 = vst [vmem:[#allocation2] sm:$0xff] (!%p9465_p1), %v7156_v9 }
 0x526   : > { %v3704_v1 = vmax.f32 %v3703_v14, %v3522_v21  ;;  %v3778_v58 = vmax.f32 %v3777_v20, %v3524_v52  ;;  %v3523_v50 = vsel %vm3205_vm0, %v3104_v55, -inf  ;;  %v3525_v49 = vsel %vm3205_vm0, %v3106_v22, -inf }
 0x527   : > { %v3741_v25 = vmax.f32 %v3740_v15, %v3523_v50  ;;  %v3815_v56 = vmax.f32 %v3814_v45, %v3525_v49 }
 0x528   : > { %v3705_v13 = vrot.slane %v3704_v1, 4  ;;  %v3779_v60 = vrot.slane %v3778_v58, 4 }
 0x529   : > { %v3742_v27 = vrot.slane %v3741_v25, 4  ;;  %v3816_v62 = vrot.slane %v3815_v56, 4 }
 0x52a   : > { %v3706_v6 = vmax.f32 %v3704_v1, %v3705_v13  ;;  %v3780_v41 = vmax.f32 %v3778_v58, %v3779_v60 }
 0x52b   : > { %v3743_v26 = vmax.f32 %v3741_v25, %v3742_v27  ;;  %v3817_v38 = vmax.f32 %v3815_v56, %v3816_v62 }
 0x52c   : > { %v3707_v4 = vrot.slane %v3706_v6, 2  ;;  %v3781_v61 = vrot.slane %v3780_v41, 2 }
 0x52d   : > { %v3744_v48 = vrot.slane %v3743_v26, 2  ;;  %v3818_v0 = vrot.slane %v3817_v38, 2  ;;  %3825 = sbr.rel (%p9465_p1) target bundleno = 1332 (0x534), region = 120 }
 0x52e   : > { %v3708_v28 = vmax.f32 %v3706_v6, %v3707_v4  ;;  %v3782_v24 = vmax.f32 %v3780_v41, %v3781_v61 }
 0x52f   : > { %v3745_v19 = vmax.f32 %v3743_v26, %v3744_v48  ;;  %v3819_v23 = vmax.f32 %v3817_v38, %v3818_v0 }
 0x530   : > { %v3709_v2 = vrot.slane %v3708_v28, 1  ;;  %v3783_v47 = vrot.slane %v3782_v24, 1 }
 0x531   : > { %v3746_v17 = vrot.slane %v3745_v19, 1  ;;  %v3820_v12 = vrot.slane %v3819_v23, 1 }
 0x532   : > { %v3710_v7 = vmax.f32 %v3708_v28, %v3709_v2  ;;  %v3784_v63 = vmax.f32 %v3782_v24, %v3783_v47 }
 0x533   : > { %v3747_v40 = vmax.f32 %v3745_v19, %v3746_v17  ;;  %v3821_v46 = vmax.f32 %v3819_v23, %v3820_v12 }
 0x534 PF: > { %v7157_v36 = vmov 1966171168   ;;  %v3836_v59 = vcombine.low %v8728_v34, %v8738_v29  ;;  %v9466_v30 = vld [vmem:[#allocation40_spill] sm:$0xff]  ;;  %v9467_v44 = vld [vmem:[#allocation30_spill] sm:$0xff]  ;;  %p5710_p5 = scmp.ne.s32.totalorder %s7235_s28, 3 }
 0x535   : > { %v3841_v5 = vunpack.c.l.s4 %v7157_v36  ;;  %v3837_v53 = vcombine.low %v9466_v30, %v8740_v10  ;;  %v3838_v51 = vcombine.low %v3710_v7, %v3747_v40  ;;  %v3839_v39 = vcombine.low %v3784_v63, %v3821_v46  ;;  %v3827_v20 = vld [vmem:[#allocation2] sm:$0xff]  ;;  %v3893_v33 = vld [vmem:[#allocation14] sm:$0xff] (!%p5710_p5) }
 0x536   : > { %v3894_v34 = vld [vmem:[#allocation14 + $0x8] sm:$0xff] (!%p5710_p5)  ;;  %v3897_v37 = vld [vmem:[#allocation14 + $0x20] sm:$0xff] (!%p5710_p5)  ;;  %vm5427_vm15 = vcmask (!%p5710_p5), 319488  }
 0x537   : > { %v3842_v8 = vunpack.c.0.s8 %v3841_v5  ;;  %v3898_v29 = vld [vmem:[#allocation14 + $0x28] sm:$0xff] (!%p5710_p5)  ;;  %v5872_v22 = vpack.c.bf16 (!%p5710_p5), %v3897_v37, %v3893_v33  ;;  %v4021_v11 = vld [vmem:[#allocation14 + $0x400] sm:$0xff] (!%p5710_p5) }
 0x538   : > { %v4022_v10 = vld [vmem:[#allocation14 + $0x408] sm:$0xff] (!%p5710_p5)  ;;  %v5870_v15 = vpack.c.bf16 (!%p5710_p5), %v3898_v29, %v3894_v34  ;;  %v4025_v21 = vld [vmem:[#allocation14 + $0x420] sm:$0xff] (!%p5710_p5) }
 0x539   : > { %v3845_v35 = vsub.s32 %v3842_v8, %v9467_v44  ;;  %v4026_v45 = vld [vmem:[#allocation14 + $0x428] sm:$0xff] (!%p5710_p5)  ;;  %v5936_v1 = vpack.c.bf16 (!%p5710_p5), %v4025_v21, %v4021_v11  ;;  %v3901_v13 = vld [vmem:[#allocation14 + $0x40] sm:$0xff] (!%p5710_p5) }
 0x53a   : > { %v5934_v55 = vpack.c.bf16 (!%p5710_p5), %v4026_v45, %v4022_v10  ;;  %v3902_v52 = vld [vmem:[#allocation14 + $0x48] sm:$0xff] (!%p5710_p5)  ;;  %5871 = vmatprep.subr.bf16.mxu1 (!%p5710_p5), %v5870_v15  ;;  %v3905_v60 = vld [vmem:[#allocation14 + $0x60] sm:$0xff] (!%p5710_p5) }
 0x53b   : > { %v3846_v54 = vrot.slane %v3836_v59, %v3845_v35  ;;  %v3853_v43 = vrot.slane %v3837_v53, %v3845_v35  ;;  %v3860_v32 = vrot.slane %v3838_v51, %v3845_v35  ;;  %v3867_v18 = vrot.slane %v3839_v39, %v3845_v35  ;;  %v3906_v58 = vld [vmem:[#allocation14 + $0x68] sm:$0xff] (!%p5710_p5)  ;;  %5873 = vmatpush1.bf16.msra.mxu1 (!%p5710_p5), %v5872_v22  ;;  %v4029_v27 = vld [vmem:[#allocation14 + $0x440] sm:$0xff] (!%p5710_p5) }
 0x53c   : > { %v4030_v50 = vld [vmem:[#allocation14 + $0x448] sm:$0xff] (!%p5710_p5)  ;;  %5935 = vmatprep.subr.bf16.mxu0 (!%p5710_p5), %v5934_v55  ;;  %v5874_v25 = vpack.c.bf16 (!%p5710_p5), %v3906_v58, %v3902_v52  ;;  %v5876_v62 = vpack.c.bf16 (!%p5710_p5), %v3905_v60, %v3901_v13  ;;  %v4033_v6 = vld [vmem:[#allocation14 + $0x460] sm:$0xff] (!%p5710_p5) }
 0x53d   : > { %v3868_v31 = vcombine.low %v3846_v54, %v3853_v43  ;;  %v3869_v57 = vcombine.low %v3860_v32, %v3867_v18  ;;  %v4034_v49 = vld [vmem:[#allocation14 + $0x468] sm:$0xff] (!%p5710_p5)  ;;  %5937 = vmatpush1.bf16.msra.mxu0 (!%p5710_p5), %v5936_v1  ;;  %v5940_v38 = vpack.c.bf16 (!%p5710_p5), %v4033_v6, %v4029_v27  ;;  %v3909_v0 = vld [vmem:[#allocation14 + $0x80] sm:$0xff] (!%p5710_p5) }
 0x53e   : > { %v5938_v56 = vpack.c.bf16 (!%p5710_p5), %v4034_v49, %v4030_v50  ;;  %v3910_v41 = vld [vmem:[#allocation14 + $0x88] sm:$0xff] (!%p5710_p5)  ;;  %5875 = vmatprep.subr.bf16.mxu1 (!%p5710_p5), %v5874_v25  ;;  %v3913_v24 = vld [vmem:[#allocation14 + $0xa0] sm:$0xff] (!%p5710_p5) }
 0x53f   : > { %v3876_v3 = vrot.slane %v3868_v31, %v3845_v35  ;;  %v3883_v14 = vrot.slane %v3869_v57, %v3845_v35  ;;  %3891 = sbr.rel (%p5710_p5) target bundleno = 2315 (0x90b), region = 124  ;;  %v3914_v26 = vld [vmem:[#allocation14 + $0xa8] sm:$0xff] (!%p5710_p5)  ;;  %v4037_v19 = vld [vmem:[#allocation14 + $0x480] sm:$0xff] (!%p5710_p5)  ;;  %5877 = vmatpush1.bf16.msra.mxu1 (!%p5710_p5), %v5876_v62  ;;  %v5880_v2 = vpack.c.bf16 (!%p5710_p5), %v3913_v24, %v3909_v0 }
 0x540   : > { %5939 = vmatprep.subr.bf16.mxu0 (!%p5710_p5), %v5938_v56  ;;  %v5878_v4 = vpack.c.bf16 (!%p5710_p5), %v3914_v26, %v3910_v41  ;;  %v4038_v61 = vld [vmem:[#allocation14 + $0x488] sm:$0xff] (!%p5710_p5)  ;;  %v4041_v23 = vld [vmem:[#allocation14 + $0x4a0] sm:$0xff] (!%p5710_p5) }
 0x541   : > { %v3884_v16 = vcombine.low %v3876_v3, %v3883_v14  ;;  %v4042_v48 = vld [vmem:[#allocation14 + $0x4a8] sm:$0xff] (!%p5710_p5)  ;;  %5941 = vmatpush1.bf16.msra.mxu0 (!%p5710_p5), %v5940_v38  ;;  %v5944_v7 = vpack.c.bf16 (!%p5710_p5), %v4041_v23, %v4037_v19  ;;  %v3917_v46 = vld [vmem:[#allocation14 + $0xc0] sm:$0xff] (!%p5710_p5) }
 0x542   : > { %v5942_v28 = vpack.c.bf16 (!%p5710_p5), %v4042_v48, %v4038_v61  ;;  %v3918_v47 = vld [vmem:[#allocation14 + $0xc8] sm:$0xff] (!%p5710_p5)  ;;  %5879 = vmatprep.subr.bf16.mxu1 (!%p5710_p5), %v5878_v4  ;;  %v3921_v9 = vld [vmem:[#allocation14 + $0xe0] sm:$0xff] (!%p5710_p5) }
 0x543   : > { %v3886_v42 = vmax.f32 %v3827_v20, %v3884_v16  ;;  %v3922_v17 = vld [vmem:[#allocation14 + $0xe8] sm:$0xff] (!%p5710_p5)  ;;  %v4045_v5 = vld [vmem:[#allocation14 + $0x4c0] sm:$0xff] (!%p5710_p5)  ;;  %5881 = vmatpush1.bf16.msra.mxu1 (!%p5710_p5), %v5880_v2  ;;  %v5884_v8 = vpack.c.bf16 (!%p5710_p5), %v3921_v9, %v3917_v46 }
 0x544   : > { %v4046_v12 = vld [vmem:[#allocation14 + $0x4c8] sm:$0xff] (!%p5710_p5)  ;;  %v5882_v63 = vpack.c.bf16 (!%p5710_p5), %v3922_v17, %v3918_v47  ;;  %5943 = vmatprep.subr.bf16.mxu0 (!%p5710_p5), %v5942_v28  ;;  %v4049_v59 = vld [vmem:[#allocation14 + $0x4e0] sm:$0xff] (!%p5710_p5) }
 0x545   : > { %3887 = vst [vmem:[#allocation2] sm:$0xff] %v3886_v42  ;;  %v4050_v40 = vld [vmem:[#allocation14 + $0x4e8] sm:$0xff] (!%p5710_p5)  ;;  %5945 = vmatpush1.bf16.msra.mxu0 (!%p5710_p5), %v5944_v7  ;;  %v5948_v44 = vpack.c.bf16 (!%p5710_p5), %v4049_v59, %v4045_v5  ;;  %v3925_v54 = vld [vmem:[#allocation14 + $0x100] sm:$0xff] (!%p5710_p5) }
 0x546   : > { %v5946_v36 = vpack.c.bf16 %v4050_v40, %v4046_v12  ;;  %v3926_v30 = vld [vmem:[#allocation14 + $0x108] sm:$0xff]  ;;  %5883 = vmatprep.subr.bf16.mxu1 %v5882_v63  ;;  %v3929_v43 = vld [vmem:[#allocation14 + $0x120] sm:$0xff] }
 0x547   : > { %v3930_v53 = vld [vmem:[#allocation14 + $0x128] sm:$0xff]  ;;  %v4053_v32 = vld [vmem:[#allocation14 + $0x500] sm:$0xff]  ;;  %5885 = vmatpush1.bf16.msra.mxu1 %v5884_v8  ;;  %v5888_v16 = vpack.c.bf16 %v3929_v43, %v3925_v54 }
 0x548   : > { %v4054_v51 = vld [vmem:[#allocation14 + $0x508] sm:$0xff]  ;;  %v5886_v35 = vpack.c.bf16 %v3930_v53, %v3926_v30  ;;  %5947 = vmatprep.subr.bf16.mxu0 %v5946_v36  ;;  %v4057_v31 = vld [vmem:[#allocation14 + $0x520] sm:$0xff] }
 0x549   : > { %v4058_v39 = vld [vmem:[#allocation14 + $0x528] sm:$0xff]  ;;  %5949 = vmatpush1.bf16.msra.mxu0 %v5948_v44  ;;  %v5952_v42 = vpack.c.bf16 %v4057_v31, %v4053_v32  ;;  %v3933_v29 = vld [vmem:[#allocation14 + $0x140] sm:$0xff] }
 0x54a   : > { %v5950_v18 = vpack.c.bf16 %v4058_v39, %v4054_v51  ;;  %v3934_v57 = vld [vmem:[#allocation14 + $0x148] sm:$0xff]  ;;  %5887 = vmatprep.subr.bf16.mxu1 %v5886_v35  ;;  %v3937_v10 = vld [vmem:[#allocation14 + $0x160] sm:$0xff] }
 0x54b   : > { %v3938_v3 = vld [vmem:[#allocation14 + $0x168] sm:$0xff]  ;;  %v4061_v15 = vld [vmem:[#allocation14 + $0x540] sm:$0xff]  ;;  %5889 = vmatpush1.bf16.msra.mxu1 %v5888_v16  ;;  %v5892_v21 = vpack.c.bf16 %v3937_v10, %v3933_v29 }
 0x54c   : > { %v4062_v14 = vld [vmem:[#allocation14 + $0x548] sm:$0xff]  ;;  %v5890_v34 = vpack.c.bf16 %v3938_v3, %v3934_v57  ;;  %5951 = vmatprep.subr.bf16.mxu0 %v5950_v18  ;;  %v4065_v33 = vld [vmem:[#allocation14 + $0x560] sm:$0xff] }
 0x54d   : > { %v4066_v20 = vld [vmem:[#allocation14 + $0x568] sm:$0xff]  ;;  %5953 = vmatpush1.bf16.msra.mxu0 %v5952_v42  ;;  %v5956_v52 = vpack.c.bf16 %v4065_v33, %v4061_v15  ;;  %v3941_v58 = vld [vmem:[#allocation14 + $0x180] sm:$0xff] }
 0x54e   : > { %v5954_v45 = vpack.c.bf16 %v4066_v20, %v4062_v14  ;;  %v3942_v37 = vld [vmem:[#allocation14 + $0x188] sm:$0xff]  ;;  %5891 = vmatprep.subr.bf16.mxu1 %v5890_v34  ;;  %v3945_v50 = vld [vmem:[#allocation14 + $0x1a0] sm:$0xff] }
 0x54f   : > { %v3946_v55 = vld [vmem:[#allocation14 + $0x1a8] sm:$0xff]  ;;  %v4069_v49 = vld [vmem:[#allocation14 + $0x580] sm:$0xff]  ;;  %5893 = vmatpush1.bf16.msra.mxu1 %v5892_v21  ;;  %v5896_v6 = vpack.c.bf16 %v3945_v50, %v3941_v58 }
 0x550   : > { %v4070_v22 = vld [vmem:[#allocation14 + $0x588] sm:$0xff]  ;;  %v5894_v1 = vpack.c.bf16 %v3946_v55, %v3942_v37  ;;  %5955 = vmatprep.subr.bf16.mxu0 %v5954_v45  ;;  %v4073_v56 = vld [vmem:[#allocation14 + $0x5a0] sm:$0xff] }
 0x551   : > { %v4074_v11 = vld [vmem:[#allocation14 + $0x5a8] sm:$0xff]  ;;  %5957 = vmatpush1.bf16.msra.mxu0 %v5956_v52  ;;  %v5960_v41 = vpack.c.bf16 %v4073_v56, %v4069_v49  ;;  %v3949_v38 = vld [vmem:[#allocation14 + $0x1c0] sm:$0xff] }
 0x552   : > { %v5958_v25 = vpack.c.bf16 %v4074_v11, %v4070_v22  ;;  %v3950_v13 = vld [vmem:[#allocation14 + $0x1c8] sm:$0xff]  ;;  %5895 = vmatprep.subr.bf16.mxu1 %v5894_v1  ;;  %v3953_v4 = vld [vmem:[#allocation14 + $0x1e0] sm:$0xff] }
 0x553   : > { %v3954_v60 = vld [vmem:[#allocation14 + $0x1e8] sm:$0xff]  ;;  %v4077_v61 = vld [vmem:[#allocation14 + $0x5c0] sm:$0xff]  ;;  %5897 = vmatpush1.bf16.msra.mxu1 %v5896_v6  ;;  %v5900_v2 = vpack.c.bf16 %v3953_v4, %v3949_v38 }
 0x554   : > { %v4078_v27 = vld [vmem:[#allocation14 + $0x5c8] sm:$0xff]  ;;  %v5898_v26 = vpack.c.bf16 %v3954_v60, %v3950_v13  ;;  %5959 = vmatprep.subr.bf16.mxu0 %v5958_v25  ;;  %v4081_v0 = vld [vmem:[#allocation14 + $0x5e0] sm:$0xff]  ;;  %v9468_v60 = vld [vmem:[#allocation31_spill] sm:$0xff] }
 0x555   : > { %v4082_v62 = vld [vmem:[#allocation14 + $0x5e8] sm:$0xff]  ;;  %5961 = vmatpush1.bf16.msra.mxu0 %v5960_v41  ;;  %v5964_v47 = vpack.c.bf16 %v4081_v0, %v4077_v61  ;;  %v3957_v12 = vld [vmem:[#allocation14 + $0x200] sm:$0xff] }
 0x556   : > { %v5962_v48 = vpack.c.bf16 %v4082_v62, %v4078_v27  ;;  %v3958_v28 = vld [vmem:[#allocation14 + $0x208] sm:$0xff]  ;;  %5899 = vmatprep.subr.bf16.mxu1 %v5898_v26  ;;  %v3961_v7 = vld [vmem:[#allocation14 + $0x220] sm:$0xff] }
 0x557   : > { %v3962_v24 = vld [vmem:[#allocation14 + $0x228] sm:$0xff]  ;;  %v4085_v63 = vld [vmem:[#allocation14 + $0x600] sm:$0xff]  ;;  %5901 = vmatpush1.bf16.msra.mxu1 %v5900_v2  ;;  %v5904_v30 = vpack.c.bf16 %v3961_v7, %v3957_v12 }
 0x558   : > { %v4086_v19 = vld [vmem:[#allocation14 + $0x608] sm:$0xff]  ;;  %v5902_v17 = vpack.c.bf16 %v3962_v24, %v3958_v28  ;;  %5963 = vmatprep.subr.bf16.mxu0 %v5962_v48  ;;  %v4089_v46 = vld [vmem:[#allocation14 + $0x620] sm:$0xff] }
 0x559   : > { %v4090_v23 = vld [vmem:[#allocation14 + $0x628] sm:$0xff]  ;;  %5965 = vmatpush1.bf16.msra.mxu0 %v5964_v47  ;;  %v5968_v53 = vpack.c.bf16 %v4089_v46, %v4085_v63  ;;  %v3965_v39 = vld [vmem:[#allocation14 + $0x240] sm:$0xff] }
 0x55a   : > { %v5966_v40 = vpack.c.bf16 %v4090_v23, %v4086_v19  ;;  %v3966_v9 = vld [vmem:[#allocation14 + $0x248] sm:$0xff]  ;;  %5903 = vmatprep.subr.bf16.mxu1 %v5902_v17  ;;  %v3969_v8 = vld [vmem:[#allocation14 + $0x260] sm:$0xff] }
 0x55b   : > { %v3970_v36 = vld [vmem:[#allocation14 + $0x268] sm:$0xff]  ;;  %v4093_v44 = vld [vmem:[#allocation14 + $0x640] sm:$0xff]  ;;  %5905 = vmatpush1.bf16.msra.mxu1 %v5904_v30  ;;  %v5908_v57 = vpack.c.bf16 %v3969_v8, %v3965_v39 }
 0x55c   : > { %v4094_v5 = vld [vmem:[#allocation14 + $0x648] sm:$0xff]  ;;  %v5906_v51 = vpack.c.bf16 %v3970_v36, %v3966_v9  ;;  %5967 = vmatprep.subr.bf16.mxu0 %v5966_v40  ;;  %v4097_v54 = vld [vmem:[#allocation14 + $0x660] sm:$0xff] }
 0x55d   : > { %v4098_v59 = vld [vmem:[#allocation14 + $0x668] sm:$0xff]  ;;  %5969 = vmatpush1.bf16.msra.mxu0 %v5968_v53  ;;  %v5972_v3 = vpack.c.bf16 %v4097_v54, %v4093_v44  ;;  %v3973_v20 = vld [vmem:[#allocation14 + $0x280] sm:$0xff] }
 0x55e   : > { %v5970_v35 = vpack.c.bf16 %v4098_v59, %v4094_v5  ;;  %v3974_v43 = vld [vmem:[#allocation14 + $0x288] sm:$0xff]  ;;  %5907 = vmatprep.subr.bf16.mxu1 %v5906_v51  ;;  %v3977_v16 = vld [vmem:[#allocation14 + $0x2a0] sm:$0xff] }
 0x55f   : > { %v3978_v32 = vld [vmem:[#allocation14 + $0x2a8] sm:$0xff]  ;;  %v4101_v42 = vld [vmem:[#allocation14 + $0x680] sm:$0xff]  ;;  %5909 = vmatpush1.bf16.msra.mxu1 %v5908_v57  ;;  %v5912_v37 = vpack.c.bf16 %v3977_v16, %v3973_v20 }
 0x560   : > { %v4102_v18 = vld [vmem:[#allocation14 + $0x688] sm:$0xff]  ;;  %v5910_v14 = vpack.c.bf16 %v3978_v32, %v3974_v43  ;;  %5971 = vmatprep.subr.bf16.mxu0 %v5970_v35  ;;  %v4105_v29 = vld [vmem:[#allocation14 + $0x6a0] sm:$0xff] }
 0x561   : > { %v4106_v31 = vld [vmem:[#allocation14 + $0x6a8] sm:$0xff]  ;;  %v3981_v55 = vld [vmem:[#allocation14 + $0x2c0] sm:$0xff]  ;;  %5973 = vmatpush1.bf16.msra.mxu0 %v5972_v3  ;;  %v5976_v22 = vpack.c.bf16 %v4105_v29, %v4101_v42 }
 0x562   : > { %v5974_v34 = vpack.c.bf16 %v4106_v31, %v4102_v18  ;;  %v3982_v10 = vld [vmem:[#allocation14 + $0x2c8] sm:$0xff]  ;;  %5911 = vmatprep.subr.bf16.mxu1 %v5910_v14  ;;  %v3985_v21 = vld [vmem:[#allocation14 + $0x2e0] sm:$0xff] }
 0x563   : > { %v3986_v15 = vld [vmem:[#allocation14 + $0x2e8] sm:$0xff]  ;;  %v4109_v52 = vld [vmem:[#allocation14 + $0x6c0] sm:$0xff]  ;;  %5913 = vmatpush1.bf16.msra.mxu1 %v5912_v37  ;;  %v5916_v41 = vpack.c.bf16 %v3985_v21, %v3981_v55 }
 0x564   : > { %v4110_v45 = vld [vmem:[#allocation14 + $0x6c8] sm:$0xff]  ;;  %v5914_v11 = vpack.c.bf16 %v3986_v15, %v3982_v10  ;;  %v4113_v1 = vld [vmem:[#allocation14 + $0x6e0] sm:$0xff]  ;;  %5975 = vmatprep.subr.bf16.mxu0 %v5974_v34  ;;  %v3896_v15 = vld [vmem:[#allocation14 + $0x18] sm:$0xff] }
 0x565   : > { %v4114_v33 = vld [vmem:[#allocation14 + $0x6e8] sm:$0xff]  ;;  %5977 = vmatpush1.bf16.msra.mxu0 %v5976_v22  ;;  %v5980_v26 = vpack.c.bf16 %v4113_v1, %v4109_v52  ;;  %v3989_v4 = vld [vmem:[#allocation14 + $0x300] sm:$0xff]  ;;  %v3895_v52 = vld [vmem:[#allocation14 + $0x10] sm:$0xff] }
 0x566   : > { %v5978_v58 = vpack.c.bf16 %v4114_v33, %v4110_v45  ;;  %v3990_v50 = vld [vmem:[#allocation14 + $0x308] sm:$0xff]  ;;  %5915 = vmatprep.subr.bf16.mxu1 %v5914_v11  ;;  %v3993_v61 = vld [vmem:[#allocation14 + $0x320] sm:$0xff]  ;;  %v3900_v45 = vld [vmem:[#allocation14 + $0x38] sm:$0xff] }
 0x567   : > { %v3994_v49 = vld [vmem:[#allocation14 + $0x328] sm:$0xff]  ;;  %v4117_v48 = vld [vmem:[#allocation14 + $0x700] sm:$0xff]  ;;  %5917 = vmatpush1.bf16.msra.mxu1 %v5916_v41  ;;  %v5920_v47 = vpack.c.bf16 %v3993_v61, %v3989_v4  ;;  %v6126_v11 = vpack.c.bf16 %v3900_v45, %v3896_v15  ;;  %v3899_v1 = vld [vmem:[#allocation14 + $0x30] sm:$0xff] }
 0x568   : > { %v9112_v25 = vld [vmem:[#allocation2] sm:$0xff]  ;;  %v5918_v38 = vpack.c.bf16 %v3994_v49, %v3990_v50  ;;  %5979 = vmatprep.subr.bf16.mxu0 %v5978_v58  ;;  %v4121_v28 = vld [vmem:[#allocation14 + $0x720] sm:$0xff]  ;;  %v3904_v49 = vld [vmem:[#allocation14 + $0x58] sm:$0xff] }
 0x569   : > { %v4118_v56 = vld [vmem:[#allocation14 + $0x708] sm:$0xff]  ;;  %v9116_v27 = vrot.slane %v9112_v25, %v9468_v60  ;;  %5981 = vmatpush1.bf16.msra.mxu0 %v5980_v26  ;;  %v5984_v17 = vpack.c.bf16 %v4121_v28, %v4117_v48  ;;  %v3997_v7 = vld [vmem:[#allocation14 + $0x340] sm:$0xff]  ;;  %v6128_v48 = vpack.c.bf16 %v3899_v1, %v3895_v52  ;;  %v3940_v52 = vld [vmem:[#allocation14 + $0x178] sm:$0xff] }
 0x56a   : > { %v4122_v13 = vld [vmem:[#allocation14 + $0x728] sm:$0xff]  ;;  %5919 = vmatprep.subr.bf16.mxu1 %v5918_v38  ;;  %v4001_v63 = vld [vmem:[#allocation14 + $0x360] sm:$0xff] }
 0x56b   : > { %v9469_v62 = vld [vmem:[#allocation34_spill] sm:$0xff]  ;;  %v5982_v0 = vpack.c.bf16 %v4122_v13, %v4118_v56  ;;  %4532 = vmatprep.mubr.f32.mxu1 %v9116_v27  ;;  %v4125_v40 = vld [vmem:[#allocation14 + $0x740] sm:$0xff]  ;;  %5921 = vmatpush1.bf16.msra.mxu1 %v5920_v47  ;;  %v5924_v53 = vpack.c.bf16 %v4001_v63, %v3997_v7  ;;  %v3908_v56 = vld [vmem:[#allocation14 + $0x78] sm:$0xff] }
 0x56c   : > { %v9120_v6 = vrot.slane %v9112_v25, %v9469_v62  ;;  %v3998_v24 = vld [vmem:[#allocation14 + $0x348] sm:$0xff]  ;;  %v4129_v9 = vld [vmem:[#allocation14 + $0x760] sm:$0xff]  ;;  %v6130_v28 = vpack.c.bf16 %v3908_v56, %v3904_v49 }
 0x56d   : > { %v4002_v19 = vld [vmem:[#allocation14 + $0x368] sm:$0xff]  ;;  %5983 = vmatprep.subr.bf16.mxu0 %v5982_v0  ;;  %v5988_v51 = vpack.c.bf16 %v4129_v9, %v4125_v40  ;;  %v4005_v8 = vld [vmem:[#allocation14 + $0x380] sm:$0xff] }
 0x56e   : > { %v4126_v23 = vld [vmem:[#allocation14 + $0x748] sm:$0xff]  ;;  %4603 = vmatprep.mubr.f32.mxu0 %v9120_v6  ;;  %v5922_v12 = vpack.c.bf16 %v4002_v19, %v3998_v24  ;;  %5985 = vmatpush1.bf16.msra.mxu0 %v5984_v17  ;;  %v4009_v44 = vld [vmem:[#allocation14 + $0x3a0] sm:$0xff]  ;;  %v3903_v19 = vld [vmem:[#allocation14 + $0x50] sm:$0xff] }
 0x56f   : > { %v4130_v2 = vld [vmem:[#allocation14 + $0x768] sm:$0xff]  ;;  %v4133_v35 = vld [vmem:[#allocation14 + $0x780] sm:$0xff]  ;;  %v5928_v3 = vpack.c.bf16 %v4009_v44, %v4005_v8  ;;  %v3912_v17 = vld [vmem:[#allocation14 + $0x98] sm:$0xff] }
 0x570   : > { %v5986_v46 = vpack.c.bf16 %v4130_v2, %v4126_v23  ;;  %v4006_v36 = vld [vmem:[#allocation14 + $0x388] sm:$0xff]  ;;  %5923 = vmatprep.subr.bf16.mxu1 %v5922_v12  ;;  %v4137_v43 = vld [vmem:[#allocation14 + $0x7a0] sm:$0xff]  ;;  %v3907_v23 = vld [vmem:[#allocation14 + $0x70] sm:$0xff] }
 0x571   : > { %v4010_v5 = vld [vmem:[#allocation14 + $0x3a8] sm:$0xff]  ;;  %5925 = vmatpush1.bf16.msra.mxu1 %v5924_v53  ;;  %v5992_v14 = vpack.c.bf16 %v4137_v43, %v4133_v35  ;;  %v4013_v16 = vld [vmem:[#allocation14 + $0x3c0] sm:$0xff]  ;;  %v3916_v12 = vld [vmem:[#allocation14 + $0xb8] sm:$0xff] }
 0x572   : > { %v4134_v59 = vld [vmem:[#allocation14 + $0x788] sm:$0xff]  ;;  %v5926_v39 = vpack.c.bf16 %v4010_v5, %v4006_v36  ;;  %5987 = vmatprep.subr.bf16.mxu0 %v5986_v46  ;;  %v4017_v42 = vld [vmem:[#allocation14 + $0x3e0] sm:$0xff]  ;;  %v6132_v36 = vpack.c.bf16 %v3907_v23, %v3903_v19  ;;  %v3911_v53 = vld [vmem:[#allocation14 + $0x90] sm:$0xff] }
 0x573   : > { %v4138_v30 = vld [vmem:[#allocation14 + $0x7a8] sm:$0xff]  ;;  %5989 = vmatpush1.bf16.msra.mxu0 %v5988_v51  ;;  %v4141_v34 = vld [vmem:[#allocation14 + $0x7c0] sm:$0xff]  ;;  %v5932_v55 = vpack.c.bf16 %v4017_v42, %v4013_v16  ;;  %v3915_v51 = vld [vmem:[#allocation14 + $0xb0] sm:$0xff] }
 0x574   : > { %v5990_v54 = vpack.c.bf16 %v4138_v30, %v4134_v59  ;;  %v4014_v32 = vld [vmem:[#allocation14 + $0x3c8] sm:$0xff]  ;;  %5927 = vmatprep.subr.bf16.mxu1 %v5926_v39  ;;  %v4145_v10 = vld [vmem:[#allocation14 + $0x7e0] sm:$0xff]  ;;  %v6134_v59 = vpack.c.bf16 %v3916_v12, %v3912_v17  ;;  %v3920_v44 = vld [vmem:[#allocation14 + $0xd8] sm:$0xff] }
 0x575   : > { %v4018_v18 = vld [vmem:[#allocation14 + $0x3e8] sm:$0xff]  ;;  %5929 = vmatpush1.bf16.msra.mxu1 %v5928_v3  ;;  %v5996_v22 = vpack.c.bf16 %v4145_v10, %v4141_v34  ;;  %v4149_v21 = vld [vmem:[#allocation14 + $0x800] sm:$0xff]  ;;  %v3924_v35 = vld [vmem:[#allocation14 + $0xf8] sm:$0xff] }
 0x576   : > { %v4142_v31 = vld [vmem:[#allocation14 + $0x7c8] sm:$0xff]  ;;  %v5930_v20 = vpack.c.bf16 %v4018_v18, %v4014_v32  ;;  %5991 = vmatprep.subr.bf16.mxu0 %v5990_v54  ;;  %v4153_v50 = vld [vmem:[#allocation14 + $0x820] sm:$0xff]  ;;  %v6136_v32 = vpack.c.bf16 %v3915_v51, %v3911_v53  ;;  %v3919_v3 = vld [vmem:[#allocation14 + $0xd0] sm:$0xff] }
 0x577   : > { %v4146_v57 = vld [vmem:[#allocation14 + $0x7e8] sm:$0xff]  ;;  %5993 = vmatpush1.bf16.msra.mxu0 %v5992_v14  ;;  %v9470_v13 = vld [vmem:[#allocation32_spill] sm:$0xff]  ;;  %v6000_v0 = vpack.c.bf16 %v4153_v50, %v4149_v21  ;;  %v3923_v14 = vld [vmem:[#allocation14 + $0xf0] sm:$0xff] }
 0x578   : > { %v5994_v29 = vpack.c.bf16 %v4146_v57, %v4142_v31  ;;  %v4150_v33 = vld [vmem:[#allocation14 + $0x808] sm:$0xff]  ;;  %5931 = vmatprep.subr.bf16.mxu1 %v5930_v20  ;;  %v9126_v41 = vrot.slane %v9112_v25, %v9470_v13  ;;  %v4157_v24 = vld [vmem:[#allocation14 + $0x840] sm:$0xff]  ;;  %v6138_v31 = vpack.c.bf16 %v3924_v35, %v3920_v44  ;;  %v3928_v42 = vld [vmem:[#allocation14 + $0x118] sm:$0xff]  ;;  %v6140_v15 = vpack.c.bf16 %v3923_v14, %v3919_v3 }
 0x579   : > { %v4154_v37 = vld [vmem:[#allocation14 + $0x828] sm:$0xff]  ;;  %5933 = vmatpush1.bf16.msra.mxu1 %v5932_v55  ;;  %v4161_v47 = vld [vmem:[#allocation14 + $0x860] sm:$0xff]  ;;  %v3932_v34 = vld [vmem:[#allocation14 + $0x138] sm:$0xff] }
 0x57a   : > { %5995 = vmatprep.subr.bf16.mxu0 %v5994_v29  ;;  %v5998_v58 = vpack.c.bf16 %v4154_v37, %v4150_v33  ;;  %v4158_v26 = vld [vmem:[#allocation14 + $0x848] sm:$0xff]  ;;  %6127 = vmatprep.subr.bf16.mxu1 %v6126_v11  ;;  %v6004_v5 = vpack.c.bf16 %v4161_v47, %v4157_v24  ;;  %v4165_v30 = vld [vmem:[#allocation14 + $0x880] sm:$0xff]  ;;  %v6142_v45 = vpack.c.bf16 %v3932_v34, %v3928_v42  ;;  %v3927_v37 = vld [vmem:[#allocation14 + $0x110] sm:$0xff] }
 0x57b   : > { %v4162_v38 = vld [vmem:[#allocation14 + $0x868] sm:$0xff]  ;;  %5997 = vmatpush1.bf16.msra.mxu0 %v5996_v22  ;;  %v4169_v8 = vld [vmem:[#allocation14 + $0x8a0] sm:$0xff]  ;;  %v3931_v55 = vld [vmem:[#allocation14 + $0x130] sm:$0xff] }
 0x57c   : > { %v9471_v4 = vld [vmem:[#allocation33_spill] sm:$0xff]  ;;  %5999 = vmatprep.subr.bf16.mxu0 %v5998_v58  ;;  %v6002_v2 = vpack.c.bf16 %v4162_v38, %v4158_v26  ;;  %v9472_v7 = vld [vmem:[#allocation30_spill] sm:$0xff]  ;;  %4533 = vmatmul.mubr.f32.vlgmr.msra.gmra.mrb[0].mxu1 %v9126_v41  ;;  %v6008_v18 = vpack.c.bf16 %v4169_v8, %v4165_v30  ;;  %v3936_v21 = vld [vmem:[#allocation14 + $0x158] sm:$0xff]  ;;  %v6144_v50 = vpack.c.bf16 %v3931_v55, %v3927_v37 }
 0x57d   : > { %v9130_v61 = vrot.slane %v9112_v25, %v9471_v4  ;;  %v9473_v63 = vsub.s32 5, %v9472_v7  ;;  %v4166_v46 = vld [vmem:[#allocation14 + $0x888] sm:$0xff]  ;;  %6129 = vmatpush1.bf16.msra.mxu1 %v6128_v48  ;;  %4816 = vmatprep.mubr.f32.mxu1 %v9116_v27  ;;  %v4173_v57 = vld [vmem:[#allocation14 + $0x8c0] sm:$0xff]  ;;  %v6146_v56 = vpack.c.bf16 %v3940_v52, %v3936_v21  ;;  %v3935_v38 = vld [vmem:[#allocation14 + $0x150] sm:$0xff] }
 0x57e   : > { %v4170_v9 = vld [vmem:[#allocation14 + $0x8a8] sm:$0xff]  ;;  %6131 = vmatprep.subr.bf16.mxu1 %v6130_v28  ;;  %v4177_v16 = vld [vmem:[#allocation14 + $0x8e0] sm:$0xff]  ;;  %v3939_v48 = vld [vmem:[#allocation14 + $0x170] sm:$0xff] }
 0x57f   : > { %v9135_v40 = vrot.slane %v9112_v25, %v9473_v63  ;;  %4604 = vmatmul.mubr.f32.vlgmr.msra.gmra.mrb[0].mxu0 %v9130_v61  ;;  %v6006_v39 = vpack.c.bf16 %v4170_v9, %v4166_v46  ;;  %v4174_v54 = vld [vmem:[#allocation14 + $0x8c8] sm:$0xff]  ;;  %v6012_v27 = vpack.c.bf16 %v4177_v16, %v4173_v57  ;;  %v4181_v33 = vld [vmem:[#allocation14 + $0x900] sm:$0xff]  ;;  %v3944_v24 = vld [vmem:[#allocation14 + $0x198] sm:$0xff]  ;;  %v6148_v47 = vpack.c.bf16 %v3939_v48, %v3935_v38 }
 0x580   : > { %6001 = vmatpush1.bf16.msra.mxu0 %v6000_v0  ;;  %v4178_v43 = vld [vmem:[#allocation14 + $0x8e8] sm:$0xff]  ;;  %v4185_v11 = vld [vmem:[#allocation14 + $0x920] sm:$0xff]  ;;  %v3948_v19 = vld [vmem:[#allocation14 + $0x1b8] sm:$0xff] }
 0x581   : > { %6003 = vmatprep.subr.bf16.mxu0 %v6002_v2  ;;  %4674 = vmatprep.mubr.f32.mxu0 %v9135_v40  ;;  %v6010_v20 = vpack.c.bf16 %v4178_v43, %v4174_v54  ;;  %v4182_v29 = vld [vmem:[#allocation14 + $0x908] sm:$0xff]  ;;  %v6016_v49 = vpack.c.bf16 %v4185_v11, %v4181_v33  ;;  %v4189_v26 = vld [vmem:[#allocation14 + $0x940] sm:$0xff]  ;;  %v6150_v12 = vpack.c.bf16 %v3948_v19, %v3944_v24  ;;  %v3943_v46 = vld [vmem:[#allocation14 + $0x190] sm:$0xff] }
 0x582   : > { %6133 = vmatpush1.bf16.msra.mxu1 %v6132_v36  ;;  %v4186_v10 = vld [vmem:[#allocation14 + $0x928] sm:$0xff]  ;;  %v4193_v28 = vld [vmem:[#allocation14 + $0x960] sm:$0xff]  ;;  %v3947_v9 = vld [vmem:[#allocation14 + $0x1b0] sm:$0xff] }
 0x583   : > { %6135 = vmatprep.subr.bf16.mxu1 %v6134_v59  ;;  %v6014_v22 = vpack.c.bf16 %v4186_v10, %v4182_v29  ;;  %v4190_v1 = vld [vmem:[#allocation14 + $0x948] sm:$0xff]  ;;  %v6020_v17 = vpack.c.bf16 %v4193_v28, %v4189_v26  ;;  %v4197_v63 = vld [vmem:[#allocation14 + $0x980] sm:$0xff]  ;;  %v3952_v59 = vld [vmem:[#allocation14 + $0x1d8] sm:$0xff] }
 0x584   : > { %6005 = vmatpush1.bf16.msra.mxu0 %v6004_v5  ;;  %v4194_v58 = vld [vmem:[#allocation14 + $0x968] sm:$0xff]  ;;  %v4201_v5 = vld [vmem:[#allocation14 + $0x9a0] sm:$0xff]  ;;  %v3956_v30 = vld [vmem:[#allocation14 + $0x1f8] sm:$0xff] }
 0x585   : > { %6007 = vmatprep.subr.bf16.mxu0 %v6006_v39  ;;  %v6018_v0 = vpack.c.bf16 %v4194_v58, %v4190_v1  ;;  %v4198_v23 = vld [vmem:[#allocation14 + $0x988] sm:$0xff]  ;;  %v6152_v39 = vpack.c.bf16 %v3947_v9, %v3943_v46  ;;  %v6024_v8 = vpack.c.bf16 %v4201_v5, %v4197_v63  ;;  %v6154_v44 = vpack.c.bf16 %v3956_v30, %v3952_v59  ;;  %v4205_v35 = vld [vmem:[#allocation14 + $0x9c0] sm:$0xff]  ;;  %v3951_v54 = vld [vmem:[#allocation14 + $0x1d0] sm:$0xff] }
 0x586   : > { %6137 = vmatpush1.bf16.msra.mxu1 %v6136_v32  ;;  %v4202_v2 = vld [vmem:[#allocation14 + $0x9a8] sm:$0xff]  ;;  %v3955_v43 = vld [vmem:[#allocation14 + $0x1f0] sm:$0xff]  ;;  %v3964_v57 = vld [vmem:[#allocation14 + $0x238] sm:$0xff] }
 0x587   : > { %6139 = vmatprep.subr.bf16.mxu1 %v6138_v31  ;;  %v6022_v36 = vpack.c.bf16 %v4202_v2, %v4198_v23  ;;  %v4206_v53 = vld [vmem:[#allocation14 + $0x9c8] sm:$0xff]  ;;  %v3960_v31 = vld [vmem:[#allocation14 + $0x218] sm:$0xff]  ;;  %v4213_v34 = vld [vmem:[#allocation14 + $0xa00] sm:$0xff] }
 0x588   : > { %6009 = vmatpush1.bf16.msra.mxu0 %v6008_v18  ;;  %v4210_v51 = vld [vmem:[#allocation14 + $0x9e8] sm:$0xff]  ;;  %v4209_v18 = vld [vmem:[#allocation14 + $0x9e0] sm:$0xff]  ;;  %v6158_v42 = vpack.c.bf16 %v3964_v57, %v3960_v31  ;;  %v3959_v29 = vld [vmem:[#allocation14 + $0x210] sm:$0xff] }
 0x589   : > { %6011 = vmatprep.subr.bf16.mxu0 %v6010_v20  ;;  %v6026_v32 = vpack.c.bf16 %v4210_v51, %v4206_v53  ;;  %v4214_v3 = vld [vmem:[#allocation14 + $0xa08] sm:$0xff]  ;;  %v6156_v20 = vpack.c.bf16 %v3955_v43, %v3951_v54  ;;  %v6028_v16 = vpack.c.bf16 %v4209_v18, %v4205_v35  ;;  %v3963_v10 = vld [vmem:[#allocation14 + $0x230] sm:$0xff]  ;;  %v3972_v33 = vld [vmem:[#allocation14 + $0x278] sm:$0xff] }
 0x58a   : > { %6141 = vmatpush1.bf16.msra.mxu1 %v6140_v15  ;;  %v4218_v14 = vld [vmem:[#allocation14 + $0xa28] sm:$0xff]  ;;  %v4221_v52 = vld [vmem:[#allocation14 + $0xa40] sm:$0xff]  ;;  %v3967_v1 = vld [vmem:[#allocation14 + $0x250] sm:$0xff] }
 0x58b   : > { %6143 = vmatprep.subr.bf16.mxu1 %v6142_v45  ;;  %v6030_v15 = vpack.c.bf16 %v4218_v14, %v4214_v3  ;;  %v3968_v45 = vld [vmem:[#allocation14 + $0x258] sm:$0xff]  ;;  %v4222_v37 = vld [vmem:[#allocation14 + $0xa48] sm:$0xff]  ;;  %v3971_v58 = vld [vmem:[#allocation14 + $0x270] sm:$0xff] }
 0x58c   : > { %6013 = vmatpush1.bf16.msra.mxu0 %v6012_v27  ;;  %v4217_v27 = vld [vmem:[#allocation14 + $0xa20] sm:$0xff]  ;;  %v4226_v55 = vld [vmem:[#allocation14 + $0xa68] sm:$0xff]  ;;  %v6162_v21 = vpack.c.bf16 %v3972_v33, %v3968_v45  ;;  %v3980_v26 = vld [vmem:[#allocation14 + $0x2b8] sm:$0xff] }
 0x58d   : > { %6015 = vmatprep.subr.bf16.mxu0 %v6014_v22  ;;  %v6160_v22 = vpack.c.bf16 %v3963_v10, %v3959_v29  ;;  %v6032_v11 = vpack.c.bf16 %v4217_v27, %v4213_v34  ;;  %v4230_v38 = vld [vmem:[#allocation14 + $0xa88] sm:$0xff]  ;;  %v4229_v19 = vld [vmem:[#allocation14 + $0xa80] sm:$0xff]  ;;  %v3975_v23 = vld [vmem:[#allocation14 + $0x290] sm:$0xff] }
 0x58e   : > { %6145 = vmatpush1.bf16.msra.mxu1 %v6144_v50  ;;  %v6034_v50 = vpack.c.bf16 %v4226_v55, %v4222_v37  ;;  %v4234_v48 = vld [vmem:[#allocation14 + $0xaa8] sm:$0xff]  ;;  %v3979_v2 = vld [vmem:[#allocation14 + $0x2b0] sm:$0xff]  ;;  %v3988_v63 = vld [vmem:[#allocation14 + $0x2f8] sm:$0xff] }
 0x58f   : > { %6147 = vmatprep.subr.bf16.mxu1 %v6146_v56  ;;  %v3976_v56 = vld [vmem:[#allocation14 + $0x298] sm:$0xff]  ;;  %v4238_v46 = vld [vmem:[#allocation14 + $0xac8] sm:$0xff]  ;;  %v4237_v30 = vld [vmem:[#allocation14 + $0xac0] sm:$0xff] }
 0x590   : > { %6017 = vmatpush1.bf16.msra.mxu0 %v6016_v49  ;;  %v4225_v49 = vld [vmem:[#allocation14 + $0xa60] sm:$0xff]  ;;  %v6166_v24 = vpack.c.bf16 %v3980_v26, %v3976_v56  ;;  %v4242_v9 = vld [vmem:[#allocation14 + $0xae8] sm:$0xff]  ;;  %v3983_v53 = vld [vmem:[#allocation14 + $0x2d0] sm:$0xff] }
 0x591   : > { %6019 = vmatprep.subr.bf16.mxu0 %v6018_v0  ;;  %v6164_v0 = vpack.c.bf16 %v3971_v58, %v3967_v1  ;;  %v6036_v28 = vpack.c.bf16 %v4225_v49, %v4221_v52  ;;  %v3987_v51 = vld [vmem:[#allocation14 + $0x2f0] sm:$0xff]  ;;  %v3996_v35 = vld [vmem:[#allocation14 + $0x338] sm:$0xff]  ;;  %v4246_v54 = vld [vmem:[#allocation14 + $0xb08] sm:$0xff] }
 0x592   : > { %6149 = vmatpush1.bf16.msra.mxu1 %v6148_v47  ;;  %v6038_v47 = vpack.c.bf16 %v4234_v48, %v4230_v38  ;;  %v4250_v43 = vld [vmem:[#allocation14 + $0xb28] sm:$0xff]  ;;  %v4245_v57 = vld [vmem:[#allocation14 + $0xb00] sm:$0xff]  ;;  %v3991_v3 = vld [vmem:[#allocation14 + $0x310] sm:$0xff] }
 0x593   : > { %6151 = vmatprep.subr.bf16.mxu1 %v6150_v12  ;;  %v3984_v12 = vld [vmem:[#allocation14 + $0x2d8] sm:$0xff]  ;;  %v3995_v14 = vld [vmem:[#allocation14 + $0x330] sm:$0xff]  ;;  %v4254_v29 = vld [vmem:[#allocation14 + $0xb48] sm:$0xff] }
 0x594   : > { %6021 = vmatpush1.bf16.msra.mxu0 %v6020_v17  ;;  %v4233_v17 = vld [vmem:[#allocation14 + $0xaa0] sm:$0xff]  ;;  %v6170_v59 = vpack.c.bf16 %v3988_v63, %v3984_v12  ;;  %v4004_v34 = vld [vmem:[#allocation14 + $0x378] sm:$0xff]  ;;  %v4258_v10 = vld [vmem:[#allocation14 + $0xb68] sm:$0xff] }
 0x595   : > { %6023 = vmatprep.subr.bf16.mxu0 %v6022_v36  ;;  %v6168_v36 = vpack.c.bf16 %v3979_v2, %v3975_v23  ;;  %v6040_v5 = vpack.c.bf16 %v4233_v17, %v4229_v19  ;;  %v4253_v33 = vld [vmem:[#allocation14 + $0xb40] sm:$0xff]  ;;  %v3999_v37 = vld [vmem:[#allocation14 + $0x350] sm:$0xff]  ;;  %v4012_v52 = vld [vmem:[#allocation14 + $0x3b8] sm:$0xff] }
 0x596   : > { %6153 = vmatpush1.bf16.msra.mxu1 %v6152_v39  ;;  %v6042_v39 = vpack.c.bf16 %v4242_v9, %v4238_v46  ;;  %v4003_v55 = vld [vmem:[#allocation14 + $0x370] sm:$0xff]  ;;  %v4262_v1 = vld [vmem:[#allocation14 + $0xb88] sm:$0xff]  ;;  %v4261_v26 = vld [vmem:[#allocation14 + $0xb80] sm:$0xff] }
 0x597   : > { %6155 = vmatprep.subr.bf16.mxu1 %v6154_v44  ;;  %v3992_v44 = vld [vmem:[#allocation14 + $0x318] sm:$0xff]  ;;  %v4266_v58 = vld [vmem:[#allocation14 + $0xba8] sm:$0xff]  ;;  %v4007_v38 = vld [vmem:[#allocation14 + $0x390] sm:$0xff] }
 0x598   : > { %6025 = vmatpush1.bf16.msra.mxu0 %v6024_v8  ;;  %v4241_v8 = vld [vmem:[#allocation14 + $0xae0] sm:$0xff]  ;;  %v6174_v31 = vpack.c.bf16 %v3996_v35, %v3992_v44  ;;  %v4011_v48 = vld [vmem:[#allocation14 + $0x3b0] sm:$0xff]  ;;  %v4020_v19 = vld [vmem:[#allocation14 + $0x3f8] sm:$0xff] }
 0x599   : > { %6027 = vmatprep.subr.bf16.mxu0 %v6026_v32  ;;  %v6172_v32 = vpack.c.bf16 %v3987_v51, %v3983_v53  ;;  %v6044_v18 = vpack.c.bf16 %v4241_v8, %v4237_v30  ;;  %v4270_v23 = vld [vmem:[#allocation14 + $0xbc8] sm:$0xff]  ;;  %v4269_v63 = vld [vmem:[#allocation14 + $0xbc0] sm:$0xff]  ;;  %v4015_v46 = vld [vmem:[#allocation14 + $0x3d0] sm:$0xff] }
 0x59a   : > { %6157 = vmatpush1.bf16.msra.mxu1 %v6156_v20  ;;  %v6046_v20 = vpack.c.bf16 %v4250_v43, %v4246_v54  ;;  %v4274_v2 = vld [vmem:[#allocation14 + $0xbe8] sm:$0xff]  ;;  %v4019_v9 = vld [vmem:[#allocation14 + $0x3f0] sm:$0xff]  ;;  %v4028_v30 = vld [vmem:[#allocation14 + $0x438] sm:$0xff] }
 0x59b   : > { %6159 = vmatprep.subr.bf16.mxu1 %v6158_v42  ;;  %v4000_v42 = vld [vmem:[#allocation14 + $0x358] sm:$0xff]  ;;  %v4278_v53 = vld [vmem:[#allocation14 + $0xc08] sm:$0xff]  ;;  %v4277_v35 = vld [vmem:[#allocation14 + $0xc00] sm:$0xff] }
 0x59c   : > { %6029 = vmatpush1.bf16.msra.mxu0 %v6028_v16  ;;  %v4249_v16 = vld [vmem:[#allocation14 + $0xb20] sm:$0xff]  ;;  %v6178_v45 = vpack.c.bf16 %v4004_v34, %v4000_v42  ;;  %v4282_v51 = vld [vmem:[#allocation14 + $0xc28] sm:$0xff]  ;;  %v4023_v54 = vld [vmem:[#allocation14 + $0x410] sm:$0xff] }
 0x59d   : > { %6031 = vmatprep.subr.bf16.mxu0 %v6030_v15  ;;  %v6176_v15 = vpack.c.bf16 %v3995_v14, %v3991_v3  ;;  %v6048_v27 = vpack.c.bf16 %v4249_v16, %v4245_v57  ;;  %v4027_v43 = vld [vmem:[#allocation14 + $0x430] sm:$0xff]  ;;  %v4036_v57 = vld [vmem:[#allocation14 + $0x478] sm:$0xff]  ;;  %v4286_v3 = vld [vmem:[#allocation14 + $0xc48] sm:$0xff] }
 0x59e   : > { %6161 = vmatpush1.bf16.msra.mxu1 %v6160_v22  ;;  %v6050_v22 = vpack.c.bf16 %v4258_v10, %v4254_v29  ;;  %v4290_v14 = vld [vmem:[#allocation14 + $0xc68] sm:$0xff]  ;;  %v6192_v42 = vpack.c.bf16 %v4027_v43, %v4023_v54  ;;  %v4285_v10 = vld [vmem:[#allocation14 + $0xc40] sm:$0xff]  ;;  %v4068_v54 = vld [vmem:[#allocation14 + $0x578] sm:$0xff] }
 0x59f   : > { %6163 = vmatprep.subr.bf16.mxu1 %v6162_v21  ;;  %v4008_v21 = vld [vmem:[#allocation14 + $0x398] sm:$0xff]  ;;  %v4318_v43 = vld [vmem:[#allocation14 + $0xd48] sm:$0xff] }
 0x5a0   : > { %6033 = vmatpush1.bf16.msra.mxu0 %v6032_v11  ;;  %v4257_v11 = vld [vmem:[#allocation14 + $0xb60] sm:$0xff]  ;;  %v6182_v56 = vpack.c.bf16 %v4012_v52, %v4008_v21  ;;  %v4294_v21 = vld [vmem:[#allocation14 + $0xc88] sm:$0xff] }
 0x5a1   : > { %6035 = vmatprep.subr.bf16.mxu0 %v6034_v50  ;;  %v6180_v50 = vpack.c.bf16 %v4003_v55, %v3999_v37  ;;  %v6052_v49 = vpack.c.bf16 %v4257_v11, %v4253_v33  ;;  %v4289_v33 = vld [vmem:[#allocation14 + $0xc60] sm:$0xff]  ;;  %v4040_v37 = vld [vmem:[#allocation14 + $0x498] sm:$0xff]  ;;  %v4298_v52 = vld [vmem:[#allocation14 + $0xca8] sm:$0xff] }
 0x5a2   : > { %6165 = vmatpush1.bf16.msra.mxu1 %v6164_v0  ;;  %v6054_v0 = vpack.c.bf16 %v4266_v58, %v4262_v1  ;;  %v4044_v55 = vld [vmem:[#allocation14 + $0x4b8] sm:$0xff]  ;;  %v6068_v58 = vpack.c.bf16 %v4289_v33, %v4285_v10 }
 0x5a3   : > { %6167 = vmatprep.subr.bf16.mxu1 %v6166_v24  ;;  %v4016_v24 = vld [vmem:[#allocation14 + $0x3d8] sm:$0xff] }
 0x5a4   : > { %6037 = vmatpush1.bf16.msra.mxu0 %v6036_v28  ;;  %v4265_v28 = vld [vmem:[#allocation14 + $0xba0] sm:$0xff]  ;;  %v6186_v12 = vpack.c.bf16 %v4020_v19, %v4016_v24  ;;  %v4076_v10 = vld [vmem:[#allocation14 + $0x5b8] sm:$0xff] }
 0x5a5   : > { %6039 = vmatprep.subr.bf16.mxu0 %v6038_v47  ;;  %v6184_v47 = vpack.c.bf16 %v4011_v48, %v4007_v38  ;;  %v6056_v17 = vpack.c.bf16 %v4265_v28, %v4261_v26  ;;  %v4043_v26 = vld [vmem:[#allocation14 + $0x4b0] sm:$0xff]  ;;  %v6070_v38 = vpack.c.bf16 %v4298_v52, %v4294_v21  ;;  %v4297_v48 = vld [vmem:[#allocation14 + $0xca0] sm:$0xff]  ;;  %v4306_v28 = vld [vmem:[#allocation14 + $0xce8] sm:$0xff] }
 0x5a6   : > { %6169 = vmatpush1.bf16.msra.mxu1 %v6168_v36  ;;  %v6058_v36 = vpack.c.bf16 %v4274_v2, %v4270_v23  ;;  %v4301_v2 = vld [vmem:[#allocation14 + $0xcc0] sm:$0xff]  ;;  %v4075_v21 = vld [vmem:[#allocation14 + $0x5b0] sm:$0xff] }
 0x5a7   : > { %6171 = vmatprep.subr.bf16.mxu1 %v6170_v59  ;;  %v4024_v59 = vld [vmem:[#allocation14 + $0x418] sm:$0xff] }
 0x5a8   : > { %6041 = vmatpush1.bf16.msra.mxu0 %v6040_v5  ;;  %v4273_v5 = vld [vmem:[#allocation14 + $0xbe0] sm:$0xff]  ;;  %v6190_v44 = vpack.c.bf16 %v4028_v30, %v4024_v59 }
 0x5a9   : > { %6043 = vmatprep.subr.bf16.mxu0 %v6042_v39  ;;  %v6188_v39 = vpack.c.bf16 %v4019_v9, %v4015_v46  ;;  %v6060_v8 = vpack.c.bf16 %v4273_v5, %v4269_v63  ;;  %v4305_v63 = vld [vmem:[#allocation14 + $0xce0] sm:$0xff]  ;;  %v4056_v46 = vld [vmem:[#allocation14 + $0x518] sm:$0xff]  ;;  %v4314_v5 = vld [vmem:[#allocation14 + $0xd28] sm:$0xff] }
 0x5aa   : > { %6173 = vmatpush1.bf16.msra.mxu1 %v6172_v32  ;;  %v6062_v32 = vpack.c.bf16 %v4282_v51, %v4278_v53  ;;  %v4060_v9 = vld [vmem:[#allocation14 + $0x538] sm:$0xff]  ;;  %v4309_v53 = vld [vmem:[#allocation14 + $0xd00] sm:$0xff]  ;;  %v4055_v51 = vld [vmem:[#allocation14 + $0x510] sm:$0xff] }
 0x5ab   : > { %6175 = vmatprep.subr.bf16.mxu1 %v6174_v31  ;;  %v4032_v31 = vld [vmem:[#allocation14 + $0x458] sm:$0xff]  ;;  %v6206_v30 = vpack.c.bf16 %v4060_v9, %v4056_v46  ;;  %v4341_v46 = vld [vmem:[#allocation14 + $0xe00] sm:$0xff]  ;;  %v4087_v9 = vld [vmem:[#allocation14 + $0x610] sm:$0xff] }
 0x5ac   : > { %6045 = vmatpush1.bf16.msra.mxu0 %v6044_v18  ;;  %v4281_v18 = vld [vmem:[#allocation14 + $0xc20] sm:$0xff]  ;;  %v6194_v29 = vpack.c.bf16 %v4036_v57, %v4032_v31 }
 0x5ad   : > { %6047 = vmatprep.subr.bf16.mxu0 %v6046_v20  ;;  %v9474_v20 = vsub.s32 4, %v9472_v7  ;;  %v6064_v34 = vpack.c.bf16 %v4281_v18, %v4277_v35  ;;  %v4064_v35 = vld [vmem:[#allocation14 + $0x558] sm:$0xff] }
 0x5ae   : > { %6177 = vmatpush1.bf16.msra.mxu1 %v6176_v15  ;;  %v4031_v15 = vld [vmem:[#allocation14 + $0x450] sm:$0xff]  ;;  %v6210_v57 = vpack.c.bf16 %v4068_v54, %v4064_v35  ;;  %v4349_v35 = vld [vmem:[#allocation14 + $0xe40] sm:$0xff] }
 0x5af   : > { %6179 = vmatprep.subr.bf16.mxu1 %v6178_v45  ;;  %v9144_v16 = vrot.slane %v9112_v25, %v9474_v20  ;;  %v6066_v45 = vpack.c.bf16 %v4290_v14, %v4286_v3  ;;  %v4317_v3 = vld [vmem:[#allocation14 + $0xd40] sm:$0xff]  ;;  %v4063_v14 = vld [vmem:[#allocation14 + $0x550] sm:$0xff] }
 0x5b0   : > { %6049 = vmatpush1.bf16.msra.mxu0 %v6048_v27  ;;  %v4035_v27 = vld [vmem:[#allocation14 + $0x470] sm:$0xff] }
 0x5b1   : > { %6051 = vmatprep.subr.bf16.mxu0 %v6050_v22  ;;  %v9475_v22 = vsub.s32 7, %v9472_v7  ;;  %v6196_v1 = vpack.c.bf16 %v4035_v27, %v4031_v15  ;;  %v4067_v20 = vld [vmem:[#allocation14 + $0x570] sm:$0xff]  ;;  %v4326_v15 = vld [vmem:[#allocation14 + $0xd88] sm:$0xff] }
 0x5b2   : > { %6181 = vmatpush1.bf16.msra.mxu1 %v6180_v50  ;;  %v6198_v50 = vpack.c.bf16 %v4044_v55, %v4040_v37  ;;  %v4330_v27 = vld [vmem:[#allocation14 + $0xda8] sm:$0xff]  ;;  %v4325_v55 = vld [vmem:[#allocation14 + $0xd80] sm:$0xff]  ;;  %v4095_v54 = vld [vmem:[#allocation14 + $0x650] sm:$0xff] }
 0x5b3   : > { %6183 = vmatprep.subr.bf16.mxu1 %v6182_v56  ;;  %v9149_v11 = vrot.slane %v9112_v25, %v9475_v22  ;;  %v4039_v56 = vld [vmem:[#allocation14 + $0x490] sm:$0xff]  ;;  %v4048_v25 = vld [vmem:[#allocation14 + $0x4d8] sm:$0xff]  ;;  %v6086_v52 = vpack.c.bf16 %v4330_v27, %v4326_v15 }
 0x5b4   : > { %6053 = vmatpush1.bf16.msra.mxu0 %v6052_v49  ;;  %v4293_v49 = vld [vmem:[#allocation14 + $0xc80] sm:$0xff]  ;;  %v6200_v24 = vpack.c.bf16 %v4043_v26, %v4039_v56  ;;  %v4071_v22 = vld [vmem:[#allocation14 + $0x590] sm:$0xff]  ;;  %v4338_v56 = vld [vmem:[#allocation14 + $0xde8] sm:$0xff] }
 0x5b5   : > { %6055 = vmatprep.subr.bf16.mxu0 %v6054_v0  ;;  %v4052_v0 = vld [vmem:[#allocation14 + $0x4f8] sm:$0xff]  ;;  %v6072_v19 = vpack.c.bf16 %v4297_v48, %v4293_v49  ;;  %v4334_v49 = vld [vmem:[#allocation14 + $0xdc8] sm:$0xff]  ;;  %v6216_v26 = vpack.c.bf16 %v4075_v21, %v4071_v22  ;;  %v4107_v15 = vld [vmem:[#allocation14 + $0x6b0] sm:$0xff] }
 0x5b6   : > { %6185 = vmatpush1.bf16.msra.mxu1 %v6184_v47  ;;  %v6202_v23 = vpack.c.bf16 %v4052_v0, %v4048_v25  ;;  %v4047_v47 = vld [vmem:[#allocation14 + $0x4d0] sm:$0xff]  ;;  %v4333_v25 = vld [vmem:[#allocation14 + $0xdc0] sm:$0xff]  ;;  %v4370_v22 = vld [vmem:[#allocation14 + $0xee8] sm:$0xff] }
 0x5b7   : > { %6187 = vmatprep.subr.bf16.mxu1 %v6186_v12  ;;  %v4079_v0 = vld [vmem:[#allocation14 + $0x5d0] sm:$0xff] }
 0x5b8   : > { %6057 = vmatpush1.bf16.msra.mxu0 %v6056_v17  ;;  %v4051_v17 = vld [vmem:[#allocation14 + $0x4f0] sm:$0xff] }
 0x5b9   : > { %6059 = vmatprep.subr.bf16.mxu0 %v6058_v36  ;;  %v4310_v36 = vld [vmem:[#allocation14 + $0xd08] sm:$0xff]  ;;  %v6204_v59 = vpack.c.bf16 %v4051_v17, %v4047_v47 }
 0x5ba   : > { %6189 = vmatpush1.bf16.msra.mxu1 %v6188_v39  ;;  %v4059_v39 = vld [vmem:[#allocation14 + $0x530] sm:$0xff]  ;;  %v4346_v47 = vld [vmem:[#allocation14 + $0xe28] sm:$0xff] }
 0x5bb   : > { %6191 = vmatprep.subr.bf16.mxu1 %v6190_v44  ;;  %v4313_v44 = vld [vmem:[#allocation14 + $0xd20] sm:$0xff]  ;;  %v6208_v18 = vpack.c.bf16 %v4059_v39, %v4055_v51  ;;  %v4354_v51 = vld [vmem:[#allocation14 + $0xe68] sm:$0xff] }
 0x5bc   : > { %6061 = vmatpush1.bf16.msra.mxu0 %v6060_v8  ;;  %v6078_v8 = vpack.c.bf16 %v4314_v5, %v4310_v36  ;;  %v6080_v31 = vpack.c.bf16 %v4313_v44, %v4309_v53  ;;  %v4091_v36 = vld [vmem:[#allocation14 + $0x630] sm:$0xff]  ;;  %v4350_v53 = vld [vmem:[#allocation14 + $0xe48] sm:$0xff] }
 0x5bd   : > { %6063 = vmatprep.subr.bf16.mxu0 %v6062_v32  ;;  %4817 = vmatmul.mubr.f32.vlgmr.msra.gmra.mrb[2].mxu1 %v9126_v41  ;;  %v4302_v41 = vld [vmem:[#allocation14 + $0xcc8] sm:$0xff]  ;;  %v6224_v39 = vpack.c.bf16 %v4091_v36, %v4087_v9 }
 0x5be   : > { %6193 = vmatpush1.bf16.msra.mxu1 %v6192_v42  ;;  %4887 = vmatprep.mubr.f32.mxu1 %v9120_v6  ;;  %v6074_v12 = vpack.c.bf16 %v4306_v28, %v4302_v41  ;;  %v6076_v6 = vpack.c.bf16 %v4305_v63, %v4301_v2  ;;  %v4322_v32 = vld [vmem:[#allocation14 + $0xd68] sm:$0xff]  ;;  %v4083_v41 = vld [vmem:[#allocation14 + $0x5f0] sm:$0xff]  ;;  %v6090_v28 = vpack.c.bf16 %v4338_v56, %v4334_v49 }
 0x5bf   : > { %4675 = vmatmul.mubr.f32.vlgmr.msra.gmra.mrb[0].mxu0 %v9144_v16  ;;  %6195 = vmatprep.subr.bf16.mxu1 %v6194_v29  ;;  %v6082_v42 = vpack.c.bf16 %v4322_v32, %v4318_v43  ;;  %v4072_v29 = vld [vmem:[#allocation14 + $0x598] sm:$0xff]  ;;  %v4342_v2 = vld [vmem:[#allocation14 + $0xe08] sm:$0xff]  ;;  %v6220_v17 = vpack.c.bf16 %v4083_v41, %v4079_v0  ;;  %v4099_v43 = vld [vmem:[#allocation14 + $0x670] sm:$0xff]  ;;  %v6098_v32 = vpack.c.bf16 %v4354_v51, %v4350_v53 }
 0x5c0   : > { %6065 = vmatpush1.bf16.msra.mxu0 %v6064_v34  ;;  %4745 = vmatprep.mubr.f32.mxu0 %v9149_v11  ;;  %v4321_v34 = vld [vmem:[#allocation14 + $0xd60] sm:$0xff]  ;;  %v6214_v37 = vpack.c.bf16 %v4076_v10, %v4072_v29  ;;  %v6094_v5 = vpack.c.bf16 %v4346_v47, %v4342_v2  ;;  %v4103_v10 = vld [vmem:[#allocation14 + $0x690] sm:$0xff]  ;;  %v4378_v0 = vld [vmem:[#allocation14 + $0xf28] sm:$0xff] }
 0x5c1   : > { %6067 = vmatprep.subr.bf16.mxu0 %v6066_v45  ;;  %v6212_v45 = vpack.c.bf16 %v4067_v20, %v4063_v14  ;;  %v6084_v33 = vpack.c.bf16 %v4321_v34, %v4317_v3  ;;  %v4358_v3 = vld [vmem:[#allocation14 + $0xe88] sm:$0xff]  ;;  %v6228_v20 = vpack.c.bf16 %v4099_v43, %v4095_v54  ;;  %v4357_v29 = vld [vmem:[#allocation14 + $0xe80] sm:$0xff]  ;;  %v6232_v21 = vpack.c.bf16 %v4107_v15, %v4103_v10  ;;  %v4115_v49 = vld [vmem:[#allocation14 + $0x6f0] sm:$0xff] }
 0x5c2   : > { %6197 = vmatpush1.bf16.msra.mxu1 %v6196_v1  ;;  %v4329_v1 = vld [vmem:[#allocation14 + $0xda0] sm:$0xff]  ;;  %v4362_v14 = vld [vmem:[#allocation14 + $0xea8] sm:$0xff]  ;;  %v4123_v2 = vld [vmem:[#allocation14 + $0x730] sm:$0xff] }
 0x5c3   : > { %6199 = vmatprep.subr.bf16.mxu1 %v6198_v50  ;;  %v4084_v50 = vld [vmem:[#allocation14 + $0x5f8] sm:$0xff]  ;;  %v6102_v27 = vpack.c.bf16 %v4362_v14, %v4358_v3  ;;  %v4386_v9 = vld [vmem:[#allocation14 + $0xf68] sm:$0xff]  ;;  %v4131_v53 = vld [vmem:[#allocation14 + $0x770] sm:$0xff] }
 0x5c4   : > { %6069 = vmatpush1.bf16.msra.mxu0 %v6068_v58  ;;  %v4080_v58 = vld [vmem:[#allocation14 + $0x5d8] sm:$0xff]  ;;  %v4394_v54 = vld [vmem:[#allocation14 + $0xfa8] sm:$0xff]  ;;  %v4139_v3 = vld [vmem:[#allocation14 + $0x7b0] sm:$0xff] }
 0x5c5   : > { %6071 = vmatprep.subr.bf16.mxu0 %v6070_v38  ;;  %v6088_v38 = vpack.c.bf16 %v4329_v1, %v4325_v55  ;;  %v6218_v48 = vpack.c.bf16 %v4084_v50, %v4080_v58  ;;  %v4366_v55 = vld [vmem:[#allocation14 + $0xec8] sm:$0xff]  ;;  %v4365_v58 = vld [vmem:[#allocation14 + $0xec0] sm:$0xff]  ;;  %v4111_v50 = vld [vmem:[#allocation14 + $0x6d0] sm:$0xff] }
 0x5c6   : > { %6201 = vmatpush1.bf16.msra.mxu1 %v6200_v24  ;;  %v4337_v24 = vld [vmem:[#allocation14 + $0xde0] sm:$0xff]  ;;  %v6106_v56 = vpack.c.bf16 %v4370_v22, %v4366_v55  ;;  %v6236_v41 = vpack.c.bf16 %v4115_v49, %v4111_v50  ;;  %v4402_v10 = vld [vmem:[#allocation14 + $0xfe8] sm:$0xff]  ;;  %v4147_v55 = vld [vmem:[#allocation14 + $0x7f0] sm:$0xff] }
 0x5c7   : > { %6203 = vmatprep.subr.bf16.mxu1 %v6202_v23  ;;  %v4092_v23 = vld [vmem:[#allocation14 + $0x638] sm:$0xff] }
 0x5c8   : > { %6073 = vmatpush1.bf16.msra.mxu0 %v6072_v19  ;;  %v4088_v19 = vld [vmem:[#allocation14 + $0x618] sm:$0xff] }
 0x5c9   : > { %6075 = vmatprep.subr.bf16.mxu0 %v6074_v12  ;;  %v6092_v12 = vpack.c.bf16 %v4337_v24, %v4333_v25  ;;  %v6222_v63 = vpack.c.bf16 %v4092_v23, %v4088_v19  ;;  %v4374_v25 = vld [vmem:[#allocation14 + $0xf08] sm:$0xff]  ;;  %v4373_v19 = vld [vmem:[#allocation14 + $0xf00] sm:$0xff]  ;;  %v4119_v23 = vld [vmem:[#allocation14 + $0x710] sm:$0xff] }
 0x5ca   : > { %6205 = vmatpush1.bf16.msra.mxu1 %v6204_v59  ;;  %v4345_v59 = vld [vmem:[#allocation14 + $0xe20] sm:$0xff]  ;;  %v6110_v47 = vpack.c.bf16 %v4378_v0, %v4374_v25  ;;  %v6240_v36 = vpack.c.bf16 %v4123_v2, %v4119_v23  ;;  %v6765_v25 = vld [vmem:[#allocation2] sm:$0xff]  ;;  %v9476_v0 = vsub.s32 6, %v9472_v7  ;;  %v4163_v23 = vld [vmem:[#allocation14 + $0x870] sm:$0xff] }
 0x5cb   : > { %6207 = vmatprep.subr.bf16.mxu1 %v6206_v30  ;;  %v4100_v30 = vld [vmem:[#allocation14 + $0x678] sm:$0xff] }
 0x5cc   : > { %6077 = vmatpush1.bf16.msra.mxu0 %v6076_v6  ;;  %v4096_v6 = vld [vmem:[#allocation14 + $0x658] sm:$0xff] }
 0x5cd   : > { %6079 = vmatprep.subr.bf16.mxu0 %v6078_v8  ;;  %v6096_v8 = vpack.c.bf16 %v4345_v59, %v4341_v46  ;;  %v6226_v44 = vpack.c.bf16 %v4100_v30, %v4096_v6  ;;  %v4382_v46 = vld [vmem:[#allocation14 + $0xf48] sm:$0xff]  ;;  %v4381_v6 = vld [vmem:[#allocation14 + $0xf40] sm:$0xff]  ;;  %v4127_v30 = vld [vmem:[#allocation14 + $0x750] sm:$0xff] }
 0x5ce   : > { %6209 = vmatpush1.bf16.msra.mxu1 %v6208_v18  ;;  %v4353_v18 = vld [vmem:[#allocation14 + $0xe60] sm:$0xff]  ;;  %v6114_v51 = vpack.c.bf16 %v4386_v9, %v4382_v46  ;;  %v6244_v43 = vpack.c.bf16 %v4131_v53, %v4127_v30  ;;  %v4168_v2 = vld [vmem:[#allocation14 + $0x898] sm:$0xff] }
 0x5cf   : > { %6211 = vmatprep.subr.bf16.mxu1 %v6210_v57  ;;  %v4108_v57 = vld [vmem:[#allocation14 + $0x6b8] sm:$0xff]  ;;  %v5040_v9 = vld [vmem:[#allocation17] sm:$0xff] }
 0x5d0   : > { %6081 = vmatpush1.bf16.msra.mxu0 %v6080_v31  ;;  %v4104_v31 = vld [vmem:[#allocation14 + $0x698] sm:$0xff] }
 0x5d1   : > { %6083 = vmatprep.subr.bf16.mxu0 %v6082_v42  ;;  %v6100_v42 = vpack.c.bf16 %v4353_v18, %v4349_v35  ;;  %v6230_v34 = vpack.c.bf16 %v4108_v57, %v4104_v31  ;;  %v4390_v35 = vld [vmem:[#allocation14 + $0xf88] sm:$0xff]  ;;  %v4389_v31 = vld [vmem:[#allocation14 + $0xf80] sm:$0xff]  ;;  %v4135_v57 = vld [vmem:[#allocation14 + $0x790] sm:$0xff] }
 0x5d2   : > { %6213 = vmatpush1.bf16.msra.mxu1 %v6212_v45  ;;  %v4361_v45 = vld [vmem:[#allocation14 + $0xea0] sm:$0xff]  ;;  %v6118_v14 = vpack.c.bf16 %v4394_v54, %v4390_v35  ;;  %v6248_v15 = vpack.c.bf16 %v4139_v3, %v4135_v57  ;;  %v4180_v35 = vld [vmem:[#allocation14 + $0x8f8] sm:$0xff] }
 0x5d3   : > { %6215 = vmatprep.subr.bf16.mxu1 %v6214_v37  ;;  %v4116_v37 = vld [vmem:[#allocation14 + $0x6f8] sm:$0xff]  ;;  %v5048_v57 = vld [vmem:[#allocation17 + $0x40] sm:$0xff] }
 0x5d4   : > { %6085 = vmatpush1.bf16.msra.mxu0 %v6084_v33  ;;  %v4112_v33 = vld [vmem:[#allocation14 + $0x6d8] sm:$0xff] }
 0x5d5   : > { %6087 = vmatprep.subr.bf16.mxu0 %v6086_v52  ;;  %v6104_v52 = vpack.c.bf16 %v4361_v45, %v4357_v29  ;;  %v6234_v1 = vpack.c.bf16 %v4116_v37, %v4112_v33  ;;  %v4398_v29 = vld [vmem:[#allocation14 + $0xfc8] sm:$0xff]  ;;  %v4397_v33 = vld [vmem:[#allocation14 + $0xfc0] sm:$0xff]  ;;  %v4143_v37 = vld [vmem:[#allocation14 + $0x7d0] sm:$0xff] }
 0x5d6   : > { %6217 = vmatpush1.bf16.msra.mxu1 %v6216_v26  ;;  %v4369_v26 = vld [vmem:[#allocation14 + $0xee0] sm:$0xff]  ;;  %v6122_v22 = vpack.c.bf16 %v4402_v10, %v4398_v29  ;;  %v5050_v3 = vld [vmem:[#allocation17 + $0x50] sm:$0xff] }
 0x5d7   : > { %6219 = vmatprep.subr.bf16.mxu1 %v6218_v48  ;;  %v4124_v48 = vld [vmem:[#allocation14 + $0x738] sm:$0xff]  ;;  %v6392_v10 = vpack.c.bf16 %v5050_v3, %v5048_v57  ;;  %v4215_v3 = vld [vmem:[#allocation14 + $0xa10] sm:$0xff] }
 0x5d8   : > { %6089 = vmatpush1.bf16.msra.mxu0 %v6088_v38  ;;  %v4120_v38 = vld [vmem:[#allocation14 + $0x718] sm:$0xff] }
 0x5d9   : > { %6091 = vmatprep.subr.bf16.mxu0 %v6090_v28  ;;  %v6108_v28 = vpack.c.bf16 %v4369_v26, %v4365_v58  ;;  %v6238_v24 = vpack.c.bf16 %v4124_v48, %v4120_v38  ;;  %v6252_v58 = vpack.c.bf16 %v4147_v55, %v4143_v37  ;;  %v4155_v26 = vld [vmem:[#allocation14 + $0x830] sm:$0xff]  ;;  %v4160_v38 = vld [vmem:[#allocation14 + $0x858] sm:$0xff] }
 0x5da   : > { %6221 = vmatpush1.bf16.msra.mxu1 %v6220_v17  ;;  %v4377_v17 = vld [vmem:[#allocation14 + $0xf20] sm:$0xff]  ;;  %v4164_v48 = vld [vmem:[#allocation14 + $0x878] sm:$0xff] }
 0x5db   : > { %6223 = vmatprep.subr.bf16.mxu1 %v6222_v63  ;;  %v4132_v63 = vld [vmem:[#allocation14 + $0x778] sm:$0xff] }
 0x5dc   : > { %6093 = vmatpush1.bf16.msra.mxu0 %v6092_v12  ;;  %v4128_v12 = vld [vmem:[#allocation14 + $0x758] sm:$0xff] }
 0x5dd   : > { %6095 = vmatprep.subr.bf16.mxu0 %v6094_v5  ;;  %v6112_v5 = vpack.c.bf16 %v4377_v17, %v4373_v19  ;;  %v6242_v59 = vpack.c.bf16 %v4132_v63, %v4128_v12  ;;  %v4159_v19 = vld [vmem:[#allocation14 + $0x850] sm:$0xff]  ;;  %v5043_v46 = vld [vmem:[#allocation17 + $0x18] sm:$0xff] }
 0x5de   : > { %6225 = vmatpush1.bf16.msra.mxu1 %v6224_v39  ;;  %v4385_v39 = vld [vmem:[#allocation14 + $0xf60] sm:$0xff]  ;;  %v4167_v17 = vld [vmem:[#allocation14 + $0x890] sm:$0xff]  ;;  %v6260_v7 = vpack.c.bf16 %v4163_v23, %v4159_v19  ;;  %v4188_v29 = vld [vmem:[#allocation14 + $0x938] sm:$0xff] }
 0x5df   : > { %6227 = vmatprep.subr.bf16.mxu1 %v6226_v44  ;;  %v4140_v44 = vld [vmem:[#allocation14 + $0x7b8] sm:$0xff]  ;;  %v4171_v12 = vld [vmem:[#allocation14 + $0x8b0] sm:$0xff] }
 0x5e0   : > { %6097 = vmatpush1.bf16.msra.mxu0 %v6096_v8  ;;  %v4136_v8 = vld [vmem:[#allocation14 + $0x798] sm:$0xff]  ;;  %v5041_v63 = vld [vmem:[#allocation17 + $0x8] sm:$0xff] }
 0x5e1   : > { %6099 = vmatprep.subr.bf16.mxu0 %v6098_v32  ;;  %v6116_v32 = vpack.c.bf16 %v4385_v39, %v4381_v6  ;;  %v6246_v18 = vpack.c.bf16 %v4140_v44, %v4136_v8  ;;  %v5047_v6 = vld [vmem:[#allocation17 + $0x38] sm:$0xff]  ;;  %v5046_v39 = vld [vmem:[#allocation17 + $0x30] sm:$0xff]  ;;  %v5049_v8 = vld [vmem:[#allocation17 + $0x48] sm:$0xff] }
 0x5e2   : > { %6229 = vmatpush1.bf16.msra.mxu1 %v6228_v20  ;;  %v4393_v20 = vld [vmem:[#allocation14 + $0xfa0] sm:$0xff]  ;;  %v4176_v44 = vld [vmem:[#allocation14 + $0x8d8] sm:$0xff] }
 0x5e3   : > { %6231 = vmatprep.subr.bf16.mxu1 %v6230_v34  ;;  %v4148_v34 = vld [vmem:[#allocation14 + $0x7f8] sm:$0xff] }
 0x5e4   : > { %6101 = vmatpush1.bf16.msra.mxu0 %v6100_v42  ;;  %v4144_v42 = vld [vmem:[#allocation14 + $0x7d8] sm:$0xff] }
 0x5e5   : > { %6103 = vmatprep.subr.bf16.mxu0 %v6102_v27  ;;  %v6120_v27 = vpack.c.bf16 %v4393_v20, %v4389_v31  ;;  %v6250_v45 = vpack.c.bf16 %v4148_v34, %v4144_v42  ;;  %v5051_v54 = vld [vmem:[#allocation17 + $0x58] sm:$0xff]  ;;  %v5053_v20 = vld [vmem:[#allocation17 + $0x68] sm:$0xff]  ;;  %v5054_v37 = vld [vmem:[#allocation17 + $0x70] sm:$0xff] }
 0x5e6   : > { %6233 = vmatpush1.bf16.msra.mxu1 %v6232_v21  ;;  %v4401_v21 = vld [vmem:[#allocation14 + $0xfe0] sm:$0xff]  ;;  %v6390_v31 = vpack.c.bf16 %v5051_v54, %v5049_v8  ;;  %v4184_v34 = vld [vmem:[#allocation14 + $0x918] sm:$0xff]  ;;  %v5069_v54 = vld [vmem:[#allocation17 + $0xe8] sm:$0xff] }
 0x5e7   : > { %6235 = vmatprep.subr.bf16.mxu1 %v6234_v1  ;;  %v4156_v1 = vld [vmem:[#allocation14 + $0x838] sm:$0xff]  ;;  %v6124_v50 = vpack.c.bf16 %v4401_v21, %v4397_v33  ;;  %v5052_v33 = vld [vmem:[#allocation17 + $0x60] sm:$0xff]  ;;  %v6270_v55 = vpack.c.bf16 %v4188_v29, %v4184_v34  ;;  %v5057_v21 = vld [vmem:[#allocation17 + $0x88] sm:$0xff] }
 0x5e8   : > { %6105 = vmatpush1.bf16.msra.mxu0 %v6104_v52  ;;  %v4152_v52 = vld [vmem:[#allocation14 + $0x818] sm:$0xff]  ;;  %v4219_v34 = vld [vmem:[#allocation14 + $0xa30] sm:$0xff] }
 0x5e9   : > { %6107 = vmatprep.subr.bf16.mxu0 %v6106_v56  ;;  %v6254_v49 = vpack.c.bf16 %v4156_v1, %v4152_v52  ;;  %v4151_v56 = vld [vmem:[#allocation14 + $0x810] sm:$0xff]  ;;  %v5055_v42 = vld [vmem:[#allocation17 + $0x78] sm:$0xff] }
 0x5ea   : > { %6237 = vmatpush1.bf16.msra.mxu1 %v6236_v41  ;;  %v9157_v41 = vrot.slane %v6765_v25, %v9476_v0  ;;  %v5059_v52 = vld [vmem:[#allocation17 + $0x98] sm:$0xff]  ;;  %v4195_v0 = vld [vmem:[#allocation14 + $0x970] sm:$0xff] }
 0x5eb   : > { %6239 = vmatprep.subr.bf16.mxu1 %v6238_v24  ;;  %v6258_v24 = vpack.c.bf16 %v4164_v48, %v4160_v38  ;;  %v4192_v1 = vld [vmem:[#allocation14 + $0x958] sm:$0xff]  ;;  %v5056_v38 = vld [vmem:[#allocation17 + $0x80] sm:$0xff]  ;;  %v5073_v29 = vld [vmem:[#allocation17 + $0x108] sm:$0xff] }
 0x5ec   : > { %6109 = vmatpush1.bf16.msra.mxu0 %v6108_v28  ;;  %v6256_v28 = vpack.c.bf16 %v4155_v26, %v4151_v56  ;;  %v4191_v56 = vld [vmem:[#allocation14 + $0x950] sm:$0xff]  ;;  %v6398_v26 = vpack.c.bf16 %v5059_v52, %v5057_v21  ;;  %v4200_v19 = vld [vmem:[#allocation14 + $0x998] sm:$0xff] }
 0x5ed   : > { %6111 = vmatprep.subr.bf16.mxu0 %v6110_v47  ;;  %v4172_v47 = vld [vmem:[#allocation14 + $0x8b8] sm:$0xff] }
 0x5ee   : > { %6241 = vmatpush1.bf16.msra.mxu1 %v6240_v36  ;;  %v6382_v36 = vpack.c.bf16 %v5043_v46, %v5041_v63  ;;  %v6262_v30 = vpack.c.bf16 %v4172_v47, %v4168_v2  ;;  %v5058_v48 = vld [vmem:[#allocation17 + $0x90] sm:$0xff]  ;;  %v6276_v47 = vpack.c.bf16 %v4195_v0, %v4191_v56  ;;  %v5060_v63 = vld [vmem:[#allocation17 + $0xa0] sm:$0xff] }
 0x5ef   : > { %6243 = vmatprep.subr.bf16.mxu1 %v6242_v59  ;;  %v5045_v59 = vld [vmem:[#allocation17 + $0x28] sm:$0xff]  ;;  %v4204_v23 = vld [vmem:[#allocation14 + $0x9b8] sm:$0xff]  ;;  %v6400_v2 = vpack.c.bf16 %v5058_v48, %v5056_v38  ;;  %v5076_v0 = vld [vmem:[#allocation17 + $0x120] sm:$0xff] }
 0x5f0   : > { %6113 = vmatpush1.bf16.msra.mxu0 %v6112_v5  ;;  %v5042_v5 = vld [vmem:[#allocation17 + $0x10] sm:$0xff] }
 0x5f1   : > { %6115 = vmatprep.subr.bf16.mxu0 %v6114_v51  ;;  %v6384_v53 = vpack.c.bf16 %v5042_v5, %v5040_v9  ;;  %v6386_v51 = vpack.c.bf16 %v5047_v6, %v5045_v59  ;;  %v5062_v46 = vld [vmem:[#allocation17 + $0xb0] sm:$0xff]  ;;  %v6278_v9 = vpack.c.bf16 %v4204_v23, %v4200_v19  ;;  %v5067_v5 = vld [vmem:[#allocation17 + $0xd8] sm:$0xff]  ;;  %v5081_v23 = vld [vmem:[#allocation17 + $0x148] sm:$0xff] }
 0x5f2   : > { %6245 = vmatpush1.bf16.msra.mxu1 %v6244_v43  ;;  %v4208_v59 = vld [vmem:[#allocation14 + $0x9d8] sm:$0xff]  ;;  %v4231_v48 = vld [vmem:[#allocation14 + $0xa90] sm:$0xff] }
 0x5f3   : > { %6247 = vmatprep.subr.bf16.mxu1 %v6246_v18  ;;  %v4175_v18 = vld [vmem:[#allocation14 + $0x8d0] sm:$0xff]  ;;  %v4212_v6 = vld [vmem:[#allocation14 + $0x9f8] sm:$0xff] }
 0x5f4   : > { %6117 = vmatpush1.bf16.msra.mxu0 %v6116_v32  ;;  %v6264_v32 = vpack.c.bf16 %v4171_v12, %v4167_v17  ;;  %v4199_v17 = vld [vmem:[#allocation14 + $0x990] sm:$0xff]  ;;  %v4236_v56 = vld [vmem:[#allocation14 + $0xab8] sm:$0xff] }
 0x5f5   : > { %6119 = vmatprep.subr.bf16.mxu0 %v6118_v14  ;;  %v4179_v14 = vld [vmem:[#allocation14 + $0x8f0] sm:$0xff] }
 0x5f6   : > { %6249 = vmatpush1.bf16.msra.mxu1 %v6248_v15  ;;  %v6268_v15 = vpack.c.bf16 %v4179_v14, %v4175_v18  ;;  %v5066_v8 = vld [vmem:[#allocation17 + $0xd0] sm:$0xff]  ;;  %v5068_v14 = vld [vmem:[#allocation17 + $0xe0] sm:$0xff] }
 0x5f7   : > { %6251 = vmatprep.subr.bf16.mxu1 %v6250_v45  ;;  %v6394_v45 = vpack.c.bf16 %v5055_v42, %v5053_v20  ;;  %v4220_v18 = vld [vmem:[#allocation14 + $0xa38] sm:$0xff]  ;;  %v4235_v19 = vld [vmem:[#allocation14 + $0xab0] sm:$0xff] }
 0x5f8   : > { %6121 = vmatpush1.bf16.msra.mxu0 %v6120_v27  ;;  %v4183_v27 = vld [vmem:[#allocation14 + $0x910] sm:$0xff] }
 0x5f9   : > { %6123 = vmatprep.subr.bf16.mxu0 %v6122_v22  ;;  %v4187_v22 = vld [vmem:[#allocation14 + $0x930] sm:$0xff] }
 0x5fa   : > { %6253 = vmatpush1.bf16.msra.mxu1 %v6252_v58  ;;  %v4196_v58 = vld [vmem:[#allocation14 + $0x978] sm:$0xff] }
 0x5fb   : > { %6255 = vmatprep.subr.bf16.mxu1 %v6254_v49  ;;  %v6272_v49 = vpack.c.bf16 %v4187_v22, %v4183_v27  ;;  %v6274_v25 = vpack.c.bf16 %v4196_v58, %v4192_v1  ;;  %v5070_v20 = vld [vmem:[#allocation17 + $0xf0] sm:$0xff]  ;;  %v5072_v22 = vld [vmem:[#allocation17 + $0x100] sm:$0xff]  ;;  %v5077_v58 = vld [vmem:[#allocation17 + $0x128] sm:$0xff] }
 0x5fc   : > { %6125 = vmatpush1.bf16.msra.mxu0 %v6124_v50  ;;  %v6396_v50 = vpack.c.bf16 %v5054_v37, %v5052_v33  ;;  %v4228_v27 = vld [vmem:[#allocation14 + $0xa78] sm:$0xff]  ;;  %v6288_v33 = vpack.c.bf16 %v4219_v34, %v4215_v3  ;;  %v4223_v37 = vld [vmem:[#allocation14 + $0xa50] sm:$0xff]  ;;  %v5088_v34 = vld [vmem:[#allocation17 + $0x180] sm:$0xff] }
 0x5fd   : > { %4888 = vmatmul.mubr.f32.vlgmr.msra.gmra.mrb[2].mxu1 %v9130_v61  ;;  %v5044_v61 = vld [vmem:[#allocation17 + $0x20] sm:$0xff]  ;;  %6383 = vmatprep.subr.bf16.mxu0 %v6382_v36  ;;  %v5065_v36 = vld [vmem:[#allocation17 + $0xc8] sm:$0xff]  ;;  %v5074_v21 = vld [vmem:[#allocation17 + $0x110] sm:$0xff] }
 0x5fe   : > { %6257 = vmatpush1.bf16.msra.mxu1 %v6256_v28  ;;  %4958 = vmatprep.mubr.f32.mxu1 %v9135_v40  ;;  %v6388_v43 = vpack.c.bf16 %v5046_v39, %v5044_v61  ;;  %v6266_v40 = vpack.c.bf16 %v4180_v35, %v4176_v44  ;;  %v5061_v28 = vld [vmem:[#allocation17 + $0xa8] sm:$0xff]  ;;  %v6406_v61 = vpack.c.bf16 %v5067_v5, %v5065_v36  ;;  %v5064_v39 = vld [vmem:[#allocation17 + $0xc0] sm:$0xff]  ;;  %v5082_v36 = vld [vmem:[#allocation17 + $0x150] sm:$0xff] }
 0x5ff   : > { %4746 = vmatmul.mubr.f32.vlgmr.msra.gmra.mrb[0].mxu0 %v9157_v41  ;;  %6259 = vmatprep.subr.bf16.mxu1 %v6258_v24  ;;  %v5063_v24 = vld [vmem:[#allocation17 + $0xb8] sm:$0xff]  ;;  %v6282_v44 = vpack.c.bf16 %v4212_v6, %v4208_v59  ;;  %v4211_v35 = vld [vmem:[#allocation14 + $0x9f0] sm:$0xff] }
 0x600   : > { %6385 = vmatpush1.bf16.msra.mxu0 %v6384_v53  ;;  %v6402_v12 = vpack.c.bf16 %v5063_v24, %v5061_v28  ;;  %v4227_v1 = vld [vmem:[#allocation14 + $0xa70] sm:$0xff]  ;;  %v4260_v3 = vld [vmem:[#allocation14 + $0xb78] sm:$0xff] }
 0x601   : > { %6387 = vmatprep.subr.bf16.mxu0 %v6386_v51  ;;  %v4207_v51 = vld [vmem:[#allocation14 + $0x9d0] sm:$0xff]  ;;  %v6292_v38 = vpack.c.bf16 %v4227_v1, %v4223_v37  ;;  %v4268_v37 = vld [vmem:[#allocation14 + $0xbb8] sm:$0xff]  ;;  %v5092_v1 = vld [vmem:[#allocation17 + $0x1a0] sm:$0xff] }
 0x602   : > { %6261 = vmatpush1.bf16.msra.mxu1 %v6260_v7  ;;  %v4203_v7 = vld [vmem:[#allocation14 + $0x9b0] sm:$0xff]  ;;  %v6284_v57 = vpack.c.bf16 %v4211_v35, %v4207_v51  ;;  %v4252_v51 = vld [vmem:[#allocation14 + $0xb38] sm:$0xff]  ;;  %v5084_v35 = vld [vmem:[#allocation17 + $0x160] sm:$0xff] }
 0x603   : > { %6263 = vmatprep.subr.bf16.mxu1 %v6262_v30  ;;  %v6404_v30 = vpack.c.bf16 %v5062_v46, %v5060_v63  ;;  %v6280_v53 = vpack.c.bf16 %v4203_v7, %v4199_v17  ;;  %v5078_v28 = vld [vmem:[#allocation17 + $0x130] sm:$0xff]  ;;  %v6296_v63 = vpack.c.bf16 %v4235_v19, %v4231_v48  ;;  %v5080_v7 = vld [vmem:[#allocation17 + $0x140] sm:$0xff]  ;;  %v5085_v6 = vld [vmem:[#allocation17 + $0x168] sm:$0xff] }
 0x604   : > { %6389 = vmatpush1.bf16.msra.mxu0 %v6388_v43  ;;  %v5071_v43 = vld [vmem:[#allocation17 + $0xf8] sm:$0xff]  ;;  %v4239_v46 = vld [vmem:[#allocation14 + $0xad0] sm:$0xff] }
 0x605   : > { %6391 = vmatprep.subr.bf16.mxu0 %v6390_v31  ;;  %v6408_v31 = vpack.c.bf16 %v5066_v8, %v5064_v39  ;;  %v4244_v17 = vld [vmem:[#allocation14 + $0xaf8] sm:$0xff]  ;;  %v4243_v59 = vld [vmem:[#allocation14 + $0xaf0] sm:$0xff] }
 0x606   : > { %6265 = vmatpush1.bf16.msra.mxu1 %v6264_v32  ;;  %v4216_v32 = vld [vmem:[#allocation14 + $0xa18] sm:$0xff]  ;;  %v6300_v39 = vpack.c.bf16 %v4243_v59, %v4239_v46  ;;  %v4247_v8 = vld [vmem:[#allocation14 + $0xb10] sm:$0xff] }
 0x607   : > { %6267 = vmatprep.subr.bf16.mxu1 %v6266_v40  ;;  %v6410_v40 = vpack.c.bf16 %v5071_v43, %v5069_v54  ;;  %v6286_v42 = vpack.c.bf16 %v4220_v18, %v4216_v32  ;;  %v5086_v54 = vld [vmem:[#allocation17 + $0x170] sm:$0xff]  ;;  %v5089_v18 = vld [vmem:[#allocation17 + $0x188] sm:$0xff] }
 0x608   : > { %6393 = vmatpush1.bf16.msra.mxu0 %v6392_v10  ;;  %v5075_v10 = vld [vmem:[#allocation17 + $0x118] sm:$0xff]  ;;  %v4251_v32 = vld [vmem:[#allocation14 + $0xb30] sm:$0xff] }
 0x609   : > { %6395 = vmatprep.subr.bf16.mxu0 %v6394_v45  ;;  %v6412_v45 = vpack.c.bf16 %v5070_v20, %v5068_v14  ;;  %v6304_v14 = vpack.c.bf16 %v4251_v32, %v4247_v8  ;;  %v4255_v20 = vld [vmem:[#allocation14 + $0xb50] sm:$0xff]  ;;  %v4276_v48 = vld [vmem:[#allocation14 + $0xbf8] sm:$0xff] }
 0x60a   : > { %6269 = vmatpush1.bf16.msra.mxu1 %v6268_v15  ;;  %v4224_v15 = vld [vmem:[#allocation14 + $0xa58] sm:$0xff]  ;;  %v4271_v19 = vld [vmem:[#allocation14 + $0xbd0] sm:$0xff] }
 0x60b   : > { %6271 = vmatprep.subr.bf16.mxu1 %v6270_v55  ;;  %v6414_v55 = vpack.c.bf16 %v5075_v10, %v5073_v29  ;;  %v6290_v52 = vpack.c.bf16 %v4228_v27, %v4224_v15  ;;  %v5090_v29 = vld [vmem:[#allocation17 + $0x190] sm:$0xff]  ;;  %v5093_v27 = vld [vmem:[#allocation17 + $0x1a8] sm:$0xff] }
 0x60c   : > { %6397 = vmatpush1.bf16.msra.mxu0 %v6396_v50  ;;  %v5079_v50 = vld [vmem:[#allocation17 + $0x138] sm:$0xff]  ;;  %v4259_v15 = vld [vmem:[#allocation14 + $0xb70] sm:$0xff] }
 0x60d   : > { %6399 = vmatprep.subr.bf16.mxu0 %v6398_v26  ;;  %v6416_v26 = vpack.c.bf16 %v5074_v21, %v5072_v22  ;;  %v6308_v22 = vpack.c.bf16 %v4259_v15, %v4255_v20  ;;  %v4263_v21 = vld [vmem:[#allocation14 + $0xb90] sm:$0xff]  ;;  %v4324_v20 = vld [vmem:[#allocation14 + $0xd78] sm:$0xff] }
 0x60e   : > { %6273 = vmatpush1.bf16.msra.mxu1 %v6272_v49  ;;  %v4232_v49 = vld [vmem:[#allocation14 + $0xa98] sm:$0xff]  ;;  %v4283_v46 = vld [vmem:[#allocation14 + $0xc30] sm:$0xff] }
 0x60f   : > { %6275 = vmatprep.subr.bf16.mxu1 %v6274_v25  ;;  %v6418_v25 = vpack.c.bf16 %v5079_v50, %v5077_v58  ;;  %v6294_v24 = vpack.c.bf16 %v4236_v56, %v4232_v49  ;;  %v5094_v58 = vld [vmem:[#allocation17 + $0x1b0] sm:$0xff]  ;;  %v5097_v56 = vld [vmem:[#allocation17 + $0x1c8] sm:$0xff] }
 0x610   : > { %6401 = vmatpush1.bf16.msra.mxu0 %v6400_v2  ;;  %v5083_v2 = vld [vmem:[#allocation17 + $0x158] sm:$0xff]  ;;  %v4267_v49 = vld [vmem:[#allocation14 + $0xbb0] sm:$0xff] }
 0x611   : > { %6403 = vmatprep.subr.bf16.mxu0 %v6402_v12  ;;  %v6420_v12 = vpack.c.bf16 %v5078_v28, %v5076_v0  ;;  %v6312_v0 = vpack.c.bf16 %v4267_v49, %v4263_v21  ;;  %v4287_v59 = vld [vmem:[#allocation14 + $0xc50] sm:$0xff]  ;;  %v4328_v15 = vld [vmem:[#allocation14 + $0xd98] sm:$0xff] }
 0x612   : > { %6277 = vmatpush1.bf16.msra.mxu1 %v6276_v47  ;;  %v4240_v47 = vld [vmem:[#allocation14 + $0xad8] sm:$0xff]  ;;  %v4299_v8 = vld [vmem:[#allocation14 + $0xcb0] sm:$0xff] }
 0x613   : > { %6279 = vmatprep.subr.bf16.mxu1 %v6278_v9  ;;  %v6422_v9 = vpack.c.bf16 %v5083_v2, %v5081_v23  ;;  %v6298_v5 = vpack.c.bf16 %v4244_v17, %v4240_v47  ;;  %v4275_v23 = vld [vmem:[#allocation14 + $0xbf0] sm:$0xff]  ;;  %v4280_v2 = vld [vmem:[#allocation14 + $0xc18] sm:$0xff] }
 0x614   : > { %6405 = vmatpush1.bf16.msra.mxu0 %v6404_v30  ;;  %v5087_v30 = vld [vmem:[#allocation17 + $0x178] sm:$0xff]  ;;  %v6316_v17 = vpack.c.bf16 %v4275_v23, %v4271_v19  ;;  %v4303_v32 = vld [vmem:[#allocation14 + $0xcd0] sm:$0xff] }
 0x615   : > { %6407 = vmatprep.subr.bf16.mxu0 %v6406_v61  ;;  %v6424_v61 = vpack.c.bf16 %v5082_v36, %v5080_v7  ;;  %v4284_v47 = vld [vmem:[#allocation14 + $0xc38] sm:$0xff]  ;;  %v4331_v21 = vld [vmem:[#allocation14 + $0xdb0] sm:$0xff] }
 0x616   : > { %6281 = vmatpush1.bf16.msra.mxu1 %v6280_v53  ;;  %v4248_v53 = vld [vmem:[#allocation14 + $0xb18] sm:$0xff]  ;;  %v4339_v19 = vld [vmem:[#allocation14 + $0xdf0] sm:$0xff] }
 0x617   : > { %6283 = vmatprep.subr.bf16.mxu1 %v6282_v44  ;;  %v6426_v44 = vpack.c.bf16 %v5087_v30, %v5085_v6  ;;  %v6302_v43 = vpack.c.bf16 %v4252_v51, %v4248_v53  ;;  %v4292_v7 = vld [vmem:[#allocation14 + $0xc78] sm:$0xff]  ;;  %v4291_v6 = vld [vmem:[#allocation14 + $0xc70] sm:$0xff] }
 0x618   : > { %6409 = vmatpush1.bf16.msra.mxu0 %v6408_v31  ;;  %v5091_v31 = vld [vmem:[#allocation17 + $0x198] sm:$0xff]  ;;  %v6324_v51 = vpack.c.bf16 %v4291_v6, %v4287_v59 }
 0x619   : > { %6411 = vmatprep.subr.bf16.mxu0 %v6410_v40  ;;  %v6428_v40 = vpack.c.bf16 %v5086_v54, %v5084_v35  ;;  %v4296_v30 = vld [vmem:[#allocation14 + $0xc98] sm:$0xff] }
 0x61a   : > { %6285 = vmatpush1.bf16.msra.mxu1 %v6284_v57  ;;  %v4256_v57 = vld [vmem:[#allocation14 + $0xb58] sm:$0xff] }
 0x61b   : > { %6287 = vmatprep.subr.bf16.mxu1 %v6286_v42  ;;  %v6430_v42 = vpack.c.bf16 %v5091_v31, %v5089_v18  ;;  %v6306_v10 = vpack.c.bf16 %v4260_v3, %v4256_v57  ;;  %v4300_v53 = vld [vmem:[#allocation14 + $0xcb8] sm:$0xff]  ;;  %v4307_v18 = vld [vmem:[#allocation14 + $0xcf0] sm:$0xff] }
 0x61c   : > { %6413 = vmatpush1.bf16.msra.mxu0 %v6412_v45  ;;  %v5095_v45 = vld [vmem:[#allocation17 + $0x1b8] sm:$0xff] }
 0x61d   : > { %6415 = vmatprep.subr.bf16.mxu0 %v6414_v55  ;;  %v6432_v55 = vpack.c.bf16 %v5090_v29, %v5088_v34  ;;  %v4308_v35 = vld [vmem:[#allocation14 + $0xcf8] sm:$0xff]  ;;  %v4319_v29 = vld [vmem:[#allocation14 + $0xd50] sm:$0xff] }
 0x61e   : > { %6289 = vmatpush1.bf16.msra.mxu1 %v6288_v33  ;;  %v4264_v33 = vld [vmem:[#allocation14 + $0xb98] sm:$0xff] }
 0x61f   : > { %6291 = vmatprep.subr.bf16.mxu1 %v6290_v52  ;;  %v6434_v52 = vpack.c.bf16 %v5095_v45, %v5093_v27  ;;  %v6310_v50 = vpack.c.bf16 %v4268_v37, %v4264_v33  ;;  %v4312_v31 = vld [vmem:[#allocation14 + $0xd18] sm:$0xff]  ;;  %v5096_v33 = vld [vmem:[#allocation17 + $0x1c0] sm:$0xff] }
 0x620   : > { %6417 = vmatpush1.bf16.msra.mxu0 %v6416_v26  ;;  %v5099_v26 = vld [vmem:[#allocation17 + $0x1d8] sm:$0xff]  ;;  %v5098_v37 = vld [vmem:[#allocation17 + $0x1d0] sm:$0xff] }
 0x621   : > { %6419 = vmatprep.subr.bf16.mxu0 %v6418_v25  ;;  %v6436_v25 = vpack.c.bf16 %v5094_v58, %v5092_v1  ;;  %v6438_v28 = vpack.c.bf16 %v5099_v26, %v5097_v56  ;;  %v4316_v57 = vld [vmem:[#allocation14 + $0xd38] sm:$0xff]  ;;  %v5101_v56 = vld [vmem:[#allocation17 + $0x1e8] sm:$0xff] }
 0x622   : > { %6293 = vmatpush1.bf16.msra.mxu1 %v6292_v38  ;;  %v4272_v38 = vld [vmem:[#allocation14 + $0xbd8] sm:$0xff]  ;;  %v6334_v3 = vpack.c.bf16 %v4316_v57, %v4312_v31  ;;  %v4367_v57 = vld [vmem:[#allocation14 + $0xed0] sm:$0xff] }
 0x623   : > { %6295 = vmatprep.subr.bf16.mxu1 %v6294_v24  ;;  %v6314_v24 = vpack.c.bf16 %v4276_v48, %v4272_v38  ;;  %v4332_v27 = vld [vmem:[#allocation14 + $0xdb8] sm:$0xff] }
 0x624   : > { %6421 = vmatpush1.bf16.msra.mxu0 %v6420_v12  ;;  %v6318_v12 = vpack.c.bf16 %v4284_v47, %v4280_v2  ;;  %v4336_v58 = vld [vmem:[#allocation14 + $0xdd8] sm:$0xff] }
 0x625   : > { %6423 = vmatprep.subr.bf16.mxu0 %v6422_v9  ;;  %v4288_v9 = vld [vmem:[#allocation14 + $0xc58] sm:$0xff] }
 0x626   : > { %6297 = vmatpush1.bf16.msra.mxu1 %v6296_v63  ;;  %v4279_v63 = vld [vmem:[#allocation14 + $0xc10] sm:$0xff]  ;;  %v5103_v26 = vld [vmem:[#allocation17 + $0x1f8] sm:$0xff] }
 0x627   : > { %6299 = vmatprep.subr.bf16.mxu1 %v6298_v5  ;;  %v6320_v36 = vpack.c.bf16 %v4283_v46, %v4279_v63  ;;  %v6322_v5 = vpack.c.bf16 %v4292_v7, %v4288_v9  ;;  %v6442_v48 = vpack.c.bf16 %v5103_v26, %v5101_v56  ;;  %v4344_v2 = vld [vmem:[#allocation14 + $0xe18] sm:$0xff]  ;;  %v4343_v63 = vld [vmem:[#allocation14 + $0xe10] sm:$0xff] }
 0x628   : > { %6425 = vmatpush1.bf16.msra.mxu0 %v6424_v61  ;;  %v6326_v61 = vpack.c.bf16 %v4300_v53, %v4296_v30  ;;  %v4348_v47 = vld [vmem:[#allocation14 + $0xe38] sm:$0xff]  ;;  %v4347_v46 = vld [vmem:[#allocation14 + $0xe30] sm:$0xff] }
 0x629   : > { %6427 = vmatprep.subr.bf16.mxu0 %v6426_v44  ;;  %v4304_v44 = vld [vmem:[#allocation14 + $0xcd8] sm:$0xff]  ;;  %v6352_v6 = vpack.c.bf16 %v4347_v46, %v4343_v63  ;;  %v4351_v53 = vld [vmem:[#allocation14 + $0xe50] sm:$0xff] }
 0x62a   : > { %6301 = vmatpush1.bf16.msra.mxu1 %v6300_v39  ;;  %v4295_v39 = vld [vmem:[#allocation14 + $0xc90] sm:$0xff]  ;;  %v4352_v9 = vld [vmem:[#allocation14 + $0xe58] sm:$0xff] }
 0x62b   : > { %6303 = vmatprep.subr.bf16.mxu1 %v6302_v43  ;;  %v6328_v54 = vpack.c.bf16 %v4299_v8, %v4295_v39  ;;  %v6330_v43 = vpack.c.bf16 %v4308_v35, %v4304_v44  ;;  %v4356_v7 = vld [vmem:[#allocation14 + $0xe78] sm:$0xff]  ;;  %v4359_v35 = vld [vmem:[#allocation14 + $0xe90] sm:$0xff] }
 0x62c   : > { %6429 = vmatpush1.bf16.msra.mxu0 %v6428_v40  ;;  %v4311_v40 = vld [vmem:[#allocation14 + $0xd10] sm:$0xff]  ;;  %v6354_v30 = vpack.c.bf16 %v4356_v7, %v4352_v9  ;;  %v4364_v39 = vld [vmem:[#allocation14 + $0xeb8] sm:$0xff] }
 0x62d   : > { %6431 = vmatprep.subr.bf16.mxu0 %v6430_v42  ;;  %v5106_v63 = vld [vmem:[#allocation17 + $0x210] sm:$0xff]  ;;  %v5109_v9 = vld [vmem:[#allocation17 + $0x228] sm:$0xff] }
 0x62e   : > { %6305 = vmatpush1.bf16.msra.mxu1 %v6304_v14  ;;  %v4320_v14 = vld [vmem:[#allocation14 + $0xd58] sm:$0xff] }
 0x62f   : > { %6307 = vmatprep.subr.bf16.mxu1 %v6306_v10  ;;  %v6338_v34 = vpack.c.bf16 %v4324_v20, %v4320_v14  ;;  %v4323_v10 = vld [vmem:[#allocation14 + $0xd70] sm:$0xff] }
 0x630   : > { %6433 = vmatpush1.bf16.msra.mxu0 %v6432_v55  ;;  %v6340_v45 = vpack.c.bf16 %v4323_v10, %v4319_v29  ;;  %v6342_v55 = vpack.c.bf16 %v4332_v27, %v4328_v15  ;;  %v4375_v20 = vld [vmem:[#allocation14 + $0xf10] sm:$0xff]  ;;  %v4388_v29 = vld [vmem:[#allocation14 + $0xf78] sm:$0xff] }
 0x631   : > { %6435 = vmatprep.subr.bf16.mxu0 %v6434_v52  ;;  %v6440_v52 = vpack.c.bf16 %v5098_v37, %v5096_v33  ;;  %v4383_v27 = vld [vmem:[#allocation14 + $0xf50] sm:$0xff]  ;;  %v4392_v33 = vld [vmem:[#allocation14 + $0xf98] sm:$0xff] }
 0x632   : > { %6309 = vmatpush1.bf16.msra.mxu1 %v6308_v22  ;;  %v4327_v22 = vld [vmem:[#allocation14 + $0xd90] sm:$0xff]  ;;  %v4396_v37 = vld [vmem:[#allocation14 + $0xfb8] sm:$0xff] }
 0x633   : > { %6311 = vmatprep.subr.bf16.mxu1 %v6310_v50  ;;  %v4340_v50 = vld [vmem:[#allocation14 + $0xdf8] sm:$0xff]  ;;  %v6344_v38 = vpack.c.bf16 %v4331_v21, %v4327_v22  ;;  %v6374_v22 = vpack.c.bf16 %v4396_v37, %v4392_v33  ;;  %v4391_v21 = vld [vmem:[#allocation14 + $0xf90] sm:$0xff]  ;;  %v5116_v37 = vld [vmem:[#allocation17 + $0x260] sm:$0xff] }
 0x634   : > { %6437 = vmatpush1.bf16.msra.mxu0 %v6436_v25  ;;  %v5100_v25 = vld [vmem:[#allocation17 + $0x1e0] sm:$0xff] }
 0x635   : > { %6439 = vmatprep.subr.bf16.mxu0 %v6438_v28  ;;  %v6346_v28 = vpack.c.bf16 %v4340_v50, %v4336_v58  ;;  %v4400_v58 = vld [vmem:[#allocation14 + $0xfd8] sm:$0xff] }
 0x636   : > { %6313 = vmatpush1.bf16.msra.mxu1 %v6312_v0  ;;  %v5102_v0 = vld [vmem:[#allocation17 + $0x1f0] sm:$0xff] }
 0x637   : > { %6315 = vmatprep.subr.bf16.mxu1 %v6314_v24  ;;  %v4335_v24 = vld [vmem:[#allocation14 + $0xdd0] sm:$0xff]  ;;  %v6444_v23 = vpack.c.bf16 %v5102_v0, %v5100_v25  ;;  %v4404_v50 = vld [vmem:[#allocation14 + $0xff8] sm:$0xff]  ;;  %v9169_v0 = vld [vmem:[#allocation15] sm:$0xf] }
 0x638   : > { %6441 = vmatpush1.bf16.msra.mxu0 %v6440_v52  ;;  %v4395_v52 = vld [vmem:[#allocation14 + $0xfb0] sm:$0xff]  ;;  %v6378_v26 = vpack.c.bf16 %v4404_v50, %v4400_v58  ;;  %v5330_v50 = vld [vmem:[%s9316_s11 + $0x30] sm:$0xff] }
 0x639   : > { %6443 = vmatprep.subr.bf16.mxu0 %v6442_v48  ;;  %v6376_v56 = vpack.c.bf16 %v4395_v52, %v4391_v21  ;;  %v4403_v48 = vld [vmem:[#allocation14 + $0xff0] sm:$0xff]  ;;  %v5123_v21 = vld [vmem:[#allocation17 + $0x298] sm:$0xff] }
 0x63a   : > { %6317 = vmatpush1.bf16.msra.mxu1 %v6316_v17  ;;  %v6348_v17 = vpack.c.bf16 %v4339_v19, %v4335_v24  ;;  %v4455_v24 = vrot.slane %v9169_v0, %v9468_v60 }
 0x63b   : > { %6319 = vmatprep.subr.bf16.mxu1 %v6318_v12  ;;  %v6350_v12 = vpack.c.bf16 %v4348_v47, %v4344_v2 }
 0x63c   : > { %6445 = vmatpush1.bf16.msra.mxu0 %v6444_v23 }
 0x63d   : > { %4959 = vmatmul.mubr.f32.vlgmr.msra.gmra.mrb[2].mxu1 %v9144_v16  ;;  %v6332_v16 = vpack.c.bf16 %v4307_v18, %v4303_v32  ;;  %v4372_v32 = vld [vmem:[#allocation14 + $0xef8] sm:$0xff] }
 0x63e   : > { %6321 = vmatpush1.bf16.msra.mxu1 %v6320_v36  ;;  %5029 = vmatprep.mubr.f32.mxu1 %v9149_v11  ;;  %v4315_v11 = vld [vmem:[#allocation14 + $0xd30] sm:$0xff] }
 0x63f   : > { %6323 = vmatprep.subr.bf16.mxu1 %v6322_v5  ;;  %v6336_v42 = vpack.c.bf16 %v4315_v11, %v4311_v40  ;;  %v5105_v36 = vld [vmem:[#allocation17 + $0x208] sm:$0xff]  ;;  %v5107_v5 = vld [vmem:[#allocation17 + $0x218] sm:$0xff] }
 0x640   : > { %v6446_v59 = vpack.c.bf16 %v5107_v5, %v5105_v36  ;;  %v4380_v40 = vld [vmem:[#allocation14 + $0xf38] sm:$0xff]  ;;  %v5108_v5 = vld [vmem:[#allocation17 + $0x220] sm:$0xff] }
 0x642   : > { %6325 = vmatpush1.bf16.msra.mxu1 %v6324_v51  ;;  %v4355_v51 = vld [vmem:[#allocation14 + $0xe70] sm:$0xff]  ;;  %6447 = vmatprep.subr.bf16.mxu0 %v6446_v59 }
 0x643   : > { %6327 = vmatprep.subr.bf16.mxu1 %v6326_v61  ;;  %v4360_v61 = vld [vmem:[#allocation14 + $0xe98] sm:$0xff]  ;;  %v6356_v8 = vpack.c.bf16 %v4355_v51, %v4351_v53  ;;  %v5113_v53 = vld [vmem:[#allocation17 + $0x248] sm:$0xff] }
 0x644   : > { %v6358_v44 = vpack.c.bf16 %v4364_v39, %v4360_v61  ;;  %v5115_v51 = vld [vmem:[#allocation17 + $0x258] sm:$0xff]  ;;  %v5324_v61 = vld [vmem:[%s9316_s11] sm:$0xff] }
 0x646   : > { %6329 = vmatpush1.bf16.msra.mxu1 %v6328_v54  ;;  %v4363_v54 = vld [vmem:[#allocation14 + $0xeb0] sm:$0xff] }
 0x647   : > { %6331 = vmatprep.subr.bf16.mxu1 %v6330_v43  ;;  %v4368_v43 = vld [vmem:[#allocation14 + $0xed8] sm:$0xff]  ;;  %v6360_v18 = vpack.c.bf16 %v4363_v54, %v4359_v35  ;;  %v5343_v35 = vld [vmem:[%s9316_s11 + $0x98] sm:$0xff] }
 0x648   : > { %v6362_v31 = vpack.c.bf16 %v4372_v32, %v4368_v43 }
 0x64a   : > { %6333 = vmatpush1.bf16.msra.mxu1 %v6332_v16  ;;  %v4371_v16 = vld [vmem:[#allocation14 + $0xef0] sm:$0xff] }
 0x64b   : > { %6335 = vmatprep.subr.bf16.mxu1 %v6334_v3  ;;  %v4376_v3 = vld [vmem:[#allocation14 + $0xf18] sm:$0xff]  ;;  %v6364_v11 = vpack.c.bf16 %v4371_v16, %v4367_v57  ;;  %v5344_v57 = vld [vmem:[%s9316_s11 + $0xa0] sm:$0xff]  ;;  %v6454_v16 = vpack.c.bf16 %v5115_v51, %v5113_v53  ;;  %v5335_v51 = vld [vmem:[%s9316_s11 + $0x58] sm:$0xff] }
 0x64c   : > { %v6366_v14 = vpack.c.bf16 %v4380_v40, %v4376_v3  ;;  %v5112_v3 = vld [vmem:[#allocation17 + $0x240] sm:$0xff]  ;;  %v5114_v40 = vld [vmem:[#allocation17 + $0x250] sm:$0xff] }
 0x64d   : > { %v5334_v53 = vld [vmem:[%s9316_s11 + $0x50] sm:$0xff] }
 0x64e   : > { %6337 = vmatpush1.bf16.msra.mxu1 %v6336_v42  ;;  %v4379_v42 = vld [vmem:[#allocation14 + $0xf30] sm:$0xff] }
 0x64f   : > { %6339 = vmatprep.subr.bf16.mxu1 %v6338_v34  ;;  %v9164_v1 = vpop.f32.mrb[0].mxu1  ;;  %v4384_v34 = vld [vmem:[#allocation14 + $0xf58] sm:$0xff]  ;;  %v6368_v10 = vpack.c.bf16 %v4379_v42, %v4375_v20 }
 0x650   : > { %v9166_v49 = vpop.f32.mrb[1].mxu1  ;;  %v6370_v15 = vpack.c.bf16 %v4388_v29, %v4384_v34  ;;  %v5119_v20 = vld [vmem:[#allocation17 + $0x278] sm:$0xff]  ;;  %v5328_v29 = vld [vmem:[%s9316_s11 + $0x20] sm:$0xff] }
 0x651   : > { %v4537_v23 = vadd.f32 %v9166_v49, %v4455_v24  ;;  %v5341_v49 = vld [vmem:[%s9316_s11 + $0x88] sm:$0xff] }
 0x652   : > { %6341 = vmatpush1.bf16.msra.mxu1 %v6340_v45  ;;  %v4387_v45 = vld [vmem:[#allocation14 + $0xf70] sm:$0xff] }
 0x653   : > { %6343 = vmatprep.subr.bf16.mxu1 %v6342_v55  ;;  %v6372_v55 = vpack.c.bf16 %v4387_v45, %v4383_v27  ;;  %v5346_v27 = vld [vmem:[%s9316_s11 + $0xb0] sm:$0xff]  ;;  %v5347_v45 = vld [vmem:[%s9316_s11 + $0xb8] sm:$0xff] }
 0x654   : > { %v6522_v58 = vpack.c.bf16 %v5347_v45, %v5346_v27  ;;  %v5122_v24 = vld [vmem:[#allocation17 + $0x290] sm:$0xff]  ;;  %v5140_v27 = vld [vmem:[#allocation17 + $0x320] sm:$0xff] }
 0x655   : > { %v5142_v45 = vld [vmem:[#allocation17 + $0x330] sm:$0xff] }
 0x656   : > { %6345 = vmatpush1.bf16.msra.mxu1 %v6344_v38  ;;  %v4399_v38 = vld [vmem:[#allocation14 + $0xfd0] sm:$0xff] }
 0x657   : > { %6347 = vmatprep.subr.bf16.mxu1 %v6346_v28  ;;  %v6380_v25 = vpack.c.bf16 %v4403_v48, %v4399_v38  ;;  %v4451_v28 = vrot.slane %v9169_v0, %v9470_v13  ;;  %v5348_v38 = vld [vmem:[%s9316_s11 + $0xc0] sm:$0xff]  ;;  %v5349_v48 = vld [vmem:[%s9316_s11 + $0xc8] sm:$0xff] }
 0x659   : > { %v4535_v19 = vadd.f32 %v9164_v1, %v4451_v28  ;;  %v5340_v1 = vld [vmem:[%s9316_s11 + $0x80] sm:$0xff] }
 0x65a   : > { %6349 = vmatpush1.bf16.msra.mxu1 %v6348_v17  ;;  %v6510_v39 = vpack.c.bf16 %v5341_v49, %v5340_v1  ;;  %v5120_v28 = vld [vmem:[#allocation17 + $0x280] sm:$0xff] }
 0x65b   : > { %6351 = vmatprep.subr.bf16.mxu1 %v6350_v12  ;;  %v5104_v12 = vld [vmem:[#allocation17 + $0x200] sm:$0xff] }
 0x65c   : > { %v6448_v36 = vpack.c.bf16 %v5106_v63, %v5104_v12  ;;  %v5333_v12 = vld [vmem:[%s9316_s11 + $0x48] sm:$0xff]  ;;  %v6464_v63 = vpack.c.bf16 %v5122_v24, %v5120_v28  ;;  %v5352_v49 = vld [vmem:[%s9316_s11 + $0xe0] sm:$0xff]  ;;  %v5155_v28 = vld [vmem:[#allocation17 + $0x398] sm:$0xff] }
 0x65e   : > { %6353 = vmatpush1.bf16.msra.mxu1 %v6352_v6 }
 0x65f   : > { %6355 = vmatprep.subr.bf16.mxu1 %v6354_v30  ;;  %v5110_v30 = vld [vmem:[#allocation17 + $0x230] sm:$0xff] }
 0x660   : > { %v6452_v54 = vpack.c.bf16 %v5110_v30, %v5108_v5  ;;  %v5129_v5 = vld [vmem:[#allocation17 + $0x2c8] sm:$0xff] }
 0x662   : > { %6357 = vmatpush1.bf16.msra.mxu1 %v6356_v8  ;;  %v5325_v8 = vld [vmem:[%s9316_s11 + $0x8] sm:$0xff] }
 0x663   : > { %6359 = vmatprep.subr.bf16.mxu1 %v6358_v44  ;;  %v5342_v44 = vld [vmem:[%s9316_s11 + $0x90] sm:$0xff]  ;;  %v6512_v43 = vpack.c.bf16 %v5325_v8, %v5324_v61  ;;  %v5353_v61 = vld [vmem:[%s9316_s11 + $0xe8] sm:$0xff]  ;;  %v5128_v8 = vld [vmem:[#allocation17 + $0x2c0] sm:$0xff] }
 0x664   : > { %v6514_v32 = vpack.c.bf16 %v5343_v35, %v5342_v44  ;;  %v5130_v44 = vld [vmem:[#allocation17 + $0x2d0] sm:$0xff]  ;;  %v5133_v35 = vld [vmem:[#allocation17 + $0x2e8] sm:$0xff] }
 0x666   : > { %6361 = vmatpush1.bf16.msra.mxu1 %v6360_v18  ;;  %v5326_v18 = vld [vmem:[%s9316_s11 + $0x10] sm:$0xff] }
 0x667   : > { %6363 = vmatprep.subr.bf16.mxu1 %v6362_v31  ;;  %v5327_v31 = vld [vmem:[%s9316_s11 + $0x18] sm:$0xff] }
 0x668   : > { %v6516_v42 = vpack.c.bf16 %v5327_v31, %v5326_v18  ;;  %v6472_v18 = vpack.c.bf16 %v5130_v44, %v5128_v8  ;;  %v4459_v8 = vrot.slane %v9169_v0, %v9471_v4  ;;  %v4463_v44 = vrot.slane %v9169_v0, %v9469_v62  ;;  %v5354_v62 = vld [vmem:[%s9316_s11 + $0xf0] sm:$0xff]  ;;  %v5355_v0 = vld [vmem:[%s9316_s11 + $0xf8] sm:$0xff] }
 0x66a   : > { %6365 = vmatpush1.bf16.msra.mxu1 %v6364_v11  ;;  %v5345_v11 = vld [vmem:[%s9316_s11 + $0xa8] sm:$0xff] }
 0x66b   : > { %6367 = vmatprep.subr.bf16.mxu1 %v6366_v14  ;;  %v5117_v14 = vld [vmem:[#allocation17 + $0x268] sm:$0xff]  ;;  %v6518_v34 = vpack.c.bf16 %v5345_v11, %v5344_v57  ;;  %v5132_v57 = vld [vmem:[#allocation17 + $0x2e0] sm:$0xff] }
 0x66c   : > { %v6458_v33 = vpack.c.bf16 %v5119_v20, %v5117_v14  ;;  %v5136_v20 = vld [vmem:[#allocation17 + $0x300] sm:$0xff] }
 0x66e   : > { %6369 = vmatpush1.bf16.msra.mxu1 %v6368_v10  ;;  %v5329_v10 = vld [vmem:[%s9316_s11 + $0x28] sm:$0xff] }
 0x66f   : > { %6371 = vmatprep.subr.bf16.mxu1 %v6370_v15  ;;  %v6456_v15 = vpack.c.bf16 %v5114_v40, %v5112_v3  ;;  %v6520_v52 = vpack.c.bf16 %v5329_v10, %v5328_v29  ;;  %v5137_v3 = vld [vmem:[#allocation17 + $0x308] sm:$0xff]  ;;  %v5139_v40 = vld [vmem:[#allocation17 + $0x318] sm:$0xff] }
 0x670   : > { %v6478_v14 = vpack.c.bf16 %v5139_v40, %v5137_v3  ;;  %v5143_v29 = vld [vmem:[#allocation17 + $0x338] sm:$0xff]  ;;  %v6538_v3 = vpack.c.bf16 %v5355_v0, %v5354_v62 }
 0x671   : > { %v5338_v40 = vld [vmem:[%s9316_s11 + $0x70] sm:$0xff] }
 0x672   : > { %6373 = vmatpush1.bf16.msra.mxu1 %v6372_v55  ;;  %v5118_v55 = vld [vmem:[#allocation17 + $0x270] sm:$0xff] }
 0x673   : > { %6375 = vmatprep.subr.bf16.mxu1 %v6374_v22  ;;  %v5121_v22 = vld [vmem:[#allocation17 + $0x288] sm:$0xff] }
 0x676   : > { %6377 = vmatpush1.bf16.msra.mxu1 %v6376_v56  ;;  %v5331_v56 = vld [vmem:[%s9316_s11 + $0x38] sm:$0xff] }
 0x677   : > { %6379 = vmatprep.subr.bf16.mxu1 %v6378_v26  ;;  %v6460_v26 = vpack.c.bf16 %v5118_v55, %v5116_v37  ;;  %v5147_v37 = vld [vmem:[#allocation17 + $0x358] sm:$0xff]  ;;  %v6484_v55 = vpack.c.bf16 %v5142_v45, %v5140_v27 }
 0x67a   : > { %6381 = vmatpush1.bf16.msra.mxu1 %v6380_v25  ;;  %v6462_v25 = vpack.c.bf16 %v5123_v21, %v5121_v22  ;;  %v5144_v21 = vld [vmem:[#allocation17 + $0x340] sm:$0xff] }
 0x67b   : > { %6511 = vmatprep.subr.bf16.mxu1 %v6510_v39 }
 0x67d   : > { %5030 = vmatmul.mubr.f32.vlgmr.msra.gmra.mrb[2].mxu1 %v9157_v41  ;;  %v5111_v41 = vld [vmem:[#allocation17 + $0x238] sm:$0xff] }
 0x67e   : > { %v6450_v6 = vpack.c.bf16 %v5111_v41, %v5109_v9  ;;  %6513 = vmatpush3.bf16.msra.mxu1 %v6512_v43  ;;  %v5351_v9 = vld [vmem:[%s9316_s11 + $0xd8] sm:$0xff]  ;;  %v6532_v43 = vpack.c.bf16 %v5335_v51, %v5334_v53 }
 0x67f   : > { %6515 = vmatprep.subr.bf16.mxu1 %v6514_v32  ;;  %v6534_v32 = vpack.c.bf16 %v5353_v61, %v5352_v49  ;;  %v5167_v53 = vld [vmem:[#allocation17 + $0x3f8] sm:$0xff]  ;;  %v5164_v49 = vld [vmem:[#allocation17 + $0x3e0] sm:$0xff]  ;;  %v5166_v61 = vld [vmem:[#allocation17 + $0x3f0] sm:$0xff] }
 0x682   : > { %6517 = vmatpush3.bf16.msra.mxu1 %v6516_v42  ;;  %v5138_v42 = vld [vmem:[#allocation17 + $0x310] sm:$0xff] }
 0x683   : > { %6519 = vmatprep.subr.bf16.mxu1 %v6518_v34  ;;  %v5141_v34 = vld [vmem:[#allocation17 + $0x328] sm:$0xff]  ;;  %v6480_v10 = vpack.c.bf16 %v5138_v42, %v5136_v20  ;;  %v5168_v20 = vld [vmem:[#allocation18] sm:$0x3] }
 0x684   : > { %v5173_v42 = vrot.slane %v5168_v20, %v9470_v13 }
 0x686   : > { %6521 = vmatpush3.bf16.msra.mxu1 %v6520_v52  ;;  %v5146_v52 = vld [vmem:[#allocation17 + $0x350] sm:$0xff] }
 0x687   : > { %6523 = vmatprep.subr.bf16.mxu1 %v6522_v58  ;;  %v5149_v58 = vld [vmem:[#allocation17 + $0x368] sm:$0xff] }
 0x6d2   : > { %v4747_v2 = vpop.f32.mrb[0].mxu0 }
 0x6d3   : > { %v6551_v47 = vadd.f32 %v4747_v2, %v4535_v19  ;;  %v4749_v17 = vpop.f32.mrb[1].mxu0  ;;  %v5125_v19 = vld [vmem:[#allocation17 + $0x2a8] sm:$0xff]  ;;  %v6524_v2 = vpack.c.bf16 %v5331_v56, %v5330_v50  ;;  %v5151_v50 = vld [vmem:[#allocation17 + $0x378] sm:$0xff]  ;;  %v6488_v56 = vpack.c.bf16 %v5146_v52, %v5144_v21 }
 0x6d4   : > { %v6553_v46 = vadd.f32 %v4749_v17, %v4537_v23  ;;  %v5127_v23 = vld [vmem:[#allocation17 + $0x2b8] sm:$0xff]  ;;  %v5332_v17 = vld [vmem:[%s9316_s11 + $0x40] sm:$0xff] }
 0x6d5   : > { %v5036_v59 = vmax.f32 %v6551_v47, 0.0  ;;  %v6526_v47 = vpack.c.bf16 %v5349_v48, %v5348_v38  ;;  %v6466_v41 = vpack.c.bf16 %v5127_v23, %v5125_v19  ;;  %6525 = vmatpush3.bf16.msra.mxu1 %v6524_v2  ;;  %v5148_v38 = vld [vmem:[#allocation17 + $0x360] sm:$0xff]  ;;  %v5150_v48 = vld [vmem:[#allocation17 + $0x370] sm:$0xff] }
 0x6d6   : > { %v5037_v7 = vmax.f32 %v6553_v46, 0.0  ;;  %v5350_v46 = vld [vmem:[%s9316_s11 + $0xd0] sm:$0xff]  ;;  %v6492_v24 = vpack.c.bf16 %v5150_v48, %v5148_v38  ;;  %v5152_v23 = vld [vmem:[#allocation17 + $0x380] sm:$0xff] }
 0x6d7   : > { %6527 = vmatprep.subr.bf16.mxu1 %v6526_v47  ;;  %v6530_v30 = vpack.c.bf16 %v5351_v9, %v5350_v46  ;;  %v5154_v2 = vld [vmem:[#allocation17 + $0x390] sm:$0xff]  ;;  %v5157_v47 = vld [vmem:[#allocation17 + $0x3a8] sm:$0xff]  ;;  %v5156_v46 = vld [vmem:[#allocation17 + $0x3a0] sm:$0xff] }
 0x6d8   : > { %5244 = vmatprep.mubr.f32.mxu0 %v5037_v7  ;;  %v5124_v7 = vld [vmem:[#allocation17 + $0x2a0] sm:$0xff]  ;;  %v5158_v9 = vld [vmem:[#allocation17 + $0x3b0] sm:$0xff] }
 0x6d9   : > { %5245 = vmatmul.mubr.f32.vlgmr.msra.gmra.mrb[2].mxu0 %v5036_v59  ;;  %v5131_v59 = vld [vmem:[#allocation17 + $0x2d8] sm:$0xff] }
 0x6da   : > { %6449 = vmatpush1.bf16.msra.mxu0 %v6448_v36  ;;  %v5126_v36 = vld [vmem:[#allocation17 + $0x2b0] sm:$0xff]  ;;  %v6470_v39 = vpack.c.bf16 %v5131_v59, %v5129_v5  ;;  %v5160_v59 = vld [vmem:[#allocation17 + $0x3c0] sm:$0xff] }
 0x6db   : > { %6451 = vmatprep.subr.bf16.mxu0 %v6450_v6  ;;  %v6528_v6 = vpack.c.bf16 %v5333_v12, %v5332_v17  ;;  %v6468_v1 = vpack.c.bf16 %v5126_v36, %v5124_v7  ;;  %v5159_v17 = vld [vmem:[#allocation17 + $0x3b8] sm:$0xff]  ;;  %v6496_v12 = vpack.c.bf16 %v5154_v2, %v5152_v23  ;;  %v6500_v36 = vpack.c.bf16 %v5158_v9, %v5156_v46 }
 0x6dc   : > { %v5163_v7 = vld [vmem:[#allocation17 + $0x3d8] sm:$0xff] }
 0x6dd   : > { %6529 = vmatpush3.bf16.msra.mxu1 %v6528_v6  ;;  %v5162_v6 = vld [vmem:[#allocation17 + $0x3d0] sm:$0xff] }
 0x6de   : > { %6453 = vmatpush1.bf16.msra.mxu0 %v6452_v54  ;;  %v5135_v54 = vld [vmem:[#allocation17 + $0x2f8] sm:$0xff]  ;;  %6531 = vmatprep.subr.bf16.mxu1 %v6530_v30  ;;  %v5165_v30 = vld [vmem:[#allocation17 + $0x3e8] sm:$0xff]  ;;  %v6504_v51 = vpack.c.bf16 %v5162_v6, %v5160_v59 }
 0x6df   : > { %6455 = vmatprep.subr.bf16.mxu0 %v6454_v16  ;;  %v6474_v31 = vpack.c.bf16 %v5135_v54, %v5133_v35  ;;  %v5134_v16 = vld [vmem:[#allocation17 + $0x2f0] sm:$0xff] }
 0x6e0   : > { %v6476_v11 = vpack.c.bf16 %v5134_v16, %v5132_v57  ;;  %v5336_v57 = vld [vmem:[%s9316_s11 + $0x60] sm:$0xff]  ;;  %v5337_v16 = vld [vmem:[%s9316_s11 + $0x68] sm:$0xff] }
 0x6e1   : > { %6533 = vmatpush3.bf16.msra.mxu1 %v6532_v43  ;;  %v6536_v4 = vpack.c.bf16 %v5337_v16, %v5336_v57 }
 0x6e2   : > { %6457 = vmatpush1.bf16.msra.mxu0 %v6456_v15  ;;  %6535 = vmatprep.subr.bf16.mxu1 %v6534_v32  ;;  %v6482_v15 = vpack.c.bf16 %v5143_v29, %v5141_v34  ;;  %v5177_v34 = vrot.slane %v5168_v20, %v9468_v60 }
 0x6e3   : > { %6459 = vmatprep.subr.bf16.mxu0 %v6458_v33  ;;  %v5145_v33 = vld [vmem:[#allocation17 + $0x348] sm:$0xff] }
 0x6e4   : > { %v6486_v22 = vpack.c.bf16 %v5147_v37, %v5145_v33 }
 0x6e5   : > { %6537 = vmatpush3.bf16.msra.mxu1 %v6536_v4 }
 0x6e6   : > { %6461 = vmatpush1.bf16.msra.mxu0 %v6460_v26  ;;  %v6490_v26 = vpack.c.bf16 %v5151_v50, %v5149_v58  ;;  %6539 = vmatprep.subr.bf16.mxu1 %v6538_v3 }
 0x6e7   : > { %6463 = vmatprep.subr.bf16.mxu0 %v6462_v25  ;;  %v5153_v25 = vld [vmem:[#allocation17 + $0x388] sm:$0xff] }
 0x6e8   : > { %v6494_v19 = vpack.c.bf16 %v5155_v28, %v5153_v25 }
 0x6ea   : > { %6465 = vmatpush1.bf16.msra.mxu0 %v6464_v63  ;;  %v6498_v63 = vpack.c.bf16 %v5159_v17, %v5157_v47 }
 0x6eb   : > { %6467 = vmatprep.subr.bf16.mxu0 %v6466_v41  ;;  %v5161_v41 = vld [vmem:[#allocation17 + $0x3c8] sm:$0xff] }
 0x6ec   : > { %v6502_v5 = vpack.c.bf16 %v5163_v7, %v5161_v41 }
 0x6ee   : > { %6469 = vmatpush1.bf16.msra.mxu0 %v6468_v1  ;;  %v6506_v1 = vpack.c.bf16 %v5167_v53, %v5165_v30 }
 0x6ef   : > { %6471 = vmatprep.subr.bf16.mxu0 %v6470_v39  ;;  %v6508_v39 = vpack.c.bf16 %v5166_v61, %v5164_v49 }
 0x6f2   : > { %6473 = vmatpush1.bf16.msra.mxu0 %v6472_v18 }
 0x6f3   : > { %6475 = vmatprep.subr.bf16.mxu0 %v6474_v31 }
 0x6f6   : > { %6477 = vmatpush1.bf16.msra.mxu0 %v6476_v11  ;;  %v5339_v11 = vld [vmem:[%s9316_s11 + $0x78] sm:$0xff] }
 0x6f7   : > { %6479 = vmatprep.subr.bf16.mxu0 %v6478_v14  ;;  %v6540_v14 = vpack.c.bf16 %v5339_v11, %v5338_v40 }
 0x6f9   : > { %6541 = vmatpush3.bf16.msra.mxu1 %v6540_v14 }
 0x6fa   : > { %6481 = vmatpush1.bf16.msra.mxu0 %v6480_v10 }
 0x6fb   : > { %6483 = vmatprep.subr.bf16.mxu0 %v6482_v15 }
 0x6fe   : > { %6485 = vmatpush1.bf16.msra.mxu0 %v6484_v55  ;;  %v5356_v55 = vld [vmem:[#allocation20] sm:$0x1] }
 0x6ff   : > { %6487 = vmatprep.subr.bf16.mxu0 %v6486_v22 }
 0x702   : > { %6489 = vmatpush1.bf16.msra.mxu0 %v6488_v56 }
 0x703   : > { %6491 = vmatprep.subr.bf16.mxu0 %v6490_v26 }
 0x706   : > { %6493 = vmatpush1.bf16.msra.mxu0 %v6492_v24 }
 0x707   : > { %6495 = vmatprep.subr.bf16.mxu0 %v6494_v19 }
 0x70a   : > { %6497 = vmatpush1.bf16.msra.mxu0 %v6496_v12 }
 0x70b   : > { %6499 = vmatprep.subr.bf16.mxu0 %v6498_v63 }
 0x70e   : > { %6501 = vmatpush1.bf16.msra.mxu0 %v6500_v36 }
 0x70f   : > { %6503 = vmatprep.subr.bf16.mxu0 %v6502_v5 }
 0x712   : > { %6505 = vmatpush1.bf16.msra.mxu0 %v6504_v51 }
 0x713   : > { %6507 = vmatprep.subr.bf16.mxu0 %v6506_v1 }
 0x716   : > { %6509 = vmatpush1.bf16.msra.mxu0 %v6508_v39 }
 0x750   : > { %v5031_v35 = vpop.f32.mrb[2].mxu1 }
 0x751   : > { %v6554_v54 = vadd.f32 %v5031_v35, %v4459_v8  ;;  %v5033_v43 = vpop.f32.mrb[3].mxu1 }
 0x752   : > { %v6555_v32 = vadd.f32 %v5033_v43, %v4463_v44 }
 0x753   : > { %v5038_v31 = vmax.f32 %v6554_v54, 0.0 }
 0x754   : > { %v5039_v18 = vmax.f32 %v6555_v32, 0.0 }
 0x756   : > { %5315 = vmatprep.mubr.f32.mxu0 %v5039_v18 }
 0x757   : > { %5316 = vmatmul.mubr.f32.vlgmr.msra.gmra.mrb[2].mxu0 %v5038_v31 }
 0x82a   : > { %v5317_v29 = vpop.f32.mrb[2].mxu0 }
 0x82b   : > { %v6556_v10 = vadd.f32 %v5317_v29, %v5173_v42  ;;  %v5319_v15 = vpop.f32.mrb[3].mxu0 }
 0x82c   : > { %v6557_v27 = vadd.f32 %v5319_v15, %v5177_v34 }
 0x82d   : > { %v5322_v33 = vmax.f32 %v6556_v10, 0.0 }
 0x82e   : > { %v5323_v45 = vmax.f32 %v6557_v27, 0.0 }
 0x830   : > { %5421 = vmatprep.mubr.f32.mxu1 %v5323_v45 }
 0x831   : > { %5422 = vmatmul.mubr.f32.vlgmr.msra.gmra.mrb[4].mxu1 %v5322_v33 }
 0x904   : > { %v5787_v37 = vpop.f32.mrb[4].mxu1 }
 0x905   : > { %v5788_v22 = vpop.f32.mrb[5].mxu1 }
 0x906   : > { %v5789_v21 = vadd.f32 %v5788_v22, %v5787_v37 }
 0x908   : > { %v5424_v52 = vadd.f32 %v5789_v21, %v5356_v55 }
 0x90a   : > { %5428 = vst.msk [vmem:[#allocation21] sm:$0x1] %vm5427_vm15, %v5424_v52 }
 0x90b PF: > { %p6674_p8 = scmp.eq.s32.totalorder %s7235_s28, 3  ;;  %s7158_s18 = smov [#allocation21]  }
 0x90c   : > { %s5436_s20 = sshll.u32 %s7158_s18, 4  ;;  %s5437_s20 = int_to_ptr.vmem [resolvable:$true] %s5436_s20 }
 0x90d   : > { %s7074_s15 = scalar_lea.vmem %s5437_s20, 16  ;;  %s7080_s16 = scalar_lea.vmem %s5437_s20, 32 }
 0x90e   : > { %p7075_p3 = scmp.ne.s32.totalorder %s5437_s20, %s7074_s15  ;;  %p7081_p6 = scmp.lt.s32.totalorder %s5437_s20, %s5437_s20 }
 0x90f   : > { %p7082_p9 = scmp.lt.s32.totalorder %s7080_s16, %s7074_s15 }
 0x910   : > { %p7076_p4 = pnand %p7075_p3, %p6674_p8 }
 0x911   : > { %p7083_p10 = por %p7082_p9, %p7081_p6 }
 0x912   : > { %p7077_p7 = pneg %p7076_p4 }
 0x914   : > { %p7084_p11 = pnand %p7083_p10, %p7077_p7 }
 0x916   : > { %7087 = shalt.err (!%p7084_p11)
}
 0x917   : > { %s7088_s29 = scalar_lea.hbm %s9318_s13, 16 }
 0x918   : > { %p7089_p12 = scmp.ne.s32.totalorder %s9318_s13, %s7088_s29  ;;  %p7094_p0 = scmp.lt.u32.totalorder %s7088_s29, %s9318_s13 }
 0x91a   : > { %p7090_p2 = pnand %p7089_p12, %p6674_p8 }
 0x91c   : > { %p7091_p13 = pneg %p7090_p2 }
 0x91e   : > { %p7096_p1 = pnand %p7094_p0, %p7091_p13 }
 0x920   : > { %7099 = shalt.err (!%p7096_p1)
}
 0x921   : > { %6615 = dma.vmem_to_hbm [thread:$0]  (%p6674_p8), %s5437_s20, 16, %s9318_s13, [#allocation5]  }
 0x922   : > { %7129 = dma.done.wait (%p6674_p8), [#allocation5], 16  }
 0x923   : > { %7131 = vsyncadd (%p6674_p8), [#allocation5], 4294967280 }
 0x924 PF: > { %s9477_s1 = sld [smem:[#allocation29_spill]] }
 0x92a   : > { %s30_s25 = sadd.s32 1, %s9477_s1  }
 0x92b   : > { %p27_p5 = scmp.ge.s32.totalorder %s30_s25, 6  }
 0x92d   :  { %29 = sbr.rel (!%p27_p5) target bundleno = 11 (0xb), region = 152 }
 0x934   :  { %5449 = vsyncpa [#allocation4], 1 }
 0x935   :  { %5451 = vsyncpa [#allocation4 + $0x1], 1 }
 0x936   :  { %5452 = vsyncpa [#allocation7], 1 }
 0x937   :  { %5453 = vsyncpa [#allocation10], 1 }
 0x938   :  { %5454 = vsyncpa [#allocation13], 1 }
 0x939   :  { %5455 = vsyncpa [#allocation16], 1 }
 0x93a   :  { %5456 = vsyncpa [#allocation19], 1 }
 0x93b   :  { %5457 = vsyncpa [#allocation5], 1 }
 0x93c   :  { %5459 = vsyncpa [#allocation5 + $0x1], 1 }

</bundles_post_ra>
